<compile_context>
chip_gen: v5e
topology: v5e:2x2
jax: 0.10.0
libtpu: 0.0.40
codegen_flags: <defaults>
</compile_context>

<pallas_src>
import math

import jax
import jax.numpy as jnp
from jax.experimental import pallas as pl
from jax.experimental.pallas import tpu as pltpu


# ----------------------------------------------------------------------------
# Fused BasicBlock kernel (one grid step == one batch image).
# ----------------------------------------------------------------------------
def _make_basic_block_kernel(*, dilation, p1, p2,
                             h_in, w_in, h_o1, w_o1, h_o2, w_o2,
                             c_in, c_mid, c_out):
    taps = [(i, j) for i in range(3) for j in range(3)]

    def kernel(x_ref, w1_ref, b1_ref, w2_ref, b2_ref, o_ref,
               xpad_ref, mid_ref, acc1_ref):
        hp1, wp1 = h_in + 2 * p1, w_in + 2 * p1
        hp2, wp2 = h_o1 + 2 * p2, w_o1 + 2 * p2

        # --- stage the input into the padded bf16 buffer; zero only halo strips.
        if p1 > 0:
            xpad_ref[0:p1, :, :] = jnp.zeros((p1, wp1, c_in), jnp.bfloat16)
            xpad_ref[p1 + h_in:hp1, :, :] = jnp.zeros((p1, wp1, c_in), jnp.bfloat16)
            xpad_ref[p1:p1 + h_in, 0:p1, :] = jnp.zeros((h_in, p1, c_in), jnp.bfloat16)
            xpad_ref[p1:p1 + h_in, p1 + w_in:wp1, :] = (
                jnp.zeros((h_in, p1, c_in), jnp.bfloat16))
        xpad_ref[p1:p1 + h_in, p1:p1 + w_in, :] = x_ref[0].astype(jnp.bfloat16)

        # --- conv1 (+ folded BN1 scale): 9 accumulating MXU dots from shifted
        #     ref slices (bf16 operands, f32 accumulation), seeded with BN1 bias.
        acc1_ref[...] = jnp.broadcast_to(b1_ref[...], acc1_ref.shape)
        for t, (i, j) in enumerate(taps):
            h0, w0 = i * dilation, j * dilation
            patch = xpad_ref[h0:h0 + h_o1, w0:w0 + w_o1, :]       # stride==1
            acc1_ref[...] += jnp.dot(patch.reshape(h_o1 * w_o1, c_in), w1_ref[t],
                                     preferred_element_type=jnp.float32)

        # --- ReLU (f32 VPU), restaged as bf16 into the padded mid buffer.
        if p2 > 0:
            mid_ref[0:p2, :, :] = jnp.zeros((p2, wp2, c_mid), jnp.bfloat16)
            mid_ref[p2 + h_o1:hp2, :, :] = jnp.zeros((p2, wp2, c_mid), jnp.bfloat16)
            mid_ref[p2:p2 + h_o1, 0:p2, :] = jnp.zeros((h_o1, p2, c_mid), jnp.bfloat16)
            mid_ref[p2:p2 + h_o1, p2 + w_o1:wp2, :] = (
                jnp.zeros((h_o1, p2, c_mid), jnp.bfloat16))
        mid = jnp.maximum(acc1_ref[...], 0.0)
        mid_ref[p2:p2 + h_o1, p2:p2 + w_o1, :] = (
            mid.reshape(h_o1, w_o1, c_mid).astype(jnp.bfloat16))

        # --- conv2 (+ folded BN2 scale): accumulate directly into the output
        #     block, seeded with identity residual (re-read from x_ref) + BN2 bias.
        o_ref[0] = x_ref[0].reshape(h_o2 * w_o2, c_in) + b2_ref[...]
        for t, (i, j) in enumerate(taps):
            h0, w0 = i * dilation, j * dilation
            patch = mid_ref[h0:h0 + h_o2, w0:w0 + w_o2, :]
            o_ref[0] += jnp.dot(patch.reshape(h_o2 * w_o2, c_mid), w2_ref[t],
                                preferred_element_type=jnp.float32)
        # no ReLU after the residual add (matches the provided module's forward)

    return kernel


# ----------------------------------------------------------------------------
# BatchNorm folding helpers.
# ----------------------------------------------------------------------------
def fold_bn(gamma, beta, mean, var, eps=1e-5):
    scale = gamma / jnp.sqrt(var + eps)
    return scale, beta - mean * scale


def _fold_params(params):
    s1, b1 = fold_bn(params["bn1_gamma"], params["bn1_beta"],
                     params["bn1_mean"], params["bn1_var"])
    s2, b2 = fold_bn(params["bn2_gamma"], params["bn2_beta"],
                     params["bn2_mean"], params["bn2_var"])
    # Fold BN scale into the conv weights; cast weights to bf16 for the MXU.
    w1f = (params["w1"] * s1).astype(jnp.bfloat16)   # (3,3,Cin,Cmid)  HWIO
    w2f = (params["w2"] * s2).astype(jnp.bfloat16)   # (3,3,Cmid,Cout) HWIO
    return w1f, b1.astype(jnp.float32), w2f, b2.astype(jnp.float32)


# ----------------------------------------------------------------------------
# VMEM footprint estimate (lane/sublane-padded), used for vmem_limit_bytes.
# ----------------------------------------------------------------------------
def _ceil_to(x, m):
    return -(-x // m) * m


def _vmem_bytes(shape, dtype):
    itemsize = jnp.dtype(dtype).itemsize
    s = list(shape)
    if len(s) >= 1:
        s[-1] = _ceil_to(s[-1], 128)
    if len(s) >= 2:
        s[-2] = _ceil_to(s[-2], 8 * max(1, 4 // itemsize))
    return math.prod(s) * itemsize


# ----------------------------------------------------------------------------
# BasicBlock forward (downsample=None case).
# ----------------------------------------------------------------------------
def basic_block_forward(x_nchw, params, *, stride, pad, dilation):
    # layout: PyTorch NCHW -> NHWC (channels on the lane axis) for the kernel.
    x = jnp.transpose(x_nchw, (0, 2, 3, 1)).astype(jnp.float32)
    n, h_in, w_in, c_in = x.shape

    w1f, b1, w2f, b2 = _fold_params(params)
    kh, kw, _, c_mid = w1f.shape
    c_out = w2f.shape[-1]
    assert (kh, kw) == (3, 3)

    p1 = dilation if dilation > 1 else pad                 # convbn() padding rule
    p2 = p1                                                # conv2: same pad/dilation, stride 1
    h_o1 = (h_in + 2 * p1 - 2 * dilation - 1) // stride + 1
    w_o1 = (w_in + 2 * p1 - 2 * dilation - 1) // stride + 1
    h_o2 = h_o1 + 2 * p2 - 2 * dilation
    w_o2 = w_o1 + 2 * p2 - 2 * dilation

    # Identity residual (downsample=None) requires matching shapes.
    assert stride == 1 and c_in == c_out and (h_o2, w_o2) == (h_in, w_in), (
        "identity residual (downsample=None) needs stride=1 and matching shapes")

    w1p = w1f.reshape(9, c_in, c_mid)      # tap-major: w1p[t] = (Cin, Cmid) slab
    w2p = w2f.reshape(9, c_mid, c_out)
    b1r = b1.reshape(1, c_mid)
    b2r = b2.reshape(1, c_out)

    kernel = _make_basic_block_kernel(
        dilation=dilation, p1=p1, p2=p2,
        h_in=h_in, w_in=w_in, h_o1=h_o1, w_o1=w_o1, h_o2=h_o2, w_o2=w_o2,
        c_in=c_in, c_mid=c_mid, c_out=c_out)

    scratch_shapes = [
        pltpu.VMEM((h_in + 2 * p1, w_in + 2 * p1, c_in), jnp.bfloat16),   # xpad
        pltpu.VMEM((h_o1 + 2 * p2, w_o1 + 2 * p2, c_mid), jnp.bfloat16),  # mid
        pltpu.VMEM((h_o1 * w_o1, c_mid), jnp.float32),                    # conv1 acc
    ]

    # vmem limit derived from actual usage (scratch + double-buffered blocks).
    vmem_need = (
        _vmem_bytes((h_in + 2 * p1, w_in + 2 * p1, c_in), jnp.bfloat16)
        + _vmem_bytes((h_o1 + 2 * p2, w_o1 + 2 * p2, c_mid), jnp.bfloat16)
        + _vmem_bytes((h_o1 * w_o1, c_mid), jnp.float32)
        + 2 * _vmem_bytes((1, h_in, w_in, c_in), jnp.float32)
        + 2 * _vmem_bytes((1, h_o2 * w_o2, c_out), jnp.float32)
        + 2 * (_vmem_bytes((9, c_in, c_mid), jnp.bfloat16)
               + _vmem_bytes((9, c_mid, c_out), jnp.bfloat16)
               + _vmem_bytes((1, c_mid), jnp.float32)
               + _vmem_bytes((1, c_out), jnp.float32)))
    vmem_limit = int(min(max(int(vmem_need * 1.5) + (4 << 20), 16 << 20), 96 << 20))

    out_flat = pl.pallas_call(
        kernel,
        out_shape=jax.ShapeDtypeStruct((n, h_o2 * w_o2, c_out), jnp.float32),
        grid_spec=pltpu.PrefetchScalarGridSpec(
            num_scalar_prefetch=0,
            grid=(n,),
            in_specs=[
                pl.BlockSpec((1, h_in, w_in, c_in), lambda b: (b, 0, 0, 0)),
                pl.BlockSpec((9, c_in, c_mid), lambda b: (0, 0, 0)),
                pl.BlockSpec((1, c_mid), lambda b: (0, 0)),
                pl.BlockSpec((9, c_mid, c_out), lambda b: (0, 0, 0)),
                pl.BlockSpec((1, c_out), lambda b: (0, 0)),
            ],
            out_specs=pl.BlockSpec((1, h_o2 * w_o2, c_out), lambda b: (b, 0, 0)),
            scratch_shapes=scratch_shapes,
        ),
        compiler_params=pltpu.CompilerParams(
            dimension_semantics=("parallel",),
            vmem_limit_bytes=vmem_limit,
        ),
    )(x, w1p, b1r, w2p, b2r)

    out = out_flat.reshape(n, h_o2, w_o2, c_out)   # free metadata reshape
    return jnp.transpose(out, (0, 3, 1, 2))        # back to NCHW


# ----------------------------------------------------------------------------
# Pure-JAX reference with identical bf16/fold semantics (sanity check).
# ----------------------------------------------------------------------------
def basic_block_ref(x_nchw, params, *, stride, pad, dilation):
    w1f, b1, w2f, b2 = _fold_params(params)
    x = jnp.transpose(x_nchw, (0, 2, 3, 1)).astype(jnp.float32)
    p = dilation if dilation > 1 else pad
    y = jax.lax.conv_general_dilated(
        x.astype(jnp.bfloat16), w1f, (stride, stride), [(p, p), (p, p)],
        rhs_dilation=(dilation, dilation),
        dimension_numbers=("NHWC", "HWIO", "NHWC"),
        preferred_element_type=jnp.float32)
    y = jnp.maximum(y + b1.reshape(1, 1, 1, -1), 0.0)
    y = jax.lax.conv_general_dilated(
        y.astype(jnp.bfloat16), w2f, (1, 1), [(p, p), (p, p)],
        rhs_dilation=(dilation, dilation),
        dimension_numbers=("NHWC", "HWIO", "NHWC"),
        preferred_element_type=jnp.float32)
    y = y + b2.reshape(1, 1, 1, -1) + x            # no ReLU after residual (per spec)
    return jnp.transpose(y, (0, 3, 1, 2))


if __name__ == "__main__":
    # BasicBlock(inplanes=4, planes=4, stride=1, downsample=None, pad=1, dilation=1)
    inplanes, planes = 4, 4
    stride, pad, dilation = 1, 1, 1
    N, H, W = 2, 16, 16

    key = jax.random.PRNGKey(0)
    ks = jax.random.split(key, 11)
    params = {
        # conv weights in HWIO layout (kh, kw, Cin, Cout)
        "w1": 0.1 * jax.random.normal(ks[0], (3, 3, inplanes, planes), jnp.float32),
        "w2": 0.1 * jax.random.normal(ks[1], (3, 3, planes, planes), jnp.float32),
        "bn1_gamma": 1.0 + 0.1 * jax.random.normal(ks[2], (planes,), jnp.float32),
        "bn1_beta": 0.1 * jax.random.normal(ks[3], (planes,), jnp.float32),
        "bn1_mean": 0.1 * jax.random.normal(ks[4], (planes,), jnp.float32),
        "bn1_var": 0.5 + jnp.abs(jax.random.normal(ks[5], (planes,), jnp.float32)),
        "bn2_gamma": 1.0 + 0.1 * jax.random.normal(ks[6], (planes,), jnp.float32),
        "bn2_beta": 0.1 * jax.random.normal(ks[7], (planes,), jnp.float32),
        "bn2_mean": 0.1 * jax.random.normal(ks[8], (planes,), jnp.float32),
        "bn2_var": 0.5 + jnp.abs(jax.random.normal(ks[9], (planes,), jnp.float32)),
    }
    x = jax.random.normal(ks[10], (N, inplanes, H, W), jnp.float32)

    out = basic_block_forward(x, params, stride=stride, pad=pad, dilation=dilation)
    out = jax.block_until_ready(out)
    assert out.shape == (N, planes, H, W)

    ref = basic_block_ref(x, params, stride=stride, pad=pad, dilation=dilation)
    assert jnp.allclose(out, ref, atol=5e-3, rtol=5e-3), "mismatch vs reference"

    print("KERNEL_OK")
</pallas_src>

<mosaic_0001>
module attributes {stable_mosaic.version = 11 : i64} {
  func.func @kernel(%arg0: i32, %arg1: memref<1x16x16x4xf32, #tpu.memory_space<vmem>>, %arg2: memref<9x4x4xbf16, #tpu.memory_space<vmem>>, %arg3: memref<1x4xf32, #tpu.memory_space<vmem>>, %arg4: memref<9x4x4xbf16, #tpu.memory_space<vmem>>, %arg5: memref<1x4xf32, #tpu.memory_space<vmem>>, %arg6: memref<1x256x4xf32, #tpu.memory_space<vmem>>, %arg7: memref<18x18x4xbf16, #tpu.memory_space<vmem>>, %arg8: memref<18x18x4xbf16, #tpu.memory_space<vmem>>, %arg9: memref<256x4xf32, #tpu.memory_space<vmem>>) attributes {dimension_semantics = [#tpu.dimension_semantics<parallel>], iteration_bounds = array<i64: 2>, scalar_prefetch = 0 : i64, scratch_operands = 3 : i64, tpu.core_type = #tpu.core_type<tc>, window_params = [{transform_indices = @transform_0, window_bounds = array<i64: 1, 16, 16, 4>}, {pipeline_mode = #tpu.pipeline_mode<synchronous>, transform_indices = @transform_1, window_bounds = array<i64: 9, 4, 4>}, {pipeline_mode = #tpu.pipeline_mode<synchronous>, transform_indices = @transform_2, window_bounds = array<i64: 1, 4>}, {pipeline_mode = #tpu.pipeline_mode<synchronous>, transform_indices = @transform_3, window_bounds = array<i64: 9, 4, 4>}, {pipeline_mode = #tpu.pipeline_mode<synchronous>, transform_indices = @transform_4, window_bounds = array<i64: 1, 4>}, {transform_indices = @transform_5, window_bounds = array<i64: 1, 256, 4>}]} {
    %cst = arith.constant 0.000000e+00 : bf16
    %0 = vector.broadcast %cst : bf16 to vector<1x18x4xbf16>
    %c0 = arith.constant 0 : index
    %c0_0 = arith.constant 0 : index
    %c0_1 = arith.constant 0 : index
    %1 = vector.load %arg7[%c0, %c0_0, %c0_1] : memref<18x18x4xbf16, #tpu.memory_space<vmem>>, vector<1x18x4xbf16>
    tpu.vector_store %arg7[%c0, %c0_0, %c0_1], %0 {strides = array<i32>} : memref<18x18x4xbf16, #tpu.memory_space<vmem>>, vector<1x18x4xbf16>,
    %cst_2 = arith.constant 0.000000e+00 : bf16
    %2 = vector.broadcast %cst_2 : bf16 to vector<1x18x4xbf16>
    %c17 = arith.constant 17 : index
    %c0_3 = arith.constant 0 : index
    %c0_4 = arith.constant 0 : index
    %3 = vector.load %arg7[%c17, %c0_3, %c0_4] : memref<18x18x4xbf16, #tpu.memory_space<vmem>>, vector<1x18x4xbf16>
    tpu.vector_store %arg7[%c17, %c0_3, %c0_4], %2 {strides = array<i32>} : memref<18x18x4xbf16, #tpu.memory_space<vmem>>, vector<1x18x4xbf16>,
    %cst_5 = arith.constant 0.000000e+00 : bf16
    %4 = vector.broadcast %cst_5 : bf16 to vector<16x1x4xbf16>
    %c1 = arith.constant 1 : index
    %c0_6 = arith.constant 0 : index
    %c0_7 = arith.constant 0 : index
    %5 = vector.load %arg7[%c1, %c0_6, %c0_7] : memref<18x18x4xbf16, #tpu.memory_space<vmem>>, vector<16x1x4xbf16>
    tpu.vector_store %arg7[%c1, %c0_6, %c0_7], %4 {strides = array<i32>} : memref<18x18x4xbf16, #tpu.memory_space<vmem>>, vector<16x1x4xbf16>,
    %cst_8 = arith.constant 0.000000e+00 : bf16
    %6 = vector.broadcast %cst_8 : bf16 to vector<16x1x4xbf16>
    %c1_9 = arith.constant 1 : index
    %c17_10 = arith.constant 17 : index
    %c0_11 = arith.constant 0 : index
    %7 = vector.load %arg7[%c1_9, %c17_10, %c0_11] : memref<18x18x4xbf16, #tpu.memory_space<vmem>>, vector<16x1x4xbf16>
    tpu.vector_store %arg7[%c1_9, %c17_10, %c0_11], %6 {strides = array<i32>} : memref<18x18x4xbf16, #tpu.memory_space<vmem>>, vector<16x1x4xbf16>,
    %c0_12 = arith.constant 0 : index
    %c0_13 = arith.constant 0 : index
    %c0_14 = arith.constant 0 : index
    %c0_15 = arith.constant 0 : index
    %8 = vector.load %arg1[%c0_12, %c0_13, %c0_14, %c0_15] : memref<1x16x16x4xf32, #tpu.memory_space<vmem>>, vector<1x16x16x4xf32>
    %9 = vector.shape_cast %8 : vector<1x16x16x4xf32> to vector<16x16x4xf32>
    %10 = arith.truncf %9 : vector<16x16x4xf32> to vector<16x16x4xbf16>
    %c1_16 = arith.constant 1 : index
    %c1_17 = arith.constant 1 : index
    %c0_18 = arith.constant 0 : index
    %11 = vector.load %arg7[%c1_16, %c1_17, %c0_18] : memref<18x18x4xbf16, #tpu.memory_space<vmem>>, vector<16x16x4xbf16>
    tpu.vector_store %arg7[%c1_16, %c1_17, %c0_18], %10 {strides = array<i32>} : memref<18x18x4xbf16, #tpu.memory_space<vmem>>, vector<16x16x4xbf16>,
    %c0_19 = arith.constant 0 : index
    %c0_20 = arith.constant 0 : index
    %12 = vector.load %arg3[%c0_19, %c0_20] : memref<1x4xf32, #tpu.memory_space<vmem>>, vector<1x4xf32>
    %13 = vector.shape_cast %12 : vector<1x4xf32> to vector<1x4xf32>
    %14 = vector.broadcast %13 : vector<1x4xf32> to vector<256x4xf32>
    %c0_21 = arith.constant 0 : index
    %c0_22 = arith.constant 0 : index
    %15 = vector.load %arg9[%c0_21, %c0_22] : memref<256x4xf32, #tpu.memory_space<vmem>>, vector<256x4xf32>
    tpu.vector_store %arg9[%c0_21, %c0_22], %14 {strides = array<i32>} : memref<256x4xf32, #tpu.memory_space<vmem>>, vector<256x4xf32>,
    %c0_23 = arith.constant 0 : index
    %c0_24 = arith.constant 0 : index
    %c0_25 = arith.constant 0 : index
    %16 = vector.load %arg7[%c0_23, %c0_24, %c0_25] : memref<18x18x4xbf16, #tpu.memory_space<vmem>>, vector<16x16x4xbf16>
    %c0_26 = arith.constant 0 : index
    %c0_27 = arith.constant 0 : index
    %17 = vector.load %arg9[%c0_26, %c0_27] : memref<256x4xf32, #tpu.memory_space<vmem>>, vector<256x4xf32>
    %18 = vector.shape_cast %16 : vector<16x16x4xbf16> to vector<256x4xbf16>
    %c0_28 = arith.constant 0 : index
    %c0_29 = arith.constant 0 : index
    %c0_30 = arith.constant 0 : index
    %19 = vector.load %arg2[%c0_28, %c0_29, %c0_30] : memref<9x4x4xbf16, #tpu.memory_space<vmem>>, vector<1x4x4xbf16>
    %20 = vector.shape_cast %19 : vector<1x4x4xbf16> to vector<4x4xbf16>
    %cst_31 = arith.constant dense<0.000000e+00> : vector<256x4xf32>
    %21 = tpu.matmul %18, %20, %cst_31 {dimension_numbers = #tpu.dot_dimension_numbers<[1], [0], [0], [1], [0, 0, 1, 1], [], []>} : vector<256x4xbf16>, vector<4x4xbf16>, vector<256x4xf32> -> vector<256x4xf32>
    %22 = arith.addf %17, %21 : vector<256x4xf32>
    %c0_32 = arith.constant 0 : index
    %c0_33 = arith.constant 0 : index
    %23 = vector.load %arg9[%c0_32, %c0_33] : memref<256x4xf32, #tpu.memory_space<vmem>>, vector<256x4xf32>
    tpu.vector_store %arg9[%c0_32, %c0_33], %22 {strides = array<i32>} : memref<256x4xf32, #tpu.memory_space<vmem>>, vector<256x4xf32>,
    %c0_34 = arith.constant 0 : index
    %c1_35 = arith.constant 1 : index
    %c0_36 = arith.constant 0 : index
    %24 = vector.load %arg7[%c0_34, %c1_35, %c0_36] : memref<18x18x4xbf16, #tpu.memory_space<vmem>>, vector<16x16x4xbf16>
    %c0_37 = arith.constant 0 : index
    %c0_38 = arith.constant 0 : index
    %25 = vector.load %arg9[%c0_37, %c0_38] : memref<256x4xf32, #tpu.memory_space<vmem>>, vector<256x4xf32>
    %26 = vector.shape_cast %24 : vector<16x16x4xbf16> to vector<256x4xbf16>
    %c1_39 = arith.constant 1 : index
    %c0_40 = arith.constant 0 : index
    %c0_41 = arith.constant 0 : index
    %27 = vector.load %arg2[%c1_39, %c0_40, %c0_41] : memref<9x4x4xbf16, #tpu.memory_space<vmem>>, vector<1x4x4xbf16>
    %28 = vector.shape_cast %27 : vector<1x4x4xbf16> to vector<4x4xbf16>
    %cst_42 = arith.constant dense<0.000000e+00> : vector<256x4xf32>
    %29 = tpu.matmul %26, %28, %cst_42 {dimension_numbers = #tpu.dot_dimension_numbers<[1], [0], [0], [1], [0, 0, 1, 1], [], []>} : vector<256x4xbf16>, vector<4x4xbf16>, vector<256x4xf32> -> vector<256x4xf32>
    %30 = arith.addf %25, %29 : vector<256x4xf32>
    %c0_43 = arith.constant 0 : index
    %c0_44 = arith.constant 0 : index
    %31 = vector.load %arg9[%c0_43, %c0_44] : memref<256x4xf32, #tpu.memory_space<vmem>>, vector<256x4xf32>
    tpu.vector_store %arg9[%c0_43, %c0_44], %30 {strides = array<i32>} : memref<256x4xf32, #tpu.memory_space<vmem>>, vector<256x4xf32>,
    %c0_45 = arith.constant 0 : index
    %c2 = arith.constant 2 : index
    %c0_46 = arith.constant 0 : index
    %32 = vector.load %arg7[%c0_45, %c2, %c0_46] : memref<18x18x4xbf16, #tpu.memory_space<vmem>>, vector<16x16x4xbf16>
    %c0_47 = arith.constant 0 : index
    %c0_48 = arith.constant 0 : index
    %33 = vector.load %arg9[%c0_47, %c0_48] : memref<256x4xf32, #tpu.memory_space<vmem>>, vector<256x4xf32>
    %34 = vector.shape_cast %32 : vector<16x16x4xbf16> to vector<256x4xbf16>
    %c2_49 = arith.constant 2 : index
    %c0_50 = arith.constant 0 : index
    %c0_51 = arith.constant 0 : index
    %35 = vector.load %arg2[%c2_49, %c0_50, %c0_51] : memref<9x4x4xbf16, #tpu.memory_space<vmem>>, vector<1x4x4xbf16>
    %36 = vector.shape_cast %35 : vector<1x4x4xbf16> to vector<4x4xbf16>
    %cst_52 = arith.constant dense<0.000000e+00> : vector<256x4xf32>
    %37 = tpu.matmul %34, %36, %cst_52 {dimension_numbers = #tpu.dot_dimension_numbers<[1], [0], [0], [1], [0, 0, 1, 1], [], []>} : vector<256x4xbf16>, vector<4x4xbf16>, vector<256x4xf32> -> vector<256x4xf32>
    %38 = arith.addf %33, %37 : vector<256x4xf32>
    %c0_53 = arith.constant 0 : index
    %c0_54 = arith.constant 0 : index
    %39 = vector.load %arg9[%c0_53, %c0_54] : memref<256x4xf32, #tpu.memory_space<vmem>>, vector<256x4xf32>
    tpu.vector_store %arg9[%c0_53, %c0_54], %38 {strides = array<i32>} : memref<256x4xf32, #tpu.memory_space<vmem>>, vector<256x4xf32>,
    %c1_55 = arith.constant 1 : index
    %c0_56 = arith.constant 0 : index
    %c0_57 = arith.constant 0 : index
    %40 = vector.load %arg7[%c1_55, %c0_56, %c0_57] : memref<18x18x4xbf16, #tpu.memory_space<vmem>>, vector<16x16x4xbf16>
    %c0_58 = arith.constant 0 : index
    %c0_59 = arith.constant 0 : index
    %41 = vector.load %arg9[%c0_58, %c0_59] : memref<256x4xf32, #tpu.memory_space<vmem>>, vector<256x4xf32>
    %42 = vector.shape_cast %40 : vector<16x16x4xbf16> to vector<256x4xbf16>
    %c3 = arith.constant 3 : index
    %c0_60 = arith.constant 0 : index
    %c0_61 = arith.constant 0 : index
    %43 = vector.load %arg2[%c3, %c0_60, %c0_61] : memref<9x4x4xbf16, #tpu.memory_space<vmem>>, vector<1x4x4xbf16>
    %44 = vector.shape_cast %43 : vector<1x4x4xbf16> to vector<4x4xbf16>
    %cst_62 = arith.constant dense<0.000000e+00> : vector<256x4xf32>
    %45 = tpu.matmul %42, %44, %cst_62 {dimension_numbers = #tpu.dot_dimension_numbers<[1], [0], [0], [1], [0, 0, 1, 1], [], []>} : vector<256x4xbf16>, vector<4x4xbf16>, vector<256x4xf32> -> vector<256x4xf32>
    %46 = arith.addf %41, %45 : vector<256x4xf32>
    %c0_63 = arith.constant 0 : index
    %c0_64 = arith.constant 0 : index
    %47 = vector.load %arg9[%c0_63, %c0_64] : memref<256x4xf32, #tpu.memory_space<vmem>>, vector<256x4xf32>
    tpu.vector_store %arg9[%c0_63, %c0_64], %46 {strides = array<i32>} : memref<256x4xf32, #tpu.memory_space<vmem>>, vector<256x4xf32>,
    %c1_65 = arith.constant 1 : index
    %c1_66 = arith.constant 1 : index
    %c0_67 = arith.constant 0 : index
    %48 = vector.load %arg7[%c1_65, %c1_66, %c0_67] : memref<18x18x4xbf16, #tpu.memory_space<vmem>>, vector<16x16x4xbf16>
    %c0_68 = arith.constant 0 : index
    %c0_69 = arith.constant 0 : index
    %49 = vector.load %arg9[%c0_68, %c0_69] : memref<256x4xf32, #tpu.memory_space<vmem>>, vector<256x4xf32>
    %50 = vector.shape_cast %48 : vector<16x16x4xbf16> to vector<256x4xbf16>
    %c4 = arith.constant 4 : index
    %c0_70 = arith.constant 0 : index
    %c0_71 = arith.constant 0 : index
    %51 = vector.load %arg2[%c4, %c0_70, %c0_71] : memref<9x4x4xbf16, #tpu.memory_space<vmem>>, vector<1x4x4xbf16>
    %52 = vector.shape_cast %51 : vector<1x4x4xbf16> to vector<4x4xbf16>
    %cst_72 = arith.constant dense<0.000000e+00> : vector<256x4xf32>
    %53 = tpu.matmul %50, %52, %cst_72 {dimension_numbers = #tpu.dot_dimension_numbers<[1], [0], [0], [1], [0, 0, 1, 1], [], []>} : vector<256x4xbf16>, vector<4x4xbf16>, vector<256x4xf32> -> vector<256x4xf32>
    %54 = arith.addf %49, %53 : vector<256x4xf32>
    %c0_73 = arith.constant 0 : index
    %c0_74 = arith.constant 0 : index
    %55 = vector.load %arg9[%c0_73, %c0_74] : memref<256x4xf32, #tpu.memory_space<vmem>>, vector<256x4xf32>
    tpu.vector_store %arg9[%c0_73, %c0_74], %54 {strides = array<i32>} : memref<256x4xf32, #tpu.memory_space<vmem>>, vector<256x4xf32>,
    %c1_75 = arith.constant 1 : index
    %c2_76 = arith.constant 2 : index
    %c0_77 = arith.constant 0 : index
    %56 = vector.load %arg7[%c1_75, %c2_76, %c0_77] : memref<18x18x4xbf16, #tpu.memory_space<vmem>>, vector<16x16x4xbf16>
    %c0_78 = arith.constant 0 : index
    %c0_79 = arith.constant 0 : index
    %57 = vector.load %arg9[%c0_78, %c0_79] : memref<256x4xf32, #tpu.memory_space<vmem>>, vector<256x4xf32>
    %58 = vector.shape_cast %56 : vector<16x16x4xbf16> to vector<256x4xbf16>
    %c5 = arith.constant 5 : index
    %c0_80 = arith.constant 0 : index
    %c0_81 = arith.constant 0 : index
    %59 = vector.load %arg2[%c5, %c0_80, %c0_81] : memref<9x4x4xbf16, #tpu.memory_space<vmem>>, vector<1x4x4xbf16>
    %60 = vector.shape_cast %59 : vector<1x4x4xbf16> to vector<4x4xbf16>
    %cst_82 = arith.constant dense<0.000000e+00> : vector<256x4xf32>
    %61 = tpu.matmul %58, %60, %cst_82 {dimension_numbers = #tpu.dot_dimension_numbers<[1], [0], [0], [1], [0, 0, 1, 1], [], []>} : vector<256x4xbf16>, vector<4x4xbf16>, vector<256x4xf32> -> vector<256x4xf32>
    %62 = arith.addf %57, %61 : vector<256x4xf32>
    %c0_83 = arith.constant 0 : index
    %c0_84 = arith.constant 0 : index
    %63 = vector.load %arg9[%c0_83, %c0_84] : memref<256x4xf32, #tpu.memory_space<vmem>>, vector<256x4xf32>
    tpu.vector_store %arg9[%c0_83, %c0_84], %62 {strides = array<i32>} : memref<256x4xf32, #tpu.memory_space<vmem>>, vector<256x4xf32>,
    %c2_85 = arith.constant 2 : index
    %c0_86 = arith.constant 0 : index
    %c0_87 = arith.constant 0 : index
    %64 = vector.load %arg7[%c2_85, %c0_86, %c0_87] : memref<18x18x4xbf16, #tpu.memory_space<vmem>>, vector<16x16x4xbf16>
    %c0_88 = arith.constant 0 : index
    %c0_89 = arith.constant 0 : index
    %65 = vector.load %arg9[%c0_88, %c0_89] : memref<256x4xf32, #tpu.memory_space<vmem>>, vector<256x4xf32>
    %66 = vector.shape_cast %64 : vector<16x16x4xbf16> to vector<256x4xbf16>
    %c6 = arith.constant 6 : index
    %c0_90 = arith.constant 0 : index
    %c0_91 = arith.constant 0 : index
    %67 = vector.load %arg2[%c6, %c0_90, %c0_91] : memref<9x4x4xbf16, #tpu.memory_space<vmem>>, vector<1x4x4xbf16>
    %68 = vector.shape_cast %67 : vector<1x4x4xbf16> to vector<4x4xbf16>
    %cst_92 = arith.constant dense<0.000000e+00> : vector<256x4xf32>
    %69 = tpu.matmul %66, %68, %cst_92 {dimension_numbers = #tpu.dot_dimension_numbers<[1], [0], [0], [1], [0, 0, 1, 1], [], []>} : vector<256x4xbf16>, vector<4x4xbf16>, vector<256x4xf32> -> vector<256x4xf32>
    %70 = arith.addf %65, %69 : vector<256x4xf32>
    %c0_93 = arith.constant 0 : index
    %c0_94 = arith.constant 0 : index
    %71 = vector.load %arg9[%c0_93, %c0_94] : memref<256x4xf32, #tpu.memory_space<vmem>>, vector<256x4xf32>
    tpu.vector_store %arg9[%c0_93, %c0_94], %70 {strides = array<i32>} : memref<256x4xf32, #tpu.memory_space<vmem>>, vector<256x4xf32>,
    %c2_95 = arith.constant 2 : index
    %c1_96 = arith.constant 1 : index
    %c0_97 = arith.constant 0 : index
    %72 = vector.load %arg7[%c2_95, %c1_96, %c0_97] : memref<18x18x4xbf16, #tpu.memory_space<vmem>>, vector<16x16x4xbf16>
    %c0_98 = arith.constant 0 : index
    %c0_99 = arith.constant 0 : index
    %73 = vector.load %arg9[%c0_98, %c0_99] : memref<256x4xf32, #tpu.memory_space<vmem>>, vector<256x4xf32>
    %74 = vector.shape_cast %72 : vector<16x16x4xbf16> to vector<256x4xbf16>
    %c7 = arith.constant 7 : index
    %c0_100 = arith.constant 0 : index
    %c0_101 = arith.constant 0 : index
    %75 = vector.load %arg2[%c7, %c0_100, %c0_101] : memref<9x4x4xbf16, #tpu.memory_space<vmem>>, vector<1x4x4xbf16>
    %76 = vector.shape_cast %75 : vector<1x4x4xbf16> to vector<4x4xbf16>
    %cst_102 = arith.constant dense<0.000000e+00> : vector<256x4xf32>
    %77 = tpu.matmul %74, %76, %cst_102 {dimension_numbers = #tpu.dot_dimension_numbers<[1], [0], [0], [1], [0, 0, 1, 1], [], []>} : vector<256x4xbf16>, vector<4x4xbf16>, vector<256x4xf32> -> vector<256x4xf32>
    %78 = arith.addf %73, %77 : vector<256x4xf32>
    %c0_103 = arith.constant 0 : index
    %c0_104 = arith.constant 0 : index
    %79 = vector.load %arg9[%c0_103, %c0_104] : memref<256x4xf32, #tpu.memory_space<vmem>>, vector<256x4xf32>
    tpu.vector_store %arg9[%c0_103, %c0_104], %78 {strides = array<i32>} : memref<256x4xf32, #tpu.memory_space<vmem>>, vector<256x4xf32>,
    %c2_105 = arith.constant 2 : index
    %c2_106 = arith.constant 2 : index
    %c0_107 = arith.constant 0 : index
    %80 = vector.load %arg7[%c2_105, %c2_106, %c0_107] : memref<18x18x4xbf16, #tpu.memory_space<vmem>>, vector<16x16x4xbf16>
    %c0_108 = arith.constant 0 : index
    %c0_109 = arith.constant 0 : index
    %81 = vector.load %arg9[%c0_108, %c0_109] : memref<256x4xf32, #tpu.memory_space<vmem>>, vector<256x4xf32>
    %82 = vector.shape_cast %80 : vector<16x16x4xbf16> to vector<256x4xbf16>
    %c8 = arith.constant 8 : index
    %c0_110 = arith.constant 0 : index
    %c0_111 = arith.constant 0 : index
    %83 = vector.load %arg2[%c8, %c0_110, %c0_111] : memref<9x4x4xbf16, #tpu.memory_space<vmem>>, vector<1x4x4xbf16>
    %84 = vector.shape_cast %83 : vector<1x4x4xbf16> to vector<4x4xbf16>
    %cst_112 = arith.constant dense<0.000000e+00> : vector<256x4xf32>
    %85 = tpu.matmul %82, %84, %cst_112 {dimension_numbers = #tpu.dot_dimension_numbers<[1], [0], [0], [1], [0, 0, 1, 1], [], []>} : vector<256x4xbf16>, vector<4x4xbf16>, vector<256x4xf32> -> vector<256x4xf32>
    %86 = arith.addf %81, %85 : vector<256x4xf32>
    %c0_113 = arith.constant 0 : index
    %c0_114 = arith.constant 0 : index
    %87 = vector.load %arg9[%c0_113, %c0_114] : memref<256x4xf32, #tpu.memory_space<vmem>>, vector<256x4xf32>
    tpu.vector_store %arg9[%c0_113, %c0_114], %86 {strides = array<i32>} : memref<256x4xf32, #tpu.memory_space<vmem>>, vector<256x4xf32>,
    %cst_115 = arith.constant 0.000000e+00 : bf16
    %88 = vector.broadcast %cst_115 : bf16 to vector<1x18x4xbf16>
    %c0_116 = arith.constant 0 : index
    %c0_117 = arith.constant 0 : index
    %c0_118 = arith.constant 0 : index
    %89 = vector.load %arg8[%c0_116, %c0_117, %c0_118] : memref<18x18x4xbf16, #tpu.memory_space<vmem>>, vector<1x18x4xbf16>
    tpu.vector_store %arg8[%c0_116, %c0_117, %c0_118], %88 {strides = array<i32>} : memref<18x18x4xbf16, #tpu.memory_space<vmem>>, vector<1x18x4xbf16>,
    %cst_119 = arith.constant 0.000000e+00 : bf16
    %90 = vector.broadcast %cst_119 : bf16 to vector<1x18x4xbf16>
    %c17_120 = arith.constant 17 : index
    %c0_121 = arith.constant 0 : index
    %c0_122 = arith.constant 0 : index
    %91 = vector.load %arg8[%c17_120, %c0_121, %c0_122] : memref<18x18x4xbf16, #tpu.memory_space<vmem>>, vector<1x18x4xbf16>
    tpu.vector_store %arg8[%c17_120, %c0_121, %c0_122], %90 {strides = array<i32>} : memref<18x18x4xbf16, #tpu.memory_space<vmem>>, vector<1x18x4xbf16>,
    %cst_123 = arith.constant 0.000000e+00 : bf16
    %92 = vector.broadcast %cst_123 : bf16 to vector<16x1x4xbf16>
    %c1_124 = arith.constant 1 : index
    %c0_125 = arith.constant 0 : index
    %c0_126 = arith.constant 0 : index
    %93 = vector.load %arg8[%c1_124, %c0_125, %c0_126] : memref<18x18x4xbf16, #tpu.memory_space<vmem>>, vector<16x1x4xbf16>
    tpu.vector_store %arg8[%c1_124, %c0_125, %c0_126], %92 {strides = array<i32>} : memref<18x18x4xbf16, #tpu.memory_space<vmem>>, vector<16x1x4xbf16>,
    %cst_127 = arith.constant 0.000000e+00 : bf16
    %94 = vector.broadcast %cst_127 : bf16 to vector<16x1x4xbf16>
    %c1_128 = arith.constant 1 : index
    %c17_129 = arith.constant 17 : index
    %c0_130 = arith.constant 0 : index
    %95 = vector.load %arg8[%c1_128, %c17_129, %c0_130] : memref<18x18x4xbf16, #tpu.memory_space<vmem>>, vector<16x1x4xbf16>
    tpu.vector_store %arg8[%c1_128, %c17_129, %c0_130], %94 {strides = array<i32>} : memref<18x18x4xbf16, #tpu.memory_space<vmem>>, vector<16x1x4xbf16>,
    %c0_131 = arith.constant 0 : index
    %c0_132 = arith.constant 0 : index
    %96 = vector.load %arg9[%c0_131, %c0_132] : memref<256x4xf32, #tpu.memory_space<vmem>>, vector<256x4xf32>
    %cst_133 = arith.constant 0.000000e+00 : f32
    %97 = vector.broadcast %cst_133 : f32 to vector<256x4xf32>
    %98 = arith.maximumf %96, %97 : vector<256x4xf32>
    %99 = vector.shape_cast %98 : vector<256x4xf32> to vector<16x16x4xf32>
    %100 = arith.truncf %99 : vector<16x16x4xf32> to vector<16x16x4xbf16>
    %c1_134 = arith.constant 1 : index
    %c1_135 = arith.constant 1 : index
    %c0_136 = arith.constant 0 : index
    %101 = vector.load %arg8[%c1_134, %c1_135, %c0_136] : memref<18x18x4xbf16, #tpu.memory_space<vmem>>, vector<16x16x4xbf16>
    tpu.vector_store %arg8[%c1_134, %c1_135, %c0_136], %100 {strides = array<i32>} : memref<18x18x4xbf16, #tpu.memory_space<vmem>>, vector<16x16x4xbf16>,
    %c0_137 = arith.constant 0 : index
    %c0_138 = arith.constant 0 : index
    %c0_139 = arith.constant 0 : index
    %c0_140 = arith.constant 0 : index
    %102 = vector.load %arg1[%c0_137, %c0_138, %c0_139, %c0_140] : memref<1x16x16x4xf32, #tpu.memory_space<vmem>>, vector<1x16x16x4xf32>
    %103 = vector.shape_cast %102 : vector<1x16x16x4xf32> to vector<16x16x4xf32>
    %104 = vector.shape_cast %103 : vector<16x16x4xf32> to vector<256x4xf32>
    %c0_141 = arith.constant 0 : index
    %c0_142 = arith.constant 0 : index
    %105 = vector.load %arg5[%c0_141, %c0_142] : memref<1x4xf32, #tpu.memory_space<vmem>>, vector<1x4xf32>
    %106 = vector.broadcast %105 : vector<1x4xf32> to vector<256x4xf32>
    %107 = arith.addf %104, %106 : vector<256x4xf32>
    %c0_143 = arith.constant 0 : index
    %c0_144 = arith.constant 0 : index
    %c0_145 = arith.constant 0 : index
    %108 = vector.load %arg6[%c0_143, %c0_144, %c0_145] : memref<1x256x4xf32, #tpu.memory_space<vmem>>, vector<1x256x4xf32>
    %109 = vector.shape_cast %108 : vector<1x256x4xf32> to vector<256x4xf32>
    %110 = vector.shape_cast %107 : vector<256x4xf32> to vector<1x256x4xf32>
    tpu.vector_store %arg6[%c0_143, %c0_144, %c0_145], %110 {strides = array<i32>} : memref<1x256x4xf32, #tpu.memory_space<vmem>>, vector<1x256x4xf32>,
    %c0_146 = arith.constant 0 : index
    %c0_147 = arith.constant 0 : index
    %c0_148 = arith.constant 0 : index
    %111 = vector.load %arg8[%c0_146, %c0_147, %c0_148] : memref<18x18x4xbf16, #tpu.memory_space<vmem>>, vector<16x16x4xbf16>
    %c0_149 = arith.constant 0 : index
    %c0_150 = arith.constant 0 : index
    %c0_151 = arith.constant 0 : index
    %112 = vector.load %arg6[%c0_149, %c0_150, %c0_151] : memref<1x256x4xf32, #tpu.memory_space<vmem>>, vector<1x256x4xf32>
    %113 = vector.shape_cast %112 : vector<1x256x4xf32> to vector<256x4xf32>
    %114 = vector.shape_cast %111 : vector<16x16x4xbf16> to vector<256x4xbf16>
    %c0_152 = arith.constant 0 : index
    %c0_153 = arith.constant 0 : index
    %c0_154 = arith.constant 0 : index
    %115 = vector.load %arg4[%c0_152, %c0_153, %c0_154] : memref<9x4x4xbf16, #tpu.memory_space<vmem>>, vector<1x4x4xbf16>
    %116 = vector.shape_cast %115 : vector<1x4x4xbf16> to vector<4x4xbf16>
    %cst_155 = arith.constant dense<0.000000e+00> : vector<256x4xf32>
    %117 = tpu.matmul %114, %116, %cst_155 {dimension_numbers = #tpu.dot_dimension_numbers<[1], [0], [0], [1], [0, 0, 1, 1], [], []>} : vector<256x4xbf16>, vector<4x4xbf16>, vector<256x4xf32> -> vector<256x4xf32>
    %118 = arith.addf %113, %117 : vector<256x4xf32>
    %c0_156 = arith.constant 0 : index
    %c0_157 = arith.constant 0 : index
    %c0_158 = arith.constant 0 : index
    %119 = vector.load %arg6[%c0_156, %c0_157, %c0_158] : memref<1x256x4xf32, #tpu.memory_space<vmem>>, vector<1x256x4xf32>
    %120 = vector.shape_cast %119 : vector<1x256x4xf32> to vector<256x4xf32>
    %121 = vector.shape_cast %118 : vector<256x4xf32> to vector<1x256x4xf32>
    tpu.vector_store %arg6[%c0_156, %c0_157, %c0_158], %121 {strides = array<i32>} : memref<1x256x4xf32, #tpu.memory_space<vmem>>, vector<1x256x4xf32>,
    %c0_159 = arith.constant 0 : index
    %c1_160 = arith.constant 1 : index
    %c0_161 = arith.constant 0 : index
    %122 = vector.load %arg8[%c0_159, %c1_160, %c0_161] : memref<18x18x4xbf16, #tpu.memory_space<vmem>>, vector<16x16x4xbf16>
    %c0_162 = arith.constant 0 : index
    %c0_163 = arith.constant 0 : index
    %c0_164 = arith.constant 0 : index
    %123 = vector.load %arg6[%c0_162, %c0_163, %c0_164] : memref<1x256x4xf32, #tpu.memory_space<vmem>>, vector<1x256x4xf32>
    %124 = vector.shape_cast %123 : vector<1x256x4xf32> to vector<256x4xf32>
    %125 = vector.shape_cast %122 : vector<16x16x4xbf16> to vector<256x4xbf16>
    %c1_165 = arith.constant 1 : index
    %c0_166 = arith.constant 0 : index
    %c0_167 = arith.constant 0 : index
    %126 = vector.load %arg4[%c1_165, %c0_166, %c0_167] : memref<9x4x4xbf16, #tpu.memory_space<vmem>>, vector<1x4x4xbf16>
    %127 = vector.shape_cast %126 : vector<1x4x4xbf16> to vector<4x4xbf16>
    %cst_168 = arith.constant dense<0.000000e+00> : vector<256x4xf32>
    %128 = tpu.matmul %125, %127, %cst_168 {dimension_numbers = #tpu.dot_dimension_numbers<[1], [0], [0], [1], [0, 0, 1, 1], [], []>} : vector<256x4xbf16>, vector<4x4xbf16>, vector<256x4xf32> -> vector<256x4xf32>
    %129 = arith.addf %124, %128 : vector<256x4xf32>
    %c0_169 = arith.constant 0 : index
    %c0_170 = arith.constant 0 : index
    %c0_171 = arith.constant 0 : index
    %130 = vector.load %arg6[%c0_169, %c0_170, %c0_171] : memref<1x256x4xf32, #tpu.memory_space<vmem>>, vector<1x256x4xf32>
    %131 = vector.shape_cast %130 : vector<1x256x4xf32> to vector<256x4xf32>
    %132 = vector.shape_cast %129 : vector<256x4xf32> to vector<1x256x4xf32>
    tpu.vector_store %arg6[%c0_169, %c0_170, %c0_171], %132 {strides = array<i32>} : memref<1x256x4xf32, #tpu.memory_space<vmem>>, vector<1x256x4xf32>,
    %c0_172 = arith.constant 0 : index
    %c2_173 = arith.constant 2 : index
    %c0_174 = arith.constant 0 : index
    %133 = vector.load %arg8[%c0_172, %c2_173, %c0_174] : memref<18x18x4xbf16, #tpu.memory_space<vmem>>, vector<16x16x4xbf16>
    %c0_175 = arith.constant 0 : index
    %c0_176 = arith.constant 0 : index
    %c0_177 = arith.constant 0 : index
    %134 = vector.load %arg6[%c0_175, %c0_176, %c0_177] : memref<1x256x4xf32, #tpu.memory_space<vmem>>, vector<1x256x4xf32>
    %135 = vector.shape_cast %134 : vector<1x256x4xf32> to vector<256x4xf32>
    %136 = vector.shape_cast %133 : vector<16x16x4xbf16> to vector<256x4xbf16>
    %c2_178 = arith.constant 2 : index
    %c0_179 = arith.constant 0 : index
    %c0_180 = arith.constant 0 : index
    %137 = vector.load %arg4[%c2_178, %c0_179, %c0_180] : memref<9x4x4xbf16, #tpu.memory_space<vmem>>, vector<1x4x4xbf16>
    %138 = vector.shape_cast %137 : vector<1x4x4xbf16> to vector<4x4xbf16>
    %cst_181 = arith.constant dense<0.000000e+00> : vector<256x4xf32>
    %139 = tpu.matmul %136, %138, %cst_181 {dimension_numbers = #tpu.dot_dimension_numbers<[1], [0], [0], [1], [0, 0, 1, 1], [], []>} : vector<256x4xbf16>, vector<4x4xbf16>, vector<256x4xf32> -> vector<256x4xf32>
    %140 = arith.addf %135, %139 : vector<256x4xf32>
    %c0_182 = arith.constant 0 : index
    %c0_183 = arith.constant 0 : index
    %c0_184 = arith.constant 0 : index
    %141 = vector.load %arg6[%c0_182, %c0_183, %c0_184] : memref<1x256x4xf32, #tpu.memory_space<vmem>>, vector<1x256x4xf32>
    %142 = vector.shape_cast %141 : vector<1x256x4xf32> to vector<256x4xf32>
    %143 = vector.shape_cast %140 : vector<256x4xf32> to vector<1x256x4xf32>
    tpu.vector_store %arg6[%c0_182, %c0_183, %c0_184], %143 {strides = array<i32>} : memref<1x256x4xf32, #tpu.memory_space<vmem>>, vector<1x256x4xf32>,
    %c1_185 = arith.constant 1 : index
    %c0_186 = arith.constant 0 : index
    %c0_187 = arith.constant 0 : index
    %144 = vector.load %arg8[%c1_185, %c0_186, %c0_187] : memref<18x18x4xbf16, #tpu.memory_space<vmem>>, vector<16x16x4xbf16>
    %c0_188 = arith.constant 0 : index
    %c0_189 = arith.constant 0 : index
    %c0_190 = arith.constant 0 : index
    %145 = vector.load %arg6[%c0_188, %c0_189, %c0_190] : memref<1x256x4xf32, #tpu.memory_space<vmem>>, vector<1x256x4xf32>
    %146 = vector.shape_cast %145 : vector<1x256x4xf32> to vector<256x4xf32>
    %147 = vector.shape_cast %144 : vector<16x16x4xbf16> to vector<256x4xbf16>
    %c3_191 = arith.constant 3 : index
    %c0_192 = arith.constant 0 : index
    %c0_193 = arith.constant 0 : index
    %148 = vector.load %arg4[%c3_191, %c0_192, %c0_193] : memref<9x4x4xbf16, #tpu.memory_space<vmem>>, vector<1x4x4xbf16>
    %149 = vector.shape_cast %148 : vector<1x4x4xbf16> to vector<4x4xbf16>
    %cst_194 = arith.constant dense<0.000000e+00> : vector<256x4xf32>
    %150 = tpu.matmul %147, %149, %cst_194 {dimension_numbers = #tpu.dot_dimension_numbers<[1], [0], [0], [1], [0, 0, 1, 1], [], []>} : vector<256x4xbf16>, vector<4x4xbf16>, vector<256x4xf32> -> vector<256x4xf32>
    %151 = arith.addf %146, %150 : vector<256x4xf32>
    %c0_195 = arith.constant 0 : index
    %c0_196 = arith.constant 0 : index
    %c0_197 = arith.constant 0 : index
    %152 = vector.load %arg6[%c0_195, %c0_196, %c0_197] : memref<1x256x4xf32, #tpu.memory_space<vmem>>, vector<1x256x4xf32>
    %153 = vector.shape_cast %152 : vector<1x256x4xf32> to vector<256x4xf32>
    %154 = vector.shape_cast %151 : vector<256x4xf32> to vector<1x256x4xf32>
    tpu.vector_store %arg6[%c0_195, %c0_196, %c0_197], %154 {strides = array<i32>} : memref<1x256x4xf32, #tpu.memory_space<vmem>>, vector<1x256x4xf32>,
    %c1_198 = arith.constant 1 : index
    %c1_199 = arith.constant 1 : index
    %c0_200 = arith.constant 0 : index
    %155 = vector.load %arg8[%c1_198, %c1_199, %c0_200] : memref<18x18x4xbf16, #tpu.memory_space<vmem>>, vector<16x16x4xbf16>
    %c0_201 = arith.constant 0 : index
    %c0_202 = arith.constant 0 : index
    %c0_203 = arith.constant 0 : index
    %156 = vector.load %arg6[%c0_201, %c0_202, %c0_203] : memref<1x256x4xf32, #tpu.memory_space<vmem>>, vector<1x256x4xf32>
    %157 = vector.shape_cast %156 : vector<1x256x4xf32> to vector<256x4xf32>
    %158 = vector.shape_cast %155 : vector<16x16x4xbf16> to vector<256x4xbf16>
    %c4_204 = arith.constant 4 : index
    %c0_205 = arith.constant 0 : index
    %c0_206 = arith.constant 0 : index
    %159 = vector.load %arg4[%c4_204, %c0_205, %c0_206] : memref<9x4x4xbf16, #tpu.memory_space<vmem>>, vector<1x4x4xbf16>
    %160 = vector.shape_cast %159 : vector<1x4x4xbf16> to vector<4x4xbf16>
    %cst_207 = arith.constant dense<0.000000e+00> : vector<256x4xf32>
    %161 = tpu.matmul %158, %160, %cst_207 {dimension_numbers = #tpu.dot_dimension_numbers<[1], [0], [0], [1], [0, 0, 1, 1], [], []>} : vector<256x4xbf16>, vector<4x4xbf16>, vector<256x4xf32> -> vector<256x4xf32>
    %162 = arith.addf %157, %161 : vector<256x4xf32>
    %c0_208 = arith.constant 0 : index
    %c0_209 = arith.constant 0 : index
    %c0_210 = arith.constant 0 : index
    %163 = vector.load %arg6[%c0_208, %c0_209, %c0_210] : memref<1x256x4xf32, #tpu.memory_space<vmem>>, vector<1x256x4xf32>
    %164 = vector.shape_cast %163 : vector<1x256x4xf32> to vector<256x4xf32>
    %165 = vector.shape_cast %162 : vector<256x4xf32> to vector<1x256x4xf32>
    tpu.vector_store %arg6[%c0_208, %c0_209, %c0_210], %165 {strides = array<i32>} : memref<1x256x4xf32, #tpu.memory_space<vmem>>, vector<1x256x4xf32>,
    %c1_211 = arith.constant 1 : index
    %c2_212 = arith.constant 2 : index
    %c0_213 = arith.constant 0 : index
    %166 = vector.load %arg8[%c1_211, %c2_212, %c0_213] : memref<18x18x4xbf16, #tpu.memory_space<vmem>>, vector<16x16x4xbf16>
    %c0_214 = arith.constant 0 : index
    %c0_215 = arith.constant 0 : index
    %c0_216 = arith.constant 0 : index
    %167 = vector.load %arg6[%c0_214, %c0_215, %c0_216] : memref<1x256x4xf32, #tpu.memory_space<vmem>>, vector<1x256x4xf32>
    %168 = vector.shape_cast %167 : vector<1x256x4xf32> to vector<256x4xf32>
    %169 = vector.shape_cast %166 : vector<16x16x4xbf16> to vector<256x4xbf16>
    %c5_217 = arith.constant 5 : index
    %c0_218 = arith.constant 0 : index
    %c0_219 = arith.constant 0 : index
    %170 = vector.load %arg4[%c5_217, %c0_218, %c0_219] : memref<9x4x4xbf16, #tpu.memory_space<vmem>>, vector<1x4x4xbf16>
    %171 = vector.shape_cast %170 : vector<1x4x4xbf16> to vector<4x4xbf16>
    %cst_220 = arith.constant dense<0.000000e+00> : vector<256x4xf32>
    %172 = tpu.matmul %169, %171, %cst_220 {dimension_numbers = #tpu.dot_dimension_numbers<[1], [0], [0], [1], [0, 0, 1, 1], [], []>} : vector<256x4xbf16>, vector<4x4xbf16>, vector<256x4xf32> -> vector<256x4xf32>
    %173 = arith.addf %168, %172 : vector<256x4xf32>
    %c0_221 = arith.constant 0 : index
    %c0_222 = arith.constant 0 : index
    %c0_223 = arith.constant 0 : index
    %174 = vector.load %arg6[%c0_221, %c0_222, %c0_223] : memref<1x256x4xf32, #tpu.memory_space<vmem>>, vector<1x256x4xf32>
    %175 = vector.shape_cast %174 : vector<1x256x4xf32> to vector<256x4xf32>
    %176 = vector.shape_cast %173 : vector<256x4xf32> to vector<1x256x4xf32>
    tpu.vector_store %arg6[%c0_221, %c0_222, %c0_223], %176 {strides = array<i32>} : memref<1x256x4xf32, #tpu.memory_space<vmem>>, vector<1x256x4xf32>,
    %c2_224 = arith.constant 2 : index
    %c0_225 = arith.constant 0 : index
    %c0_226 = arith.constant 0 : index
    %177 = vector.load %arg8[%c2_224, %c0_225, %c0_226] : memref<18x18x4xbf16, #tpu.memory_space<vmem>>, vector<16x16x4xbf16>
    %c0_227 = arith.constant 0 : index
    %c0_228 = arith.constant 0 : index
    %c0_229 = arith.constant 0 : index
    %178 = vector.load %arg6[%c0_227, %c0_228, %c0_229] : memref<1x256x4xf32, #tpu.memory_space<vmem>>, vector<1x256x4xf32>
    %179 = vector.shape_cast %178 : vector<1x256x4xf32> to vector<256x4xf32>
    %180 = vector.shape_cast %177 : vector<16x16x4xbf16> to vector<256x4xbf16>
    %c6_230 = arith.constant 6 : index
    %c0_231 = arith.constant 0 : index
    %c0_232 = arith.constant 0 : index
    %181 = vector.load %arg4[%c6_230, %c0_231, %c0_232] : memref<9x4x4xbf16, #tpu.memory_space<vmem>>, vector<1x4x4xbf16>
    %182 = vector.shape_cast %181 : vector<1x4x4xbf16> to vector<4x4xbf16>
    %cst_233 = arith.constant dense<0.000000e+00> : vector<256x4xf32>
    %183 = tpu.matmul %180, %182, %cst_233 {dimension_numbers = #tpu.dot_dimension_numbers<[1], [0], [0], [1], [0, 0, 1, 1], [], []>} : vector<256x4xbf16>, vector<4x4xbf16>, vector<256x4xf32> -> vector<256x4xf32>
    %184 = arith.addf %179, %183 : vector<256x4xf32>
    %c0_234 = arith.constant 0 : index
    %c0_235 = arith.constant 0 : index
    %c0_236 = arith.constant 0 : index
    %185 = vector.load %arg6[%c0_234, %c0_235, %c0_236] : memref<1x256x4xf32, #tpu.memory_space<vmem>>, vector<1x256x4xf32>
    %186 = vector.shape_cast %185 : vector<1x256x4xf32> to vector<256x4xf32>
    %187 = vector.shape_cast %184 : vector<256x4xf32> to vector<1x256x4xf32>
    tpu.vector_store %arg6[%c0_234, %c0_235, %c0_236], %187 {strides = array<i32>} : memref<1x256x4xf32, #tpu.memory_space<vmem>>, vector<1x256x4xf32>,
    %c2_237 = arith.constant 2 : index
    %c1_238 = arith.constant 1 : index
    %c0_239 = arith.constant 0 : index
    %188 = vector.load %arg8[%c2_237, %c1_238, %c0_239] : memref<18x18x4xbf16, #tpu.memory_space<vmem>>, vector<16x16x4xbf16>
    %c0_240 = arith.constant 0 : index
    %c0_241 = arith.constant 0 : index
    %c0_242 = arith.constant 0 : index
    %189 = vector.load %arg6[%c0_240, %c0_241, %c0_242] : memref<1x256x4xf32, #tpu.memory_space<vmem>>, vector<1x256x4xf32>
    %190 = vector.shape_cast %189 : vector<1x256x4xf32> to vector<256x4xf32>
    %191 = vector.shape_cast %188 : vector<16x16x4xbf16> to vector<256x4xbf16>
    %c7_243 = arith.constant 7 : index
    %c0_244 = arith.constant 0 : index
    %c0_245 = arith.constant 0 : index
    %192 = vector.load %arg4[%c7_243, %c0_244, %c0_245] : memref<9x4x4xbf16, #tpu.memory_space<vmem>>, vector<1x4x4xbf16>
    %193 = vector.shape_cast %192 : vector<1x4x4xbf16> to vector<4x4xbf16>
    %cst_246 = arith.constant dense<0.000000e+00> : vector<256x4xf32>
    %194 = tpu.matmul %191, %193, %cst_246 {dimension_numbers = #tpu.dot_dimension_numbers<[1], [0], [0], [1], [0, 0, 1, 1], [], []>} : vector<256x4xbf16>, vector<4x4xbf16>, vector<256x4xf32> -> vector<256x4xf32>
    %195 = arith.addf %190, %194 : vector<256x4xf32>
    %c0_247 = arith.constant 0 : index
    %c0_248 = arith.constant 0 : index
    %c0_249 = arith.constant 0 : index
    %196 = vector.load %arg6[%c0_247, %c0_248, %c0_249] : memref<1x256x4xf32, #tpu.memory_space<vmem>>, vector<1x256x4xf32>
    %197 = vector.shape_cast %196 : vector<1x256x4xf32> to vector<256x4xf32>
    %198 = vector.shape_cast %195 : vector<256x4xf32> to vector<1x256x4xf32>
    tpu.vector_store %arg6[%c0_247, %c0_248, %c0_249], %198 {strides = array<i32>} : memref<1x256x4xf32, #tpu.memory_space<vmem>>, vector<1x256x4xf32>,
    %c2_250 = arith.constant 2 : index
    %c2_251 = arith.constant 2 : index
    %c0_252 = arith.constant 0 : index
    %199 = vector.load %arg8[%c2_250, %c2_251, %c0_252] : memref<18x18x4xbf16, #tpu.memory_space<vmem>>, vector<16x16x4xbf16>
    %c0_253 = arith.constant 0 : index
    %c0_254 = arith.constant 0 : index
    %c0_255 = arith.constant 0 : index
    %200 = vector.load %arg6[%c0_253, %c0_254, %c0_255] : memref<1x256x4xf32, #tpu.memory_space<vmem>>, vector<1x256x4xf32>
    %201 = vector.shape_cast %200 : vector<1x256x4xf32> to vector<256x4xf32>
    %202 = vector.shape_cast %199 : vector<16x16x4xbf16> to vector<256x4xbf16>
    %c8_256 = arith.constant 8 : index
    %c0_257 = arith.constant 0 : index
    %c0_258 = arith.constant 0 : index
    %203 = vector.load %arg4[%c8_256, %c0_257, %c0_258] : memref<9x4x4xbf16, #tpu.memory_space<vmem>>, vector<1x4x4xbf16>
    %204 = vector.shape_cast %203 : vector<1x4x4xbf16> to vector<4x4xbf16>
    %cst_259 = arith.constant dense<0.000000e+00> : vector<256x4xf32>
    %205 = tpu.matmul %202, %204, %cst_259 {dimension_numbers = #tpu.dot_dimension_numbers<[1], [0], [0], [1], [0, 0, 1, 1], [], []>} : vector<256x4xbf16>, vector<4x4xbf16>, vector<256x4xf32> -> vector<256x4xf32>
    %206 = arith.addf %201, %205 : vector<256x4xf32>
    %c0_260 = arith.constant 0 : index
    %c0_261 = arith.constant 0 : index
    %c0_262 = arith.constant 0 : index
    %207 = vector.load %arg6[%c0_260, %c0_261, %c0_262] : memref<1x256x4xf32, #tpu.memory_space<vmem>>, vector<1x256x4xf32>
    %208 = vector.shape_cast %207 : vector<1x256x4xf32> to vector<256x4xf32>
    %209 = vector.shape_cast %206 : vector<256x4xf32> to vector<1x256x4xf32>
    tpu.vector_store %arg6[%c0_260, %c0_261, %c0_262], %209 {strides = array<i32>} : memref<1x256x4xf32, #tpu.memory_space<vmem>>, vector<1x256x4xf32>,
    return
  }
  func.func @transform_0(%arg0: i32) -> (i32, i32, i32, i32) {
    %c0_i32 = arith.constant 0 : i32
    %c0_i32_0 = arith.constant 0 : i32
    %c0_i32_1 = arith.constant 0 : i32
    %c0_i32_2 = arith.constant 0 : i32
    return %arg0, %c0_i32, %c0_i32_0, %c0_i32_1 : i32, i32, i32, i32
  }
  func.func @transform_1(%arg0: i32) -> (i32, i32, i32) {
    %c0_i32 = arith.constant 0 : i32
    %c0_i32_0 = arith.constant 0 : i32
    %c0_i32_1 = arith.constant 0 : i32
    %c0_i32_2 = arith.constant 0 : i32
    return %c0_i32, %c0_i32_0, %c0_i32_1 : i32, i32, i32
  }
  func.func @transform_2(%arg0: i32) -> (i32, i32) {
    %c0_i32 = arith.constant 0 : i32
    %c0_i32_0 = arith.constant 0 : i32
    %c0_i32_1 = arith.constant 0 : i32
    return %c0_i32, %c0_i32_0 : i32, i32
  }
  func.func @transform_3(%arg0: i32) -> (i32, i32, i32) {
    %c0_i32 = arith.constant 0 : i32
    %c0_i32_0 = arith.constant 0 : i32
    %c0_i32_1 = arith.constant 0 : i32
    %c0_i32_2 = arith.constant 0 : i32
    return %c0_i32, %c0_i32_0, %c0_i32_1 : i32, i32, i32
  }
  func.func @transform_4(%arg0: i32) -> (i32, i32) {
    %c0_i32 = arith.constant 0 : i32
    %c0_i32_0 = arith.constant 0 : i32
    %c0_i32_1 = arith.constant 0 : i32
    return %c0_i32, %c0_i32_0 : i32, i32
  }
  func.func @transform_5(%arg0: i32) -> (i32, i32, i32) {
    %c0_i32 = arith.constant 0 : i32
    %c0_i32_0 = arith.constant 0 : i32
    %c0_i32_1 = arith.constant 0 : i32
    return %arg0, %c0_i32, %c0_i32_0 : i32, i32, i32
  }
}

</mosaic_0001>

<bundles_post_ra>
// kernel: tpu_custom_call.1
= control target key start
LH: loop header
LB: loop body
LE: loop exit
PB: predicated region body
PF: predicated region fallthrough
CT: control target
= control target key end

     0   :  { %s11987_s18 = smov 0   ;;  %s16309_s0 = inlined_call_operand.vmem [shape: f32[2,16,16,4], index: 0, kind: input, shape index: {}]   ;;  %s16310_s1 = inlined_call_operand.vmem [shape: bf16[9,4,4], index: 1, kind: input, shape index: {}]   ;;  %s16311_s2 = inlined_call_operand.vmem [shape: f32[1,4], index: 2, kind: input, shape index: {}]   ;;  %s16312_s3 = inlined_call_operand.vmem [shape: bf16[9,4,4], index: 3, kind: input, shape index: {}]   ;;  %s16313_s4 = inlined_call_operand.vmem [shape: f32[1,4], index: 4, kind: input, shape index: {}]   ;;  %s16314_s5 = inlined_call_operand.vmem [shape: f32[2,256,4], index: 5, kind: output, shape index: {}]  }
   0x1 LB: > { %s11040_s19 = sadd.s32 4294967295, %s11954_s18   ;;  %p11044_p0 = scmp.ge.s32.totalorder %s11954_s18, 1  ;;  %s11954_s18 = sphi %s11987_s18, %s15_s18  }
   0x2   : > { %p187_p1 = scmp.lt.s32.totalorder %s11954_s18, 3 }
   0x4   : > { %p188_p2 = pnand %p11044_p0, %p187_p1 }
   0x5   : > { %p215_p3 = scmp.lt.s32.totalorder (!%p188_p2), %s11040_s19, 1 }
   0x6   : > { %191 = sbr.rel (%p188_p2) target bundleno = 1528 (0x5f8), region = 40 }
   0xb   : > { %v938_v0 = vld [vmem:[%s16310_s1] sm:$0x3]  ;;  %vm1067_vm0 = vcmask 1041408   ;;  %vm226_vm1 = vcmask 27648   ;;  %v11956_v2 = vmov 0   ;;  %vm229_vm2 = vcmask 24576  }
   0xc   : > { %v1069_v1 = vsel %vm1067_vm0, %v938_v0, 0  ;;  %227 = vst.msk [vmem:[#allocation2] sm:$0xf] %vm226_vm1, %v11956_v2  ;;  %vm237_vm3 = vsmask.f32 256  ;;  %s16332_s19 = smov (!%p215_p3, %s11040_s19), 1 }
   0xd   : > { %1078 = vmatpush.bf16.msra.mxu0 %v1069_v1  ;;  %228 = vst.msk [vmem:[#allocation2 + $0x4] sm:$0xf] %vm226_vm1, %v11956_v2  ;;  %11933 = vmatpush.bf16.msra.mxu2 %v1069_v1  ;;  %v260_v3 = vld [vmem:[#allocation2 + $0x60] sm:$0x1]  ;;  %vm12006_vm4 = vmand %vm229_vm2, %vm237_vm3  ;;  %vm841_vm5 = vcmask 31744   ;;  %s11835_s22 = sshll.u32 %s16332_s19, 8 }
   0xe   : > { %232 = vst.msk [vmem:[#allocation2 + $0xcc] sm:$0xf] %vm226_vm1, %v11956_v2  ;;  %vm287_vm6 = vsmask.f32 7938  ;;  %v261_v5 = vsel %vm12006_vm4, 0, %v260_v3  ;;  %s12021_s25 = scalar_lea.vmem %s16309_s0, %s11835_s22  ;;  %vm2073_vm14 = vcmask 1042432   ;;  %s13809_s12 = scalar_lea.vmem %s16314_s5, %s11835_s22 }
   0xf   : > { %233 = vst.msk [vmem:[#allocation2 + $0xd0] sm:$0xf] %vm226_vm1, %v11956_v2  ;;  %vm401_vm7 = vsmask.f32 4368  ;;  %v239_v6 = vld [vmem:[#allocation2 + $0xc] sm:$0x1]  ;;  %vm12039_vm8 = vmand %vm229_vm2, %vm287_vm6 }
  0x10   : > { %5567 = vst.msk [vmem:[#allocation3] sm:$0xf] %vm226_vm1, %v11956_v2  ;;  %v11162_v7 = vld [vmem:[%s16310_s1 + $0x4] sm:$0x3]  ;;  %v351_v8 = vld [vmem:[%s12021_s25 + $0x70] sm:$0xff]  ;;  %v352_v9 = vld [vmem:[%s12021_s25 + $0x78] sm:$0xff] }
  0x11   : > { %5568 = vst.msk [vmem:[#allocation3 + $0x4] sm:$0xf] %vm226_vm1, %v11956_v2  ;;  %v337_v10 = vld [vmem:[%s12021_s25] sm:$0xff]  ;;  %v2287_v11 = vsel %vm1067_vm0, %v11162_v7, 0  ;;  %v383_v12 = vpack.c.bf16 %v351_v8, %v351_v8  ;;  %v384_v13 = vpack.c.bf16 %v352_v9, %v352_v9  ;;  %v338_v14 = vld [vmem:[%s12021_s25 + $0x8] sm:$0xff]  ;;  %v240_v27 = vsel %vm12006_vm4, 0, %v239_v6  ;;  %vm12055_vm9 = vmor %vm237_vm3, %vm401_vm7 }
  0x12   : > { %5571 = vst.msk [vmem:[#allocation3 + $0xcc] sm:$0xf] %vm226_vm1, %v11956_v2  ;;  %v369_v15 = vpack.c.bf16 %v337_v10, %v337_v10  ;;  %2296 = vmatpush.bf16.msrb.mxu2 %v2287_v11  ;;  %v11129_v16 = vld [vmem:[%s16310_s1 + $0x2] sm:$0x3]  ;;  %v370_v20 = vpack.c.bf16 %v338_v14, %v338_v14  ;;  %v310_v22 = vld [vmem:[#allocation2 + $0x68] sm:$0x1]  ;;  %vm12064_vm10 = vmand %vm226_vm1, %vm287_vm6 }
  0x13   : > { %5572 = vst.msk [vmem:[#allocation3 + $0xd0] sm:$0xf] %vm226_vm1, %v11956_v2  ;;  %v353_v17 = vld [vmem:[%s12021_s25 + $0x80] sm:$0xff]  ;;  %v1790_v21 = vsel %vm1067_vm0, %v11129_v16, 0  ;;  %v523_v23 = vshrl.u32 %v383_v12, 16  ;;  %v526_v24 = vshll.u32 %v383_v12, 16 }
  0x14   : > { %v11837_v18 = vld [vmem:[#allocation2] sm:$0xff]  ;;  %262 = vst [vmem:[#allocation2 + $0x60] sm:$0x1] %v261_v5  ;;  %v531_v25 = vshrl.u32 %v384_v13, 16  ;;  %v534_v26 = vshll.u32 %v384_v13, 16  ;;  %11934 = vmatpush.bf16.msra.mxu3 %v1790_v21  ;;  %1799 = vmatpush.bf16.msra.mxu1 %v1790_v21  ;;  %v404_v28 = vshrl.u32 %v369_v15, 16  ;;  %v385_v39 = vpack.c.bf16 %v353_v17, %v353_v17 }
  0x15   : > { %230 = vst.msk [vmem:[#allocation2 + $0x8] sm:$0x1] %vm229_vm2, %v11956_v2  ;;  %11113 = vmatmul.msk.bf16.vlgmr.msra.gmra.mxu0 %vm841_vm5, %v11837_v18  ;;  %v412_v29 = vshrl.u32 %v370_v20, 16  ;;  %v415_v30 = vshll.u32 %v370_v20, 16  ;;  %v525_v31 = vrot.slane %v523_v23, 7  ;;  %v311_v33 = vsel %vm12039_vm8, 0, %v310_v22 }
  0x16   : > { %234 = vst.msk [vmem:[#allocation2 + $0xd4] sm:$0x1] %vm229_vm2, %v11956_v2  ;;  %v533_v32 = vrot.slane %v531_v25, 7  ;;  %v354_v34 = vld [vmem:[%s12021_s25 + $0x88] sm:$0xff]  ;;  %v406_v36 = vrot.slane %v404_v28, 7  ;;  %v407_v37 = vshll.u32 %v369_v15, 16 }
  0x17   : > { %5569 = vst.msk [vmem:[#allocation3 + $0x8] sm:$0x1] %vm229_vm2, %v11956_v2  ;;  %v12060_v38 = vrot.slane %v412_v29, 7  ;;  %v528_v40 = vor.u32 %v526_v24, %v525_v31  ;;  %v529_v41 = vrot.slane %v525_v31, 4  ;;  %v11179_v44 = vld [vmem:[%s16310_s1 + $0x6] sm:$0x3]  ;;  %v386_v45 = vpack.c.bf16 %v354_v34, %v354_v34 }
  0x18   : > { %5573 = vst.msk [vmem:[#allocation3 + $0xd4] sm:$0x1] %vm229_vm2, %v11956_v2  ;;  %v536_v42 = vor.u32 %v534_v26, %v533_v32  ;;  %v410_v46 = vrot.slane %v406_v36, 4  ;;  %v263_v48 = vld [vmem:[#allocation2 + $0x6c] sm:$0x1]  ;;  %v538_v50 = vrot.slane %v533_v32, 4  ;;  %v409_v58 = vor.u32 %v407_v37, %v406_v36 }
  0x19   : > { %241 = vst [vmem:[#allocation2 + $0xc] sm:$0x1] %v240_v27  ;;  %v417_v47 = vor.u32 %v415_v30, %v12060_v38  ;;  %v2637_v52 = vsel %vm1067_vm0, %v11179_v44, 0  ;;  %v264_v55 = vsel %vm12006_vm4, 0, %v263_v48  ;;  %v540_v56 = vshrl.u32 %v385_v39, 16  ;;  %v339_v62 = vld [vmem:[%s12021_s25 + $0x10] sm:$0xff] }
  0x1a   : > { %312 = vst [vmem:[#allocation2 + $0x68] sm:$0x1] %v311_v33  ;;  %v537_v49 = vsel %vm12055_vm9, %v529_v41, %v536_v42  ;;  %2646 = vmatpush.bf16.msrb.mxu3 %v2637_v52  ;;  %v242_v57 = vld [vmem:[#allocation2 + $0x18] sm:$0x1]  ;;  %v548_v59 = vshrl.u32 %v386_v45, 16  ;;  %v551_v60 = vshll.u32 %v386_v45, 16  ;;  %v371_v1 = vpack.c.bf16 %v339_v62, %v339_v62 }
  0x1b   : > { %v774_v51 = vld [vmem:[#allocation2 + $0x60] sm:$0xf]  ;;  %777 = vst.msk [vmem:[#allocation2 + $0x64] sm:$0xf] %vm226_vm1, %v537_v49  ;;  %v418_v54 = vsel %vm12055_vm9, %v410_v46, %v417_v47  ;;  %v243_v61 = vsel %vm12006_vm4, 0, %v242_v57  ;;  %v542_v63 = vrot.slane %v540_v56, 7 }
  0x1c   : > { %v775_v53 = vsel %vm12064_vm10, %v528_v40, %v774_v51  ;;  %728 = vst.msk [vmem:[#allocation2 + $0x10] sm:$0xf] %vm226_vm1, %v418_v54  ;;  %v340_v0 = vld [vmem:[%s12021_s25 + $0x18] sm:$0xff]  ;;  %v313_v2 = vld [vmem:[#allocation2 + $0x74] sm:$0x1]  ;;  %v543_v3 = vshll.u32 %v385_v39, 16 }
  0x1d   : > { %776 = vst [vmem:[#allocation2 + $0x60] sm:$0xf] %v775_v53  ;;  %vm1304_vm11 = vsmask.f32 3328  ;;  %vm1305_vm12 = vsmask.f32 7440  ;;  %v372_v6 = vpack.c.bf16 %v340_v0, %v340_v0 }
  0x1e   : > { %265 = vst [vmem:[#allocation2 + $0x6c] sm:$0x1] %v264_v55  ;;  %v550_v5 = vrot.slane %v548_v59, 7  ;;  %v314_v7 = vsel %vm12039_vm8, 0, %v313_v2  ;;  %v546_v9 = vrot.slane %v542_v63, 4  ;;  %v421_v10 = vshrl.u32 %v371_v1, 16  ;;  %vm12116_vm13 = vmor %vm1304_vm11, %vm1305_vm12 }
  0x1f   : > { %244 = vst [vmem:[#allocation2 + $0x18] sm:$0x1] %v243_v61  ;;  %v424_v14 = vshll.u32 %v371_v1, 16  ;;  %v429_v17 = vshrl.u32 %v372_v6, 16  ;;  %v1224_v18 = vld [vmem:[#allocation2] sm:$0xf]  ;;  %v545_v21 = vor.u32 %v543_v3, %v542_v63 }
  0x20   : > { %v725_v8 = vld [vmem:[#allocation2 + $0xc] sm:$0xf]  ;;  %v553_v13 = vor.u32 %v551_v60, %v550_v5  ;;  %315 = vst [vmem:[#allocation2 + $0x74] sm:$0x1] %v314_v7  ;;  %v423_v16 = vrot.slane %v421_v10, 7  ;;  %v555_v23 = vrot.slane %v550_v5, 4 }
  0x21   : > { %v726_v11 = vsel %vm12064_vm10, %v409_v58, %v725_v8  ;;  %v778_v12 = vld [vmem:[#allocation2 + $0x68] sm:$0x1]  ;;  %v432_v24 = vshll.u32 %v372_v6, 16  ;;  %v12096_v33 = vrot.slane %v429_v17, 7  ;;  %v1308_v34 = vshrl.u32 %v1224_v18, 16  ;;  %v355_v36 = vld [vmem:[%s12021_s25 + $0x90] sm:$0xff] }
  0x22   : > { %727 = vst [vmem:[#allocation2 + $0xc] sm:$0xf] %v726_v11  ;;  %v779_v15 = vsel %vm12006_vm4, %v538_v50, %v778_v12  ;;  %v1249_v20 = vld [vmem:[#allocation2 + $0x64] sm:$0xf]  ;;  %v554_v22 = vsel %vm12055_vm9, %v546_v9, %v553_v13  ;;  %v426_v29 = vor.u32 %v424_v14, %v423_v16  ;;  %v427_v30 = vrot.slane %v423_v16, 4 }
  0x23   : > { %780 = vst [vmem:[#allocation2 + $0x68] sm:$0x1] %v779_v15  ;;  %v1509_v27 = vshll.u32 %v1249_v20, 16  ;;  %v1513_v28 = vshrl.u32 %v1249_v20, 16  ;;  %v11260_v41 = vld [vmem:[%s16310_s1 + $0x8] sm:$0x3]  ;;  %v434_v47 = vor.u32 %v432_v24, %v12096_v33  ;;  %v387_v1 = vpack.c.bf16 %v355_v36, %v355_v36 }
  0x24   : > { %v11845_v25 = vld [vmem:[#allocation2 + $0x60] sm:$0xff]  ;;  %784 = vst.msk [vmem:[#allocation2 + $0x70] sm:$0xf] %vm226_vm1, %v554_v22  ;;  %v1226_v49 = vld [vmem:[#allocation2 + $0x8] sm:$0x1]  ;;  %v419_v50 = vrot.slane %v12060_v38, 4 }
  0x25   : > { %v1248_v26 = vld [vmem:[#allocation2 + $0x60] sm:$0xf]  ;;  %11121 = vmatmul.msk.bf16.vlgmr.msra.gmra.mxu2 %vm841_vm5, %v11845_v25  ;;  %v1511_v37 = vrot.slane %v1509_v27, 5  ;;  %v1515_v39 = vrot.slane %v1513_v28, 4  ;;  %v781_v40 = vld [vmem:[#allocation2 + $0x6c] sm:$0xf]  ;;  %v435_v57 = vsel %vm12055_vm9, %v427_v30, %v434_v47 }
  0x26   : > { %v1500_v31 = vshrl.u32 %v1248_v26, 16  ;;  %v1503_v32 = vshll.u32 %v1248_v26, 16  ;;  %v1225_v42 = vld [vmem:[#allocation2 + $0x4] sm:$0xf]  ;;  %v782_v46 = vsel %vm12064_vm10, %v545_v21, %v781_v40  ;;  %v732_v48 = vld [vmem:[#allocation2 + $0x18] sm:$0xf] }
  0x27   : > { %v1516_v51 = vor.u32 %v1515_v39, %v1511_v37  ;;  %783 = vst [vmem:[#allocation2 + $0x6c] sm:$0xf] %v782_v46  ;;  %v733_v52 = vsel %vm12064_vm10, %v426_v29, %v732_v48  ;;  %v785_v53 = vld [vmem:[#allocation2 + $0x74] sm:$0x1]  ;;  %v3355_v54 = vsel %vm1067_vm0, %v11260_v41, 0  ;;  %v1310_v59 = vrot.slane %v1308_v34, 4 }
  0x28   : > { %v1502_v44 = vrot.slane %v1500_v31, 4  ;;  %v1505_v45 = vrot.slane %v1503_v32, 5  ;;  %734 = vst [vmem:[#allocation2 + $0x18] sm:$0xf] %v733_v52  ;;  %v786_v58 = vsel %vm12006_vm4, %v555_v23, %v785_v53  ;;  %3364 = vmatpush.bf16.msrb.mxu0 %v3355_v54  ;;  %v266_v60 = vld [vmem:[#allocation2 + $0x78] sm:$0x1] }
  0x29   : > { %v11838_v55 = vld [vmem:[#allocation2 + $0xc] sm:$0xff]  ;;  %v1517_v63 = vrot.slane %v1516_v51, 4  ;;  %735 = vst.msk [vmem:[#allocation2 + $0x1c] sm:$0xf] %vm226_vm1, %v435_v57  ;;  %v1311_v0 = vshll.u32 %v1224_v18, 16  ;;  %v1317_v5 = vshll.u32 %v1225_v42, 16 }
  0x2a   : > { %v1506_v56 = vor.u32 %v1505_v45, %v1502_v44  ;;  %v1250_v61 = vld [vmem:[#allocation2 + $0x68] sm:$0x1]  ;;  %11114 = vmatmul.msk.bf16.gmra.mxu0 %vm841_vm5, %v11838_v55  ;;  %787 = vst [vmem:[#allocation2 + $0x74] sm:$0x1] %v786_v58  ;;  %v1321_v6 = vshrl.u32 %v1225_v42, 16  ;;  %v436_v7 = vrot.slane %v12096_v33, 4 }
  0x2b   : > { %v1519_v3 = vshll.u32 %v1250_v61, 16  ;;  %v1252_v8 = vld [vmem:[#allocation2 + $0x70] sm:$0xf]  ;;  %v1313_v9 = vrot.slane %v1311_v0, 5  ;;  %v1327_v10 = vshll.u32 %v1226_v49, 16  ;;  %v267_v11 = vsel %vm12006_vm4, 0, %v266_v60 }
  0x2c   : > { %v1507_v2 = vrot.slane %v1506_v56, 4  ;;  %v1533_v14 = vshll.u32 %v1252_v8, 16  ;;  %v1537_v15 = vshrl.u32 %v1252_v8, 16  ;;  %268 = vst [vmem:[#allocation2 + $0x78] sm:$0x1] %v267_v11  ;;  %v1319_v18 = vrot.slane %v1317_v5, 5 }
  0x2d   : > { %v1521_v13 = vrot.slane %v1519_v3, 5  ;;  %v1314_v17 = vor.u32 %v1313_v9, %v1310_v59  ;;  %v1323_v20 = vrot.slane %v1321_v6, 4  ;;  %v356_v21 = vld [vmem:[%s12021_s25 + $0x98] sm:$0xff]  ;;  %v1329_v26 = vrot.slane %v1327_v10, 5  ;;  %v341_v55 = vld [vmem:[%s12021_s25 + $0x20] sm:$0xff]  ;;  %v342_v56 = vld [vmem:[%s12021_s25 + $0x28] sm:$0xff] }
  0x2e   : > { %v1512_v12 = vsel %vm12116_vm13, %v1507_v2, %v1511_v37  ;;  %v1251_v23 = vld [vmem:[#allocation2 + $0x6c] sm:$0xf]  ;;  %v1535_v24 = vrot.slane %v1533_v14, 5  ;;  %v1539_v25 = vrot.slane %v1537_v15, 4  ;;  %v388_v34 = vpack.c.bf16 %v356_v21, %v356_v21  ;;  %v245_v37 = vld [vmem:[#allocation2 + $0x24] sm:$0x1] }
  0x2f   : > { %v1709_v16 = vunpack.c.l.b16 %v1512_v12  ;;  %v1522_v22 = vsel %vm12116_vm13, %v1517_v63, %v1521_v13  ;;  %v1524_v28 = vshrl.u32 %v1251_v23, 16  ;;  %v1527_v29 = vshll.u32 %v1251_v23, 16  ;;  %v11846_v40 = vld [vmem:[#allocation2 + $0x6c] sm:$0xff]  ;;  %v316_v10 = vld [vmem:[#allocation2 + $0x80] sm:$0x1] }
  0x30   : > { %v1710_v27 = vunpack.c.l.b16 %v1522_v22  ;;  %v1315_v30 = vrot.slane %v1314_v17, 4  ;;  %v1540_v31 = vor.u32 %v1539_v25, %v1535_v24  ;;  %v1324_v32 = vor.u32 %v1323_v20, %v1319_v18  ;;  %v289_v15 = vld [vmem:[#allocation2 + $0x14] sm:$0x1]  ;;  %v1228_v22 = vld [vmem:[#allocation2 + $0x10] sm:$0xf] }
  0x31   : > { %v557_v36 = vshrl.u32 %v387_v1, 16  ;;  %v1253_v41 = vld [vmem:[#allocation2 + $0x74] sm:$0x1]  ;;  %v1526_v42 = vrot.slane %v1524_v28, 4  ;;  %v1529_v44 = vrot.slane %v1527_v29, 5  ;;  %v560_v53 = vshll.u32 %v387_v1, 16 }
  0x32   : > { %v1733_v39 = vpack.c.b16 %v1710_v27, %v1709_v16  ;;  %v1320_v45 = vsel %vm12116_vm13, %v1315_v30, %v1319_v18  ;;  %v1541_v46 = vrot.slane %v1540_v31, 4  ;;  %v1543_v47 = vshll.u32 %v1253_v41, 16  ;;  %v11839_v1 = vld [vmem:[#allocation2 + $0x18] sm:$0xff]  ;;  %v1227_v16 = vld [vmem:[#allocation2 + $0xc] sm:$0xf]  ;;  %v357_v27 = vld [vmem:[%s12021_s25 + $0xa0] sm:$0xff] }
  0x33   : > { %v1325_v48 = vrot.slane %v1324_v32, 4  ;;  %v1693_v49 = vunpack.c.l.b16 %v1320_v45  ;;  %v1530_v51 = vor.u32 %v1529_v44, %v1526_v42  ;;  %v559_v52 = vrot.slane %v557_v36, 7  ;;  %v788_v60 = vld [vmem:[#allocation2 + $0x78] sm:$0xf]  ;;  %v269_v32 = vld [vmem:[#allocation2 + $0x84] sm:$0x1] }
  0x34   : > { %11138 = vmatmul.msk.bf16.vlgmr.msra.gmra.mxu3 %vm841_vm5, %v1733_v39  ;;  %v565_v54 = vshrl.u32 %v388_v34, 16  ;;  %v1545_v57 = vrot.slane %v1543_v47, 5  ;;  %v568_v59 = vshll.u32 %v388_v34, 16  ;;  %v246_v61 = vsel %vm12006_vm4, 0, %v245_v37  ;;  %v358_v34 = vld [vmem:[%s12021_s25 + $0xa8] sm:$0xff] }
  0x35   : > { %v1330_v58 = vsel %vm12116_vm13, %v1325_v48, %v1329_v26  ;;  %11122 = vmatmul.msk.bf16.gmra.mxu2 %vm841_vm5, %v11846_v40  ;;  %v1531_v63 = vrot.slane %v1530_v51, 4  ;;  %v562_v2 = vor.u32 %v560_v53, %v559_v52  ;;  %v563_v3 = vrot.slane %v559_v52, 4  ;;  %247 = vst [vmem:[#allocation2 + $0x24] sm:$0x1] %v246_v61 }
  0x36   : > { %v1694_v0 = vunpack.c.l.b16 %v1330_v58  ;;  %v1546_v5 = vsel %vm12116_vm13, %v1541_v46, %v1545_v57  ;;  %v12142_v6 = vrot.slane %v565_v54, 7  ;;  %v373_v8 = vpack.c.bf16 %v341_v55, %v341_v55  ;;  %v344_v57 = vld [vmem:[%s12021_s25 + $0x38] sm:$0xff] }
  0x37   : > { %v374_v9 = vpack.c.bf16 %v342_v56, %v342_v56  ;;  %v1536_v11 = vsel %vm12116_vm13, %v1531_v63, %v1535_v24  ;;  %v12146_v12 = vunpack.c.l.b16 %v1546_v5  ;;  %v789_v14 = vsel %vm12064_vm10, %v562_v2, %v788_v60  ;;  %v343_v56 = vld [vmem:[%s12021_s25 + $0x30] sm:$0xff] }
  0x38   : > { %v1725_v13 = vpack.c.b16 %v1694_v0, %v1693_v49  ;;  %v12150_v17 = vunpack.c.l.b16 %v1536_v11  ;;  %v570_v18 = vor.u32 %v568_v59, %v12142_v6  ;;  %v572_v20 = vrot.slane %v12142_v6, 4  ;;  %790 = vst [vmem:[#allocation2 + $0x78] sm:$0xf] %v789_v14 }
  0x39   : > { %v438_v21 = vshrl.u32 %v373_v8, 16  ;;  %v441_v23 = vshll.u32 %v373_v8, 16  ;;  %v446_v24 = vshrl.u32 %v374_v9, 16  ;;  %v449_v25 = vshll.u32 %v374_v9, 16  ;;  %v248_v9 = vld [vmem:[#allocation2 + $0x30] sm:$0x1] }
  0x3a   : > { %11130 = vmatmul.msk.bf16.vlgmr.msra.gmra.mxu1 %vm841_vm5, %v1725_v13  ;;  %v317_v26 = vsel %vm12039_vm8, 0, %v316_v10  ;;  %11115 = vmatmul.msk.bf16.gmra.mxu0 %vm841_vm5, %v11839_v1  ;;  %v1734_v28 = vpack.c.b16 %v12146_v12, %v12150_v17  ;;  %v571_v29 = vsel %vm12055_vm9, %v563_v3, %v570_v18  ;;  %v290_v31 = vsel %vm12039_vm8, 0, %v289_v15 }
  0x3b   : > { %v440_v30 = vrot.slane %v438_v21, 7  ;;  %318 = vst [vmem:[#allocation2 + $0x80] sm:$0x1] %v317_v26  ;;  %v12167_v36 = vrot.slane %v446_v24, 7  ;;  %v1332_v37 = vshrl.u32 %v1227_v16, 16  ;;  %v1335_v39 = vshll.u32 %v1227_v16, 16 }
  0x3c   : > { %791 = vst.msk [vmem:[#allocation2 + $0x7c] sm:$0xf] %vm226_vm1, %v571_v29  ;;  %v1341_v40 = vshll.u32 %v1228_v22, 16  ;;  %v739_v44 = vld [vmem:[#allocation2 + $0x24] sm:$0xf]  ;;  %v1345_v45 = vshrl.u32 %v1228_v22, 16  ;;  %v389_v46 = vpack.c.bf16 %v357_v27, %v357_v27  ;;  %v390_v61 = vpack.c.bf16 %v358_v34, %v358_v34 }
  0x3d   : > { %v443_v41 = vor.u32 %v441_v23, %v440_v30  ;;  %v444_v42 = vrot.slane %v440_v30, 4  ;;  %291 = vst [vmem:[#allocation2 + $0x14] sm:$0x1] %v290_v31  ;;  %v451_v47 = vor.u32 %v449_v25, %v12167_v36  ;;  %v453_v48 = vrot.slane %v12167_v36, 4  ;;  %v319_v25 = vld [vmem:[#allocation2 + $0x8c] sm:$0x1] }
  0x3e   : > { %v1334_v49 = vrot.slane %v1332_v37, 4  ;;  %v1337_v51 = vrot.slane %v1335_v39, 5  ;;  %v1343_v53 = vrot.slane %v1341_v40, 5  ;;  %v1347_v54 = vrot.slane %v1345_v45, 4  ;;  %v292_v26 = vld [vmem:[#allocation2 + $0x20] sm:$0x1] }
  0x3f   : > { %v740_v52 = vsel %vm12064_vm10, %v443_v41, %v739_v44  ;;  %v270_v55 = vsel %vm12006_vm4, 0, %v269_v32  ;;  %v452_v58 = vsel %vm12055_vm9, %v444_v42, %v451_v47  ;;  %v1254_v59 = vld [vmem:[#allocation2 + $0x78] sm:$0xf]  ;;  %v574_v63 = vshrl.u32 %v389_v46, 16 }
  0x40   : > { %741 = vst [vmem:[#allocation2 + $0x24] sm:$0xf] %v740_v52  ;;  %v1338_v60 = vor.u32 %v1337_v51, %v1334_v49  ;;  %v1548_v0 = vshrl.u32 %v1254_v59, 16  ;;  %v1551_v2 = vshll.u32 %v1254_v59, 16  ;;  %v1348_v3 = vor.u32 %v1347_v54, %v1343_v53  ;;  %v1230_v41 = vld [vmem:[#allocation2 + $0x18] sm:$0xf] }
  0x41   : > { %742 = vst.msk [vmem:[#allocation2 + $0x28] sm:$0xf] %vm226_vm1, %v452_v58  ;;  %v577_v1 = vshll.u32 %v389_v46, 16  ;;  %v12180_v8 = vrot.slane %v574_v63, 7  ;;  %v375_v10 = vpack.c.bf16 %v343_v56, %v343_v56  ;;  %v12182_v11 = vpack.c.bf16 %v344_v57, %v344_v57  ;;  %v359_v54 = vld [vmem:[%s12021_s25 + $0xb0] sm:$0xff] }
  0x42   : > { %v792_v5 = vld [vmem:[#allocation2 + $0x80] sm:$0x1]  ;;  %v1339_v6 = vrot.slane %v1338_v60, 4  ;;  %271 = vst [vmem:[#allocation2 + $0x84] sm:$0x1] %v270_v55  ;;  %v1550_v15 = vrot.slane %v1548_v0, 4 }
  0x43   : > { %v11847_v12 = vld [vmem:[#allocation2 + $0x78] sm:$0xff]  ;;  %v793_v13 = vsel %vm12006_vm4, %v572_v20, %v792_v5  ;;  %v1553_v16 = vrot.slane %v1551_v2, 5  ;;  %v12186_v17 = vrot.slane %v1348_v3, 4  ;;  %v579_v24 = vor.u32 %v577_v1, %v12180_v8  ;;  %v272_v60 = vld [vmem:[#allocation2 + $0x90] sm:$0x1] }
  0x44   : > { %v1255_v14 = vld [vmem:[#allocation2 + $0x7c] sm:$0xf]  ;;  %11139 = vmatmul.msk.bf16.gmra.mxu3 %vm841_vm5, %v1734_v28  ;;  %794 = vst [vmem:[#allocation2 + $0x80] sm:$0x1] %v793_v13  ;;  %v729_v22 = vld [vmem:[#allocation2 + $0x14] sm:$0x1]  ;;  %v1344_v23 = vsel %vm12116_vm13, %v1339_v6, %v1343_v53  ;;  %v391_v13 = vpack.c.bf16 %v359_v54, %v359_v54 }
  0x45   : > { %v1557_v18 = vshll.u32 %v1255_v14, 16  ;;  %v1561_v21 = vshrl.u32 %v1255_v14, 16  ;;  %v1554_v27 = vor.u32 %v1553_v16, %v1550_v15  ;;  %v730_v20 = vsel %vm12006_vm4, %v419_v50, %v729_v22  ;;  %11123 = vmatmul.msk.bf16.gmra.mxu2 %vm841_vm5, %v11847_v12  ;;  %v1231_v59 = vld [vmem:[#allocation2 + $0x1c] sm:$0xf] }
  0x46   : > { %v12196_v29 = vunpack.c.l.b16 %v1344_v23  ;;  %v580_v28 = vrot.slane %v12180_v8, 4  ;;  %731 = vst [vmem:[#allocation2 + $0x14] sm:$0x1] %v730_v20  ;;  %v582_v32 = vshrl.u32 %v390_v61, 16  ;;  %v585_v34 = vshll.u32 %v390_v61, 16 }
  0x47   : > { %v1559_v30 = vrot.slane %v1557_v18, 5  ;;  %v1563_v31 = vrot.slane %v1561_v21, 4  ;;  %v1555_v37 = vrot.slane %v1554_v27, 4  ;;  %v249_v39 = vsel %vm12006_vm4, 0, %v248_v9  ;;  %v360_v21 = vld [vmem:[%s12021_s25 + $0xb8] sm:$0xff] }
  0x48   : > { %v455_v38 = vshrl.u32 %v375_v10, 16  ;;  %v458_v40 = vshll.u32 %v375_v10, 16  ;;  %v11840_v50 = vld [vmem:[#allocation2 + $0x24] sm:$0xff]  ;;  %v584_v44 = vrot.slane %v582_v32, 7  ;;  %250 = vst [vmem:[#allocation2 + $0x30] sm:$0x1] %v249_v39 }
  0x49   : > { %v1564_v42 = vor.u32 %v1563_v31, %v1559_v30  ;;  %v463_v45 = vshrl.u32 %v12182_v11, 16  ;;  %v466_v46 = vshll.u32 %v12182_v11, 16  ;;  %v1560_v47 = vsel %vm12116_vm13, %v1555_v37, %v1559_v30  ;;  %v795_v49 = vld [vmem:[#allocation2 + $0x84] sm:$0xf] }
  0x4a   : > { %v457_v51 = vrot.slane %v455_v38, 7  ;;  %v320_v52 = vsel %vm12039_vm8, 0, %v319_v25  ;;  %v293_v53 = vsel %vm12039_vm8, 0, %v292_v26  ;;  %v12211_v56 = vunpack.c.l.b16 %v1560_v47  ;;  %11116 = vmatmul.msk.bf16.gmra.mxu0 %vm841_vm5, %v11840_v50 }
  0x4b   : > { %v1565_v55 = vrot.slane %v1564_v42, 4  ;;  %v587_v57 = vor.u32 %v585_v34, %v584_v44  ;;  %v589_v58 = vrot.slane %v584_v44, 4  ;;  %321 = vst [vmem:[#allocation2 + $0x8c] sm:$0x1] %v320_v52  ;;  %v1256_v61 = vld [vmem:[#allocation2 + $0x80] sm:$0x1]  ;;  %v796_v63 = vsel %vm12064_vm10, %v579_v24, %v795_v49 }
  0x4c   : > { %v460_v0 = vor.u32 %v458_v40, %v457_v51  ;;  %v461_v2 = vrot.slane %v457_v51, 4  ;;  %v12216_v3 = vrot.slane %v463_v45, 7  ;;  %294 = vst [vmem:[#allocation2 + $0x20] sm:$0x1] %v293_v53  ;;  %v1567_v1 = vshll.u32 %v1256_v61, 16 }
  0x4d   : > { %v588_v5 = vsel %vm12055_vm9, %v580_v28, %v587_v57  ;;  %797 = vst [vmem:[#allocation2 + $0x84] sm:$0xf] %v796_v63  ;;  %v1356_v6 = vshrl.u32 %v1230_v41, 16  ;;  %v1359_v8 = vshll.u32 %v1230_v41, 16  ;;  %v1229_v9 = vld [vmem:[#allocation2 + $0x14] sm:$0x1]  ;;  %v392_v37 = vpack.c.bf16 %v360_v21, %v360_v21 }
  0x4e   : > { %798 = vst.msk [vmem:[#allocation2 + $0x88] sm:$0xf] %vm226_vm1, %v588_v5  ;;  %v468_v10 = vor.u32 %v466_v46, %v12216_v3  ;;  %v470_v11 = vrot.slane %v12216_v3, 4  ;;  %v1365_v12 = vshll.u32 %v1231_v59, 16  ;;  %v1569_v14 = vrot.slane %v1567_v1, 5 }
  0x4f   : > { %v1351_v15 = vshll.u32 %v1229_v9, 16  ;;  %v1358_v16 = vrot.slane %v1356_v6, 4  ;;  %v1361_v18 = vrot.slane %v1359_v8, 5  ;;  %v746_v23 = vld [vmem:[#allocation2 + $0x30] sm:$0xf]  ;;  %v1369_v25 = vshrl.u32 %v1231_v59, 16 }
  0x50   : > { %v469_v22 = vsel %vm12055_vm9, %v461_v2, %v468_v10  ;;  %v12226_v24 = vrot.slane %v1365_v12, 5  ;;  %v273_v26 = vsel %vm12006_vm4, 0, %v272_v60  ;;  %v1570_v27 = vsel %vm12116_vm13, %v1565_v55, %v1569_v14  ;;  %v251_v49 = vld [vmem:[#allocation2 + $0x3c] sm:$0x1]  ;;  %v322_v2 = vld [vmem:[#allocation2 + $0x98] sm:$0x1] }
  0x51   : > { %v1353_v20 = vrot.slane %v1351_v15, 5  ;;  %v747_v28 = vsel %vm12064_vm10, %v460_v0, %v746_v23  ;;  %749 = vst.msk [vmem:[#allocation2 + $0x34] sm:$0xf] %vm226_vm1, %v469_v22  ;;  %v1362_v30 = vor.u32 %v1361_v18, %v1358_v16  ;;  %v1714_v31 = vunpack.c.l.b16 %v1570_v27  ;;  %v346_v0 = vld [vmem:[%s12021_s25 + $0x48] sm:$0xff] }
  0x52   : > { %748 = vst [vmem:[#allocation2 + $0x30] sm:$0xf] %v747_v28  ;;  %v799_v32 = vld [vmem:[#allocation2 + $0x8c] sm:$0x1]  ;;  %v1371_v34 = vrot.slane %v1369_v25, 4  ;;  %v591_v39 = vshrl.u32 %v391_v13, 16  ;;  %v378_v18 = vpack.c.bf16 %v346_v0, %v346_v0 }
  0x53   : > { %v1354_v38 = vsel %vm12116_vm13, %v12186_v17, %v1353_v20  ;;  %v800_v40 = vsel %vm12006_vm4, %v589_v58, %v799_v32  ;;  %v736_v41 = vld [vmem:[#allocation2 + $0x20] sm:$0x1]  ;;  %v1363_v50 = vrot.slane %v1362_v30, 4  ;;  %274 = vst [vmem:[#allocation2 + $0x90] sm:$0x1] %v273_v26  ;;  %v594_v42 = vshll.u32 %v391_v13, 16 }
  0x54   : > { %v1735_v44 = vpack.c.b16 %v1714_v31, %v12211_v56  ;;  %v1696_v45 = vunpack.c.l.b16 %v1354_v38  ;;  %801 = vst [vmem:[#allocation2 + $0x8c] sm:$0x1] %v800_v40  ;;  %v1257_v46 = vld [vmem:[#allocation2 + $0x84] sm:$0xf]  ;;  %v737_v47 = vsel %vm12006_vm4, %v436_v7, %v736_v41  ;;  %v1372_v17 = vor.u32 %v1371_v34, %v12226_v24  ;;  %v295_v22 = vld [vmem:[#allocation2 + $0x2c] sm:$0x1] }
  0x55   : > { %v11848_v51 = vld [vmem:[#allocation2 + $0x84] sm:$0xff]  ;;  %v1572_v53 = vshrl.u32 %v1257_v46, 16  ;;  %v1575_v54 = vshll.u32 %v1257_v46, 16  ;;  %v593_v55 = vrot.slane %v591_v39, 7  ;;  %738 = vst [vmem:[#allocation2 + $0x20] sm:$0x1] %v737_v47  ;;  %v1368_v33 = vsel %vm12116_vm13, %v1363_v50, %v12226_v24 }
  0x56   : > { %v1258_v52 = vld [vmem:[#allocation2 + $0x88] sm:$0xf]  ;;  %11140 = vmatmul.msk.bf16.gmra.mxu3 %vm841_vm5, %v1735_v44  ;;  %v1726_v56 = vpack.c.b16 %v1696_v45, %v12196_v29  ;;  %v345_v7 = vld [vmem:[%s12021_s25 + $0x40] sm:$0xff]  ;;  %11124 = vmatmul.msk.bf16.gmra.mxu2 %vm841_vm5, %v11848_v51  ;;  %v12253_v61 = vrot.slane %v1372_v17, 4  ;;  %v599_v6 = vshrl.u32 %v392_v37, 16  ;;  %v602_v10 = vshll.u32 %v392_v37, 16 }
  0x57   : > { %v1581_v57 = vshll.u32 %v1258_v52, 16  ;;  %v1585_v58 = vshrl.u32 %v1258_v52, 16  ;;  %v1574_v59 = vrot.slane %v1572_v53, 4  ;;  %v1577_v60 = vrot.slane %v1575_v54, 5  ;;  %v1233_v32 = vld [vmem:[#allocation2 + $0x24] sm:$0xf] }
  0x58   : > { %v596_v63 = vor.u32 %v594_v42, %v593_v55  ;;  %11131 = vmatmul.msk.bf16.gmra.mxu1 %vm841_vm5, %v1726_v56  ;;  %v597_v5 = vrot.slane %v593_v55, 4  ;;  %v252_v12 = vsel %vm12006_vm4, 0, %v251_v49  ;;  %v377_v13 = vpack.c.bf16 %v345_v7, %v345_v7  ;;  %v1234_v45 = vld [vmem:[#allocation2 + $0x28] sm:$0xf]  ;;  %v275_v0 = vld [vmem:[#allocation2 + $0x9c] sm:$0x1] }
  0x59   : > { %v1583_v29 = vrot.slane %v1581_v57, 5  ;;  %v1587_v1 = vrot.slane %v1585_v58, 4  ;;  %v11841_v8 = vld [vmem:[#allocation2 + $0x30] sm:$0xff]  ;;  %v1578_v9 = vor.u32 %v1577_v60, %v1574_v59  ;;  %v12259_v15 = vrot.slane %v599_v6, 7  ;;  %253 = vst [vmem:[#allocation2 + $0x3c] sm:$0x1] %v252_v12 }
  0x5a   : > { %v802_v16 = vld [vmem:[#allocation2 + $0x90] sm:$0xf]  ;;  %v323_v21 = vsel %vm12039_vm8, 0, %v322_v2  ;;  %v472_v26 = vshrl.u32 %v377_v13, 16  ;;  %v475_v27 = vshll.u32 %v377_v13, 16  ;;  %11117 = vmatmul.msk.bf16.gmra.mxu0 %vm841_vm5, %v11841_v8  ;;  %v12266_v30 = vunpack.c.l.b16 %v1368_v33  ;;  %v361_v2 = vld [vmem:[%s12021_s25 + $0xc0] sm:$0xff] }
  0x5b   : > { %v1588_v14 = vor.u32 %v1587_v1, %v1583_v29  ;;  %v1259_v23 = vld [vmem:[#allocation2 + $0x8c] sm:$0x1]  ;;  %v1579_v24 = vrot.slane %v1578_v9, 4  ;;  %v803_v25 = vsel %vm12064_vm10, %v596_v63, %v802_v16  ;;  %v604_v31 = vor.u32 %v602_v10, %v12259_v15  ;;  %324 = vst [vmem:[#allocation2 + $0x98] sm:$0x1] %v323_v21 }
  0x5c   : > { %v1591_v28 = vshll.u32 %v1259_v23, 16  ;;  %804 = vst [vmem:[#allocation2 + $0x90] sm:$0xf] %v803_v25  ;;  %v1232_v37 = vld [vmem:[#allocation2 + $0x20] sm:$0x1]  ;;  %v474_v39 = vrot.slane %v472_v26, 7 }
  0x5d   : > { %v1589_v20 = vrot.slane %v1588_v14, 4  ;;  %v1584_v34 = vsel %vm12116_vm13, %v1579_v24, %v1583_v29  ;;  %v480_v38 = vshrl.u32 %v378_v18, 16  ;;  %v483_v40 = vshll.u32 %v378_v18, 16  ;;  %v362_v29 = vld [vmem:[%s12021_s25 + $0xc8] sm:$0xff]  ;;  %v348_v23 = vld [vmem:[%s12021_s25 + $0x58] sm:$0xff] }
  0x5e   : > { %v1593_v41 = vrot.slane %v1591_v28, 5  ;;  %v1715_v50 = vunpack.c.l.b16 %v1584_v34  ;;  %v1375_v42 = vshll.u32 %v1232_v37, 16  ;;  %v605_v44 = vsel %vm12055_vm9, %v597_v5, %v604_v31 }
  0x5f   : > { %805 = vst.msk [vmem:[#allocation2 + $0x94] sm:$0xf] %vm226_vm1, %v605_v44  ;;  %v477_v46 = vor.u32 %v475_v27, %v474_v39  ;;  %v478_v47 = vrot.slane %v474_v39, 4  ;;  %v12274_v17 = vrot.slane %v480_v38, 7  ;;  %v296_v49 = vsel %vm12039_vm8, 0, %v295_v22  ;;  %v347_v22 = vld [vmem:[%s12021_s25 + $0x50] sm:$0xff] }
  0x60   : > { %v1594_v51 = vsel %vm12116_vm13, %v1589_v20, %v1593_v41  ;;  %v1377_v52 = vrot.slane %v1375_v42, 5  ;;  %297 = vst [vmem:[#allocation2 + $0x2c] sm:$0x1] %v296_v49  ;;  %v1380_v53 = vshrl.u32 %v1233_v32, 16  ;;  %v1383_v54 = vshll.u32 %v1233_v32, 16 }
  0x61   : > { %v1716_v55 = vunpack.c.l.b16 %v1594_v51  ;;  %v606_v56 = vrot.slane %v12259_v15, 4  ;;  %v485_v57 = vor.u32 %v483_v40, %v12274_v17  ;;  %v753_v58 = vld [vmem:[#allocation2 + $0x3c] sm:$0xf]  ;;  %v1389_v33 = vshll.u32 %v1234_v45, 16  ;;  %v254_v38 = vld [vmem:[#allocation2 + $0x48] sm:$0x1] }
  0x62   : > { %v1378_v7 = vsel %vm12116_vm13, %v12253_v61, %v1377_v52  ;;  %v754_v59 = vsel %vm12064_vm10, %v477_v46, %v753_v58  ;;  %v1382_v60 = vrot.slane %v1380_v53, 4  ;;  %v1385_v63 = vrot.slane %v1383_v54, 5  ;;  %v806_v15 = vld [vmem:[#allocation2 + $0x98] sm:$0x1] }
  0x63   : > { %v1736_v1 = vpack.c.b16 %v1716_v55, %v1715_v50  ;;  %v1698_v5 = vunpack.c.l.b16 %v1378_v7  ;;  %v486_v6 = vsel %vm12055_vm9, %v478_v47, %v485_v57  ;;  %755 = vst [vmem:[#allocation2 + $0x3c] sm:$0xf] %v754_v59  ;;  %v1260_v8 = vld [vmem:[#allocation2 + $0x90] sm:$0xf]  ;;  %v12291_v9 = vrot.slane %v1389_v33, 5 }
  0x64   : > { %756 = vst.msk [vmem:[#allocation2 + $0x40] sm:$0xf] %vm226_vm1, %v486_v6  ;;  %v1596_v61 = vshrl.u32 %v1260_v8, 16  ;;  %v1599_v10 = vshll.u32 %v1260_v8, 16  ;;  %v1386_v12 = vor.u32 %v1385_v63, %v1382_v60  ;;  %v1393_v13 = vshrl.u32 %v1234_v45, 16  ;;  %v363_v6 = vld [vmem:[%s12021_s25 + $0xd0] sm:$0xff] }
  0x65   : > { %v1727_v14 = vpack.c.b16 %v1698_v5, %v12266_v30  ;;  %v276_v16 = vsel %vm12006_vm4, 0, %v275_v0  ;;  %v393_v18 = vpack.c.bf16 %v361_v2, %v361_v2  ;;  %v394_v21 = vpack.c.bf16 %v362_v29, %v362_v29  ;;  %v325_v57 = vld [vmem:[#allocation2 + $0xa4] sm:$0x1]  ;;  %v298_v60 = vld [vmem:[#allocation2 + $0x38] sm:$0x1] }
  0x66   : > { %11141 = vmatmul.msk.bf16.gmra.mxu3 %vm841_vm5, %v1736_v1  ;;  %v11849_v24 = vld [vmem:[#allocation2 + $0x90] sm:$0xff]  ;;  %v807_v25 = vsel %vm12006_vm4, %v606_v56, %v806_v15  ;;  %v1598_v27 = vrot.slane %v1596_v61, 4  ;;  %v1601_v20 = vrot.slane %v1599_v10, 5  ;;  %v1387_v28 = vrot.slane %v1386_v12, 4  ;;  %277 = vst [vmem:[#allocation2 + $0x9c] sm:$0x1] %v276_v16 }
  0x67   : > { %v1261_v26 = vld [vmem:[#allocation2 + $0x94] sm:$0xf]  ;;  %808 = vst [vmem:[#allocation2 + $0x98] sm:$0x1] %v807_v25  ;;  %v743_v32 = vld [vmem:[#allocation2 + $0x2c] sm:$0x1]  ;;  %11125 = vmatmul.msk.bf16.gmra.mxu2 %vm841_vm5, %v11849_v24  ;;  %v379_v40 = vpack.c.bf16 %v347_v22, %v347_v22  ;;  %v380_v44 = vpack.c.bf16 %v348_v23, %v348_v23 }
  0x68   : > { %v1605_v30 = vshll.u32 %v1261_v26, 16  ;;  %v1609_v31 = vshrl.u32 %v1261_v26, 16  ;;  %11132 = vmatmul.msk.bf16.gmra.mxu1 %vm841_vm5, %v1727_v14  ;;  %v1602_v34 = vor.u32 %v1601_v20, %v1598_v27  ;;  %v744_v37 = vsel %vm12006_vm4, %v453_v48, %v743_v32  ;;  %v1236_v5 = vld [vmem:[#allocation2 + $0x30] sm:$0xf]  ;;  %v1237_v12 = vld [vmem:[#allocation2 + $0x34] sm:$0xf] }
  0x69   : > { %v1395_v39 = vrot.slane %v1393_v13, 4  ;;  %745 = vst [vmem:[#allocation2 + $0x2c] sm:$0x1] %v744_v37  ;;  %v608_v42 = vshrl.u32 %v393_v18, 16  ;;  %v611_v47 = vshll.u32 %v393_v18, 16  ;;  %v616_v49 = vshrl.u32 %v394_v21, 16 }
  0x6a   : > { %v1607_v41 = vrot.slane %v1605_v30, 5  ;;  %v1611_v50 = vrot.slane %v1609_v31, 4  ;;  %v1603_v45 = vrot.slane %v1602_v34, 4  ;;  %v619_v53 = vshll.u32 %v394_v21, 16 }
  0x6b   : > { %v1396_v46 = vor.u32 %v1395_v39, %v12291_v9  ;;  %v11842_v51 = vld [vmem:[#allocation2 + $0x3c] sm:$0xff]  ;;  %v610_v36 = vrot.slane %v608_v42, 7  ;;  %v255_v48 = vsel %vm12006_vm4, 0, %v254_v38  ;;  %v1392_v54 = vsel %vm12116_vm13, %v1387_v28, %v12291_v9 }
  0x6c   : > { %v1612_v52 = vor.u32 %v1611_v50, %v1607_v41  ;;  %v12314_v55 = vrot.slane %v616_v49, 7  ;;  %256 = vst [vmem:[#allocation2 + $0x48] sm:$0x1] %v255_v48  ;;  %v489_v56 = vshrl.u32 %v379_v40, 16  ;;  %11118 = vmatmul.msk.bf16.gmra.mxu0 %vm841_vm5, %v11842_v51  ;;  %v1608_v58 = vsel %vm12116_vm13, %v1603_v45, %v1607_v41  ;;  %v278_v50 = vld [vmem:[#allocation2 + $0xa8] sm:$0x1] }
  0x6d   : > { %v1397_v7 = vrot.slane %v1396_v46, 4  ;;  %v614_v59 = vrot.slane %v610_v36, 4  ;;  %v613_v0 = vor.u32 %v611_v47, %v610_v36  ;;  %v492_v1 = vshll.u32 %v379_v40, 16  ;;  %v809_v25 = vld [vmem:[#allocation2 + $0x9c] sm:$0xf] }
  0x6e   : > { %v1613_v33 = vrot.slane %v1612_v52, 4  ;;  %v1262_v63 = vld [vmem:[#allocation2 + $0x98] sm:$0x1]  ;;  %v621_v2 = vor.u32 %v619_v53, %v12314_v55  ;;  %v491_v29 = vrot.slane %v489_v56, 7  ;;  %v497_v9 = vshrl.u32 %v380_v44, 16  ;;  %v349_v53 = vld [vmem:[%s12021_s25 + $0x60] sm:$0xff] }
  0x6f   : > { %v1615_v8 = vshll.u32 %v1262_v63, 16  ;;  %v500_v61 = vshll.u32 %v380_v44, 16  ;;  %v326_v10 = vsel %vm12039_vm8, 0, %v325_v57  ;;  %v299_v18 = vsel %vm12039_vm8, 0, %v298_v60  ;;  %v364_v36 = vld [vmem:[%s12021_s25 + $0xd8] sm:$0xff]  ;;  %v350_v57 = vld [vmem:[%s12021_s25 + $0x68] sm:$0xff] }
  0x70   : > { %v1235_v13 = vld [vmem:[#allocation2 + $0x2c] sm:$0x1]  ;;  %v622_v14 = vsel %vm12055_vm9, %v614_v59, %v621_v2  ;;  %v494_v15 = vor.u32 %v492_v1, %v491_v29  ;;  %v495_v16 = vrot.slane %v491_v29, 4  ;;  %327 = vst [vmem:[#allocation2 + $0xa4] sm:$0x1] %v326_v10  ;;  %v1717_v22 = vunpack.c.l.b16 %v1608_v58 }
  0x71   : > { %v1617_v21 = vrot.slane %v1615_v8, 5  ;;  %v1399_v23 = vshll.u32 %v1235_v13, 16  ;;  %v1699_v24 = vunpack.c.l.b16 %v1392_v54  ;;  %812 = vst.msk [vmem:[#allocation2 + $0xa0] sm:$0xf] %vm226_vm1, %v622_v14  ;;  %v810_v26 = vsel %vm12064_vm10, %v613_v0, %v809_v25  ;;  %v257_v1 = vld [vmem:[#allocation2 + $0x54] sm:$0x1] }
  0x72   : > { %v12330_v27 = vrot.slane %v497_v9, 7  ;;  %300 = vst [vmem:[#allocation2 + $0x38] sm:$0x1] %v299_v18  ;;  %v1404_v20 = vshrl.u32 %v1236_v5, 16  ;;  %v1407_v28 = vshll.u32 %v1236_v5, 16  ;;  %v1413_v34 = vshll.u32 %v1237_v12, 16 }
  0x73   : > { %v1618_v30 = vsel %vm12116_vm13, %v1613_v33, %v1617_v21  ;;  %v1401_v31 = vrot.slane %v1399_v23, 5  ;;  %811 = vst [vmem:[#allocation2 + $0x9c] sm:$0xf] %v810_v26  ;;  %v760_v32 = vld [vmem:[#allocation2 + $0x48] sm:$0xf]  ;;  %v395_v37 = vpack.c.bf16 %v363_v6, %v363_v6  ;;  %v623_v38 = vrot.slane %v12314_v55, 4 }
  0x74   : > { %v1718_v39 = vunpack.c.l.b16 %v1618_v30  ;;  %v502_v40 = vor.u32 %v500_v61, %v12330_v27  ;;  %v761_v41 = vsel %vm12064_vm10, %v494_v15, %v760_v32  ;;  %v1406_v44 = vrot.slane %v1404_v20, 4  ;;  %v328_v25 = vld [vmem:[#allocation2 + $0xb0] sm:$0x1] }
  0x75   : > { %v1402_v42 = vsel %vm12116_vm13, %v1397_v7, %v1401_v31  ;;  %762 = vst [vmem:[#allocation2 + $0x48] sm:$0xf] %v761_v41  ;;  %v1409_v45 = vrot.slane %v1407_v28, 5  ;;  %v12340_v46 = vrot.slane %v1413_v34, 5  ;;  %v1417_v52 = vshrl.u32 %v1237_v12, 16 }
  0x76   : > { %v1737_v47 = vpack.c.b16 %v1718_v39, %v1717_v22  ;;  %v1700_v49 = vunpack.c.l.b16 %v1402_v42  ;;  %v503_v51 = vsel %vm12055_vm9, %v495_v16, %v502_v40  ;;  %v279_v55 = vsel %vm12006_vm4, 0, %v278_v50  ;;  %v1239_v40 = vld [vmem:[#allocation2 + $0x3c] sm:$0xf] }
  0x77   : > { %763 = vst.msk [vmem:[#allocation2 + $0x4c] sm:$0xf] %vm226_vm1, %v503_v51  ;;  %v813_v48 = vld [vmem:[#allocation2 + $0xa4] sm:$0x1]  ;;  %v1410_v54 = vor.u32 %v1409_v45, %v1406_v44  ;;  %v625_v56 = vshrl.u32 %v395_v37, 16  ;;  %v1419_v59 = vrot.slane %v1417_v52, 4  ;;  %v396_v29 = vpack.c.bf16 %v364_v36, %v364_v36 }
  0x78   : > { %11142 = vmatmul.msk.bf16.gmra.mxu3 %vm841_vm5, %v1737_v47  ;;  %v1728_v58 = vpack.c.b16 %v1700_v49, %v1699_v24  ;;  %v814_v33 = vsel %vm12006_vm4, %v623_v38, %v813_v48  ;;  %v1264_v7 = vld [vmem:[#allocation2 + $0xa0] sm:$0xf]  ;;  %280 = vst [vmem:[#allocation2 + $0xa8] sm:$0x1] %v279_v55  ;;  %v628_v60 = vshll.u32 %v395_v37, 16  ;;  %v381_v10 = vpack.c.bf16 %v349_v53, %v349_v53 }
  0x79   : > { %815 = vst [vmem:[#allocation2 + $0xa4] sm:$0x1] %v814_v33  ;;  %v1629_v63 = vshll.u32 %v1264_v7, 16  ;;  %v1633_v0 = vshrl.u32 %v1264_v7, 16  ;;  %v750_v2 = vld [vmem:[#allocation2 + $0x38] sm:$0x1]  ;;  %v1420_v16 = vor.u32 %v1419_v59, %v12340_v46  ;;  %v382_v21 = vpack.c.bf16 %v350_v57, %v350_v57 }
  0x7a   : > { %11133 = vmatmul.msk.bf16.gmra.mxu1 %vm841_vm5, %v1728_v58  ;;  %v11850_v5 = vld [vmem:[#allocation2 + $0x9c] sm:$0xff]  ;;  %v751_v8 = vsel %vm12006_vm4, %v470_v11, %v750_v2  ;;  %v1411_v9 = vrot.slane %v1410_v54, 4  ;;  %v627_v61 = vrot.slane %v625_v56, 7  ;;  %v633_v26 = vshrl.u32 %v396_v29, 16  ;;  %v301_v38 = vld [vmem:[#allocation2 + $0x44] sm:$0x1] }
  0x7b   : > { %v1263_v6 = vld [vmem:[#allocation2 + $0x9c] sm:$0xf]  ;;  %v1631_v14 = vrot.slane %v1629_v63, 5  ;;  %v1635_v15 = vrot.slane %v1633_v0, 4  ;;  %752 = vst [vmem:[#allocation2 + $0x38] sm:$0x1] %v751_v8  ;;  %11126 = vmatmul.msk.bf16.gmra.mxu2 %vm841_vm5, %v11850_v5 }
  0x7c   : > { %v1620_v12 = vshrl.u32 %v1263_v6, 16  ;;  %v1623_v13 = vshll.u32 %v1263_v6, 16  ;;  %v630_v18 = vor.u32 %v628_v60, %v627_v61  ;;  %v631_v24 = vrot.slane %v627_v61, 4 }
  0x7d   : > { %v1636_v3 = vor.u32 %v1635_v15, %v1631_v14  ;;  %v636_v20 = vshll.u32 %v396_v29, 16  ;;  %v258_v28 = vsel %vm12006_vm4, 0, %v257_v1  ;;  %v506_v30 = vshrl.u32 %v381_v10, 16  ;;  %v12385_v29 = vld [vmem:[%s16311_s2] ss:$0 sm:$0xff] }
  0x7e   : > { %v1622_v22 = vrot.slane %v1620_v12, 4  ;;  %v1625_v23 = vrot.slane %v1623_v13, 5  ;;  %v11843_v11 = vld [vmem:[#allocation2 + $0x48] sm:$0xff]  ;;  %v1416_v34 = vsel %vm12116_vm13, %v1411_v9, %v12340_v46  ;;  %259 = vst [vmem:[#allocation2 + $0x54] sm:$0x1] %v258_v28  ;;  %v509_v39 = vshll.u32 %v381_v10, 16 }
  0x7f   : > { %v1637_v32 = vrot.slane %v1636_v3, 4  ;;  %v816_v37 = vld [vmem:[#allocation2 + $0xa8] sm:$0xf]  ;;  %11119 = vmatmul.msk.bf16.gmra.mxu0 %vm841_vm5, %v11843_v11  ;;  %v635_v50 = vrot.slane %v633_v26, 7  ;;  %v508_v44 = vrot.slane %v506_v30, 7  ;;  %v514_v45 = vshrl.u32 %v382_v21, 16 }
  0x80   : > { %v1626_v31 = vor.u32 %v1625_v23, %v1622_v22  ;;  %v1265_v41 = vld [vmem:[#allocation2 + $0xa4] sm:$0x1]  ;;  %v817_v42 = vsel %vm12064_vm10, %v630_v18, %v816_v37  ;;  %v517_v51 = vshll.u32 %v382_v21, 16  ;;  %v329_v46 = vsel %vm12039_vm8, 0, %v328_v25  ;;  %842 = vst.msk [vmem:[#allocation4] sm:$0xff] %vm841_vm5, %v12385_v29 }
  0x81   : > { %v1639_v49 = vshll.u32 %v1265_v41, 16  ;;  %818 = vst [vmem:[#allocation2 + $0xa8] sm:$0xf] %v817_v42  ;;  %v1421_v36 = vrot.slane %v1420_v16, 4  ;;  %v638_v53 = vor.u32 %v636_v20, %v635_v50  ;;  %v511_v48 = vor.u32 %v509_v39, %v508_v44 }
  0x82   : > { %v1627_v47 = vrot.slane %v1626_v31, 4  ;;  %v1238_v52 = vld [vmem:[#allocation2 + $0x38] sm:$0x1]  ;;  %v512_v54 = vrot.slane %v508_v44, 4  ;;  %330 = vst [vmem:[#allocation2 + $0xb0] sm:$0x1] %v329_v46  ;;  %v1701_v5 = vunpack.c.l.b16 %v1416_v34 }
  0x83   : > { %v1641_v56 = vrot.slane %v1639_v49, 5  ;;  %v1423_v57 = vshll.u32 %v1238_v52, 16  ;;  %v12372_v58 = vrot.slane %v514_v45, 7  ;;  %v639_v7 = vsel %vm12055_vm9, %v631_v24, %v638_v53  ;;  %843 = vst.msk [vmem:[#allocation4 + $0x8] sm:$0xff] %vm841_vm5, %v12385_v29  ;;  %v2792_v46 = vld [vmem:[#allocation2 + $0xc] sm:$0xf] }
  0x84   : > { %v1632_v55 = vsel %vm12116_vm13, %v1627_v47, %v1631_v14  ;;  %v302_v59 = vsel %vm12039_vm8, 0, %v301_v38  ;;  %v1428_v60 = vshrl.u32 %v1239_v40, 16  ;;  %819 = vst.msk [vmem:[#allocation2 + $0xac] sm:$0xf] %vm226_vm1, %v639_v7  ;;  %v640_v6 = vrot.slane %v635_v50, 4 }
  0x85   : > { %v1719_v33 = vunpack.c.l.b16 %v1632_v55  ;;  %v1642_v63 = vsel %vm12116_vm13, %v1637_v32, %v1641_v56  ;;  %v1425_v0 = vrot.slane %v1423_v57, 5  ;;  %v519_v2 = vor.u32 %v517_v51, %v12372_v58  ;;  %v767_v8 = vld [vmem:[#allocation2 + $0x54] sm:$0xf]  ;;  %303 = vst [vmem:[#allocation2 + $0x44] sm:$0x1] %v302_v59 }
  0x86   : > { %v1720_v1 = vunpack.c.l.b16 %v1642_v63  ;;  %v1431_v9 = vshll.u32 %v1239_v40, 16  ;;  %v487_v61 = vrot.slane %v12274_v17, 4  ;;  %v768_v13 = vsel %vm12064_vm10, %v511_v48, %v767_v8  ;;  %v1240_v14 = vld [vmem:[#allocation2 + $0x40] sm:$0xf]  ;;  %844 = vst.msk [vmem:[#allocation4 + $0x10] sm:$0xff] %vm841_vm5, %v12385_v29 }
  0x87   : > { %v1426_v10 = vsel %vm12116_vm13, %v1421_v36, %v1425_v0  ;;  %v520_v12 = vsel %vm12055_vm9, %v512_v54, %v519_v2  ;;  %769 = vst [vmem:[#allocation2 + $0x54] sm:$0xf] %v768_v13  ;;  %v1430_v21 = vrot.slane %v1428_v60, 4  ;;  %v1437_v11 = vshll.u32 %v1240_v14, 16  ;;  %v2793_v52 = vld [vmem:[#allocation2 + $0x10] sm:$0xf] }
  0x88   : > { %v1738_v15 = vpack.c.b16 %v1720_v1, %v1719_v33  ;;  %v1702_v16 = vunpack.c.l.b16 %v1426_v10  ;;  %v1266_v18 = vld [vmem:[#allocation2 + $0xa8] sm:$0xf]  ;;  %v1433_v22 = vrot.slane %v1431_v9, 5  ;;  %770 = vst.msk [vmem:[#allocation2 + $0x58] sm:$0xf] %vm226_vm1, %v520_v12  ;;  %v1441_v26 = vshrl.u32 %v1240_v14, 16 }
  0x89   : > { %v820_v17 = vld [vmem:[#allocation2 + $0xb0] sm:$0x1]  ;;  %v1644_v23 = vshrl.u32 %v1266_v18, 16  ;;  %v1647_v3 = vshll.u32 %v1266_v18, 16  ;;  %845 = vst.msk [vmem:[#allocation4 + $0x18] sm:$0xff] %vm841_vm5, %v12385_v29  ;;  %v1439_v41 = vrot.slane %v1437_v11, 5 }
  0x8a   : > { %11143 = vmatmul.msk.bf16.gmra.mxu3 %vm841_vm5, %v1738_v15  ;;  %v1729_v24 = vpack.c.b16 %v1702_v16, %v1701_v5  ;;  %v821_v25 = vsel %vm12006_vm4, %v640_v6, %v820_v17  ;;  %v1434_v32 = vor.u32 %v1433_v22, %v1430_v21  ;;  %v1443_v50 = vrot.slane %v1441_v26, 4  ;;  %846 = vst.msk [vmem:[#allocation4 + $0x20] sm:$0xff] %vm841_vm5, %v12385_v29  ;;  %v906_v54 = vld [vmem:[#allocation4] sm:$0xff]  ;;  %v365_v60 = vld [vmem:[%s12021_s25 + $0xe0] sm:$0xff]  ;;  %v366_v15 = vld [vmem:[%s12021_s25 + $0xe8] sm:$0xff] }
  0x8b   : > { %822 = vst [vmem:[#allocation2 + $0xb0] sm:$0x1] %v821_v25  ;;  %v1646_v20 = vrot.slane %v1644_v23, 4  ;;  %v1649_v28 = vrot.slane %v1647_v3, 5  ;;  %v11851_v30 = vld [vmem:[#allocation2 + $0xa8] sm:$0xff]  ;;  %v2873_v57 = vshrl.u32 %v2792_v46, 16  ;;  %v12440_v3 = vpack.c.bf16 %v365_v60, %v365_v60 }
  0x8c   : > { %11134 = vmatmul.msk.bf16.gmra.mxu1 %vm841_vm5, %v1729_v24  ;;  %v1267_v31 = vld [vmem:[#allocation2 + $0xac] sm:$0xf]  ;;  %v757_v38 = vld [vmem:[#allocation2 + $0x44] sm:$0x1]  ;;  %11127 = vmatmul.msk.bf16.gmra.mxu2 %vm841_vm5, %v11851_v30  ;;  %v1435_v49 = vrot.slane %v1434_v32, 4  ;;  %847 = vst.msk [vmem:[#allocation4 + $0x28] sm:$0xff] %vm841_vm5, %v12385_v29  ;;  %v1444_v48 = vor.u32 %v1443_v50, %v1439_v41  ;;  %v398_v11 = vpack.c.bf16 %v366_v15, %v366_v15 }
  0x8d   : > { %v1650_v34 = vor.u32 %v1649_v28, %v1646_v20  ;;  %v1653_v37 = vshll.u32 %v1267_v31, 16  ;;  %v1657_v39 = vshrl.u32 %v1267_v31, 16  ;;  %v758_v40 = vsel %vm12006_vm4, %v487_v61, %v757_v38  ;;  %848 = vst.msk [vmem:[#allocation4 + $0x30] sm:$0xff] %vm841_vm5, %v12385_v29  ;;  %v2794_v1 = vld [vmem:[#allocation2 + $0x14] sm:$0x1] }
  0x8e   : > { %759 = vst [vmem:[#allocation2 + $0x44] sm:$0x1] %v758_v40  ;;  %v2876_v33 = vshll.u32 %v2792_v46, 16  ;;  %v1440_v7 = vsel %vm12116_vm13, %v1435_v49, %v1439_v41  ;;  %v2882_v63 = vshll.u32 %v2793_v52, 16  ;;  %v2875_v5 = vrot.slane %v2873_v57, 4 }
  0x8f   : > { %v1651_v42 = vrot.slane %v1650_v34, 4  ;;  %v1655_v44 = vrot.slane %v1653_v37, 5  ;;  %v1659_v45 = vrot.slane %v1657_v39, 4  ;;  %v11844_v47 = vld [vmem:[#allocation2 + $0x54] sm:$0xff]  ;;  %849 = vst.msk [vmem:[#allocation4 + $0x38] sm:$0xff] %vm841_vm5, %v12385_v29  ;;  %v1445_v61 = vrot.slane %v1444_v48, 4 }
  0x90   : > { %11120 = vmatmul.msk.bf16.gmra.mxu0 %vm841_vm5, %v11844_v47  ;;  %850 = vst.msk [vmem:[#allocation4 + $0x40] sm:$0xff] %vm841_vm5, %v12385_v29  ;;  %v2878_v6 = vrot.slane %v2876_v33, 5  ;;  %v2884_v10 = vrot.slane %v2882_v63, 5  ;;  %v2886_v12 = vshrl.u32 %v2793_v52, 16  ;;  %v2892_v18 = vshll.u32 %v2794_v1, 16  ;;  %v907_v63 = vld [vmem:[#allocation4 + $0x8] sm:$0xff] }
  0x91   : > { %v1660_v51 = vor.u32 %v1659_v45, %v1655_v44  ;;  %v1656_v53 = vsel %vm12116_vm13, %v1651_v42, %v1655_v44  ;;  %851 = vst.msk [vmem:[#allocation4 + $0x48] sm:$0xff] %vm841_vm5, %v12385_v29  ;;  %v1703_v23 = vunpack.c.l.b16 %v1440_v7  ;;  %v642_v34 = vshrl.u32 %v12440_v3, 16  ;;  %v1242_v45 = vld [vmem:[#allocation2 + $0x48] sm:$0xf]  ;;  %v2795_v47 = vld [vmem:[#allocation2 + $0x18] sm:$0xf] }
  0x92   : > { %v1268_v36 = vld [vmem:[#allocation2 + $0xb0] sm:$0x1]  ;;  %v1080_v59 = vpop.f32.mrf.mxu0  ;;  %852 = vst.msk [vmem:[#allocation4 + $0x50] sm:$0xff] %vm841_vm5, %v12385_v29  ;;  %v1721_v8 = vunpack.c.l.b16 %v1656_v53  ;;  %v2879_v16 = vor.u32 %v2878_v6, %v2875_v5  ;;  %v2888_v22 = vrot.slane %v2886_v12, 4  ;;  %v2894_v20 = vrot.slane %v2892_v18, 5 }
  0x93   : > { %v1661_v55 = vrot.slane %v1660_v51, 4  ;;  %v1663_v56 = vshll.u32 %v1268_v36, 16  ;;  %v1160_v2 = vadd.f32 %v1080_v59, %v906_v54  ;;  %853 = vst.msk [vmem:[#allocation4 + $0x58] sm:$0xff] %vm841_vm5, %v12385_v29  ;;  %v650_v38 = vshrl.u32 %v398_v11, 16  ;;  %v2796_v46 = vld [vmem:[#allocation2 + $0x1c] sm:$0xf] }
  0x94   : > { %854 = vst.msk [vmem:[#allocation4 + $0x60] sm:$0xff] %vm841_vm5, %v12385_v29  ;;  %v2880_v24 = vrot.slane %v2879_v16, 4  ;;  %v2889_v26 = vor.u32 %v2888_v22, %v2884_v10  ;;  %v12467_v42 = vrot.slane %v642_v34, 7  ;;  %v653_v51 = vshll.u32 %v398_v11, 16  ;;  %v281_v53 = vld [vmem:[#allocation2 + $0xb4] sm:$0x1] }
  0x95   : > { %v1665_v0 = vrot.slane %v1663_v56, 5  ;;  %v1241_v9 = vld [vmem:[#allocation2 + $0x44] sm:$0x1]  ;;  %1192 = vst.msk [vmem:[#allocation4] sm:$0xff] %vm841_vm5, %v1160_v2  ;;  %v12471_v49 = vrot.slane %v650_v38, 7  ;;  %v2897_v52 = vshrl.u32 %v2795_v47, 16 }
  0x96   : > { %v1447_v14 = vshll.u32 %v1241_v9, 16  ;;  %855 = vst.msk [vmem:[#allocation4 + $0x68] sm:$0xff] %vm841_vm5, %v12385_v29  ;;  %v2885_v30 = vsel %vm12116_vm13, %v2880_v24, %v2884_v10  ;;  %v2890_v32 = vrot.slane %v2889_v26, 4  ;;  %v2900_v36 = vshll.u32 %v2795_v47, 16  ;;  %v2797_v60 = vld [vmem:[#allocation2 + $0x20] sm:$0x1] }
  0x97   : > { %v1666_v13 = vsel %vm12116_vm13, %v1661_v55, %v1665_v0  ;;  %856 = vst.msk [vmem:[#allocation4 + $0x70] sm:$0xff] %vm841_vm5, %v12385_v29  ;;  %v3258_v37 = vunpack.c.l.b16 %v2885_v30  ;;  %v1452_v48 = vshrl.u32 %v1242_v45, 16  ;;  %v2899_v54 = vrot.slane %v2897_v52, 4  ;;  %v1243_v0 = vld [vmem:[#allocation2 + $0x4c] sm:$0xf]  ;;  %v908_v16 = vld [vmem:[#allocation4 + $0x10] sm:$0xff] }
  0x98   : > { %v1722_v21 = vunpack.c.l.b16 %v1666_v13  ;;  %v1449_v17 = vrot.slane %v1447_v14, 5  ;;  %857 = vst.msk [vmem:[#allocation4 + $0x78] sm:$0xff] %vm841_vm5, %v12385_v29  ;;  %v2895_v40 = vsel %vm12116_vm13, %v2890_v32, %v2894_v20  ;;  %v1455_v55 = vshll.u32 %v1242_v45, 16  ;;  %v331_v1 = vld [vmem:[#allocation2 + $0xbc] sm:$0x1]  ;;  %v909_v52 = vld [vmem:[#allocation4 + $0x18] sm:$0xff] }
  0x99   : > { %858 = vst.msk [vmem:[#allocation4 + $0x80] sm:$0xff] %vm841_vm5, %v12385_v29  ;;  %v3259_v41 = vunpack.c.l.b16 %v2895_v40  ;;  %v2902_v56 = vrot.slane %v2900_v36, 5  ;;  %v2906_v57 = vshll.u32 %v2796_v46, 16  ;;  %v2910_v33 = vshrl.u32 %v2796_v46, 16  ;;  %v304_v14 = vld [vmem:[#allocation2 + $0x50] sm:$0x1] }
  0x9a   : > { %v1739_v25 = vpack.c.b16 %v1722_v21, %v1721_v8  ;;  %v1450_v28 = vsel %vm12116_vm13, %v1445_v61, %v1449_v17  ;;  %859 = vst.msk [vmem:[#allocation4 + $0x88] sm:$0xff] %vm841_vm5, %v12385_v29  ;;  %v1082_v50 = vpop.f32.mrf.mxu0  ;;  %v648_v7 = vrot.slane %v12467_v42, 4  ;;  %v655_v59 = vor.u32 %v653_v51, %v12471_v49  ;;  %v307_v24 = vld [vmem:[#allocation2 + $0x5c] sm:$0x1]  ;;  %v12506_v30 = vld [vmem:[#allocation2 + $0x4] sm:$0xf] }
  0x9b   : > { %v1704_v31 = vunpack.c.l.b16 %v1450_v28  ;;  %860 = vst.msk [vmem:[#allocation4 + $0x90] sm:$0xff] %vm841_vm5, %v12385_v29  ;;  %v3290_v44 = vpack.c.b16 %v3259_v41, %v3258_v37  ;;  %v282_v2 = vsel %vm12006_vm4, 0, %v281_v53  ;;  %v1454_v5 = vrot.slane %v1452_v48, 4  ;;  %v11310_v34 = vld [vmem:[%s16310_s1 + $0xc] sm:$0x3] }
  0x9c   : > { %11144 = vmatmul.msk.bf16.gmra.mxu3 %vm841_vm5, %v1739_v25  ;;  %861 = vst.msk [vmem:[#allocation4 + $0x98] sm:$0xff] %vm841_vm5, %v12385_v29  ;;  %v2903_v6 = vor.u32 %v2902_v56, %v2899_v54  ;;  %v1457_v8 = vrot.slane %v1455_v55, 5  ;;  %v2908_v9 = vrot.slane %v2906_v57, 5  ;;  %v2912_v61 = vrot.slane %v2910_v33, 4  ;;  %v1945_v47 = vld [vmem:[#allocation2] sm:$0xe] }
  0x9d   : > { %v1730_v39 = vpack.c.b16 %v1704_v31, %v1703_v23  ;;  %862 = vst.msk [vmem:[#allocation4 + $0xa0] sm:$0xff] %vm841_vm5, %v12385_v29  ;;  %v2916_v10 = vshll.u32 %v2797_v60, 16  ;;  %v656_v12 = vsel %vm12055_vm9, %v648_v7, %v655_v59  ;;  %v1161_v13 = vadd.f32 %v1082_v50, %v907_v63  ;;  %v1947_v55 = vld [vmem:[#allocation2 + $0x8] sm:$0x1]  ;;  %v1245_v57 = vld [vmem:[#allocation2 + $0x54] sm:$0xf] }
  0x9e   : > { %863 = vst.msk [vmem:[#allocation4 + $0xa8] sm:$0xff] %vm841_vm5, %v12385_v29  ;;  %v1461_v15 = vshll.u32 %v1243_v0, 16  ;;  %v2904_v21 = vrot.slane %v2903_v6, 4  ;;  %v1465_v22 = vshrl.u32 %v1243_v0, 16  ;;  %v2913_v17 = vor.u32 %v2912_v61, %v2908_v9  ;;  %v12530_v0 = vld [vmem:[#allocation2 + $0x58] sm:$0xf] }
  0x9f   : > { %11135 = vmatmul.msk.bf16.gmra.mxu1 %vm841_vm5, %v1730_v39  ;;  %864 = vst.msk [vmem:[#allocation4 + $0xb0] sm:$0xff] %vm841_vm5, %v12385_v29  ;;  %v2918_v23 = vrot.slane %v2916_v10, 5  ;;  %v645_v25 = vshll.u32 %v12440_v3, 16  ;;  %v332_v11 = vsel %vm12039_vm8, 0, %v331_v1  ;;  %v305_v20 = vsel %vm12039_vm8, 0, %v304_v14 }
  0xa0   : > { %865 = vst.msk [vmem:[#allocation4 + $0xb8] sm:$0xff] %vm841_vm5, %v12385_v29  ;;  %11261 = vmatmul.msk.bf16.vlgmr.msrb.gmra.mxu0 %vm841_vm5, %v3290_v44  ;;  %v2909_v26 = vsel %vm12116_vm13, %v2904_v21, %v2908_v9  ;;  %v1458_v28 = vor.u32 %v1457_v8, %v1454_v5  ;;  %v2914_v31 = vrot.slane %v2913_v17, 4  ;;  %v12509_v32 = vrot.slane %v1461_v15, 5  ;;  %v922_v37 = vld [vmem:[#allocation4 + $0x80] sm:$0xff] }
  0xa1   : > { %866 = vst.msk [vmem:[#allocation4 + $0xc0] sm:$0xff] %vm841_vm5, %v12385_v29  ;;  %v3260_v3 = vunpack.c.l.b16 %v2909_v26  ;;  %v308_v38 = vsel %vm12039_vm8, 0, %v307_v24  ;;  %v1467_v40 = vrot.slane %v1465_v22, 4  ;;  %v4200_v50 = vsel %vm1067_vm0, %v11310_v34, 0  ;;  %v923_v63 = vld [vmem:[#allocation4 + $0x88] sm:$0xff] }
  0xa2   : > { %867 = vst.msk [vmem:[#allocation4 + $0xc8] sm:$0xff] %vm841_vm5, %v12385_v29  ;;  %v2919_v41 = vsel %vm12116_vm13, %v2914_v31, %v2918_v23  ;;  %v647_v45 = vor.u32 %v645_v25, %v12467_v42  ;;  %v2078_v51 = vrot.slane %v12506_v30, 5  ;;  %4209 = vmatpush.bf16.msra.mxu2 %v4200_v50  ;;  %v504_v36 = vrot.slane %v12330_v27, 4  ;;  %v2799_v26 = vld [vmem:[#allocation2 + $0x28] sm:$0xf] }
  0xa3   : > { %868 = vst.msk [vmem:[#allocation4 + $0xd0] sm:$0xff] %vm841_vm5, %v12385_v29  ;;  %v3261_v46 = vunpack.c.l.b16 %v2919_v41  ;;  %v521_v53 = vrot.slane %v12372_v58, 4  ;;  %v657_v48 = vrot.slane %v12471_v49, 4  ;;  %v1459_v54 = vrot.slane %v1458_v28, 4  ;;  %v11391_v30 = vld [vmem:[%s16310_s1 + $0xe] sm:$0x3] }
  0xa4   : > { %869 = vst.msk [vmem:[#allocation4 + $0xd8] sm:$0xff] %vm841_vm5, %v12385_v29  ;;  %vm2074_vm15 = vcmask 1046532   ;;  %v11146_v7 = vrot.slane %v1945_v47, 9  ;;  %v1468_v49 = vor.u32 %v1467_v40, %v12509_v32  ;;  %v2080_v60 = vrot.slane %v2078_v51, 4  ;;  %v2800_v50 = vld [vmem:[#allocation2 + $0x2c] sm:$0x1] }
  0xa5   : > { %870 = vst.msk [vmem:[#allocation4 + $0xe0] sm:$0xff] %vm841_vm5, %v12385_v29  ;;  %v3291_v56 = vpack.c.b16 %v3261_v46, %v3260_v3  ;;  %v2081_v5 = vrot.slane %v1947_v55, 5  ;;  %v1476_v6 = vshrl.u32 %v1245_v57, 16  ;;  %v1464_v9 = vsel %vm12116_vm13, %v1459_v54, %v12509_v32  ;;  %vm12537_vm2 = vmor %vm2073_vm14, %vm2074_vm15  ;;  %v910_v32 = vld [vmem:[#allocation4 + $0x20] sm:$0xff] }
  0xa6   : > { %871 = vst.msk [vmem:[#allocation4 + $0xe8] sm:$0xff] %vm841_vm5, %v12385_v29  ;;  %v12548_v17 = vrot.slane %v1468_v49, 4  ;;  %v1485_v23 = vshll.u32 %v12530_v0, 16  ;;  %v12554_v25 = vsel %vm12537_vm2, %v11146_v7, %v2078_v51  ;;  %v12557_v28 = vunpack.c.l.b16 %v1464_v9 }
  0xa7   : > { %872 = vst.msk [vmem:[#allocation4 + $0xf0] sm:$0xff] %vm841_vm5, %v12385_v29  ;;  %v1085_v18 = vpop.f32.mrf.mxu0  ;;  %v2190_v47 = vunpack.c.l.b16 %v12554_v25 }
  0xa8   : > { %873 = vst.msk [vmem:[#allocation4 + $0xf8] sm:$0xff] %vm841_vm5, %v12385_v29  ;;  %v1162_v29 = vadd.f32 %v1085_v18, %v908_v16  ;;  %v1120_v39 = vpop.f32.mrf.mxu2  ;;  %v12575_v51 = vrot.slane %v1485_v23, 5 }
  0xa9   : > { %283 = vst [vmem:[#allocation2 + $0xb4] sm:$0x1] %v282_v2  ;;  %v1176_v44 = vadd.f32 %v1120_v39, %v922_v37  ;;  %v4918_v37 = vsel %vm1067_vm0, %v11391_v30, 0 }
  0xaa   : > { %826 = vst.msk [vmem:[#allocation2 + $0xb8] sm:$0xf] %vm226_vm1, %v656_v12  ;;  %v1479_v12 = vshll.u32 %v1245_v57, 16  ;;  %4927 = vmatpush.bf16.msra.mxu3 %v4918_v37  ;;  %v2940_v57 = vshll.u32 %v2800_v50, 16  ;;  %v925_v50 = vld [vmem:[#allocation4 + $0x98] sm:$0xff] }
  0xab   : > { %1193 = vst.msk [vmem:[#allocation4 + $0x8] sm:$0xff] %vm841_vm5, %v1161_v13  ;;  %v2798_v13 = vld [vmem:[#allocation2 + $0x24] sm:$0xf] }
  0xac   : > { %333 = vst [vmem:[#allocation2 + $0xbc] sm:$0x1] %v332_v11  ;;  %v1489_v11 = vshrl.u32 %v12530_v0, 16  ;;  %v12572_v40 = vrot.slane %v1479_v12, 5  ;;  %v2924_v55 = vshll.u32 %v2798_v13, 16  ;;  %v2942_v12 = vrot.slane %v2940_v57, 5 }
  0xad   : > { %306 = vst [vmem:[#allocation2 + $0x50] sm:$0x1] %v305_v20  ;;  %v2921_v20 = vshrl.u32 %v2798_v13, 16  ;;  %v1272_v13 = vld [vmem:[#allocation4] sm:$0xff] }
  0xae   : > { %1194 = vst.msk [vmem:[#allocation4 + $0x10] sm:$0xff] %vm841_vm5, %v1162_v29  ;;  %v12561_v29 = vsel %vm12537_vm2, %v2080_v60, %v2081_v5 }
  0xaf   : > { %1208 = vst.msk [vmem:[#allocation4 + $0x80] sm:$0xff] %vm841_vm5, %v1176_v44  ;;  %v1087_v42 = vpop.f32.mrf.mxu0  ;;  %v2191_v49 = vunpack.c.l.b16 %v12561_v29 }
  0xb0   : > { %v823_v33 = vld [vmem:[#allocation2 + $0xb4] sm:$0xf]  ;;  %v1163_v59 = vadd.f32 %v1087_v42, %v909_v52  ;;  %309 = vst [vmem:[#allocation2 + $0x5c] sm:$0x1] %v308_v38  ;;  %11262 = vmatmul.msk.bf16.gmra.mxu0 %vm841_vm5, %v3291_v56  ;;  %v1122_v10 = vpop.f32.mrf.mxu2  ;;  %v12570_v38 = vrot.slane %v1476_v6, 4  ;;  %v2930_v56 = vshll.u32 %v2799_v26, 16 }
  0xb1   : > { %v824_v27 = vsel %vm12064_vm10, %v647_v45, %v823_v33  ;;  %v1270_v58 = vld [vmem:[#allocation2 + $0xb8] sm:$0xf]  ;;  %v1177_v21 = vadd.f32 %v1122_v10, %v923_v63  ;;  %v2934_v42 = vshrl.u32 %v2799_v26, 16  ;;  %v924_v33 = vld [vmem:[#allocation4 + $0x90] sm:$0xff]  ;;  %v1491_v10 = vrot.slane %v1489_v11, 4 }
  0xb2   : > { %825 = vst [vmem:[#allocation2 + $0xb4] sm:$0xf] %v824_v27  ;;  %v1677_v2 = vshll.u32 %v1270_v58, 16  ;;  %v1681_v1 = vshrl.u32 %v1270_v58, 16  ;;  %v911_v63 = vld [vmem:[#allocation4 + $0x28] sm:$0xff]  ;;  %v2932_v5 = vrot.slane %v2930_v56, 5  ;;  %v1482_v37 = vor.u32 %v12572_v40, %v12570_v38 }
  0xb3   : > { %v827_v8 = vld [vmem:[#allocation2 + $0xbc] sm:$0x1]  ;;  %1195 = vst.msk [vmem:[#allocation4 + $0x18] sm:$0xff] %vm841_vm5, %v1163_v59  ;;  %v2936_v6 = vrot.slane %v2934_v42, 4  ;;  %v2801_v56 = vld [vmem:[#allocation2 + $0x30] sm:$0xf] }
  0xb4   : > { %v828_v14 = vsel %vm12006_vm4, %v657_v48, %v827_v8  ;;  %v12544_v15 = vrot.slane %v1677_v2, 5  ;;  %v1683_v16 = vrot.slane %v1681_v1, 4  ;;  %v764_v18 = vld [vmem:[#allocation2 + $0x50] sm:$0x1]  ;;  %1209 = vst.msk [vmem:[#allocation4 + $0x88] sm:$0xff] %vm841_vm5, %v1177_v21  ;;  %v2926_v1 = vrot.slane %v2924_v55, 5 }
  0xb5   : > { %829 = vst [vmem:[#allocation2 + $0xbc] sm:$0x1] %v828_v14  ;;  %v765_v22 = vsel %vm12006_vm4, %v504_v36, %v764_v18  ;;  %v2937_v21 = vor.u32 %v2936_v6, %v2932_v5 }
  0xb6   : > { %v1684_v24 = vor.u32 %v1683_v16, %v12544_v15  ;;  %766 = vst [vmem:[#allocation2 + $0x50] sm:$0x1] %v765_v22  ;;  %v1288_v41 = vld [vmem:[#allocation4 + $0x80] sm:$0xff] }
  0xb7   : > { %v771_v31 = vld [vmem:[#allocation2 + $0x5c] sm:$0x1]  ;;  %v1090_v3 = vpop.f32.mrf.mxu0  ;;  %v1841_v34 = vpop.f32.mrf.mxu3 }
  0xb8   : > { %v772_v39 = vsel %vm12006_vm4, %v521_v53, %v771_v31  ;;  %v1164_v46 = vadd.f32 %v1090_v3, %v910_v32  ;;  %v1897_v52 = vadd.f32 %v1841_v34, %v1288_v41  ;;  %v1685_v54 = vrot.slane %v1684_v24, 4  ;;  %v1125_v7 = vpop.f32.mrf.mxu2  ;;  %v1801_v14 = vpop.f32.mrf.mxu1  ;;  %v12582_v31 = vld [vmem:[#allocation2 + $0x10] sm:$0xf] }
  0xb9   : > { %v11852_v44 = vld [vmem:[#allocation2 + $0xb4] sm:$0xff]  ;;  %773 = vst [vmem:[#allocation2 + $0x5c] sm:$0x1] %v772_v39  ;;  %v2923_v53 = vrot.slane %v2921_v20, 4  ;;  %v1178_v60 = vadd.f32 %v1125_v7, %v924_v33  ;;  %v1881_v26 = vadd.f32 %v1801_v14, %v1272_v13  ;;  %v2938_v41 = vrot.slane %v2937_v21, 4 }
  0xba   : > { %v1269_v45 = vld [vmem:[#allocation2 + $0xb4] sm:$0xf]  ;;  %11128 = vmatmul.msk.bf16.gmra.mxu2 %vm841_vm5, %v11852_v44  ;;  %1196 = vst.msk [vmem:[#allocation4 + $0x20] sm:$0xff] %vm841_vm5, %v1164_v46  ;;  %v2085_v40 = vrot.slane %v12582_v31, 5  ;;  %v1483_v33 = vrot.slane %v1482_v37, 4 }
  0xbb   : > { %v1668_v36 = vshrl.u32 %v1269_v45, 16  ;;  %v1671_v48 = vshll.u32 %v1269_v45, 16  ;;  %1929 = vst.msk [vmem:[#allocation4 + $0x80] sm:$0xff] %vm841_vm5, %v1897_v52  ;;  %v2927_v18 = vor.u32 %v2926_v1, %v2923_v53  ;;  %v1289_v23 = vld [vmem:[#allocation4 + $0x88] sm:$0xff]  ;;  %v1492_v52 = vor.u32 %v1491_v10, %v12575_v51  ;;  %v1948_v7 = vld [vmem:[#allocation2 + $0xc] sm:$0xe] }
  0xbc   : > { %v1271_v59 = vld [vmem:[#allocation2 + $0xbc] sm:$0x1]  ;;  %1210 = vst.msk [vmem:[#allocation4 + $0x90] sm:$0xff] %vm841_vm5, %v1178_v60  ;;  %v2943_v53 = vsel %vm12116_vm13, %v2938_v41, %v2942_v12  ;;  %v2802_v60 = vld [vmem:[#allocation2 + $0x34] sm:$0xf]  ;;  %v912_v1 = vld [vmem:[#allocation4 + $0x30] sm:$0xff] }
  0xbd   : > { %v1670_v27 = vrot.slane %v1668_v36, 4  ;;  %v1673_v58 = vrot.slane %v1671_v48, 5  ;;  %v1687_v0 = vshll.u32 %v1271_v59, 16  ;;  %v1244_v2 = vld [vmem:[#allocation2 + $0x50] sm:$0x1]  ;;  %v2928_v39 = vrot.slane %v2927_v18, 4 }
  0xbe   : > { %v1471_v9 = vshll.u32 %v1244_v2, 16  ;;  %1913 = vst.msk [vmem:[#allocation4] sm:$0xff] %vm841_vm5, %v1881_v26  ;;  %v12604_v59 = vld [vmem:[#allocation2 + $0x14] sm:$0x1]  ;;  %v11424_v2 = vld [vmem:[%s16310_s1 + $0x10] sm:$0x3] }
  0xbf   : > { %v1674_v8 = vor.u32 %v1673_v58, %v1670_v27  ;;  %v1689_v16 = vrot.slane %v1687_v0, 5  ;;  %v1092_v22 = vpop.f32.mrf.mxu0  ;;  %v1843_v24 = vpop.f32.mrf.mxu3  ;;  %v2933_v48 = vsel %vm12116_vm13, %v2928_v39, %v2932_v5  ;;  %v3263_v27 = vunpack.c.l.b16 %v2943_v53 }
  0xc0   : > { %v1473_v30 = vrot.slane %v1471_v9, 5  ;;  %v1165_v32 = vadd.f32 %v1092_v22, %v911_v63  ;;  %v1898_v3 = vadd.f32 %v1843_v24, %v1289_v23  ;;  %v1247_v34 = vld [vmem:[#allocation2 + $0x5c] sm:$0x1]  ;;  %v3262_v55 = vunpack.c.l.b16 %v2933_v48  ;;  %v2803_v63 = vld [vmem:[#allocation2 + $0x38] sm:$0x1] }
  0xc1   : > { %v1675_v20 = vrot.slane %v1674_v8, 4  ;;  %v1690_v11 = vsel %vm12116_vm13, %v1685_v54, %v1689_v16  ;;  %v1127_v54 = vpop.f32.mrf.mxu2  ;;  %v1493_v58 = vrot.slane %v1492_v52, 4  ;;  %v2222_v0 = vpack.c.b16 %v2191_v49, %v2190_v47 }
  0xc2   : > { %v1724_v45 = vunpack.c.l.b16 %v1690_v11  ;;  %v1474_v46 = vsel %vm12116_vm13, %v12548_v17, %v1473_v30  ;;  %1197 = vst.msk [vmem:[#allocation4 + $0x28] sm:$0xff] %vm841_vm5, %v1165_v32  ;;  %v1179_v17 = vadd.f32 %v1127_v54, %v925_v50  ;;  %v2945_v9 = vshrl.u32 %v2801_v56, 16  ;;  %v1803_v30 = vpop.f32.mrf.mxu1  ;;  %v11293_v32 = vld [vmem:[%s16310_s1 + $0xa] sm:$0x3] }
  0xc3   : > { %v1680_v44 = vsel %vm12116_vm13, %v1675_v20, %v12544_v15  ;;  %v1706_v38 = vunpack.c.l.b16 %v1474_v46  ;;  %1930 = vst.msk [vmem:[#allocation4 + $0x88] sm:$0xff] %vm841_vm5, %v1898_v3  ;;  %v1495_v15 = vshll.u32 %v1247_v34, 16  ;;  %v1290_v6 = vld [vmem:[#allocation4 + $0x90] sm:$0xff]  ;;  %v2948_v10 = vshll.u32 %v2801_v56, 16  ;;  %v1273_v20 = vld [vmem:[#allocation4 + $0x8] sm:$0xff]  ;;  %v926_v3 = vld [vmem:[#allocation4 + $0xa0] sm:$0xff] }
  0xc4   : > { %v1723_v36 = vunpack.c.l.b16 %v1680_v44  ;;  %1211 = vst.msk [vmem:[#allocation4 + $0x98] sm:$0xff] %vm841_vm5, %v1179_v17  ;;  %v5412_v13 = vsel %vm1067_vm0, %v11424_v2, 0  ;;  %v11147_v25 = vrot.slane %v1948_v7, 9  ;;  %v2947_v29 = vrot.slane %v2945_v9, 4  ;;  %v913_v46 = vld [vmem:[#allocation4 + $0x38] sm:$0xff] }
  0xc5   : > { %v1731_v57 = vpack.c.b16 %v1706_v38, %v12557_v28  ;;  %v3292_v28 = vpack.c.b16 %v3263_v27, %v3262_v55  ;;  %v1497_v12 = vrot.slane %v1495_v15, 5  ;;  %v2950_v47 = vrot.slane %v2948_v10, 5  ;;  %5421 = vmatpush.bf16.msra.mxu0 %v5412_v13  ;;  %v2805_v17 = vld [vmem:[#allocation2 + $0x40] sm:$0xf]  ;;  %v3511_v7 = vld [vmem:[#allocation2 + $0x10] sm:$0xf] }
  0xc6   : > { %v1740_v42 = vpack.c.b16 %v1724_v45, %v1723_v36  ;;  %v2954_v49 = vshll.u32 %v2802_v60, 16  ;;  %v2087_v18 = vrot.slane %v2085_v40, 4  ;;  %v2088_v21 = vrot.slane %v12604_v59, 5  ;;  %v1274_v27 = vld [vmem:[#allocation4 + $0x10] sm:$0xff] }
  0xc7   : > { %11136 = vmatmul.msk.bf16.gmra.mxu1 %vm841_vm5, %v1731_v57  ;;  %v1095_v5 = vpop.f32.mrf.mxu0  ;;  %v1846_v8 = vpop.f32.mrf.mxu3  ;;  %11263 = vmatmul.msk.bf16.gmra.mxu0 %vm841_vm5, %v3292_v28  ;;  %v2958_v22 = vshrl.u32 %v2802_v60, 16  ;;  %v2964_v23 = vshll.u32 %v2803_v63, 16  ;;  %v2951_v24 = vor.u32 %v2950_v47, %v2947_v29  ;;  %v1488_v34 = vsel %vm12116_vm13, %v1483_v33, %v12575_v51  ;;  %v2804_v51 = vld [vmem:[#allocation2 + $0x3c] sm:$0xf]  ;;  %v11853_v63 = vld [vmem:[#allocation2 + $0xc] sm:$0xff] }
  0xc8   : > { %11145 = vmatmul.msk.bf16.gmra.mxu3 %vm841_vm5, %v1740_v42  ;;  %v1166_v14 = vadd.f32 %v1095_v5, %v912_v1  ;;  %v1899_v16 = vadd.f32 %v1846_v8, %v1290_v6  ;;  %v2956_v26 = vrot.slane %v2954_v49, 5  ;;  %v1498_v37 = vsel %vm12116_vm13, %v1493_v58, %v1497_v12  ;;  %v927_v58 = vld [vmem:[#allocation4 + $0xa8] sm:$0xff]  ;;  %v2806_v13 = vld [vmem:[#allocation2 + $0x44] sm:$0x1] }
  0xc9   : > { %v1130_v11 = vpop.f32.mrf.mxu2  ;;  %v2960_v39 = vrot.slane %v2958_v22, 4  ;;  %v1882_v41 = vadd.f32 %v1803_v30, %v1273_v20  ;;  %v2952_v50 = vrot.slane %v2951_v24, 4  ;;  %v3849_v44 = vsel %vm1067_vm0, %v11293_v32, 0  ;;  %v1952_v8 = vld [vmem:[#allocation2 + $0x1c] sm:$0xf] }
  0xca   : > { %1198 = vst.msk [vmem:[#allocation4 + $0x30] sm:$0xff] %vm841_vm5, %v1166_v14  ;;  %11163 = vmatmul.msk.bf16.vlgmr.msrb.gmra.mxu2 %vm841_vm5, %v2222_v0  ;;  %v1180_v45 = vadd.f32 %v1130_v11, %v926_v3  ;;  %v2086_v52 = vsel %vm12537_vm2, %v11147_v25, %v2085_v40  ;;  %v2966_v38 = vrot.slane %v2964_v23, 5  ;;  %3858 = vmatpush.bf16.msrb.mxu1 %v3849_v44  ;;  %v1707_v48 = vunpack.c.l.b16 %v1488_v34  ;;  %v3512_v25 = vld [vmem:[#allocation2 + $0x14] sm:$0x1] }
  0xcb   : > { %1931 = vst.msk [vmem:[#allocation4 + $0x90] sm:$0xff] %vm841_vm5, %v1899_v16  ;;  %v2961_v36 = vor.u32 %v2960_v39, %v2956_v26  ;;  %v1708_v54 = vunpack.c.l.b16 %v1498_v37  ;;  %v2957_v15 = vsel %vm12116_vm13, %v2952_v50, %v2956_v26  ;;  %v2969_v31 = vshrl.u32 %v2804_v51, 16  ;;  %v1291_v57 = vld [vmem:[#allocation4 + $0x98] sm:$0xff]  ;;  %v914_v11 = vld [vmem:[#allocation4 + $0x40] sm:$0xff] }
  0xcc   : > { %1914 = vst.msk [vmem:[#allocation4 + $0x8] sm:$0xff] %vm841_vm5, %v1882_v41  ;;  %v2089_v40 = vsel %vm12537_vm2, %v2087_v18, %v2088_v21  ;;  %v3264_v33 = vunpack.c.l.b16 %v2957_v15  ;;  %v2972_v60 = vshll.u32 %v2804_v51, 16  ;;  %v2192_v0 = vunpack.c.l.b16 %v2086_v52  ;;  %v3510_v16 = vld [vmem:[#allocation2 + $0xc] sm:$0xe]  ;;  %v1951_v21 = vld [vmem:[#allocation2 + $0x18] sm:$0xe] }
  0xcd   : > { %1212 = vst.msk [vmem:[#allocation4 + $0xa0] sm:$0xff] %vm841_vm5, %v1180_v45  ;;  %v2962_v56 = vrot.slane %v2961_v36, 4  ;;  %v2971_v2 = vrot.slane %v2969_v31, 4  ;;  %v2978_v1 = vshll.u32 %v2805_v17, 16  ;;  %v1732_v5 = vpack.c.b16 %v1708_v54, %v1707_v48  ;;  %v1953_v41 = vld [vmem:[#allocation2 + $0x20] sm:$0x1] }
  0xce   : > { %v2193_v6 = vunpack.c.l.b16 %v2089_v40  ;;  %v2974_v14 = vrot.slane %v2972_v60, 5  ;;  %v3640_v29 = vrot.slane %v3511_v7, 5  ;;  %v2982_v24 = vshrl.u32 %v2805_v17, 16  ;;  %v928_v17 = vld [vmem:[#allocation4 + $0xb0] sm:$0xff]  ;;  %v2807_v60 = vld [vmem:[#allocation2 + $0x48] sm:$0xf] }
  0xcf   : > { %v1097_v53 = vpop.f32.mrf.mxu0  ;;  %v1848_v55 = vpop.f32.mrf.mxu3  ;;  %v2967_v28 = vsel %vm12116_vm13, %v2962_v56, %v2966_v38  ;;  %v2980_v23 = vrot.slane %v2978_v1, 5  ;;  %v2988_v26 = vshll.u32 %v2806_v13, 16  ;;  %v2092_v30 = vrot.slane %v1952_v8, 5 }
  0xd0   : > { %v1167_v42 = vadd.f32 %v1097_v53, %v913_v46  ;;  %v1900_v59 = vadd.f32 %v1848_v55, %v1291_v57  ;;  %v3265_v9 = vunpack.c.l.b16 %v2967_v28  ;;  %v2975_v22 = vor.u32 %v2974_v14, %v2971_v2  ;;  %v1275_v53 = vld [vmem:[#allocation4 + $0x18] sm:$0xff] }
  0xd1   : > { %v1132_v12 = vpop.f32.mrf.mxu2  ;;  %v2223_v20 = vpack.c.b16 %v2193_v6, %v2192_v0  ;;  %v11277_v32 = vrot.slane %v3510_v16, 9  ;;  %v3643_v3 = vrot.slane %v3512_v25, 5  ;;  %v3642_v50 = vrot.slane %v3640_v29, 4 }
  0xd2   : > { %1199 = vst.msk [vmem:[#allocation4 + $0x38] sm:$0xff] %vm841_vm5, %v1167_v42  ;;  %v1181_v49 = vadd.f32 %v1132_v12, %v927_v58  ;;  %v3293_v18 = vpack.c.b16 %v3265_v9, %v3264_v33  ;;  %v2984_v46 = vrot.slane %v2982_v24, 4  ;;  %v11148_v52 = vrot.slane %v1951_v21, 9  ;;  %v915_v33 = vld [vmem:[#allocation4 + $0x48] sm:$0xff] }
  0xd3   : > { %1932 = vst.msk [vmem:[#allocation4 + $0x98] sm:$0xff] %vm841_vm5, %v1900_v59  ;;  %v2976_v36 = vrot.slane %v2975_v22, 4  ;;  %v2990_v51 = vrot.slane %v2988_v26, 5  ;;  %v2094_v48 = vrot.slane %v2092_v30, 4  ;;  %v2095_v54 = vrot.slane %v1953_v41, 5 }
  0xd4   : > { %1213 = vst.msk [vmem:[#allocation4 + $0xa8] sm:$0xff] %vm841_vm5, %v1181_v49  ;;  %v1292_v37 = vld [vmem:[#allocation4 + $0xa0] sm:$0xff]  ;;  %v2985_v38 = vor.u32 %v2984_v46, %v2980_v23  ;;  %v3641_v15 = vsel %vm12537_vm2, %v11277_v32, %v3640_v29  ;;  %v3644_v40 = vsel %vm12537_vm2, %v3642_v50, %v3643_v3  ;;  %v2093_v7 = vsel %vm12537_vm2, %v11148_v52, %v2092_v30  ;;  %v1955_v50 = vld [vmem:[#allocation2 + $0x28] sm:$0xf] }
  0xd5   : > { %v1806_v10 = vpop.f32.mrf.mxu1  ;;  %v3752_v59 = vunpack.c.l.b16 %v3641_v15  ;;  %v3753_v0 = vunpack.c.l.b16 %v3644_v40  ;;  %v2996_v6 = vshll.u32 %v2807_v60, 16  ;;  %v2096_v9 = vsel %vm12537_vm2, %v2094_v48, %v2095_v54  ;;  %v1276_v29 = vld [vmem:[#allocation4 + $0x20] sm:$0xff]  ;;  %v916_v54 = vld [vmem:[#allocation4 + $0x50] sm:$0xff] }
  0xd6   : > { %v1883_v47 = vadd.f32 %v1806_v10, %v1274_v27  ;;  %v2986_v56 = vrot.slane %v2985_v38, 4  ;;  %v2981_v27 = vsel %vm12116_vm13, %v2976_v36, %v2980_v23  ;;  %v3514_v10 = vld [vmem:[#allocation2 + $0x1c] sm:$0xf]  ;;  %v2194_v24 = vunpack.c.l.b16 %v2093_v7 }
  0xd7   : > { %11137 = vmatmul.msk.bf16.gmra.mxu1 %vm841_vm5, %v1732_v5  ;;  %v1100_v34 = vpop.f32.mrf.mxu0  ;;  %11264 = vmatmul.msk.bf16.gmra.mxu0 %vm841_vm5, %v3293_v18  ;;  %v2993_v5 = vshrl.u32 %v2807_v60, 16  ;;  %v3266_v16 = vunpack.c.l.b16 %v2981_v27  ;;  %v2998_v18 = vrot.slane %v2996_v6, 5  ;;  %v11854_v23 = vld [vmem:[#allocation2 + $0x18] sm:$0xff]  ;;  %v2195_v26 = vunpack.c.l.b16 %v2096_v9 }
  0xd8   : > { %1915 = vst.msk [vmem:[#allocation4 + $0x10] sm:$0xff] %vm841_vm5, %v1883_v47  ;;  %11244 = vmatmul.msk.bf16.vlgmr.msrb.gmra.mxu3 %vm841_vm5, %v11853_v63  ;;  %v1168_v44 = vadd.f32 %v1100_v34, %v914_v11  ;;  %v2991_v58 = vsel %vm12116_vm13, %v2986_v56, %v2990_v51  ;;  %v2808_v63 = vld [vmem:[#allocation2 + $0x4c] sm:$0xf]  ;;  %v3647_v30 = vrot.slane %v3514_v10, 5  ;;  %v2809_v11 = vld [vmem:[#allocation2 + $0x50] sm:$0x1] }
  0xd9   : > { %v1851_v39 = vpop.f32.mrf.mxu3  ;;  %v1135_v31 = vpop.f32.mrf.mxu2  ;;  %v3002_v8 = vshll.u32 %v2808_v63, 16  ;;  %v3006_v14 = vshrl.u32 %v2808_v63, 16  ;;  %v3267_v25 = vunpack.c.l.b16 %v2991_v58  ;;  %v929_v47 = vld [vmem:[#allocation4 + $0xb8] sm:$0xff]  ;;  %v2995_v49 = vrot.slane %v2993_v5, 4  ;;  %v3513_v34 = vld [vmem:[#allocation2 + $0x18] sm:$0xe] }
  0xda   : > { %v1901_v45 = vadd.f32 %v1851_v39, %v1292_v37  ;;  %1200 = vst.msk [vmem:[#allocation4 + $0x40] sm:$0xff] %vm841_vm5, %v1168_v44  ;;  %11164 = vmatmul.msk.bf16.gmra.mxu2 %vm841_vm5, %v2223_v20  ;;  %v1182_v57 = vadd.f32 %v1135_v31, %v928_v17  ;;  %v3784_v20 = vpack.c.b16 %v3753_v0, %v3752_v59  ;;  %v3515_v37 = vld [vmem:[#allocation2 + $0x20] sm:$0x1]  ;;  %v3012_v52 = vshll.u32 %v2809_v11, 16  ;;  %v1954_v17 = vld [vmem:[#allocation2 + $0x24] sm:$0xe] }
  0xdb   : > { %v1293_v2 = vld [vmem:[#allocation4 + $0xa8] sm:$0xff]  ;;  %v12670_v21 = vrot.slane %v3002_v8, 5  ;;  %v3008_v22 = vrot.slane %v3006_v14, 4  ;;  %v3294_v44 = vpack.c.b16 %v3267_v25, %v3266_v16  ;;  %v2224_v36 = vpack.c.b16 %v2195_v26, %v2194_v24  ;;  %v930_v0 = vld [vmem:[#allocation4 + $0xc0] sm:$0xff]  ;;  %v917_v8 = vld [vmem:[#allocation4 + $0x58] sm:$0xff] }
  0xdc   : > { %1933 = vst.msk [vmem:[#allocation4 + $0xa0] sm:$0xff] %vm841_vm5, %v1901_v45  ;;  %v2999_v45 = vor.u32 %v2998_v18, %v2995_v49  ;;  %v11278_v38 = vrot.slane %v3513_v34, 9  ;;  %v3649_v51 = vrot.slane %v3647_v30, 4  ;;  %v3650_v48 = vrot.slane %v3515_v37, 5  ;;  %v1277_v60 = vld [vmem:[#allocation4 + $0x28] sm:$0xff]  ;;  %v1278_v34 = vld [vmem:[#allocation4 + $0x30] sm:$0xff] }
  0xdd   : > { %v1808_v55 = vpop.f32.mrf.mxu1  ;;  %1214 = vst.msk [vmem:[#allocation4 + $0xb0] sm:$0xff] %vm841_vm5, %v1182_v57  ;;  %v3009_v46 = vor.u32 %v3008_v22, %v12670_v21  ;;  %v2099_v31 = vrot.slane %v1955_v50, 5  ;;  %v3014_v7 = vrot.slane %v3012_v52, 5  ;;  %v11149_v59 = vrot.slane %v1954_v17, 9  ;;  %v2810_v14 = vld [vmem:[#allocation2 + $0x54] sm:$0xf] }
  0xde   : > { %v1884_v42 = vadd.f32 %v1808_v55, %v1275_v53  ;;  %v3000_v57 = vrot.slane %v2999_v45, 4  ;;  %v3648_v27 = vsel %vm12537_vm2, %v11278_v38, %v3647_v30  ;;  %v3651_v58 = vsel %vm12537_vm2, %v3649_v51, %v3650_v48  ;;  %v2811_v16 = vld [vmem:[#allocation2 + $0x58] sm:$0xf]  ;;  %v2812_v38 = vld [vmem:[#allocation2 + $0x5c] sm:$0x1] }
  0xdf   : > { %v1102_v28 = vpop.f32.mrf.mxu0  ;;  %v3754_v9 = vunpack.c.l.b16 %v3648_v27  ;;  %v3755_v10 = vunpack.c.l.b16 %v3651_v58  ;;  %v3017_v49 = vshrl.u32 %v2810_v14, 16  ;;  %v3020_v18 = vshll.u32 %v2810_v14, 16  ;;  %v931_v11 = vld [vmem:[#allocation4 + $0xc8] sm:$0xff]  ;;  %v3516_v51 = vld [vmem:[#allocation2 + $0x24] sm:$0xe] }
  0xe0   : > { %1916 = vst.msk [vmem:[#allocation4 + $0x18] sm:$0xff] %vm841_vm5, %v1884_v42  ;;  %v1169_v12 = vadd.f32 %v1102_v28, %v915_v33  ;;  %v1956_v42 = vld [vmem:[#allocation2 + $0x2c] sm:$0x1]  ;;  %v3010_v33 = vrot.slane %v3009_v46, 4  ;;  %v3026_v22 = vshll.u32 %v2811_v16, 16  ;;  %v2100_v24 = vsel %vm12537_vm2, %v11149_v59, %v2099_v31 }
  0xe1   : > { %v1853_v1 = vpop.f32.mrf.mxu3  ;;  %v1137_v3 = vpop.f32.mrf.mxu2  ;;  %v3019_v37 = vrot.slane %v3017_v49, 4  ;;  %v2196_v45 = vunpack.c.l.b16 %v2100_v24  ;;  %v3785_v52 = vpack.c.b16 %v3755_v10, %v3754_v9  ;;  %v3518_v17 = vld [vmem:[#allocation2 + $0x2c] sm:$0x1] }
  0xe2   : > { %v1902_v13 = vadd.f32 %v1853_v1, %v1293_v2  ;;  %1201 = vst.msk [vmem:[#allocation4 + $0x48] sm:$0xff] %vm841_vm5, %v1169_v12  ;;  %v1183_v41 = vadd.f32 %v1137_v3, %v929_v47  ;;  %v2101_v2 = vrot.slane %v2099_v31, 4  ;;  %v2102_v1 = vrot.slane %v1956_v42, 5  ;;  %v3517_v3 = vld [vmem:[#allocation2 + $0x28] sm:$0xf] }
  0xe3   : > { %v3005_v12 = vsel %vm12116_vm13, %v3000_v57, %v12670_v21  ;;  %v3654_v48 = vrot.slane %v3517_v3, 5  ;;  %v3036_v42 = vshll.u32 %v2812_v38, 16  ;;  %v3657_v58 = vrot.slane %v3518_v17, 5 }
  0xe4   : > { %1934 = vst.msk [vmem:[#allocation4 + $0xa8] sm:$0xff] %vm841_vm5, %v1902_v13  ;;  %v1294_v53 = vld [vmem:[#allocation4 + $0xb0] sm:$0xff]  ;;  %v3015_v13 = vsel %vm12116_vm13, %v3010_v33, %v3014_v7  ;;  %v2103_v21 = vsel %vm12537_vm2, %v2101_v2, %v2102_v1  ;;  %v3268_v30 = vunpack.c.l.b16 %v3005_v12  ;;  %v11279_v33 = vrot.slane %v3516_v51, 9  ;;  %v1279_v12 = vld [vmem:[#allocation4 + $0x38] sm:$0xff] }
  0xe5   : > { %v1811_v32 = vpop.f32.mrf.mxu1  ;;  %1215 = vst.msk [vmem:[#allocation4 + $0xb8] sm:$0xff] %vm841_vm5, %v1183_v41  ;;  %v12698_v41 = vrot.slane %v3026_v22, 5  ;;  %v2197_v46 = vunpack.c.l.b16 %v2103_v21  ;;  %v3656_v27 = vrot.slane %v3654_v48, 4  ;;  %v933_v51 = vld [vmem:[#allocation4 + $0xd8] sm:$0xff] }
  0xe6   : > { %v1885_v39 = vadd.f32 %v1811_v32, %v1276_v29  ;;  %v3269_v32 = vunpack.c.l.b16 %v3015_v13  ;;  %v3655_v9 = vsel %vm12537_vm2, %v11279_v33, %v3654_v48  ;;  %v932_v13 = vld [vmem:[#allocation4 + $0xd0] sm:$0xff] }
  0xe7   : > { %11294 = vmatmul.msk.bf16.vlgmr.msrb.gmra.mxu1 %vm841_vm5, %v3784_v20  ;;  %11265 = vmatmul.msk.bf16.gmra.mxu0 %vm841_vm5, %v3294_v44  ;;  %v11855_v44 = vld [vmem:[#allocation2 + $0x24] sm:$0xff]  ;;  %v2225_v57 = vpack.c.b16 %v2197_v46, %v2196_v45 }
  0xe8   : > { %1917 = vst.msk [vmem:[#allocation4 + $0x20] sm:$0xff] %vm841_vm5, %v1885_v39  ;;  %11245 = vmatmul.msk.bf16.gmra.mxu3 %vm841_vm5, %v11854_v23  ;;  %v3030_v23 = vshrl.u32 %v2811_v16, 16  ;;  %v3022_v39 = vrot.slane %v3020_v18, 5 }
  0xe9   : > { %v1105_v15 = vpop.f32.mrf.mxu0  ;;  %v1856_v55 = vpop.f32.mrf.mxu3 }
  0xea   : > { %v1170_v40 = vadd.f32 %v1105_v15, %v916_v54  ;;  %v1903_v56 = vadd.f32 %v1856_v55, %v1294_v53  ;;  %11165 = vmatmul.msk.bf16.gmra.mxu2 %vm841_vm5, %v2224_v36  ;;  %v1140_v28 = vpop.f32.mrf.mxu2  ;;  %v3032_v50 = vrot.slane %v3030_v23, 4  ;;  %v1958_v53 = vld [vmem:[#allocation2 + $0x34] sm:$0xf]  ;;  %v3295_v55 = vpack.c.b16 %v3269_v32, %v3268_v30 }
  0xeb   : > { %v1184_v6 = vadd.f32 %v1140_v28, %v930_v0  ;;  %v2106_v59 = vrot.slane %v1958_v53, 5  ;;  %v1957_v0 = vld [vmem:[#allocation2 + $0x30] sm:$0xe]  ;;  %v1959_v28 = vld [vmem:[#allocation2 + $0x38] sm:$0x1]  ;;  %v3756_v23 = vunpack.c.l.b16 %v3655_v9 }
  0xec   : > { %1202 = vst.msk [vmem:[#allocation4 + $0x50] sm:$0xff] %vm841_vm5, %v1170_v40  ;;  %v1295_v29 = vld [vmem:[#allocation4 + $0xb8] sm:$0xff]  ;;  %v3023_v40 = vor.u32 %v3022_v39, %v3019_v37  ;;  %v11150_v14 = vrot.slane %v1957_v0, 9  ;;  %v919_v39 = vld [vmem:[#allocation4 + $0x68] sm:$0xff] }
  0xed   : > { %1935 = vst.msk [vmem:[#allocation4 + $0xb0] sm:$0xff] %vm841_vm5, %v1903_v56  ;;  %v1813_v63 = vpop.f32.mrf.mxu1  ;;  %v3033_v56 = vor.u32 %v3032_v50, %v12698_v41  ;;  %v2108_v16 = vrot.slane %v2106_v59, 4 }
  0xee   : > { %v1886_v5 = vadd.f32 %v1813_v63, %v1277_v60  ;;  %1216 = vst.msk [vmem:[#allocation4 + $0xc0] sm:$0xff] %vm841_vm5, %v1184_v6  ;;  %v918_v60 = vld [vmem:[#allocation4 + $0x60] sm:$0xff] }
  0xef   : > { %v3034_v6 = vrot.slane %v3033_v56, 4 }
  0xf0   : > { %1918 = vst.msk [vmem:[#allocation4 + $0x28] sm:$0xff] %vm841_vm5, %v1886_v5  ;;  %v3024_v5 = vrot.slane %v3023_v40, 4 }
  0xf1   : > { %v1107_v25 = vpop.f32.mrf.mxu0  ;;  %v1858_v47 = vpop.f32.mrf.mxu3 }
  0xf2   : > { %v1171_v26 = vadd.f32 %v1107_v25, %v917_v8  ;;  %v1904_v20 = vadd.f32 %v1858_v47, %v1295_v29  ;;  %v1142_v36 = vpop.f32.mrf.mxu2  ;;  %v3038_v8 = vrot.slane %v3036_v42, 5  ;;  %v2109_v25 = vrot.slane %v1959_v28, 5  ;;  %v2815_v42 = vld [vmem:[#allocation2 + $0x68] sm:$0x1] }
  0xf3   : > { %v1185_v15 = vadd.f32 %v1142_v36, %v931_v11  ;;  %v3658_v29 = vsel %vm12537_vm2, %v3656_v27, %v3657_v58  ;;  %v3029_v24 = vsel %vm12116_vm13, %v3024_v5, %v12698_v41  ;;  %v1961_v27 = vld [vmem:[#allocation2 + $0x40] sm:$0xf] }
  0xf4   : > { %1203 = vst.msk [vmem:[#allocation4 + $0x58] sm:$0xff] %vm841_vm5, %v1171_v26  ;;  %v3039_v21 = vsel %vm12116_vm13, %v3034_v6, %v3038_v8  ;;  %v2813_v26 = vld [vmem:[#allocation2 + $0x60] sm:$0xf]  ;;  %v3757_v30 = vunpack.c.l.b16 %v3658_v29  ;;  %v2110_v37 = vsel %vm12537_vm2, %v2108_v16, %v2109_v25  ;;  %v3270_v45 = vunpack.c.l.b16 %v3029_v24  ;;  %v1960_v6 = vld [vmem:[#allocation2 + $0x3c] sm:$0xe] }
  0xf5   : > { %1936 = vst.msk [vmem:[#allocation4 + $0xb8] sm:$0xff] %vm841_vm5, %v1904_v20  ;;  %v1296_v7 = vld [vmem:[#allocation4 + $0xc0] sm:$0xff]  ;;  %v2814_v20 = vld [vmem:[#allocation2 + $0x64] sm:$0xf]  ;;  %v3041_v32 = vshrl.u32 %v2813_v26, 16  ;;  %v3044_v3 = vshll.u32 %v2813_v26, 16  ;;  %v3271_v46 = vunpack.c.l.b16 %v3039_v21 }
  0xf6   : > { %1217 = vst.msk [vmem:[#allocation4 + $0xc8] sm:$0xff] %vm841_vm5, %v1185_v15  ;;  %v3050_v11 = vshll.u32 %v2814_v20, 16  ;;  %v3786_v40 = vpack.c.b16 %v3757_v30, %v3756_v23  ;;  %v1962_v16 = vld [vmem:[#allocation2 + $0x44] sm:$0x1]  ;;  %v11151_v25 = vrot.slane %v1960_v6, 9  ;;  %v935_v6 = vld [vmem:[#allocation4 + $0xe8] sm:$0xff] }
  0xf7   : > { %v1816_v54 = vpop.f32.mrf.mxu1  ;;  %11295 = vmatmul.msk.bf16.gmra.mxu1 %vm841_vm5, %v3785_v52  ;;  %11266 = vmatmul.msk.bf16.gmra.mxu0 %vm841_vm5, %v3295_v55  ;;  %v3520_v52 = vld [vmem:[#allocation2 + $0x34] sm:$0xf]  ;;  %v3043_v48 = vrot.slane %v3041_v32, 4  ;;  %v3296_v58 = vpack.c.b16 %v3271_v46, %v3270_v45  ;;  %v920_v29 = vld [vmem:[#allocation4 + $0x70] sm:$0xff]  ;;  %v2116_v26 = vrot.slane %v1962_v16, 5  ;;  %v1281_v32 = vld [vmem:[#allocation4 + $0x48] sm:$0xff] }
  0xf8   : > { %v1887_v31 = vadd.f32 %v1816_v54, %v1278_v34  ;;  %11246 = vmatmul.msk.bf16.gmra.mxu3 %vm841_vm5, %v11855_v44  ;;  %v2107_v34 = vsel %vm12537_vm2, %v11150_v14, %v2106_v59  ;;  %v3054_v44 = vshrl.u32 %v2814_v20, 16  ;;  %v3046_v54 = vrot.slane %v3044_v3, 5  ;;  %v11856_v55 = vld [vmem:[#allocation2 + $0x30] sm:$0xff]  ;;  %v2816_v45 = vld [vmem:[#allocation2 + $0x6c] sm:$0xf] }
  0xf9   : > { %v12725_v15 = vrot.slane %v3050_v11, 5  ;;  %v2198_v17 = vunpack.c.l.b16 %v2107_v34  ;;  %v3661_v33 = vrot.slane %v3520_v52, 5  ;;  %v934_v3 = vld [vmem:[#allocation4 + $0xe0] sm:$0xff] }
  0xfa   : > { %1919 = vst.msk [vmem:[#allocation4 + $0x30] sm:$0xff] %vm841_vm5, %v1887_v31  ;;  %11166 = vmatmul.msk.bf16.gmra.mxu2 %vm841_vm5, %v2225_v57  ;;  %v3056_v53 = vrot.slane %v3054_v44, 4  ;;  %v2199_v31 = vunpack.c.l.b16 %v2110_v37  ;;  %v3519_v57 = vld [vmem:[#allocation2 + $0x30] sm:$0xe]  ;;  %v3047_v28 = vor.u32 %v3046_v54, %v3043_v48  ;;  %v3068_v54 = vshll.u32 %v2816_v45, 16 }
  0xfb   : > { %v1861_v63 = vpop.f32.mrf.mxu3  ;;  %v11280_v8 = vrot.slane %v3519_v57, 9  ;;  %v2817_v46 = vld [vmem:[#allocation2 + $0x70] sm:$0xf] }
  0xfc   : > { %v1905_v2 = vadd.f32 %v1861_v63, %v1296_v7  ;;  %v1110_v1 = vpop.f32.mrf.mxu0  ;;  %v1280_v7 = vld [vmem:[#allocation4 + $0x40] sm:$0xff]  ;;  %v2226_v5 = vpack.c.b16 %v2199_v31, %v2198_v17  ;;  %v3523_v31 = vld [vmem:[#allocation2 + $0x40] sm:$0xf] }
  0xfd   : > { %v1172_v10 = vadd.f32 %v1110_v1, %v918_v60  ;;  %v1297_v41 = vld [vmem:[#allocation4 + $0xc8] sm:$0xff]  ;;  %v3060_v1 = vshll.u32 %v2815_v42, 16  ;;  %v3662_v23 = vsel %vm12537_vm2, %v11280_v8, %v3661_v33  ;;  %v1964_v8 = vld [vmem:[#allocation2 + $0x4c] sm:$0xf] }
  0xfe   : > { %1937 = vst.msk [vmem:[#allocation4 + $0xc0] sm:$0xff] %vm841_vm5, %v1905_v2  ;;  %v1145_v49 = vpop.f32.mrf.mxu2  ;;  %v3521_v60 = vld [vmem:[#allocation2 + $0x38] sm:$0x1]  ;;  %v3057_v2 = vor.u32 %v3056_v53, %v12725_v15  ;;  %v3758_v37 = vunpack.c.l.b16 %v3662_v23  ;;  %v3074_v53 = vshll.u32 %v2817_v46, 16 }
  0xff   : > { %v1818_v47 = vpop.f32.mrf.mxu1  ;;  %1204 = vst.msk [vmem:[#allocation4 + $0x60] sm:$0xff] %vm841_vm5, %v1172_v10  ;;  %v1186_v22 = vadd.f32 %v1145_v49, %v932_v13  ;;  %v2113_v10 = vrot.slane %v1961_v27, 5  ;;  %v3664_v13 = vrot.slane %v3521_v60, 5  ;;  %v3048_v49 = vrot.slane %v3047_v28, 4  ;;  %v11857_v27 = vld [vmem:[#allocation2 + $0x3c] sm:$0xff] }
 0x100   : > { %v1888_v18 = vadd.f32 %v1818_v47, %v1279_v12  ;;  %v3663_v12 = vrot.slane %v3661_v33, 4 }
 0x101   : > { %1218 = vst.msk [vmem:[#allocation4 + $0xd0] sm:$0xff] %vm841_vm5, %v1186_v22  ;;  %v3062_v22 = vrot.slane %v3060_v1, 5  ;;  %v2115_v21 = vrot.slane %v2113_v10, 4  ;;  %v2114_v34 = vsel %vm12537_vm2, %v11151_v25, %v2113_v10  ;;  %v3668_v1 = vrot.slane %v3523_v31, 5  ;;  %v3524_v10 = vld [vmem:[#allocation2 + $0x44] sm:$0x1] }
 0x102   : > { %1920 = vst.msk [vmem:[#allocation4 + $0x38] sm:$0xff] %vm841_vm5, %v1888_v18  ;;  %v3058_v18 = vrot.slane %v3057_v2, 4  ;;  %v3665_v20 = vsel %vm12537_vm2, %v3663_v12, %v3664_v13  ;;  %v3522_v2 = vld [vmem:[#allocation2 + $0x3c] sm:$0xe]  ;;  %v3671_v23 = vrot.slane %v3524_v10, 5 }
 0x103   : > { %v1863_v50 = vpop.f32.mrf.mxu3  ;;  %v3759_v52 = vunpack.c.l.b16 %v3665_v20  ;;  %v2117_v48 = vsel %vm12537_vm2, %v2115_v21, %v2116_v26  ;;  %v1963_v21 = vld [vmem:[#allocation2 + $0x48] sm:$0xe]  ;;  %v1965_v26 = vld [vmem:[#allocation2 + $0x50] sm:$0x1] }
 0x104   : > { %v1906_v36 = vadd.f32 %v1863_v50, %v1297_v41  ;;  %v1112_v38 = vpop.f32.mrf.mxu0  ;;  %v3063_v41 = vsel %vm12116_vm13, %v3058_v18, %v3062_v22  ;;  %v2120_v18 = vrot.slane %v1964_v8, 5  ;;  %v3670_v22 = vrot.slane %v3668_v1, 4  ;;  %v3525_v8 = vld [vmem:[#allocation2 + $0x48] sm:$0xe] }
 0x105   : > { %v1173_v56 = vadd.f32 %v1112_v38, %v919_v39  ;;  %v3053_v39 = vsel %vm12116_vm13, %v3048_v49, %v12725_v15  ;;  %v3273_v17 = vunpack.c.l.b16 %v3063_v41  ;;  %v3787_v60 = vpack.c.b16 %v3759_v52, %v3758_v37 }
 0x106   : > { %1938 = vst.msk [vmem:[#allocation4 + $0xc8] sm:$0xff] %vm841_vm5, %v1906_v36  ;;  %v1147_v59 = vpop.f32.mrf.mxu2  ;;  %v3272_v15 = vunpack.c.l.b16 %v3053_v39  ;;  %v11152_v39 = vrot.slane %v1963_v21, 9  ;;  %v2122_v41 = vrot.slane %v2120_v18, 4 }
 0x107   : > { %1205 = vst.msk [vmem:[#allocation4 + $0x68] sm:$0xff] %vm841_vm5, %v1173_v56  ;;  %v1187_v63 = vadd.f32 %v1147_v59, %v933_v51  ;;  %11296 = vmatmul.msk.bf16.gmra.mxu1 %vm841_vm5, %v3786_v40  ;;  %11267 = vmatmul.msk.bf16.gmra.mxu0 %vm841_vm5, %v3296_v58  ;;  %v3065_v51 = vshrl.u32 %v2816_v45, 16  ;;  %v2200_v40 = vunpack.c.l.b16 %v2114_v34  ;;  %v921_v56 = vld [vmem:[#allocation4 + $0x78] sm:$0xff]  ;;  %v12753_v59 = vrot.slane %v3074_v53, 5 }
 0x108   : > { %11247 = vmatmul.msk.bf16.gmra.mxu3 %vm841_vm5, %v11856_v55  ;;  %v1298_v14 = vld [vmem:[#allocation4 + $0xd0] sm:$0xff]  ;;  %v3078_v55 = vshrl.u32 %v2817_v46, 16  ;;  %v2201_v58 = vunpack.c.l.b16 %v2117_v48  ;;  %v2819_v48 = vld [vmem:[#allocation2 + $0x78] sm:$0xf]  ;;  %v2121_v31 = vsel %vm12537_vm2, %v11152_v39, %v2120_v18 }
 0x109   : > { %v1821_v0 = vpop.f32.mrf.mxu1  ;;  %1219 = vst.msk [vmem:[#allocation4 + $0xd8] sm:$0xff] %vm841_vm5, %v1187_v63  ;;  %v3067_v33 = vrot.slane %v3065_v51, 4 }
 0x10a   : > { %v1889_v9 = vadd.f32 %v1821_v0, %v1280_v7  ;;  %11167 = vmatmul.msk.bf16.gmra.mxu2 %vm841_vm5, %v2226_v5  ;;  %v3070_v7 = vrot.slane %v3068_v54, 5  ;;  %v2818_v0 = vld [vmem:[#allocation2 + $0x74] sm:$0x1]  ;;  %v3080_v28 = vrot.slane %v3078_v55, 4  ;;  %v2820_v54 = vld [vmem:[#allocation2 + $0x7c] sm:$0xf] }
 0x10b   : > { %v3084_v25 = vshll.u32 %v2818_v0, 16  ;;  %v3089_v55 = vshrl.u32 %v2819_v48, 16  ;;  %v11858_v0 = vld [vmem:[#allocation2 + $0x48] sm:$0xff] }
 0x10c   : > { %1921 = vst.msk [vmem:[#allocation4 + $0x40] sm:$0xff] %vm841_vm5, %v1889_v9  ;;  %v3297_v9 = vpack.c.b16 %v3273_v17, %v3272_v15  ;;  %v3081_v16 = vor.u32 %v3080_v28, %v12753_v59  ;;  %v3092_v15 = vshll.u32 %v2819_v48, 16  ;;  %v3098_v17 = vshll.u32 %v2820_v54, 16 }
 0x10d   : > { %v1866_v47 = vpop.f32.mrf.mxu3  ;;  %v1115_v30 = vpop.f32.mrf.mxu0  ;;  %v2202_v28 = vunpack.c.l.b16 %v2121_v31 }
 0x10e   : > { %v1907_v24 = vadd.f32 %v1866_v47, %v1298_v14  ;;  %v1174_v11 = vadd.f32 %v1115_v30, %v920_v29  ;;  %v3071_v14 = vor.u32 %v3070_v7, %v3067_v33  ;;  %v2227_v29 = vpack.c.b16 %v2201_v58, %v2200_v40  ;;  %v3526_v7 = vld [vmem:[#allocation2 + $0x4c] sm:$0xf] }
 0x10f   : > { %v1150_v44 = vpop.f32.mrf.mxu2  ;;  %v11281_v47 = vrot.slane %v3522_v2, 9  ;;  %v3094_v58 = vrot.slane %v3092_v15, 5 }
 0x110   : > { %1939 = vst.msk [vmem:[#allocation4 + $0xd0] sm:$0xff] %vm841_vm5, %v1907_v24  ;;  %v1188_v38 = vadd.f32 %v1150_v44, %v934_v3  ;;  %v1299_v42 = vld [vmem:[#allocation4 + $0xd8] sm:$0xff]  ;;  %v1282_v24 = vld [vmem:[#allocation4 + $0x50] sm:$0xff]  ;;  %v3082_v3 = vrot.slane %v3081_v16, 4  ;;  %v3672_v44 = vsel %vm12537_vm2, %v3670_v22, %v3671_v23  ;;  %v3527_v16 = vld [vmem:[#allocation2 + $0x50] sm:$0x1] }
 0x111   : > { %v1823_v50 = vpop.f32.mrf.mxu1  ;;  %1206 = vst.msk [vmem:[#allocation4 + $0x70] sm:$0xff] %vm841_vm5, %v1174_v11  ;;  %v3086_v11 = vrot.slane %v3084_v25, 5  ;;  %v3669_v34 = vsel %vm12537_vm2, %v11281_v47, %v3668_v1  ;;  %v3761_v53 = vunpack.c.l.b16 %v3672_v44  ;;  %v11282_v22 = vrot.slane %v3525_v8, 9 }
 0x112   : > { %v1890_v36 = vadd.f32 %v1823_v50, %v1281_v32  ;;  %1220 = vst.msk [vmem:[#allocation4 + $0xe0] sm:$0xff] %vm841_vm5, %v1188_v38  ;;  %v3072_v32 = vrot.slane %v3071_v14, 4  ;;  %v2123_v50 = vrot.slane %v1965_v26, 5  ;;  %v3760_v52 = vunpack.c.l.b16 %v3669_v34 }
 0x113   : > { %v3087_v51 = vsel %vm12116_vm13, %v3082_v3, %v3086_v11  ;;  %v3678_v21 = vrot.slane %v3527_v16, 5 }
 0x114   : > { %1922 = vst.msk [vmem:[#allocation4 + $0x48] sm:$0xff] %vm841_vm5, %v1890_v36  ;;  %v3077_v38 = vsel %vm12116_vm13, %v3072_v32, %v12753_v59  ;;  %v2124_v40 = vsel %vm12537_vm2, %v2122_v41, %v2123_v50  ;;  %v3275_v33 = vunpack.c.l.b16 %v3087_v51  ;;  %v3788_v1 = vpack.c.b16 %v3761_v53, %v3760_v52  ;;  %v2822_v52 = vld [vmem:[#allocation2 + $0x84] sm:$0xf] }
 0x115   : > { %v1868_v57 = vpop.f32.mrf.mxu3  ;;  %v1117_v5 = vpop.f32.mrf.mxu0  ;;  %v2203_v2 = vunpack.c.l.b16 %v2124_v40  ;;  %v3113_v48 = vshrl.u32 %v2822_v52, 16 }
 0x116   : > { %v1908_v63 = vadd.f32 %v1868_v57, %v1299_v42  ;;  %v1175_v12 = vadd.f32 %v1117_v5, %v921_v56  ;;  %v1283_v56 = vld [vmem:[#allocation4 + $0x58] sm:$0xff]  ;;  %v3102_v42 = vshrl.u32 %v2820_v54, 16  ;;  %v3274_v57 = vunpack.c.l.b16 %v3077_v38 }
 0x117   : > { %v1152_v13 = vpop.f32.mrf.mxu2  ;;  %11297 = vmatmul.msk.bf16.gmra.mxu1 %vm841_vm5, %v3787_v60  ;;  %11268 = vmatmul.msk.bf16.gmra.mxu0 %vm841_vm5, %v3297_v9  ;;  %v3100_v60 = vrot.slane %v3098_v17, 5  ;;  %v3675_v9 = vrot.slane %v3526_v7, 5  ;;  %v2228_v18 = vpack.c.b16 %v2203_v2, %v2202_v28  ;;  %v2823_v38 = vld [vmem:[#allocation2 + $0x88] sm:$0xf]  ;;  %v3116_v54 = vshll.u32 %v2822_v52, 16 }
 0x118   : > { %1940 = vst.msk [vmem:[#allocation4 + $0xd8] sm:$0xff] %vm841_vm5, %v1908_v63  ;;  %11248 = vmatmul.msk.bf16.gmra.mxu3 %vm841_vm5, %v11857_v27  ;;  %v1189_v49 = vadd.f32 %v1152_v13, %v935_v6  ;;  %v3091_v27 = vrot.slane %v3089_v55, 4  ;;  %v3104_v63 = vrot.slane %v3102_v42, 4  ;;  %v2821_v6 = vld [vmem:[#allocation2 + $0x80] sm:$0x1]  ;;  %v3298_v14 = vpack.c.b16 %v3275_v33, %v3274_v57 }
 0x119   : > { %1207 = vst.msk [vmem:[#allocation4 + $0x78] sm:$0xff] %vm841_vm5, %v1175_v12  ;;  %v1300_v30 = vld [vmem:[#allocation4 + $0xe0] sm:$0xff]  ;;  %v1967_v13 = vld [vmem:[#allocation2 + $0x58] sm:$0xf]  ;;  %v3676_v34 = vsel %vm12537_vm2, %v11282_v22, %v3675_v9  ;;  %v3122_v53 = vshll.u32 %v2823_v38, 16  ;;  %v3126_v17 = vshrl.u32 %v2823_v38, 16 }
 0x11a   : > { %1221 = vst.msk [vmem:[#allocation4 + $0xe8] sm:$0xff] %vm841_vm5, %v1189_v49  ;;  %11168 = vmatmul.msk.bf16.gmra.mxu2 %vm841_vm5, %v2227_v29  ;;  %v3095_v29 = vor.u32 %v3094_v58, %v3091_v27  ;;  %v3105_v47 = vor.u32 %v3104_v63, %v3100_v60  ;;  %v3108_v49 = vshll.u32 %v2821_v6, 16  ;;  %v2127_v23 = vrot.slane %v1967_v13, 5  ;;  %v11859_v27 = vld [vmem:[#allocation2 + $0x54] sm:$0xff]  ;;  %v3530_v6 = vld [vmem:[#allocation2 + $0x5c] sm:$0x1] }
 0x11b   : > { %v3762_v44 = vunpack.c.l.b16 %v3676_v34  ;;  %v3115_v57 = vrot.slane %v3113_v48, 4  ;;  %v3118_v33 = vrot.slane %v3116_v54, 5  ;;  %v3124_v7 = vrot.slane %v3122_v53, 5  ;;  %v3528_v28 = vld [vmem:[#allocation2 + $0x54] sm:$0xe] }
 0x11c   : > { %v1826_v20 = vpop.f32.mrf.mxu1  ;;  %v3096_v32 = vrot.slane %v3095_v29, 4  ;;  %v3106_v3 = vrot.slane %v3105_v47, 4  ;;  %v3110_v11 = vrot.slane %v3108_v49, 5  ;;  %v2129_v39 = vrot.slane %v2127_v23, 4  ;;  %v1969_v29 = vld [vmem:[#allocation2 + $0x60] sm:$0xe] }
 0x11d   : > { %v1891_v37 = vadd.f32 %v1826_v20, %v1282_v24  ;;  %v12768_v36 = vpop.f32.mrf.mxu0  ;;  %v3677_v24 = vrot.slane %v3675_v9, 4  ;;  %v1966_v20 = vld [vmem:[#allocation2 + $0x54] sm:$0xe]  ;;  %v3119_v8 = vor.u32 %v3118_v33, %v3115_v57  ;;  %v11283_v13 = vrot.slane %v3528_v28, 9  ;;  %v1971_v47 = vld [vmem:[#allocation2 + $0x68] sm:$0x1] }
 0x11e   : > { %v11860_v33 = vld [vmem:[#allocation2 + $0x60] sm:$0xff] }
 0x11f   : > { %v1871_v45 = vpop.f32.mrf.mxu3  ;;  %1923 = vst.msk [vmem:[#allocation4 + $0x50] sm:$0xff] %vm841_vm5, %v1891_v37  ;;  %v11153_v37 = vrot.slane %v1966_v20, 9  ;;  %v3679_v50 = vsel %vm12537_vm2, %v3677_v24, %v3678_v21  ;;  %v3120_v49 = vrot.slane %v3119_v8, 4  ;;  %v936_v24 = vld [vmem:[#allocation4 + $0xf0] sm:$0xff]  ;;  %v11154_v21 = vrot.slane %v1969_v29, 9 }
 0x120   : > { %v1909_v46 = vadd.f32 %v1871_v45, %v1300_v30  ;;  %v1968_v30 = vld [vmem:[#allocation2 + $0x5c] sm:$0x1]  ;;  %v3101_v45 = vsel %vm12116_vm13, %v3096_v32, %v3100_v60  ;;  %v3763_v51 = vunpack.c.l.b16 %v3679_v50  ;;  %v2826_v50 = vld [vmem:[#allocation2 + $0x94] sm:$0xf] }
 0x121   : > { %v1301_v10 = vld [vmem:[#allocation4 + $0xe8] sm:$0xff]  ;;  %v2130_v41 = vrot.slane %v1968_v30, 5  ;;  %v2128_v55 = vsel %vm12537_vm2, %v11153_v37, %v2127_v23  ;;  %v3276_v31 = vunpack.c.l.b16 %v3101_v45  ;;  %v2137_v30 = vrot.slane %v1971_v47, 5 }
 0x122   : > { %1941 = vst.msk [vmem:[#allocation4 + $0xe0] sm:$0xff] %vm841_vm5, %v1909_v46  ;;  %v3111_v46 = vsel %vm12116_vm13, %v3106_v3, %v3110_v11  ;;  %v2204_v58 = vunpack.c.l.b16 %v2128_v55  ;;  %v3789_v63 = vpack.c.b16 %v3763_v51, %v3762_v44  ;;  %v3125_v37 = vsel %vm12116_vm13, %v3120_v49, %v3124_v7  ;;  %v1974_v49 = vld [vmem:[#allocation2 + $0x74] sm:$0x1] }
 0x123   : > { %v2131_v15 = vsel %vm12537_vm2, %v2129_v39, %v2130_v41  ;;  %v3277_v40 = vunpack.c.l.b16 %v3111_v46  ;;  %v2825_v41 = vld [vmem:[#allocation2 + $0x90] sm:$0xf]  ;;  %v3146_v48 = vshll.u32 %v2826_v50, 16  ;;  %v3150_v54 = vshrl.u32 %v2826_v50, 16 }
 0x124   : > { %v1828_v59 = vpop.f32.mrf.mxu1  ;;  %v2205_v60 = vunpack.c.l.b16 %v2131_v15  ;;  %v3137_v46 = vshrl.u32 %v2825_v41, 16  ;;  %v3140_v52 = vshll.u32 %v2825_v41, 16  ;;  %v3278_v53 = vunpack.c.l.b16 %v3125_v37  ;;  %v3532_v15 = vld [vmem:[#allocation2 + $0x64] sm:$0xf] }
 0x125   : > { %v1892_v5 = vadd.f32 %v1828_v59, %v1283_v56  ;;  %v12784_v26 = vpop.f32.mrf.mxu0  ;;  %v3529_v56 = vld [vmem:[#allocation2 + $0x58] sm:$0xf]  ;;  %v3128_v59 = vrot.slane %v3126_v17, 4  ;;  %v1284_v17 = vld [vmem:[#allocation4 + $0x60] sm:$0xff]  ;;  %v3152_v57 = vrot.slane %v3150_v54, 4  ;;  %v3689_v28 = vrot.slane %v3532_v15, 5 }
 0x126   : > { %v3682_v2 = vrot.slane %v3529_v56, 5  ;;  %v12821_v56 = vrot.slane %v3146_v48, 5 }
 0x127   : > { %v1873_v12 = vpop.f32.mrf.mxu3  ;;  %1924 = vst.msk [vmem:[#allocation4 + $0x58] sm:$0xff] %vm841_vm5, %v1892_v5  ;;  %11298 = vmatmul.msk.bf16.gmra.mxu1 %vm841_vm5, %v3788_v1  ;;  %11269 = vmatmul.msk.bf16.gmra.mxu0 %vm841_vm5, %v3298_v14  ;;  %v1970_v1 = vld [vmem:[#allocation2 + $0x64] sm:$0xf]  ;;  %v3299_v5 = vpack.c.b16 %v3277_v40, %v3276_v31  ;;  %v3129_v9 = vor.u32 %v3128_v59, %v3124_v7  ;;  %v3139_v31 = vrot.slane %v3137_v46, 4  ;;  %v3142_v40 = vrot.slane %v3140_v52, 5  ;;  %v1993_v46 = vld [vmem:[#allocation4] sm:$0xff] }
 0x128   : > { %v1910_v25 = vadd.f32 %v1873_v12, %v1301_v10  ;;  %11249 = vmatmul.msk.bf16.gmra.mxu3 %vm841_vm5, %v11858_v0  ;;  %v2824_v0 = vld [vmem:[#allocation2 + $0x8c] sm:$0x1]  ;;  %v2229_v12 = vpack.c.b16 %v2205_v60, %v2204_v58  ;;  %v2134_v14 = vrot.slane %v1970_v1, 5  ;;  %v3684_v16 = vrot.slane %v3682_v2, 4  ;;  %v2827_v58 = vld [vmem:[#allocation2 + $0x98] sm:$0x1] }
 0x129   : > { %v3132_v10 = vshll.u32 %v2824_v0, 16  ;;  %v3683_v23 = vsel %vm12537_vm2, %v11283_v13, %v3682_v2  ;;  %v1973_v0 = vld [vmem:[#allocation2 + $0x70] sm:$0xf]  ;;  %v3156_v13 = vshll.u32 %v2827_v58, 16 }
 0x12a   : > { %1942 = vst.msk [vmem:[#allocation4 + $0xe8] sm:$0xff] %vm841_vm5, %v1910_v25  ;;  %11169 = vmatmul.msk.bf16.gmra.mxu2 %vm841_vm5, %v2228_v18  ;;  %v3685_v25 = vrot.slane %v3530_v6, 5  ;;  %v3130_v18 = vrot.slane %v3129_v9, 4  ;;  %v2136_v20 = vrot.slane %v2134_v14, 4  ;;  %v3764_v34 = vunpack.c.l.b16 %v3683_v23  ;;  %v3533_v6 = vld [vmem:[#allocation2 + $0x68] sm:$0x1] }
 0x12b   : > { %v3134_v22 = vrot.slane %v3132_v10, 5  ;;  %v2135_v38 = vsel %vm12537_vm2, %v11154_v21, %v2134_v14  ;;  %v3143_v10 = vor.u32 %v3142_v40, %v3139_v31  ;;  %v2141_v29 = vrot.slane %v1973_v0, 5  ;;  %v1285_v21 = vld [vmem:[#allocation4 + $0x68] sm:$0xff]  ;;  %v2829_v40 = vld [vmem:[#allocation2 + $0xa0] sm:$0xf] }
 0x12c   : > { %v3686_v32 = vsel %vm12537_vm2, %v3684_v16, %v3685_v25  ;;  %v2138_v51 = vsel %vm12537_vm2, %v2136_v20, %v2137_v30  ;;  %v2206_v7 = vunpack.c.l.b16 %v2135_v38  ;;  %v1972_v25 = vld [vmem:[#allocation2 + $0x6c] sm:$0xe]  ;;  %v3692_v23 = vrot.slane %v3533_v6, 5  ;;  %v2828_v31 = vld [vmem:[#allocation2 + $0x9c] sm:$0xf] }
 0x12d   : > { %v12800_v42 = vpop.f32.mrf.mxu0  ;;  %v3135_v39 = vsel %vm12116_vm13, %v3130_v18, %v3134_v22  ;;  %v3765_v45 = vunpack.c.l.b16 %v3686_v32  ;;  %v2207_v59 = vunpack.c.l.b16 %v2138_v51  ;;  %v3691_v22 = vrot.slane %v3689_v28, 4 }
 0x12e   : > { %v3279_v55 = vunpack.c.l.b16 %v3135_v39  ;;  %v11155_v20 = vrot.slane %v1972_v25, 9  ;;  %v3144_v30 = vrot.slane %v3143_v10, 4  ;;  %v2143_v37 = vrot.slane %v2141_v29, 4  ;;  %v11861_v10 = vld [vmem:[#allocation2 + $0x6c] sm:$0xff] }
 0x12f   : > { %v2230_v16 = vpack.c.b16 %v2207_v59, %v2206_v7  ;;  %v2144_v39 = vrot.slane %v1974_v49, 5  ;;  %v3170_v7 = vshll.u32 %v2829_v40, 16  ;;  %v3174_v59 = vshrl.u32 %v2829_v40, 16 }
 0x130   : > { %v3300_v1 = vpack.c.b16 %v3279_v55, %v3278_v53  ;;  %v2142_v38 = vsel %vm12537_vm2, %v11155_v20, %v2141_v29  ;;  %v3149_v48 = vsel %vm12116_vm13, %v3144_v30, %v12821_v56  ;;  %v1975_v30 = vld [vmem:[#allocation2 + $0x78] sm:$0xe] }
 0x131   : > { %v2145_v55 = vsel %vm12537_vm2, %v2143_v37, %v2144_v39  ;;  %v3176_v6 = vrot.slane %v3174_v59, 4 }
 0x135   : > { %v12810_v3 = vpop.f32.mrf.mxu0 }
 0x137   : > { %11299 = vmatmul.msk.bf16.gmra.mxu1 %vm841_vm5, %v3789_v63  ;;  %11270 = vmatmul.msk.bf16.gmra.mxu0 %vm841_vm5, %v3299_v5  ;;  %v937_v63 = vld [vmem:[#allocation4 + $0xf8] sm:$0xff]  ;;  %v3531_v5 = vld [vmem:[#allocation2 + $0x60] sm:$0xe] }
 0x138   : > { %11250 = vmatmul.msk.bf16.gmra.mxu3 %vm841_vm5, %v11859_v27  ;;  %v3790_v27 = vpack.c.b16 %v3765_v45, %v3764_v34  ;;  %v11284_v18 = vrot.slane %v3531_v5, 9  ;;  %v12850_v5 = vrot.slane %v3170_v7, 5 }
 0x13a   : > { %11170 = vmatmul.msk.bf16.gmra.mxu2 %vm841_vm5, %v2229_v12  ;;  %v3153_v12 = vor.u32 %v3152_v57, %v12821_v56  ;;  %v3690_v50 = vsel %vm12537_vm2, %v11284_v18, %v3689_v28  ;;  %v3161_v57 = vshrl.u32 %v2828_v31, 16  ;;  %v1976_v56 = vld [vmem:[#allocation2 + $0x7c] sm:$0xf]  ;;  %v1286_v28 = vld [vmem:[#allocation4 + $0x70] sm:$0xff] }
 0x13b   : > { %v3766_v15 = vunpack.c.l.b16 %v3690_v50  ;;  %v2148_v49 = vrot.slane %v1976_v56, 5  ;;  %v6363_v56 = vld [vmem:[%s16312_s3] sm:$0x3] }
 0x13c   : > { %v3154_v32 = vrot.slane %v3153_v12, 4  ;;  %v2208_v12 = vunpack.c.l.b16 %v2142_v38 }
 0x13d   : > { %v1155_v11 = vpop.f32.mrf.mxu2 }
 0x13e   : > { %v1190_v44 = vadd.f32 %v1155_v11, %v936_v24  ;;  %v3158_v11 = vrot.slane %v3156_v13, 5  ;;  %v2209_v13 = vunpack.c.l.b16 %v2145_v55 }
 0x140   : > { %1222 = vst.msk [vmem:[#allocation4 + $0xf0] sm:$0xff] %vm841_vm5, %v1190_v44  ;;  %v3693_v44 = vsel %vm12537_vm2, %v3691_v22, %v3692_v23  ;;  %v3159_v54 = vsel %vm12116_vm13, %v3154_v32, %v3158_v11  ;;  %v3534_v22 = vld [vmem:[#allocation2 + $0x6c] sm:$0xe]  ;;  %v3536_v23 = vld [vmem:[#allocation2 + $0x74] sm:$0x1]  ;;  %v3177_v11 = vor.u32 %v3176_v6, %v12850_v5  ;;  %v2231_v39 = vpack.c.b16 %v2209_v13, %v2208_v12 }
 0x141   : > { %v3281_v58 = vunpack.c.l.b16 %v3159_v54  ;;  %v11285_v50 = vrot.slane %v3534_v22, 9  ;;  %v1287_v54 = vld [vmem:[#allocation4 + $0x78] sm:$0xff]  ;;  %v3538_v13 = vld [vmem:[#allocation2 + $0x7c] sm:$0xf] }
 0x142   : > { %v2832_v12 = vld [vmem:[#allocation2 + $0xac] sm:$0xf] }
 0x144   : > { %v1831_v60 = vpop.f32.mrf.mxu1  ;;  %v12823_v9 = vpop.f32.mrf.mxu0 }
 0x145   : > { %v1893_v2 = vadd.f32 %v1831_v60, %v1284_v17  ;;  %v1157_v8 = vpop.f32.mrf.mxu2  ;;  %v3767_v17 = vunpack.c.l.b16 %v3693_v44  ;;  %v3535_v60 = vld [vmem:[#allocation2 + $0x70] sm:$0xf] }
 0x146   : > { %v1191_v14 = vadd.f32 %v1157_v8, %v937_v63  ;;  %v3696_v29 = vrot.slane %v3535_v60, 5 }
 0x147   : > { %1925 = vst.msk [vmem:[#allocation4 + $0x60] sm:$0xff] %vm841_vm5, %v1893_v2  ;;  %11300 = vmatmul.msk.bf16.gmra.mxu1 %vm841_vm5, %v3790_v27  ;;  %v1302_v47 = vld [vmem:[#allocation4 + $0xf0] sm:$0xff]  ;;  %11271 = vmatmul.msk.bf16.gmra.mxu0 %vm841_vm5, %v3300_v1  ;;  %v3280_v27 = vunpack.c.l.b16 %v3149_v48  ;;  %v3163_v2 = vrot.slane %v3161_v57, 4 }
 0x148   : > { %11251 = vmatmul.msk.bf16.gmra.mxu3 %vm841_vm5, %v11860_v33  ;;  %1223 = vst.msk [vmem:[#allocation4 + $0xf8] sm:$0xff] %vm841_vm5, %v1191_v14  ;;  %v3164_v33 = vshll.u32 %v2828_v31, 16  ;;  %v3791_v14 = vpack.c.b16 %v3767_v17, %v3766_v15  ;;  %v3698_v44 = vrot.slane %v3696_v29, 4  ;;  %v3178_v15 = vrot.slane %v3177_v11, 4 }
 0x149   : > { %v3301_v18 = vpack.c.b16 %v3281_v58, %v3280_v27  ;;  %v3697_v57 = vsel %vm12537_vm2, %v11285_v50, %v3696_v29  ;;  %v1995_v27 = vld [vmem:[#allocation4 + $0x10] sm:$0xff]  ;;  %v3198_v29 = vshrl.u32 %v2832_v12, 16  ;;  %v3703_v50 = vrot.slane %v3538_v13, 5 }
 0x14a   : > { %11171 = vmatmul.msk.bf16.gmra.mxu2 %vm841_vm5, %v2230_v16  ;;  %v3166_v1 = vrot.slane %v3164_v33, 5  ;;  %v2830_v16 = vld [vmem:[#allocation2 + $0xa4] sm:$0x1]  ;;  %v3768_v6 = vunpack.c.l.b16 %v3697_v57 }
 0x14b   : > { %v1876_v24 = vpop.f32.mrf.mxu3  ;;  %v3200_v11 = vrot.slane %v3198_v29, 4 }
 0x14c   : > { %v1911_v34 = vadd.f32 %v1876_v24, %v1302_v47  ;;  %v1833_v41 = vpop.f32.mrf.mxu1  ;;  %v12839_v51 = vpop.f32.mrf.mxu0  ;;  %v1994_v24 = vld [vmem:[#allocation4 + $0x8] sm:$0xff]  ;;  %v3167_v32 = vor.u32 %v3166_v1, %v3163_v2 }
 0x14d   : > { %v1894_v45 = vadd.f32 %v1833_v41, %v1285_v21  ;;  %v2298_v52 = vpop.f32.mrf.mxu2  ;;  %v1977_v41 = vld [vmem:[#allocation2 + $0x80] sm:$0x1] }
 0x14e   : > { %1943 = vst.msk [vmem:[#allocation4 + $0xf0] sm:$0xff] %vm841_vm5, %v1911_v34  ;;  %v2378_v53 = vadd.f32 %v2298_v52, %v1993_v46  ;;  %v3180_v34 = vshll.u32 %v2830_v16, 16  ;;  %v11156_v46 = vrot.slane %v1975_v30, 9  ;;  %v2150_v52 = vrot.slane %v2148_v49, 4 }
 0x14f   : > { %1926 = vst.msk [vmem:[#allocation4 + $0x68] sm:$0xff] %vm841_vm5, %v1894_v45  ;;  %v1303_v63 = vld [vmem:[#allocation4 + $0xf8] sm:$0xff]  ;;  %v3699_v45 = vrot.slane %v3536_v23, 5  ;;  %v3168_v55 = vrot.slane %v3167_v32, 4 }
 0x150   : > { %2410 = vst.msk [vmem:[#allocation4] sm:$0xff] %vm841_vm5, %v2378_v53  ;;  %v2151_v53 = vrot.slane %v1977_v41, 5  ;;  %v3182_v17 = vrot.slane %v3180_v34, 5  ;;  %v2149_v59 = vsel %vm12537_vm2, %v11156_v46, %v2148_v49  ;;  %v1979_v49 = vld [vmem:[#allocation2 + $0x88] sm:$0xf] }
 0x151   : > { %v3700_v33 = vsel %vm12537_vm2, %v3698_v44, %v3699_v45  ;;  %v3537_v41 = vld [vmem:[#allocation2 + $0x78] sm:$0xe]  ;;  %v2833_v44 = vld [vmem:[#allocation2 + $0xb0] sm:$0x1] }
 0x152   : > { %v2152_v60 = vsel %vm12537_vm2, %v2150_v52, %v2151_v53  ;;  %v3183_v2 = vsel %vm12116_vm13, %v3178_v15, %v3182_v17  ;;  %v3539_v52 = vld [vmem:[#allocation2 + $0x80] sm:$0x1]  ;;  %v1996_v17 = vld [vmem:[#allocation4 + $0x18] sm:$0xff] }
 0x153   : > { %v1878_v0 = vpop.f32.mrf.mxu3  ;;  %v3283_v22 = vunpack.c.l.b16 %v3183_v2 }
 0x154   : > { %v1912_v8 = vadd.f32 %v1878_v0, %v1303_v63  ;;  %v1836_v25 = vpop.f32.mrf.mxu1  ;;  %v12853_v20 = vpop.f32.mrf.mxu0  ;;  %v6493_v0 = vsel %vm1067_vm0, %v6363_v56, 0 }
 0x155   : > { %v1895_v47 = vadd.f32 %v1836_v25, %v1286_v28  ;;  %v2300_v21 = vpop.f32.mrf.mxu2  ;;  %v3173_v28 = vsel %vm12116_vm13, %v3168_v55, %v12850_v5  ;;  %6502 = vmatpush.bf16.msra.mxu1 %v6493_v0  ;;  %v3194_v25 = vshll.u32 %v2832_v12, 16  ;;  %v2211_v5 = vunpack.c.l.b16 %v2152_v60 }
 0x156   : > { %1944 = vst.msk [vmem:[#allocation4 + $0xf8] sm:$0xff] %vm841_vm5, %v1912_v8  ;;  %v2379_v37 = vadd.f32 %v2300_v21, %v1994_v24  ;;  %v3769_v8 = vunpack.c.l.b16 %v3700_v33  ;;  %v2155_v55 = vrot.slane %v1979_v49, 5  ;;  %v1978_v33 = vld [vmem:[#allocation2 + $0x84] sm:$0xe] }
 0x157   : > { %1927 = vst.msk [vmem:[#allocation4 + $0x70] sm:$0xff] %vm841_vm5, %v1895_v47  ;;  %11301 = vmatmul.msk.bf16.gmra.mxu1 %vm841_vm5, %v3791_v14  ;;  %11272 = vmatmul.msk.bf16.gmra.mxu0 %vm841_vm5, %v3301_v18  ;;  %v2474_v38 = vld [vmem:[#allocation4] sm:$0xff]  ;;  %v2210_v47 = vunpack.c.l.b16 %v2149_v59  ;;  %v3282_v18 = vunpack.c.l.b16 %v3173_v28  ;;  %v3196_v32 = vrot.slane %v3194_v25, 5  ;;  %v11286_v59 = vrot.slane %v3537_v41, 9 }
 0x158   : > { %11252 = vmatmul.msk.bf16.gmra.mxu3 %vm841_vm5, %v11861_v10  ;;  %2411 = vst.msk [vmem:[#allocation4 + $0x8] sm:$0xff] %vm841_vm5, %v2379_v37  ;;  %v2831_v10 = vld [vmem:[#allocation2 + $0xa8] sm:$0xf]  ;;  %v11862_v37 = vld [vmem:[#allocation2 + $0x78] sm:$0xff]  ;;  %v11157_v28 = vrot.slane %v1978_v33, 9  ;;  %v2157_v2 = vrot.slane %v2155_v55, 4 }
 0x159   : > { %v3185_v14 = vshrl.u32 %v2831_v10, 16  ;;  %v3188_v16 = vshll.u32 %v2831_v10, 16  ;;  %v3302_v15 = vpack.c.b16 %v3283_v22, %v3282_v18  ;;  %v3704_v12 = vsel %vm12537_vm2, %v11286_v59, %v3703_v50  ;;  %v284_v22 = vld [vmem:[#allocation2 + $0xc0] sm:$0x1] }
 0x15a   : > { %11172 = vmatmul.msk.bf16.gmra.mxu2 %vm841_vm5, %v2231_v39  ;;  %v3792_v39 = vpack.c.b16 %v3769_v8, %v3768_v6  ;;  %v12910_v49 = vsel %vm12537_vm2, %v11157_v28, %v2155_v55  ;;  %v2836_v28 = vld [vmem:[#allocation2 + $0xbc] sm:$0x1] }
 0x15b   : > { %v2648_v48 = vpop.f32.mrf.mxu3  ;;  %v3187_v21 = vrot.slane %v3185_v14, 4  ;;  %v3190_v30 = vrot.slane %v3188_v16, 5  ;;  %v12900_v16 = vld [vmem:[#allocation2 + $0x88] sm:$0xf]  ;;  %v2212_v33 = vunpack.c.l.b16 %v12910_v49 }
 0x15c   : > { %v2728_v31 = vadd.f32 %v2648_v48, %v2474_v38  ;;  %v1838_v40 = vpop.f32.mrf.mxu1  ;;  %v12874_v63 = vpop.f32.mrf.mxu0  ;;  %v3201_v48 = vor.u32 %v3200_v11, %v3196_v32 }
 0x15d   : > { %v1896_v7 = vadd.f32 %v1838_v40, %v1287_v54  ;;  %v2303_v58 = vpop.f32.mrf.mxu2  ;;  %v3191_v38 = vor.u32 %v3190_v30, %v3187_v21  ;;  %v3204_v54 = vshll.u32 %v2833_v44, 16  ;;  %v2232_v40 = vpack.c.b16 %v2211_v5, %v2210_v47  ;;  %v2834_v44 = vld [vmem:[#allocation2 + $0xb4] sm:$0xf] }
 0x15e   : > { %2760 = vst.msk [vmem:[#allocation4] sm:$0xff] %vm841_vm5, %v2728_v31  ;;  %v2380_v1 = vadd.f32 %v2303_v58, %v1995_v27  ;;  %v3705_v27 = vrot.slane %v3703_v50, 4  ;;  %v3706_v58 = vrot.slane %v3539_v52, 5  ;;  %v3202_v60 = vrot.slane %v3201_v48, 4 }
 0x15f   : > { %1928 = vst.msk [vmem:[#allocation4 + $0x78] sm:$0xff] %vm841_vm5, %v1896_v7  ;;  %v2475_v23 = vld [vmem:[#allocation4 + $0x8] sm:$0xff]  ;;  %v1980_v7 = vld [vmem:[#allocation2 + $0x8c] sm:$0x1]  ;;  %v3206_v0 = vrot.slane %v3204_v54, 5  ;;  %v3770_v30 = vunpack.c.l.b16 %v3704_v12  ;;  %v285_v52 = vsel %vm12006_vm4, 0, %v284_v22 }
 0x160   : > { %2412 = vst.msk [vmem:[#allocation4 + $0x10] sm:$0xff] %vm841_vm5, %v2380_v1  ;;  %v2158_v1 = vrot.slane %v1980_v7, 5  ;;  %v3707_v13 = vsel %vm12537_vm2, %v3705_v27, %v3706_v58  ;;  %v3209_v48 = vshrl.u32 %v2834_v44, 16  ;;  %v3212_v54 = vshll.u32 %v2834_v44, 16  ;;  %v334_v27 = vld [vmem:[#allocation2 + $0xc8] sm:$0x1] }
 0x161   : > { %v3207_v47 = vsel %vm12116_vm13, %v3202_v60, %v3206_v0  ;;  %286 = vst [vmem:[#allocation2 + $0xc0] sm:$0x1] %v285_v52  ;;  %v1998_v22 = vld [vmem:[#allocation4 + $0x28] sm:$0xff] }
 0x162   : > { %v12914_v18 = vsel %vm12537_vm2, %v2157_v2, %v2158_v1  ;;  %v3285_v50 = vunpack.c.l.b16 %v3207_v47  ;;  %v3211_v7 = vrot.slane %v3209_v48, 4  ;;  %v3214_v59 = vrot.slane %v3212_v54, 5 }
 0x163   : > { %v2650_v24 = vpop.f32.mrf.mxu3  ;;  %v2213_v60 = vunpack.c.l.b16 %v12914_v18 }
 0x164   : > { %v2729_v34 = vadd.f32 %v2650_v24, %v2475_v23  ;;  %v3860_v46 = vpop.f32.mrf.mxu1  ;;  %v12886_v57 = vpop.f32.mrf.mxu0  ;;  %v1997_v24 = vld [vmem:[#allocation4 + $0x20] sm:$0xff] }
 0x165   : > { %v2840_v45 = vld [vmem:[#allocation4] sm:$0xff]  ;;  %v2305_v31 = vpop.f32.mrf.mxu2 }
 0x166   : > { %2761 = vst.msk [vmem:[#allocation4 + $0x8] sm:$0xff] %vm841_vm5, %v2729_v34  ;;  %v3446_v53 = vadd.f32 %v12768_v36, %v2840_v45  ;;  %v2381_v56 = vadd.f32 %v2305_v31, %v1996_v17  ;;  %v3192_v36 = vrot.slane %v3191_v38, 4  ;;  %v2835_v45 = vld [vmem:[#allocation2 + $0xb8] sm:$0xf]  ;;  %v12925_v38 = vld [vmem:[#allocation2 + $0x94] sm:$0xf] }
 0x167   : > { %11302 = vmatmul.msk.bf16.gmra.mxu1 %vm841_vm5, %v3792_v39  ;;  %11273 = vmatmul.msk.bf16.gmra.mxu0 %vm841_vm5, %v3302_v15  ;;  %v2476_v6 = vld [vmem:[#allocation4 + $0x10] sm:$0xff]  ;;  %v3222_v55 = vshrl.u32 %v2835_v45, 16 }
 0x168   : > { %11253 = vmatmul.msk.bf16.gmra.mxu3 %vm841_vm5, %v11862_v37  ;;  %3478 = vst.msk [vmem:[#allocation4] sm:$0xff] %vm841_vm5, %v3446_v53  ;;  %v3197_v14 = vsel %vm12116_vm13, %v3192_v36, %v3196_v32  ;;  %v3771_v32 = vunpack.c.l.b16 %v3707_v13  ;;  %v367_v37 = vld [vmem:[%s12021_s25 + $0xf0] sm:$0xff]  ;;  %v3218_v53 = vshll.u32 %v2835_v45, 16  ;;  %v3540_v17 = vld [vmem:[#allocation2 + $0x84] sm:$0xe] }
 0x169   : > { %2413 = vst.msk [vmem:[#allocation4 + $0x18] sm:$0xff] %vm841_vm5, %v2381_v56  ;;  %v12918_v34 = vunpack.c.l.b16 %v3197_v14  ;;  %v12928_v31 = vpack.c.bf16 %v367_v37, %v367_v37  ;;  %v11863_v36 = vld [vmem:[#allocation2 + $0x84] sm:$0xff]  ;;  %v3224_v2 = vrot.slane %v3222_v55, 4  ;;  %v11287_v13 = vrot.slane %v3540_v17, 9 }
 0x16a   : > { %11173 = vmatmul.msk.bf16.gmra.mxu2 %vm841_vm5, %v2232_v40  ;;  %v12932_v56 = vrot.slane %v3218_v53, 5  ;;  %v3793_v0 = vpack.c.b16 %v3771_v32, %v3770_v30  ;;  %v3228_v32 = vshll.u32 %v2836_v28, 16  ;;  %v1999_v28 = vld [vmem:[#allocation4 + $0x30] sm:$0xff] }
 0x16b   : > { %v2653_v8 = vpop.f32.mrf.mxu3  ;;  %v3303_v12 = vpack.c.b16 %v3285_v50, %v12918_v34  ;;  %v659_v49 = vshrl.u32 %v12928_v31, 16  ;;  %v335_v34 = vsel %vm12039_vm8, 0, %v334_v27 }
 0x16c   : > { %v2730_v10 = vadd.f32 %v2653_v8, %v2476_v6  ;;  %v12902_v29 = vpop.f32.mrf.mxu1  ;;  %v12916_v11 = vpop.f32.mrf.mxu0  ;;  %v1981_v8 = vld [vmem:[#allocation2 + $0x90] sm:$0xe]  ;;  %v3225_v30 = vor.u32 %v3224_v2, %v12932_v56  ;;  %336 = vst [vmem:[#allocation2 + $0xc8] sm:$0x1] %v335_v34  ;;  %v3230_v17 = vrot.slane %v3228_v32, 5 }
 0x16d   : > { %v2841_v25 = vld [vmem:[#allocation4 + $0x8] sm:$0xff]  ;;  %v2308_v21 = vpop.f32.mrf.mxu2  ;;  %v11158_v50 = vrot.slane %v1981_v8, 9  ;;  %v661_v48 = vrot.slane %v659_v49, 7 }
 0x16e   : > { %2762 = vst.msk [vmem:[#allocation4 + $0x10] sm:$0xff] %vm841_vm5, %v2730_v10  ;;  %v3447_v5 = vadd.f32 %v12784_v26, %v2841_v25  ;;  %v3710_v26 = vrot.slane %v12900_v16, 5  ;;  %v2382_v41 = vadd.f32 %v2308_v21, %v1997_v24  ;;  %v2162_v10 = vrot.slane %v12925_v38, 5  ;;  %v1983_v25 = vld [vmem:[#allocation2 + $0x98] sm:$0x1] }
 0x16f   : > { %v3558_v23 = vld [vmem:[#allocation4] sm:$0xff]  ;;  %v3215_v21 = vor.u32 %v3214_v59, %v3211_v7  ;;  %v2165_v45 = vrot.slane %v1983_v25, 5  ;;  %v830_v16 = vld [vmem:[#allocation2 + $0xc0] sm:$0xf]  ;;  %v665_v25 = vrot.slane %v661_v48, 4 }
 0x170   : > { %v3940_v39 = vadd.f32 %v3860_v46, %v3558_v23  ;;  %3479 = vst.msk [vmem:[#allocation4 + $0x8] sm:$0xff] %vm841_vm5, %v3447_v5  ;;  %v2477_v15 = vld [vmem:[#allocation4 + $0x18] sm:$0xff]  ;;  %v3712_v47 = vrot.slane %v3710_v26, 4  ;;  %v2164_v44 = vrot.slane %v2162_v10, 4  ;;  %v2163_v7 = vsel %vm12537_vm2, %v11158_v50, %v2162_v10 }
 0x171   : > { %v3542_v46 = vld [vmem:[#allocation2 + $0x8c] sm:$0x1]  ;;  %2414 = vst.msk [vmem:[#allocation4 + $0x20] sm:$0xff] %vm841_vm5, %v2382_v41  ;;  %v2233_v41 = vpack.c.b16 %v2213_v60, %v2212_v33  ;;  %v3216_v55 = vrot.slane %v3215_v21, 4 }
 0x172   : > { %3972 = vst.msk [vmem:[#allocation4] sm:$0xff] %vm841_vm5, %v3940_v39  ;;  %v3713_v5 = vrot.slane %v3542_v46, 5  ;;  %v662_v46 = vshll.u32 %v12928_v31, 16  ;;  %v2166_v59 = vsel %vm12537_vm2, %v2164_v44, %v2165_v45  ;;  %v3543_v45 = vld [vmem:[#allocation2 + $0x90] sm:$0xe] }
 0x173   : > { %v2655_v40 = vpop.f32.mrf.mxu3  ;;  %v3221_v8 = vsel %vm12116_vm13, %v3216_v55, %v12932_v56  ;;  %v3544_v56 = vld [vmem:[#allocation2 + $0x94] sm:$0xf]  ;;  %v2215_v32 = vunpack.c.l.b16 %v2166_v59  ;;  %v11288_v59 = vrot.slane %v3543_v45, 9  ;;  %v3547_v45 = vld [vmem:[#allocation2 + $0xa0] sm:$0xf] }
 0x174   : > { %v2731_v58 = vadd.f32 %v2655_v40, %v2477_v15  ;;  %v12935_v6 = vpop.f32.mrf.mxu1  ;;  %v12944_v24 = vpop.f32.mrf.mxu0  ;;  %v3714_v52 = vsel %vm12537_vm2, %v3712_v47, %v3713_v5  ;;  %v3226_v15 = vrot.slane %v3225_v30, 4  ;;  %v664_v27 = vor.u32 %v662_v46, %v661_v48 }
 0x175   : > { %v2842_v1 = vld [vmem:[#allocation4 + $0x10] sm:$0xff]  ;;  %v2310_v23 = vpop.f32.mrf.mxu2  ;;  %v3773_v60 = vunpack.c.l.b16 %v3714_v52  ;;  %v3286_v5 = vunpack.c.l.b16 %v3221_v8  ;;  %v2214_v30 = vunpack.c.l.b16 %v2163_v7  ;;  %v2000_v52 = vld [vmem:[#allocation4 + $0x38] sm:$0xff] }
 0x176   : > { %2763 = vst.msk [vmem:[#allocation4 + $0x18] sm:$0xff] %vm841_vm5, %v2731_v58  ;;  %v3448_v14 = vadd.f32 %v12800_v42, %v2842_v1  ;;  %v368_v42 = vld [vmem:[%s12021_s25 + $0xf8] sm:$0xff]  ;;  %v2383_v39 = vadd.f32 %v2310_v23, %v1998_v22  ;;  %v3231_v10 = vsel %vm12116_vm13, %v3226_v15, %v3230_v17 }
 0x177   : > { %v3559_v18 = vld [vmem:[#allocation4 + $0x8] sm:$0xff]  ;;  %11303 = vmatmul.msk.bf16.gmra.mxu1 %vm841_vm5, %v3793_v0  ;;  %11274 = vmatmul.msk.bf16.gmra.mxu0 %vm841_vm5, %v3303_v12  ;;  %v400_v38 = vpack.c.bf16 %v368_v42, %v368_v42  ;;  %v3287_v49 = vunpack.c.l.b16 %v3231_v10  ;;  %v11864_v42 = vld [vmem:[#allocation2 + $0x90] sm:$0xff]  ;;  %v2234_v17 = vpack.c.b16 %v2215_v32, %v2214_v30 }
 0x178   : > { %v3941_v37 = vadd.f32 %v12902_v29, %v3559_v18  ;;  %11254 = vmatmul.msk.bf16.gmra.mxu3 %vm841_vm5, %v11863_v36  ;;  %3480 = vst.msk [vmem:[#allocation4 + $0x10] sm:$0xff] %vm841_vm5, %v3448_v14  ;;  %v3711_v29 = vsel %vm12537_vm2, %v11287_v13, %v3710_v26  ;;  %v2478_v54 = vld [vmem:[#allocation4 + $0x20] sm:$0xff]  ;;  %v831_v13 = vsel %vm12064_vm10, %v664_v27, %v830_v16 }
 0x179   : > { %2415 = vst.msk [vmem:[#allocation4 + $0x28] sm:$0xff] %vm841_vm5, %v2383_v39  ;;  %v3772_v36 = vunpack.c.l.b16 %v3711_v29  ;;  %v667_v31 = vshrl.u32 %v400_v38, 16  ;;  %v670_v12 = vshll.u32 %v400_v38, 16  ;;  %v1985_v39 = vld [vmem:[#allocation2 + $0xa0] sm:$0xf]  ;;  %v3717_v29 = vrot.slane %v3544_v56, 5 }
 0x17a   : > { %3973 = vst.msk [vmem:[#allocation4 + $0x8] sm:$0xff] %vm841_vm5, %v3941_v37  ;;  %11174 = vmatmul.msk.bf16.gmra.mxu2 %vm841_vm5, %v2233_v41  ;;  %v3304_v48 = vpack.c.b16 %v3287_v49, %v3286_v5  ;;  %v2169_v16 = vrot.slane %v1985_v39, 5 }
 0x17b   : > { %v2658_v53 = vpop.f32.mrf.mxu3  ;;  %v669_v47 = vrot.slane %v667_v31, 7  ;;  %832 = vst [vmem:[#allocation2 + $0xc0] sm:$0xf] %v831_v13  ;;  %v3794_v37 = vpack.c.b16 %v3773_v60, %v3772_v36 }
 0x17c   : > { %v2732_v40 = vadd.f32 %v2658_v53, %v2478_v54  ;;  %v3867_v26 = vpop.f32.mrf.mxu1  ;;  %v12971_v1 = vpop.f32.mrf.mxu0  ;;  %v3545_v54 = vld [vmem:[#allocation2 + $0x98] sm:$0x1] }
 0x17d   : > { %v2843_v33 = vld [vmem:[#allocation4 + $0x18] sm:$0xff]  ;;  %v2313_v2 = vpop.f32.mrf.mxu2  ;;  %v672_v18 = vor.u32 %v670_v12, %v669_v47  ;;  %v674_v22 = vrot.slane %v669_v47, 4  ;;  %v3720_v36 = vrot.slane %v3545_v54, 5 }
 0x17e   : > { %2764 = vst.msk [vmem:[#allocation4 + $0x20] sm:$0xff] %vm841_vm5, %v2732_v40  ;;  %v3449_v58 = vadd.f32 %v12810_v3, %v2843_v33  ;;  %v2384_v14 = vadd.f32 %v2313_v2, %v1999_v28  ;;  %v1984_v40 = vld [vmem:[#allocation2 + $0x9c] sm:$0xe]  ;;  %v2171_v2 = vrot.slane %v2169_v16, 4 }
 0x17f   : > { %v3560_v0 = vld [vmem:[#allocation4 + $0x10] sm:$0xff]  ;;  %v673_v41 = vsel %vm12055_vm9, %v665_v25, %v672_v18  ;;  %v3718_v25 = vsel %vm12537_vm2, %v11288_v59, %v3717_v29  ;;  %v3546_v59 = vld [vmem:[#allocation2 + $0x9c] sm:$0xe] }
 0x180   : > { %v3942_v3 = vadd.f32 %v12935_v6, %v3560_v0  ;;  %3481 = vst.msk [vmem:[#allocation4 + $0x18] sm:$0xff] %vm841_vm5, %v3449_v58  ;;  %v2479_v23 = vld [vmem:[#allocation4 + $0x28] sm:$0xff]  ;;  %v834_v6 = vld [vmem:[#allocation2 + $0xc8] sm:$0x1]  ;;  %v3719_v58 = vrot.slane %v3717_v29, 4  ;;  %v11159_v0 = vrot.slane %v1984_v40, 9 }
 0x181   : > { %2416 = vst.msk [vmem:[#allocation4 + $0x30] sm:$0xff] %vm841_vm5, %v2384_v14  ;;  %v835_v53 = vsel %vm12006_vm4, %v674_v22, %v834_v6 }
 0x182   : > { %3974 = vst.msk [vmem:[#allocation4 + $0x10] sm:$0xff] %vm841_vm5, %v3942_v3  ;;  %v2837_v27 = vld [vmem:[#allocation2 + $0xc0] sm:$0xf]  ;;  %v3721_v47 = vsel %vm12537_vm2, %v3719_v58, %v3720_v36  ;;  %v2170_v56 = vsel %vm12537_vm2, %v11159_v0, %v2169_v16  ;;  %v3724_v16 = vrot.slane %v3547_v45, 5  ;;  %v2002_v0 = vld [vmem:[#allocation4 + $0x48] sm:$0xff] }
 0x183   : > { %v2660_v21 = vpop.f32.mrf.mxu3  ;;  %833 = vst.msk [vmem:[#allocation2 + $0xc4] sm:$0xf] %vm226_vm1, %v673_v41  ;;  %v3233_v60 = vshrl.u32 %v2837_v27, 16  ;;  %v3236_v31 = vshll.u32 %v2837_v27, 16  ;;  %v3775_v41 = vunpack.c.l.b16 %v3721_v47  ;;  %v3548_v27 = vld [vmem:[#allocation2 + $0xa4] sm:$0x1] }
 0x184   : > { %v2733_v34 = vadd.f32 %v2660_v21, %v2479_v23  ;;  %v3870_v44 = vpop.f32.mrf.mxu1  ;;  %v12990_v46 = vpop.f32.mrf.mxu0  ;;  %836 = vst [vmem:[#allocation2 + $0xc8] sm:$0x1] %v835_v53  ;;  %v2001_v23 = vld [vmem:[#allocation4 + $0x40] sm:$0xff]  ;;  %v11289_v47 = vrot.slane %v3546_v59, 9 }
 0x185   : > { %v2844_v50 = vld [vmem:[#allocation4 + $0x20] sm:$0xff]  ;;  %v2315_v15 = vpop.f32.mrf.mxu2  ;;  %v3235_v10 = vrot.slane %v3233_v60, 4  ;;  %v3238_v12 = vrot.slane %v3236_v31, 5  ;;  %v5074_v31 = vld [vmem:[#allocation2 + $0x1c] sm:$0xf] }
 0x186   : > { %2765 = vst.msk [vmem:[#allocation4 + $0x28] sm:$0xff] %vm841_vm5, %v2733_v34  ;;  %v3450_v38 = vadd.f32 %v12823_v9, %v2844_v50  ;;  %v2385_v7 = vadd.f32 %v2315_v15, %v2000_v52  ;;  %v1986_v9 = vld [vmem:[#allocation2 + $0xa4] sm:$0x1]  ;;  %v13015_v15 = vld [vmem:[#allocation2 + $0xac] sm:$0xf] }
 0x187   : > { %v3561_v55 = vld [vmem:[#allocation4 + $0x18] sm:$0xff]  ;;  %11304 = vmatmul.msk.bf16.gmra.mxu1 %vm841_vm5, %v3794_v37  ;;  %11275 = vmatmul.msk.bf16.gmra.mxu0 %vm841_vm5, %v3304_v48  ;;  %v2172_v8 = vrot.slane %v1986_v9, 5  ;;  %v3239_v5 = vor.u32 %v3238_v12, %v3235_v10  ;;  %v2216_v48 = vunpack.c.l.b16 %v2170_v56 }
 0x188   : > { %v3943_v33 = vadd.f32 %v3867_v26, %v3561_v55  ;;  %11255 = vmatmul.msk.bf16.gmra.mxu3 %vm841_vm5, %v11864_v42  ;;  %3482 = vst.msk [vmem:[#allocation4 + $0x20] sm:$0xff] %vm841_vm5, %v3450_v38  ;;  %v2480_v26 = vld [vmem:[#allocation4 + $0x30] sm:$0xff] }
 0x189   : > { %2417 = vst.msk [vmem:[#allocation4 + $0x38] sm:$0xff] %vm841_vm5, %v2385_v7  ;;  %v2173_v30 = vsel %vm12537_vm2, %v2171_v2, %v2172_v8  ;;  %v3240_v6 = vrot.slane %v3239_v5, 4  ;;  %v11865_v7 = vld [vmem:[#allocation2 + $0x9c] sm:$0xff]  ;;  %v2176_v2 = vrot.slane %v13015_v15, 5  ;;  %v3726_v5 = vrot.slane %v3724_v16, 4 }
 0x18a   : > { %3975 = vst.msk [vmem:[#allocation4 + $0x18] sm:$0xff] %vm841_vm5, %v3943_v33  ;;  %11175 = vmatmul.msk.bf16.gmra.mxu2 %vm841_vm5, %v2234_v17  ;;  %v2838_v18 = vld [vmem:[#allocation2 + $0xc4] sm:$0xf]  ;;  %v2217_v54 = vunpack.c.l.b16 %v2173_v30  ;;  %v5075_v30 = vld [vmem:[#allocation2 + $0x20] sm:$0x1] }
 0x18b   : > { %v2663_v28 = vpop.f32.mrf.mxu3  ;;  %v3242_v34 = vshll.u32 %v2838_v18, 16  ;;  %v3246_v42 = vshrl.u32 %v2838_v18, 16  ;;  %v2839_v50 = vld [vmem:[#allocation2 + $0xc8] sm:$0x1] }
 0x18c   : > { %v2734_v13 = vadd.f32 %v2663_v28, %v2480_v26  ;;  %v3872_v14 = vpop.f32.mrf.mxu1  ;;  %v13010_v32 = vpop.f32.mrf.mxu0  ;;  %v3252_v38 = vshll.u32 %v2839_v50, 16  ;;  %v2235_v26 = vpack.c.b16 %v2217_v54, %v2216_v48 }
 0x18d   : > { %v2845_v3 = vld [vmem:[#allocation4 + $0x28] sm:$0xff]  ;;  %v2318_v21 = vpop.f32.mrf.mxu2  ;;  %v3244_v29 = vrot.slane %v3242_v34, 5  ;;  %v3248_v52 = vrot.slane %v3246_v42, 4 }
 0x18e   : > { %2766 = vst.msk [vmem:[#allocation4 + $0x30] sm:$0xff] %vm841_vm5, %v2734_v13  ;;  %v3451_v49 = vadd.f32 %v12839_v51, %v2845_v3  ;;  %v2386_v39 = vadd.f32 %v2318_v21, %v2001_v23  ;;  %v3774_v51 = vunpack.c.l.b16 %v3718_v25  ;;  %v3254_v40 = vrot.slane %v3252_v38, 5  ;;  %v1987_v3 = vld [vmem:[#allocation2 + $0xa8] sm:$0xe]  ;;  %v5073_v21 = vld [vmem:[#allocation2 + $0x18] sm:$0xe] }
 0x18f   : > { %v3562_v22 = vld [vmem:[#allocation4 + $0x20] sm:$0xff]  ;;  %v3249_v17 = vor.u32 %v3248_v52, %v3244_v29  ;;  %v5203_v23 = vrot.slane %v5074_v31, 5  ;;  %v11408_v45 = vrot.slane %v5073_v21, 9  ;;  %v5206_v52 = vrot.slane %v5075_v30, 5 }
 0x190   : > { %v3944_v37 = vadd.f32 %v3870_v44, %v3562_v22  ;;  %3483 = vst.msk [vmem:[#allocation4 + $0x28] sm:$0xff] %vm841_vm5, %v3451_v49  ;;  %v2481_v53 = vld [vmem:[#allocation4 + $0x38] sm:$0xff]  ;;  %v3245_v44 = vsel %vm12116_vm13, %v3240_v6, %v3244_v29  ;;  %v3795_v9 = vpack.c.b16 %v3775_v41, %v3774_v51  ;;  %v3727_v49 = vrot.slane %v3548_v27, 5 }
 0x191   : > { %2418 = vst.msk [vmem:[#allocation4 + $0x40] sm:$0xff] %vm841_vm5, %v2386_v39  ;;  %v3250_v60 = vrot.slane %v3249_v17, 4  ;;  %v3288_v8 = vunpack.c.l.b16 %v3245_v44  ;;  %v11160_v6 = vrot.slane %v1987_v3, 9  ;;  %v3725_v51 = vsel %vm12537_vm2, %v11289_v47, %v3724_v16  ;;  %v3550_v27 = vld [vmem:[#allocation2 + $0xac] sm:$0xf] }
 0x192   : > { %3976 = vst.msk [vmem:[#allocation4 + $0x20] sm:$0xff] %vm841_vm5, %v3944_v37  ;;  %v2178_v37 = vrot.slane %v2176_v2, 4  ;;  %v3728_v41 = vsel %vm12537_vm2, %v3726_v5, %v3727_v49  ;;  %v5205_v29 = vrot.slane %v5203_v23, 4  ;;  %v3549_v3 = vld [vmem:[#allocation2 + $0xa8] sm:$0xe] }
 0x193   : > { %v2665_v55 = vpop.f32.mrf.mxu3  ;;  %v3255_v25 = vsel %vm12116_vm13, %v3250_v60, %v3254_v40  ;;  %v2177_v44 = vsel %vm12537_vm2, %v11160_v6, %v2176_v2  ;;  %v3776_v40 = vunpack.c.l.b16 %v3725_v51  ;;  %v3777_v16 = vunpack.c.l.b16 %v3728_v41  ;;  %v5077_v49 = vld [vmem:[#allocation2 + $0x28] sm:$0xf]  ;;  %v1990_v6 = vld [vmem:[#allocation2 + $0xb4] sm:$0xe]  ;;  %v1992_v41 = vld [vmem:[#allocation2 + $0xbc] sm:$0x1] }
 0x194   : > { %v2735_v33 = vadd.f32 %v2665_v55, %v2481_v53  ;;  %v3875_v36 = vpop.f32.mrf.mxu1  ;;  %v13022_v13 = vpop.f32.mrf.mxu0  ;;  %v3289_v22 = vunpack.c.l.b16 %v3255_v25  ;;  %v2003_v55 = vld [vmem:[#allocation4 + $0x50] sm:$0xff]  ;;  %v5207_v59 = vsel %vm12537_vm2, %v5205_v29, %v5206_v52  ;;  %v3731_v2 = vrot.slane %v3550_v27, 5  ;;  %v3551_v25 = vld [vmem:[#allocation2 + $0xb0] sm:$0x1] }
 0x195   : > { %v2846_v58 = vld [vmem:[#allocation4 + $0x30] sm:$0xff]  ;;  %v2320_v12 = vpop.f32.mrf.mxu2  ;;  %v11161_v29 = vrot.slane %v1990_v6, 9 }
 0x196   : > { %2767 = vst.msk [vmem:[#allocation4 + $0x38] sm:$0xff] %vm841_vm5, %v2735_v33  ;;  %v3452_v28 = vadd.f32 %v12853_v20, %v2846_v58  ;;  %v2387_v18 = vadd.f32 %v2320_v12, %v2002_v0  ;;  %v1989_v20 = vld [vmem:[#allocation2 + $0xb0] sm:$0x1]  ;;  %v3305_v34 = vpack.c.b16 %v3289_v22, %v3288_v8  ;;  %v2218_v58 = vunpack.c.l.b16 %v2177_v44 }
 0x197   : > { %v3563_v10 = vld [vmem:[#allocation4 + $0x28] sm:$0xff]  ;;  %11305 = vmatmul.msk.bf16.gmra.mxu1 %vm841_vm5, %v3795_v9  ;;  %v2179_v39 = vrot.slane %v1989_v20, 5  ;;  %v3796_v12 = vpack.c.b16 %v3777_v16, %v3776_v40 }
 0x198   : > { %v3945_v56 = vadd.f32 %v3872_v14, %v3563_v10  ;;  %11256 = vmatmul.msk.bf16.gmra.mxu3 %vm841_vm5, %v11865_v7  ;;  %3484 = vst.msk [vmem:[#allocation4 + $0x30] sm:$0xff] %vm841_vm5, %v3452_v28  ;;  %v2482_v42 = vld [vmem:[#allocation4 + $0x40] sm:$0xff]  ;;  %11276 = vmatmul.msk.bf16.gmra.mxu0 %vm841_vm5, %v3305_v34  ;;  %v5316_v28 = vunpack.c.l.b16 %v5207_v59  ;;  %v11866_v10 = vld [vmem:[#allocation2 + $0xa8] sm:$0xff] }
 0x199   : > { %2419 = vst.msk [vmem:[#allocation4 + $0x48] sm:$0xff] %vm841_vm5, %v2387_v18  ;;  %v2180_v17 = vsel %vm12537_vm2, %v2178_v37, %v2179_v39  ;;  %v3734_v37 = vrot.slane %v3551_v25, 5  ;;  %v2005_v59 = vld [vmem:[#allocation4 + $0x60] sm:$0xff] }
 0x19a   : > { %3977 = vst.msk [vmem:[#allocation4 + $0x28] sm:$0xff] %vm841_vm5, %v3945_v56  ;;  %11176 = vmatmul.msk.bf16.gmra.mxu2 %vm841_vm5, %v2235_v26  ;;  %v2219_v60 = vunpack.c.l.b16 %v2180_v17  ;;  %v1991_v26 = vld [vmem:[#allocation2 + $0xb8] sm:$0xf]  ;;  %v2004_v56 = vld [vmem:[#allocation4 + $0x58] sm:$0xff] }
 0x19b   : > { %v2668_v14 = vpop.f32.mrf.mxu3  ;;  %v2183_v22 = vrot.slane %v1991_v26, 5 }
 0x19c   : > { %v2736_v50 = vadd.f32 %v2668_v14, %v2482_v42  ;;  %v3877_v48 = vpop.f32.mrf.mxu1  ;;  %v13043_v33 = vpop.f32.mrf.mxu0  ;;  %v2236_v18 = vpack.c.b16 %v2219_v60, %v2218_v58  ;;  %v11290_v42 = vrot.slane %v3549_v3, 9  ;;  %v3733_v14 = vrot.slane %v3731_v2, 4 }
 0x19d   : > { %v2847_v38 = vld [vmem:[#allocation4 + $0x38] sm:$0xff]  ;;  %v2323_v15 = vpop.f32.mrf.mxu2  ;;  %v2184_v58 = vsel %vm12537_vm2, %v11161_v29, %v2183_v22 }
 0x19e   : > { %2768 = vst.msk [vmem:[#allocation4 + $0x40] sm:$0xff] %vm841_vm5, %v2736_v50  ;;  %v3453_v54 = vadd.f32 %v12874_v63, %v2847_v38  ;;  %v2388_v9 = vadd.f32 %v2323_v15, %v2003_v55  ;;  %v5204_v63 = vsel %vm12537_vm2, %v11408_v45, %v5203_v23  ;;  %v5076_v50 = vld [vmem:[#allocation2 + $0x24] sm:$0xe]  ;;  %v5078_v45 = vld [vmem:[#allocation2 + $0x2c] sm:$0x1]  ;;  %v3735_v55 = vsel %vm12537_vm2, %v3733_v14, %v3734_v37 }
 0x19f   : > { %v3564_v53 = vld [vmem:[#allocation4 + $0x30] sm:$0xff]  ;;  %v11409_v44 = vrot.slane %v5076_v50, 9  ;;  %v5213_v40 = vrot.slane %v5078_v45, 5 }
 0x1a0   : > { %v3946_v7 = vadd.f32 %v3875_v36, %v3564_v53  ;;  %3485 = vst.msk [vmem:[#allocation4 + $0x38] sm:$0xff] %vm841_vm5, %v3453_v54  ;;  %v2483_v31 = vld [vmem:[#allocation4 + $0x48] sm:$0xff]  ;;  %v5315_v36 = vunpack.c.l.b16 %v5204_v63  ;;  %v2185_v54 = vrot.slane %v2183_v22, 4  ;;  %v3732_v53 = vsel %vm12537_vm2, %v11290_v42, %v3731_v2  ;;  %v3552_v22 = vld [vmem:[#allocation2 + $0xb4] sm:$0xe] }
 0x1a1   : > { %2420 = vst.msk [vmem:[#allocation4 + $0x50] sm:$0xff] %vm841_vm5, %v2388_v9  ;;  %v2006_v42 = vld [vmem:[#allocation4 + $0x68] sm:$0xff]  ;;  %v11291_v45 = vrot.slane %v3552_v22, 9 }
 0x1a2   : > { %3978 = vst.msk [vmem:[#allocation4 + $0x30] sm:$0xff] %vm841_vm5, %v3946_v7  ;;  %v5347_v34 = vpack.c.b16 %v5316_v28, %v5315_v36 }
 0x1a3   : > { %v2670_v0 = vpop.f32.mrf.mxu3 }
 0x1a4   : > { %v2737_v8 = vadd.f32 %v2670_v0, %v2483_v31  ;;  %v3880_v5 = vpop.f32.mrf.mxu1  ;;  %v13054_v30 = vpop.f32.mrf.mxu0  ;;  %v3778_v31 = vunpack.c.l.b16 %v3732_v53  ;;  %v3779_v0 = vunpack.c.l.b16 %v3735_v55 }
 0x1a5   : > { %v2848_v47 = vld [vmem:[#allocation4 + $0x40] sm:$0xff]  ;;  %v2325_v21 = vpop.f32.mrf.mxu2 }
 0x1a6   : > { %2769 = vst.msk [vmem:[#allocation4 + $0x48] sm:$0xff] %vm841_vm5, %v2737_v8  ;;  %v3454_v20 = vadd.f32 %v12886_v57, %v2848_v47  ;;  %v2389_v51 = vadd.f32 %v2325_v21, %v2004_v56  ;;  %v5210_v57 = vrot.slane %v5077_v49, 5  ;;  %v3553_v8 = vld [vmem:[#allocation2 + $0xb8] sm:$0xf] }
 0x1a7   : > { %v3565_v23 = vld [vmem:[#allocation4 + $0x38] sm:$0xff]  ;;  %11306 = vmatmul.msk.bf16.gmra.mxu1 %vm841_vm5, %v3796_v12  ;;  %v3738_v49 = vrot.slane %v3553_v8, 5 }
 0x1a8   : > { %v3947_v39 = vadd.f32 %v3877_v48, %v3565_v23  ;;  %11257 = vmatmul.msk.bf16.gmra.mxu3 %vm841_vm5, %v11866_v10  ;;  %3486 = vst.msk [vmem:[#allocation4 + $0x40] sm:$0xff] %vm841_vm5, %v3454_v20  ;;  %v2484_v52 = vld [vmem:[#allocation4 + $0x50] sm:$0xff]  ;;  %v2186_v48 = vrot.slane %v1992_v41, 5  ;;  %11425 = vmatmul.msk.bf16.vlgmr.msra.gmra.mxu0 %vm841_vm5, %v5347_v34  ;;  %v5212_v17 = vrot.slane %v5210_v57, 4  ;;  %v2220_v10 = vunpack.c.l.b16 %v2184_v58  ;;  %v3554_v23 = vld [vmem:[#allocation2 + $0xbc] sm:$0x1] }
 0x1a9   : > { %2421 = vst.msk [vmem:[#allocation4 + $0x58] sm:$0xff] %vm841_vm5, %v2389_v51  ;;  %v3797_v20 = vpack.c.b16 %v3779_v0, %v3778_v31  ;;  %v5080_v34 = vld [vmem:[#allocation2 + $0x34] sm:$0xf]  ;;  %v3740_v29 = vrot.slane %v3738_v49, 4 }
 0x1aa   : > { %3979 = vst.msk [vmem:[#allocation4 + $0x38] sm:$0xff] %vm841_vm5, %v3947_v39  ;;  %11177 = vmatmul.msk.bf16.gmra.mxu2 %vm841_vm5, %v2236_v18  ;;  %v2187_v60 = vsel %vm12537_vm2, %v2185_v54, %v2186_v48  ;;  %v5214_v2 = vsel %vm12537_vm2, %v5212_v17, %v5213_v40  ;;  %v11867_v18 = vld [vmem:[#allocation2 + $0xb4] sm:$0xff]  ;;  %v5217_v53 = vrot.slane %v5080_v34, 5  ;;  %v3556_v34 = vld [vmem:[#allocation2 + $0xc4] sm:$0xf] }
 0x1ab   : > { %v2673_v38 = vpop.f32.mrf.mxu3  ;;  %v2221_v12 = vunpack.c.l.b16 %v2187_v60  ;;  %v4355_v39 = vld [vmem:[#allocation2 + $0x18] sm:$0xf] }
 0x1ac   : > { %v2738_v15 = vadd.f32 %v2673_v38, %v2484_v52  ;;  %v3882_v7 = vpop.f32.mrf.mxu1  ;;  %v13073_v26 = vpop.f32.mrf.mxu0  ;;  %v3741_v52 = vrot.slane %v3554_v23, 5  ;;  %v4356_v38 = vld [vmem:[#allocation2 + $0x1c] sm:$0xf]  ;;  %v4439_v55 = vshll.u32 %v4355_v39, 16  ;;  %v5219_v58 = vrot.slane %v5217_v53, 4 }
 0x1ad   : > { %v2849_v16 = vld [vmem:[#allocation4 + $0x48] sm:$0xff]  ;;  %v2328_v27 = vpop.f32.mrf.mxu2  ;;  %v2237_v14 = vpack.c.b16 %v2221_v12, %v2220_v10  ;;  %v4445_v17 = vshll.u32 %v4356_v38, 16  ;;  %v4449_v40 = vshrl.u32 %v4356_v38, 16  ;;  %v3555_v38 = vld [vmem:[#allocation2 + $0xc0] sm:$0xe] }
 0x1ae   : > { %2770 = vst.msk [vmem:[#allocation4 + $0x50] sm:$0xff] %vm841_vm5, %v2738_v15  ;;  %v3455_v9 = vadd.f32 %v12916_v11, %v2849_v16  ;;  %v2390_v28 = vadd.f32 %v2328_v27, %v2005_v59  ;;  %v5211_v11 = vsel %vm12537_vm2, %v11409_v44, %v5210_v57  ;;  %v5079_v15 = vld [vmem:[#allocation2 + $0x30] sm:$0xe]  ;;  %v5081_v44 = vld [vmem:[#allocation2 + $0x38] sm:$0x1] }
 0x1af   : > { %v3566_v63 = vld [vmem:[#allocation4 + $0x40] sm:$0xff]  ;;  %v5317_v47 = vunpack.c.l.b16 %v5211_v11  ;;  %v11410_v27 = vrot.slane %v5079_v15, 9  ;;  %v5220_v60 = vrot.slane %v5081_v44, 5  ;;  %v13099_v8 = vrot.slane %v4445_v17, 5  ;;  %v2008_v44 = vld [vmem:[#allocation4 + $0x78] sm:$0xff] }
 0x1b0   : > { %v3948_v36 = vadd.f32 %v3880_v5, %v3566_v63  ;;  %3487 = vst.msk [vmem:[#allocation4 + $0x48] sm:$0xff] %vm841_vm5, %v3455_v9  ;;  %v2485_v3 = vld [vmem:[#allocation4 + $0x58] sm:$0xff]  ;;  %v5318_v5 = vunpack.c.l.b16 %v5214_v2  ;;  %v3739_v9 = vsel %vm12537_vm2, %v11291_v45, %v3738_v49  ;;  %v3742_v63 = vsel %vm12537_vm2, %v3740_v29, %v3741_v52  ;;  %v4357_v2 = vld [vmem:[#allocation2 + $0x20] sm:$0x1] }
 0x1b1   : > { %2422 = vst.msk [vmem:[#allocation4 + $0x60] sm:$0xff] %vm841_vm5, %v2390_v28  ;;  %v4441_v28 = vrot.slane %v4439_v55, 5  ;;  %v4451_v10 = vrot.slane %v4449_v40, 4  ;;  %v4455_v23 = vshll.u32 %v4357_v2, 16  ;;  %v5083_v55 = vld [vmem:[#allocation2 + $0x40] sm:$0xf] }
 0x1b2   : > { %3980 = vst.msk [vmem:[#allocation4 + $0x40] sm:$0xff] %vm841_vm5, %v3948_v36  ;;  %v5348_v50 = vpack.c.b16 %v5318_v5, %v5317_v47  ;;  %v3780_v47 = vunpack.c.l.b16 %v3739_v9  ;;  %v3781_v5 = vunpack.c.l.b16 %v3742_v63  ;;  %v11869_v40 = vld [vmem:[#allocation2 + $0x18] sm:$0xff] }
 0x1b3   : > { %v2675_v25 = vpop.f32.mrf.mxu3  ;;  %v4457_v52 = vrot.slane %v4455_v23, 5 }
 0x1b4   : > { %v2739_v56 = vadd.f32 %v2675_v25, %v2485_v3  ;;  %v3885_v6 = vpop.f32.mrf.mxu1  ;;  %v13084_v57 = vpop.f32.mrf.mxu0  ;;  %v2007_v3 = vld [vmem:[#allocation4 + $0x70] sm:$0xff] }
 0x1b5   : > { %v2850_v21 = vld [vmem:[#allocation4 + $0x50] sm:$0xff]  ;;  %v2330_v41 = vpop.f32.mrf.mxu2 }
 0x1b6   : > { %2771 = vst.msk [vmem:[#allocation4 + $0x58] sm:$0xff] %vm841_vm5, %v2739_v56  ;;  %v3456_v37 = vadd.f32 %v12944_v24, %v2850_v21  ;;  %v2391_v48 = vadd.f32 %v2330_v41, %v2006_v42  ;;  %v4436_v24 = vshrl.u32 %v4355_v39, 16  ;;  %v4452_v21 = vor.u32 %v4451_v10, %v13099_v8 }
 0x1b7   : > { %v3567_v51 = vld [vmem:[#allocation4 + $0x48] sm:$0xff]  ;;  %11307 = vmatmul.msk.bf16.gmra.mxu1 %vm841_vm5, %v3797_v20  ;;  %v5218_v20 = vsel %vm12537_vm2, %v11410_v27, %v5217_v53  ;;  %v3798_v41 = vpack.c.b16 %v3781_v5, %v3780_v47  ;;  %v4359_v27 = vld [vmem:[#allocation2 + $0x28] sm:$0xf] }
 0x1b8   : > { %v3949_v54 = vadd.f32 %v3882_v7, %v3567_v51  ;;  %11258 = vmatmul.msk.bf16.gmra.mxu3 %vm841_vm5, %v11867_v18  ;;  %3488 = vst.msk [vmem:[#allocation4 + $0x50] sm:$0xff] %vm841_vm5, %v3456_v37  ;;  %v2486_v16 = vld [vmem:[#allocation4 + $0x60] sm:$0xff]  ;;  %11426 = vmatmul.msk.bf16.gmra.mxu0 %vm841_vm5, %v5348_v50  ;;  %v4438_v36 = vrot.slane %v4436_v24, 4  ;;  %v11868_v51 = vld [vmem:[#allocation2 + $0xc0] sm:$0xff]  ;;  %v4453_v53 = vrot.slane %v4452_v21, 4  ;;  %v4473_v47 = vshrl.u32 %v4359_v27, 16 }
 0x1b9   : > { %2423 = vst.msk [vmem:[#allocation4 + $0x68] sm:$0xff] %vm841_vm5, %v2391_v48  ;;  %v3557_v24 = vld [vmem:[#allocation2 + $0xc8] sm:$0x1] }
 0x1ba   : > { %3981 = vst.msk [vmem:[#allocation4 + $0x48] sm:$0xff] %vm841_vm5, %v3949_v54  ;;  %11178 = vmatmul.msk.bf16.gmra.mxu2 %vm841_vm5, %v2237_v14  ;;  %v4442_v22 = vor.u32 %v4441_v28, %v4438_v36  ;;  %v5319_v14 = vunpack.c.l.b16 %v5218_v20  ;;  %v3745_v54 = vrot.slane %v3556_v34, 5  ;;  %v5082_v28 = vld [vmem:[#allocation2 + $0x3c] sm:$0xe] }
 0x1bb   : > { %v2678_v7 = vpop.f32.mrf.mxu3 }
 0x1bc   : > { %v2740_v59 = vadd.f32 %v2678_v7, %v2486_v16  ;;  %v3887_v0 = vpop.f32.mrf.mxu1  ;;  %v13101_v49 = vpop.f32.mrf.mxu0  ;;  %v4443_v29 = vrot.slane %v4442_v22, 4 }
 0x1bd   : > { %v2851_v31 = vld [vmem:[#allocation4 + $0x58] sm:$0xff]  ;;  %v2333_v25 = vpop.f32.mrf.mxu2 }
 0x1be   : > { %2772 = vst.msk [vmem:[#allocation4 + $0x60] sm:$0xff] %vm841_vm5, %v2740_v59  ;;  %v3457_v11 = vadd.f32 %v12971_v1, %v2851_v31  ;;  %v2392_v18 = vadd.f32 %v2333_v25, %v2007_v3  ;;  %v5221_v1 = vsel %vm12537_vm2, %v5219_v58, %v5220_v60  ;;  %v11292_v59 = vrot.slane %v3555_v38, 9 }
 0x1bf   : > { %v3568_v12 = vld [vmem:[#allocation4 + $0x50] sm:$0xff]  ;;  %v5320_v37 = vunpack.c.l.b16 %v5221_v1  ;;  %v3747_v58 = vrot.slane %v3745_v54, 4  ;;  %v3748_v60 = vrot.slane %v3557_v24, 5  ;;  %v5224_v31 = vrot.slane %v5083_v55, 5 }
 0x1c0   : > { %v3950_v56 = vadd.f32 %v3885_v6, %v3568_v12  ;;  %3489 = vst.msk [vmem:[#allocation4 + $0x58] sm:$0xff] %vm841_vm5, %v3457_v11  ;;  %v2487_v42 = vld [vmem:[#allocation4 + $0x68] sm:$0xff]  ;;  %v4448_v36 = vsel %vm12116_vm13, %v4443_v29, %v13099_v8  ;;  %v5084_v11 = vld [vmem:[#allocation2 + $0x44] sm:$0x1]  ;;  %v4469_v25 = vshll.u32 %v4359_v27, 16  ;;  %v3746_v8 = vsel %vm12537_vm2, %v11292_v59, %v3745_v54 }
 0x1c1   : > { %2424 = vst.msk [vmem:[#allocation4 + $0x70] sm:$0xff] %vm841_vm5, %v2392_v18  ;;  %v5349_v7 = vpack.c.b16 %v5320_v37, %v5319_v14  ;;  %v3749_v20 = vsel %vm12537_vm2, %v3747_v58, %v3748_v60  ;;  %v11411_v1 = vrot.slane %v5082_v28, 9  ;;  %v5226_v22 = vrot.slane %v5224_v31, 4  ;;  %v2009_v14 = vld [vmem:[#allocation4 + $0x80] sm:$0xff]  ;;  %v5086_v60 = vld [vmem:[#allocation2 + $0x4c] sm:$0xf] }
 0x1c2   : > { %3982 = vst.msk [vmem:[#allocation4 + $0x50] sm:$0xff] %vm841_vm5, %v3950_v56  ;;  %v5227_v23 = vrot.slane %v5084_v11, 5  ;;  %v4821_v34 = vunpack.c.l.b16 %v4448_v36  ;;  %v4475_v29 = vrot.slane %v4473_v47, 4  ;;  %v3782_v54 = vunpack.c.l.b16 %v3746_v8  ;;  %v2010_v36 = vld [vmem:[#allocation4 + $0x88] sm:$0xff] }
 0x1c3   : > { %v2680_v6 = vpop.f32.mrf.mxu3  ;;  %v5231_v8 = vrot.slane %v5086_v60, 5 }
 0x1c4   : > { %v2741_v39 = vadd.f32 %v2680_v6, %v2487_v42  ;;  %v3890_v45 = vpop.f32.mrf.mxu1  ;;  %v13113_v16 = vpop.f32.mrf.mxu0  ;;  %v5228_v24 = vsel %vm12537_vm2, %v5226_v22, %v5227_v23 }
 0x1c5   : > { %v2852_v50 = vld [vmem:[#allocation4 + $0x60] sm:$0xff]  ;;  %v2335_v17 = vpop.f32.mrf.mxu2  ;;  %v5322_v59 = vunpack.c.l.b16 %v5228_v24 }
 0x1c6   : > { %2773 = vst.msk [vmem:[#allocation4 + $0x68] sm:$0xff] %vm841_vm5, %v2741_v39  ;;  %v3458_v48 = vadd.f32 %v12990_v46, %v2852_v50  ;;  %v2393_v63 = vadd.f32 %v2335_v17, %v2008_v44  ;;  %v4358_v46 = vld [vmem:[#allocation2 + $0x24] sm:$0xf]  ;;  %v13135_v50 = vrot.slane %v4469_v25, 5 }
 0x1c7   : > { %v3569_v15 = vld [vmem:[#allocation4 + $0x58] sm:$0xff]  ;;  %11308 = vmatmul.msk.bf16.gmra.mxu1 %vm841_vm5, %v3798_v41  ;;  %v4460_v12 = vshrl.u32 %v4358_v46, 16  ;;  %v4463_v3 = vshll.u32 %v4358_v46, 16 }
 0x1c8   : > { %v3951_v9 = vadd.f32 %v3887_v0, %v3569_v15  ;;  %11259 = vmatmul.msk.bf16.gmra.mxu3 %vm841_vm5, %v11868_v51  ;;  %3490 = vst.msk [vmem:[#allocation4 + $0x60] sm:$0xff] %vm841_vm5, %v3458_v48  ;;  %v4458_v0 = vsel %vm12116_vm13, %v4453_v53, %v4457_v52  ;;  %v2488_v2 = vld [vmem:[#allocation4 + $0x70] sm:$0xff]  ;;  %11427 = vmatmul.msk.bf16.gmra.mxu0 %vm841_vm5, %v5349_v7  ;;  %v3783_v48 = vunpack.c.l.b16 %v3749_v20  ;;  %v4360_v53 = vld [vmem:[#allocation2 + $0x2c] sm:$0x1]  ;;  %v5087_v20 = vld [vmem:[#allocation2 + $0x50] sm:$0x1] }
 0x1c9   : > { %2425 = vst.msk [vmem:[#allocation4 + $0x78] sm:$0xff] %vm841_vm5, %v2393_v63  ;;  %v4822_v42 = vunpack.c.l.b16 %v4458_v0  ;;  %v4462_v51 = vrot.slane %v4460_v12, 4  ;;  %v4465_v41 = vrot.slane %v4463_v3, 5  ;;  %v4476_v17 = vor.u32 %v4475_v29, %v13135_v50  ;;  %v11870_v25 = vld [vmem:[#allocation2 + $0x24] sm:$0xff] }
 0x1ca   : > { %3983 = vst.msk [vmem:[#allocation4 + $0x58] sm:$0xff] %vm841_vm5, %v3951_v9  ;;  %11375 = vmatmul.msk.bf16.vlgmr.msra.gmra.mxu2 %vm841_vm5, %v11869_v40  ;;  %v4479_v40 = vshll.u32 %v4360_v53, 16  ;;  %v3799_v9 = vpack.c.b16 %v3783_v48, %v3782_v54  ;;  %v5233_v29 = vrot.slane %v5231_v8, 4  ;;  %v2011_v54 = vld [vmem:[#allocation4 + $0x90] sm:$0xff] }
 0x1cb   : > { %v2683_v10 = vpop.f32.mrf.mxu3  ;;  %v4853_v44 = vpack.c.b16 %v4822_v42, %v4821_v34  ;;  %v4477_v11 = vrot.slane %v4476_v17, 4 }
 0x1cc   : > { %v2742_v5 = vadd.f32 %v2683_v10, %v2488_v2  ;;  %v3892_v18 = vpop.f32.mrf.mxu1  ;;  %v13133_v39 = vpop.f32.mrf.mxu0  ;;  %v4481_v2 = vrot.slane %v4479_v40, 5 }
 0x1cd   : > { %v2853_v56 = vld [vmem:[#allocation4 + $0x68] sm:$0xff]  ;;  %v2338_v37 = vpop.f32.mrf.mxu2 }
 0x1ce   : > { %2774 = vst.msk [vmem:[#allocation4 + $0x70] sm:$0xff] %vm841_vm5, %v2742_v5  ;;  %v3459_v21 = vadd.f32 %v13010_v32, %v2853_v56  ;;  %v2394_v38 = vadd.f32 %v2338_v37, %v2009_v14  ;;  %v5225_v32 = vsel %vm12537_vm2, %v11411_v1, %v5224_v31  ;;  %v4362_v5 = vld [vmem:[#allocation2 + $0x34] sm:$0xf]  ;;  %v5085_v56 = vld [vmem:[#allocation2 + $0x48] sm:$0xe]  ;;  %v4482_v23 = vsel %vm12116_vm13, %v4477_v11, %v4481_v2 }
 0x1cf   : > { %v3570_v6 = vld [vmem:[#allocation4 + $0x60] sm:$0xff]  ;;  %v5321_v63 = vunpack.c.l.b16 %v5225_v32  ;;  %v4824_v32 = vunpack.c.l.b16 %v4482_v23 }
 0x1d0   : > { %v3952_v52 = vadd.f32 %v3890_v45, %v3570_v6  ;;  %3491 = vst.msk [vmem:[#allocation4 + $0x68] sm:$0xff] %vm841_vm5, %v3459_v21  ;;  %v2489_v55 = vld [vmem:[#allocation4 + $0x78] sm:$0xff]  ;;  %v4466_v45 = vor.u32 %v4465_v41, %v4462_v51  ;;  %v4493_v6 = vshll.u32 %v4362_v5, 16  ;;  %v4497_v51 = vshrl.u32 %v4362_v5, 16 }
 0x1d1   : > { %2426 = vst.msk [vmem:[#allocation4 + $0x80] sm:$0xff] %vm841_vm5, %v2394_v38  ;;  %v5350_v47 = vpack.c.b16 %v5322_v59, %v5321_v63  ;;  %v11412_v41 = vrot.slane %v5085_v56, 9 }
 0x1d2   : > { %3984 = vst.msk [vmem:[#allocation4 + $0x60] sm:$0xff] %vm841_vm5, %v3952_v52  ;;  %v4467_v28 = vrot.slane %v4466_v45, 4  ;;  %v5234_v52 = vrot.slane %v5087_v20, 5  ;;  %v13166_v17 = vrot.slane %v4493_v6, 5  ;;  %v4499_v40 = vrot.slane %v4497_v51, 4 }
 0x1d3   : > { %v2685_v15 = vpop.f32.mrf.mxu3 }
 0x1d4   : > { %v2743_v7 = vadd.f32 %v2685_v15, %v2489_v55  ;;  %v3895_v27 = vpop.f32.mrf.mxu1  ;;  %v13147_v10 = vpop.f32.mrf.mxu0  ;;  %v4472_v22 = vsel %vm12116_vm13, %v4467_v28, %v13135_v50  ;;  %v4500_v28 = vor.u32 %v4499_v40, %v13166_v17 }
 0x1d5   : > { %v2854_v46 = vld [vmem:[#allocation4 + $0x70] sm:$0xff]  ;;  %v2340_v0 = vpop.f32.mrf.mxu2  ;;  %v4823_v53 = vunpack.c.l.b16 %v4472_v22 }
 0x1d6   : > { %2775 = vst.msk [vmem:[#allocation4 + $0x78] sm:$0xff] %vm841_vm5, %v2743_v7  ;;  %v3460_v58 = vadd.f32 %v13022_v13, %v2854_v46  ;;  %v2395_v3 = vadd.f32 %v2340_v0, %v2010_v36  ;;  %v4361_v13 = vld [vmem:[#allocation2 + $0x30] sm:$0xf]  ;;  %v5232_v7 = vsel %vm12537_vm2, %v11412_v41, %v5231_v8  ;;  %v4365_v22 = vld [vmem:[#allocation2 + $0x40] sm:$0xf]  ;;  %v4501_v23 = vrot.slane %v4500_v28, 4 }
 0x1d7   : > { %v3571_v31 = vld [vmem:[#allocation4 + $0x68] sm:$0xff]  ;;  %11309 = vmatmul.msk.bf16.gmra.mxu1 %vm841_vm5, %v3799_v9  ;;  %v4484_v34 = vshrl.u32 %v4361_v13, 16  ;;  %v4487_v42 = vshll.u32 %v4361_v13, 16  ;;  %v4854_v46 = vpack.c.b16 %v4824_v32, %v4823_v53  ;;  %v5323_v60 = vunpack.c.l.b16 %v5232_v7  ;;  %v11871_v13 = vld [vmem:[#allocation2 + $0x30] sm:$0xff] }
 0x1d8   : > { %v3953_v12 = vadd.f32 %v3892_v18, %v3571_v31  ;;  %11392 = vmatmul.msk.bf16.vlgmr.msra.gmra.mxu3 %vm841_vm5, %v4853_v44  ;;  %3492 = vst.msk [vmem:[#allocation4 + $0x70] sm:$0xff] %vm841_vm5, %v3460_v58  ;;  %v2490_v1 = vld [vmem:[#allocation4 + $0x80] sm:$0xff]  ;;  %11428 = vmatmul.msk.bf16.gmra.mxu0 %vm841_vm5, %v5350_v47  ;;  %v4363_v9 = vld [vmem:[#allocation2 + $0x38] sm:$0x1]  ;;  %v4517_v41 = vshll.u32 %v4365_v22, 16 }
 0x1d9   : > { %2427 = vst.msk [vmem:[#allocation4 + $0x88] sm:$0xff] %vm841_vm5, %v2395_v3  ;;  %v4486_v44 = vrot.slane %v4484_v34, 4  ;;  %v4489_v45 = vrot.slane %v4487_v42, 5  ;;  %v4503_v11 = vshll.u32 %v4363_v9, 16  ;;  %v5088_v34 = vld [vmem:[#allocation2 + $0x54] sm:$0xe] }
 0x1da   : > { %3985 = vst.msk [vmem:[#allocation4 + $0x68] sm:$0xff] %vm841_vm5, %v3953_v12  ;;  %11376 = vmatmul.msk.bf16.gmra.mxu2 %vm841_vm5, %v11870_v25  ;;  %v5089_v12 = vld [vmem:[#allocation2 + $0x58] sm:$0xf]  ;;  %v2012_v25 = vld [vmem:[#allocation4 + $0x98] sm:$0xff]  ;;  %v5090_v42 = vld [vmem:[#allocation2 + $0x5c] sm:$0x1] }
 0x1db   : > { %v2688_v18 = vpop.f32.mrf.mxu3  ;;  %v4490_v58 = vor.u32 %v4489_v45, %v4486_v44  ;;  %v11413_v53 = vrot.slane %v5088_v34, 9  ;;  %v2013_v45 = vld [vmem:[#allocation4 + $0xa0] sm:$0xff]  ;;  %v13194_v9 = vrot.slane %v4517_v41, 5  ;;  %v4368_v41 = vld [vmem:[#allocation2 + $0x4c] sm:$0xf] }
 0x1dc   : > { %v2744_v21 = vadd.f32 %v2688_v18, %v2490_v1  ;;  %v3897_v37 = vpop.f32.mrf.mxu1  ;;  %v13163_v24 = vpop.f32.mrf.mxu0  ;;  %v4364_v18 = vld [vmem:[#allocation2 + $0x3c] sm:$0xf] }
 0x1dd   : > { %v2855_v14 = vld [vmem:[#allocation4 + $0x78] sm:$0xff]  ;;  %v2343_v48 = vpop.f32.mrf.mxu2  ;;  %v4491_v20 = vrot.slane %v4490_v58, 4  ;;  %v4511_v51 = vshll.u32 %v4364_v18, 16 }
 0x1de   : > { %2776 = vst.msk [vmem:[#allocation4 + $0x80] sm:$0xff] %vm841_vm5, %v2744_v21  ;;  %v3461_v50 = vadd.f32 %v13043_v33, %v2855_v14  ;;  %v2396_v15 = vadd.f32 %v2343_v48, %v2011_v54  ;;  %v5235_v33 = vsel %vm12537_vm2, %v5233_v29, %v5234_v52  ;;  %v4505_v21 = vrot.slane %v4503_v11, 5 }
 0x1df   : > { %v3572_v38 = vld [vmem:[#allocation4 + $0x70] sm:$0xff]  ;;  %v5324_v31 = vunpack.c.l.b16 %v5235_v33  ;;  %v4521_v29 = vshrl.u32 %v4365_v22, 16  ;;  %v4513_v33 = vrot.slane %v4511_v51, 5  ;;  %v4367_v51 = vld [vmem:[#allocation2 + $0x48] sm:$0xf] }
 0x1e0   : > { %v3954_v55 = vadd.f32 %v3895_v27, %v3572_v38  ;;  %3493 = vst.msk [vmem:[#allocation4 + $0x78] sm:$0xff] %vm841_vm5, %v3461_v50  ;;  %v2491_v63 = vld [vmem:[#allocation4 + $0x88] sm:$0xff]  ;;  %v4496_v50 = vsel %vm12116_vm13, %v4491_v20, %v13166_v17  ;;  %v4506_v48 = vsel %vm12116_vm13, %v4501_v23, %v4505_v21  ;;  %v5092_v20 = vld [vmem:[#allocation2 + $0x64] sm:$0xf] }
 0x1e1   : > { %2428 = vst.msk [vmem:[#allocation4 + $0x90] sm:$0xff] %vm841_vm5, %v2396_v15  ;;  %v5351_v1 = vpack.c.b16 %v5324_v31, %v5323_v60  ;;  %v4826_v58 = vunpack.c.l.b16 %v4506_v48  ;;  %v4366_v60 = vld [vmem:[#allocation2 + $0x44] sm:$0x1] }
 0x1e2   : > { %3986 = vst.msk [vmem:[#allocation4 + $0x70] sm:$0xff] %vm841_vm5, %v3954_v55  ;;  %v5241_v55 = vrot.slane %v5090_v42, 5 }
 0x1e3   : > { %v2690_v59 = vpop.f32.mrf.mxu3 }
 0x1e4   : > { %v2745_v27 = vadd.f32 %v2690_v59, %v2491_v63  ;;  %v3900_v0 = vpop.f32.mrf.mxu1  ;;  %v13177_v5 = vpop.f32.mrf.mxu0  ;;  %v4523_v63 = vrot.slane %v4521_v29, 4  ;;  %v5091_v29 = vld [vmem:[#allocation2 + $0x60] sm:$0xe] }
 0x1e5   : > { %v2856_v36 = vld [vmem:[#allocation4 + $0x80] sm:$0xff]  ;;  %v2345_v47 = vpop.f32.mrf.mxu2 }
 0x1e6   : > { %2777 = vst.msk [vmem:[#allocation4 + $0x88] sm:$0xff] %vm841_vm5, %v2745_v27  ;;  %v3462_v2 = vadd.f32 %v13054_v30, %v2856_v36  ;;  %v2397_v56 = vadd.f32 %v2345_v47, %v2012_v25  ;;  %v5238_v30 = vrot.slane %v5089_v12, 5  ;;  %v4825_v27 = vunpack.c.l.b16 %v4496_v50 }
 0x1e7   : > { %v3573_v3 = vld [vmem:[#allocation4 + $0x78] sm:$0xff] }
 0x1e8   : > { %v3955_v8 = vadd.f32 %v3897_v37, %v3573_v3  ;;  %11393 = vmatmul.msk.bf16.gmra.mxu3 %vm841_vm5, %v4854_v46  ;;  %3494 = vst.msk [vmem:[#allocation4 + $0x80] sm:$0xff] %vm841_vm5, %v3462_v2  ;;  %v2492_v6 = vld [vmem:[#allocation4 + $0x90] sm:$0xff]  ;;  %v4508_v37 = vshrl.u32 %v4364_v18, 16  ;;  %11429 = vmatmul.msk.bf16.gmra.mxu0 %vm841_vm5, %v5351_v1  ;;  %v5240_v32 = vrot.slane %v5238_v30, 4  ;;  %v4527_v2 = vshll.u32 %v4366_v60, 16  ;;  %v2014_v18 = vld [vmem:[#allocation4 + $0xa8] sm:$0xff] }
 0x1e9   : > { %2429 = vst.msk [vmem:[#allocation4 + $0x98] sm:$0xff] %vm841_vm5, %v2397_v56  ;;  %v4855_v3 = vpack.c.b16 %v4826_v58, %v4825_v27 }
 0x1ea   : > { %3987 = vst.msk [vmem:[#allocation4 + $0x78] sm:$0xff] %vm841_vm5, %v3955_v8  ;;  %11377 = vmatmul.msk.bf16.gmra.mxu2 %vm841_vm5, %v11871_v13  ;;  %v4510_v17 = vrot.slane %v4508_v37, 4  ;;  %v5242_v31 = vsel %vm12537_vm2, %v5240_v32, %v5241_v55  ;;  %v4532_v32 = vshrl.u32 %v4367_v51, 16  ;;  %v4535_v55 = vshll.u32 %v4367_v51, 16  ;;  %v11873_v51 = vld [vmem:[#allocation2 + $0x48] sm:$0xff] }
 0x1eb   : > { %v2693_v14 = vpop.f32.mrf.mxu3  ;;  %v5326_v47 = vunpack.c.l.b16 %v5242_v31 }
 0x1ec   : > { %v2746_v52 = vadd.f32 %v2693_v14, %v2492_v6  ;;  %v3902_v54 = vpop.f32.mrf.mxu1  ;;  %v13192_v7 = vpop.f32.mrf.mxu0  ;;  %v4514_v11 = vor.u32 %v4513_v33, %v4510_v17  ;;  %v11872_v14 = vld [vmem:[#allocation2 + $0x3c] sm:$0xff]  ;;  %v11414_v17 = vrot.slane %v5091_v29, 9 }
 0x1ed   : > { %v2857_v38 = vld [vmem:[#allocation4 + $0x88] sm:$0xff]  ;;  %v2348_v40 = vpop.f32.mrf.mxu2 }
 0x1ee   : > { %2778 = vst.msk [vmem:[#allocation4 + $0x90] sm:$0xff] %vm841_vm5, %v2746_v52  ;;  %v3463_v15 = vadd.f32 %v13073_v26, %v2857_v38  ;;  %v2398_v46 = vadd.f32 %v2348_v40, %v2013_v45  ;;  %v5239_v26 = vsel %vm12537_vm2, %v11413_v53, %v5238_v30  ;;  %v4515_v23 = vrot.slane %v4514_v11, 4  ;;  %v5093_v52 = vld [vmem:[#allocation2 + $0x68] sm:$0x1] }
 0x1ef   : > { %v3574_v44 = vld [vmem:[#allocation4 + $0x80] sm:$0xff]  ;;  %v5325_v25 = vunpack.c.l.b16 %v5239_v26  ;;  %v4529_v30 = vrot.slane %v4527_v2, 5  ;;  %v4545_v40 = vshrl.u32 %v4368_v41, 16  ;;  %v4537_v11 = vrot.slane %v4535_v55, 5 }
 0x1f0   : > { %v3956_v59 = vadd.f32 %v3900_v0, %v3574_v44  ;;  %3495 = vst.msk [vmem:[#allocation4 + $0x88] sm:$0xff] %vm841_vm5, %v3463_v15  ;;  %v2493_v36 = vld [vmem:[#allocation4 + $0x98] sm:$0xff]  ;;  %v4524_v0 = vor.u32 %v4523_v63, %v13194_v9  ;;  %v4541_v15 = vshll.u32 %v4368_v41, 16  ;;  %v5248_v63 = vrot.slane %v5093_v52, 5  ;;  %v5096_v55 = vld [vmem:[#allocation2 + $0x74] sm:$0x1] }
 0x1f1   : > { %2430 = vst.msk [vmem:[#allocation4 + $0xa0] sm:$0xff] %vm841_vm5, %v2398_v46  ;;  %v5352_v37 = vpack.c.b16 %v5326_v47, %v5325_v25  ;;  %v2015_v46 = vld [vmem:[#allocation4 + $0xb0] sm:$0xff]  ;;  %v4547_v2 = vrot.slane %v4545_v40, 4 }
 0x1f2   : > { %3988 = vst.msk [vmem:[#allocation4 + $0x80] sm:$0xff] %vm841_vm5, %v3956_v59  ;;  %v4525_v21 = vrot.slane %v4524_v0, 4  ;;  %v13224_v0 = vrot.slane %v4541_v15, 5 }
 0x1f3   : > { %v2695_v28 = vpop.f32.mrf.mxu3 }
 0x1f4   : > { %v2747_v12 = vadd.f32 %v2695_v28, %v2493_v36  ;;  %v3905_v8 = vpop.f32.mrf.mxu1  ;;  %v13206_v34 = vpop.f32.mrf.mxu0  ;;  %v4530_v48 = vsel %vm12116_vm13, %v4525_v21, %v4529_v30  ;;  %v4534_v28 = vrot.slane %v4532_v32, 4  ;;  %v5094_v32 = vld [vmem:[#allocation2 + $0x6c] sm:$0xe] }
 0x1f5   : > { %v2858_v13 = vld [vmem:[#allocation4 + $0x90] sm:$0xff]  ;;  %v2350_v22 = vpop.f32.mrf.mxu2  ;;  %v4828_v60 = vunpack.c.l.b16 %v4530_v48 }
 0x1f6   : > { %2779 = vst.msk [vmem:[#allocation4 + $0x98] sm:$0xff] %vm841_vm5, %v2747_v12  ;;  %v3464_v56 = vadd.f32 %v13084_v57, %v2858_v13  ;;  %v2399_v6 = vadd.f32 %v2350_v22, %v2014_v18  ;;  %v5245_v57 = vrot.slane %v5092_v20, 5 }
 0x1f7   : > { %v3575_v1 = vld [vmem:[#allocation4 + $0x88] sm:$0xff] }
 0x1f8   : > { %v3957_v42 = vadd.f32 %v3902_v54, %v3575_v1  ;;  %11394 = vmatmul.msk.bf16.gmra.mxu3 %vm841_vm5, %v4855_v3  ;;  %3496 = vst.msk [vmem:[#allocation4 + $0x90] sm:$0xff] %vm841_vm5, %v3464_v56  ;;  %v2494_v50 = vld [vmem:[#allocation4 + $0xa0] sm:$0xff]  ;;  %v4520_v54 = vsel %vm12116_vm13, %v4515_v23, %v13194_v9  ;;  %11430 = vmatmul.msk.bf16.gmra.mxu0 %vm841_vm5, %v5352_v37  ;;  %v5247_v33 = vrot.slane %v5245_v57, 4 }
 0x1f9   : > { %2431 = vst.msk [vmem:[#allocation4 + $0xa8] sm:$0xff] %vm841_vm5, %v2399_v6  ;;  %v4827_v58 = vunpack.c.l.b16 %v4520_v54  ;;  %v5246_v12 = vsel %vm12537_vm2, %v11414_v17, %v5245_v57  ;;  %v4369_v3 = vld [vmem:[#allocation2 + $0x50] sm:$0x1]  ;;  %v4538_v56 = vor.u32 %v4537_v11, %v4534_v28  ;;  %v4548_v23 = vor.u32 %v4547_v2, %v13224_v0  ;;  %v4371_v54 = vld [vmem:[#allocation2 + $0x58] sm:$0xf] }
 0x1fa   : > { %3989 = vst.msk [vmem:[#allocation4 + $0x88] sm:$0xff] %vm841_vm5, %v3957_v42  ;;  %11378 = vmatmul.msk.bf16.gmra.mxu2 %vm841_vm5, %v11872_v14  ;;  %v5327_v20 = vunpack.c.l.b16 %v5246_v12  ;;  %v4551_v21 = vshll.u32 %v4369_v3, 16  ;;  %v5095_v42 = vld [vmem:[#allocation2 + $0x70] sm:$0xf]  ;;  %v2016_v14 = vld [vmem:[#allocation4 + $0xb8] sm:$0xff]  ;;  %v4565_v17 = vshll.u32 %v4371_v54, 16 }
 0x1fb   : > { %v2698_v38 = vpop.f32.mrf.mxu3  ;;  %v4856_v13 = vpack.c.b16 %v4828_v60, %v4827_v58  ;;  %v4539_v52 = vrot.slane %v4538_v56, 4  ;;  %v4549_v48 = vrot.slane %v4548_v23, 4  ;;  %v11415_v58 = vrot.slane %v5094_v32, 9  ;;  %v2017_v11 = vld [vmem:[#allocation4 + $0xc0] sm:$0xff] }
 0x1fc   : > { %v2748_v53 = vadd.f32 %v2698_v38, %v2494_v50  ;;  %v3907_v45 = vpop.f32.mrf.mxu1  ;;  %v13221_v26 = vpop.f32.mrf.mxu0  ;;  %v4370_v38 = vld [vmem:[#allocation2 + $0x54] sm:$0xf]  ;;  %v13252_v3 = vrot.slane %v4565_v17, 5  ;;  %v4374_v17 = vld [vmem:[#allocation2 + $0x64] sm:$0xf] }
 0x1fd   : > { %v2859_v44 = vld [vmem:[#allocation4 + $0x98] sm:$0xff]  ;;  %v2353_v27 = vpop.f32.mrf.mxu2  ;;  %v4559_v40 = vshll.u32 %v4370_v38, 16 }
 0x1fe   : > { %2780 = vst.msk [vmem:[#allocation4 + $0xa0] sm:$0xff] %vm841_vm5, %v2748_v53  ;;  %v3465_v9 = vadd.f32 %v13101_v49, %v2859_v44  ;;  %v2400_v36 = vadd.f32 %v2353_v27, %v2015_v46  ;;  %v5249_v49 = vsel %vm12537_vm2, %v5247_v33, %v5248_v63  ;;  %v4553_v53 = vrot.slane %v4551_v21, 5 }
 0x1ff   : > { %v3576_v59 = vld [vmem:[#allocation4 + $0x90] sm:$0xff]  ;;  %v5328_v1 = vunpack.c.l.b16 %v5249_v49  ;;  %v4569_v33 = vshrl.u32 %v4371_v54, 16  ;;  %v4561_v49 = vrot.slane %v4559_v40, 5 }
 0x200   : > { %v3958_v31 = vadd.f32 %v3905_v8, %v3576_v59  ;;  %3497 = vst.msk [vmem:[#allocation4 + $0x98] sm:$0xff] %vm841_vm5, %v3465_v9  ;;  %v2495_v25 = vld [vmem:[#allocation4 + $0xa8] sm:$0xff]  ;;  %v4544_v9 = vsel %vm12116_vm13, %v4539_v52, %v13224_v0  ;;  %v4554_v27 = vsel %vm12116_vm13, %v4549_v48, %v4553_v53  ;;  %v4373_v40 = vld [vmem:[#allocation2 + $0x60] sm:$0xf] }
 0x201   : > { %2432 = vst.msk [vmem:[#allocation4 + $0xb0] sm:$0xff] %vm841_vm5, %v2400_v36  ;;  %v5353_v50 = vpack.c.b16 %v5328_v1, %v5327_v20  ;;  %v4830_v56 = vunpack.c.l.b16 %v4554_v27  ;;  %v4372_v20 = vld [vmem:[#allocation2 + $0x5c] sm:$0x1] }
 0x202   : > { %3990 = vst.msk [vmem:[#allocation4 + $0x90] sm:$0xff] %vm841_vm5, %v3958_v31  ;;  %v5255_v31 = vrot.slane %v5096_v55, 5  ;;  %v5098_v52 = vld [vmem:[#allocation2 + $0x7c] sm:$0xf] }
 0x203   : > { %v2700_v47 = vpop.f32.mrf.mxu3 }
 0x204   : > { %v2749_v8 = vadd.f32 %v2700_v47, %v2495_v25  ;;  %v3910_v22 = vpop.f32.mrf.mxu1  ;;  %v13235_v41 = vpop.f32.mrf.mxu0  ;;  %v4571_v25 = vrot.slane %v4569_v33, 4  ;;  %v5097_v33 = vld [vmem:[#allocation2 + $0x78] sm:$0xe] }
 0x205   : > { %v2860_v18 = vld [vmem:[#allocation4 + $0xa0] sm:$0xff]  ;;  %v2355_v37 = vpop.f32.mrf.mxu2 }
 0x206   : > { %2781 = vst.msk [vmem:[#allocation4 + $0xa8] sm:$0xff] %vm841_vm5, %v2749_v8  ;;  %v3466_v30 = vadd.f32 %v13113_v16, %v2860_v18  ;;  %v2401_v29 = vadd.f32 %v2355_v37, %v2016_v14  ;;  %v5252_v16 = vrot.slane %v5095_v42, 5  ;;  %v4829_v8 = vunpack.c.l.b16 %v4544_v9 }
 0x207   : > { %v3577_v6 = vld [vmem:[#allocation4 + $0x98] sm:$0xff] }
 0x208   : > { %v3959_v57 = vadd.f32 %v3907_v45, %v3577_v6  ;;  %11395 = vmatmul.msk.bf16.gmra.mxu3 %vm841_vm5, %v4856_v13  ;;  %3498 = vst.msk [vmem:[#allocation4 + $0xa0] sm:$0xff] %vm841_vm5, %v3466_v30  ;;  %v2496_v15 = vld [vmem:[#allocation4 + $0xb0] sm:$0xff]  ;;  %v4556_v45 = vshrl.u32 %v4370_v38, 16  ;;  %11431 = vmatmul.msk.bf16.gmra.mxu0 %vm841_vm5, %v5353_v50  ;;  %v5254_v60 = vrot.slane %v5252_v16, 4  ;;  %v4575_v30 = vshll.u32 %v4372_v20, 16  ;;  %v2018_v38 = vld [vmem:[#allocation4 + $0xc8] sm:$0xff] }
 0x209   : > { %2433 = vst.msk [vmem:[#allocation4 + $0xb8] sm:$0xff] %vm841_vm5, %v2401_v29  ;;  %v4857_v6 = vpack.c.b16 %v4830_v56, %v4829_v8 }
 0x20a   : > { %3991 = vst.msk [vmem:[#allocation4 + $0x98] sm:$0xff] %vm841_vm5, %v3959_v57  ;;  %11379 = vmatmul.msk.bf16.gmra.mxu2 %vm841_vm5, %v11873_v51  ;;  %v4558_v0 = vrot.slane %v4556_v45, 4  ;;  %v5256_v1 = vsel %vm12537_vm2, %v5254_v60, %v5255_v31  ;;  %v4580_v60 = vshrl.u32 %v4373_v40, 16  ;;  %v4583_v31 = vshll.u32 %v4373_v40, 16  ;;  %v11875_v40 = vld [vmem:[#allocation2 + $0x60] sm:$0xff] }
 0x20b   : > { %v2703_v44 = vpop.f32.mrf.mxu3  ;;  %v5330_v37 = vunpack.c.l.b16 %v5256_v1 }
 0x20c   : > { %v2750_v63 = vadd.f32 %v2703_v44, %v2496_v15  ;;  %v3912_v46 = vpop.f32.mrf.mxu1  ;;  %v13250_v12 = vpop.f32.mrf.mxu0  ;;  %v4562_v21 = vor.u32 %v4561_v49, %v4558_v0  ;;  %v11874_v15 = vld [vmem:[#allocation2 + $0x54] sm:$0xff]  ;;  %v11416_v0 = vrot.slane %v5097_v33, 9 }
 0x20d   : > { %v2861_v59 = vld [vmem:[#allocation4 + $0xa8] sm:$0xff]  ;;  %v2358_v2 = vpop.f32.mrf.mxu2 }
 0x20e   : > { %2782 = vst.msk [vmem:[#allocation4 + $0xb0] sm:$0xff] %vm841_vm5, %v2750_v63  ;;  %v3467_v36 = vadd.f32 %v13133_v39, %v2861_v59  ;;  %v2402_v13 = vadd.f32 %v2358_v2, %v2017_v11  ;;  %v5253_v39 = vsel %vm12537_vm2, %v11415_v58, %v5252_v16  ;;  %v4563_v48 = vrot.slane %v4562_v21, 4  ;;  %v5099_v63 = vld [vmem:[#allocation2 + $0x80] sm:$0x1] }
 0x20f   : > { %v3578_v28 = vld [vmem:[#allocation4 + $0xa0] sm:$0xff]  ;;  %v5329_v14 = vunpack.c.l.b16 %v5253_v39  ;;  %v4577_v16 = vrot.slane %v4575_v30, 5  ;;  %v4593_v2 = vshrl.u32 %v4374_v17, 16 }
 0x210   : > { %v3960_v47 = vadd.f32 %v3910_v22, %v3578_v28  ;;  %3499 = vst.msk [vmem:[#allocation4 + $0xa8] sm:$0xff] %vm841_vm5, %v3467_v36  ;;  %v2497_v18 = vld [vmem:[#allocation4 + $0xb8] sm:$0xff]  ;;  %v4572_v22 = vor.u32 %v4571_v25, %v13252_v3  ;;  %v4589_v36 = vshll.u32 %v4374_v17, 16  ;;  %v5262_v25 = vrot.slane %v5099_v63, 5 }
 0x211   : > { %2434 = vst.msk [vmem:[#allocation4 + $0xc0] sm:$0xff] %vm841_vm5, %v2402_v13  ;;  %v5354_v44 = vpack.c.b16 %v5330_v37, %v5329_v14  ;;  %v2019_v13 = vld [vmem:[#allocation4 + $0xd0] sm:$0xff]  ;;  %v4595_v30 = vrot.slane %v4593_v2, 4 }
 0x212   : > { %3992 = vst.msk [vmem:[#allocation4 + $0xa0] sm:$0xff] %vm841_vm5, %v3960_v47  ;;  %v4573_v53 = vrot.slane %v4572_v22, 4  ;;  %v13282_v22 = vrot.slane %v4589_v36, 5 }
 0x213   : > { %v2705_v23 = vpop.f32.mrf.mxu3 }
 0x214   : > { %v2751_v42 = vadd.f32 %v2705_v23, %v2497_v18  ;;  %v3915_v57 = vpop.f32.mrf.mxu1  ;;  %v4578_v27 = vsel %vm12116_vm13, %v4573_v53, %v4577_v16  ;;  %v4582_v18 = vrot.slane %v4580_v60, 4  ;;  %v4585_v23 = vrot.slane %v4583_v31, 5  ;;  %v5100_v60 = vld [vmem:[#allocation2 + $0x84] sm:$0xe]  ;;  %v5102_v31 = vld [vmem:[#allocation2 + $0x8c] sm:$0x1] }
 0x215   : > { %v2862_v51 = vld [vmem:[#allocation4 + $0xb0] sm:$0xff]  ;;  %v2360_v54 = vpop.f32.mrf.mxu2  ;;  %v13266_v45 = vpop.f32.mrf.mxu0  ;;  %v4832_v20 = vunpack.c.l.b16 %v4578_v27 }
 0x216   : > { %2783 = vst.msk [vmem:[#allocation4 + $0xb8] sm:$0xff] %vm841_vm5, %v2751_v42  ;;  %v3468_v29 = vadd.f32 %v13147_v10, %v2862_v51  ;;  %v2403_v55 = vadd.f32 %v2360_v54, %v2018_v38  ;;  %v5259_v10 = vrot.slane %v5098_v52, 5 }
 0x217   : > { %v3579_v50 = vld [vmem:[#allocation4 + $0xa8] sm:$0xff] }
 0x218   : > { %v3961_v32 = vadd.f32 %v3912_v46, %v3579_v50  ;;  %11396 = vmatmul.msk.bf16.gmra.mxu3 %vm841_vm5, %v4857_v6  ;;  %3500 = vst.msk [vmem:[#allocation4 + $0xb0] sm:$0xff] %vm841_vm5, %v3468_v29  ;;  %v2498_v9 = vld [vmem:[#allocation4 + $0xc0] sm:$0xff]  ;;  %v4568_v46 = vsel %vm12116_vm13, %v4563_v48, %v13252_v3  ;;  %11432 = vmatmul.msk.bf16.gmra.mxu0 %vm841_vm5, %v5354_v44  ;;  %v5261_v49 = vrot.slane %v5259_v10, 4  ;;  %v4375_v6 = vld [vmem:[#allocation2 + $0x68] sm:$0x1] }
 0x219   : > { %2435 = vst.msk [vmem:[#allocation4 + $0xc8] sm:$0xff] %vm841_vm5, %v2403_v55  ;;  %v4831_v56 = vunpack.c.l.b16 %v4568_v46  ;;  %v5260_v42 = vsel %vm12537_vm2, %v11416_v0, %v5259_v10  ;;  %v4586_v29 = vor.u32 %v4585_v23, %v4582_v18  ;;  %v4596_v48 = vor.u32 %v4595_v30, %v13282_v22  ;;  %v2021_v23 = vld [vmem:[#allocation4 + $0xe0] sm:$0xff] }
 0x21a   : > { %3993 = vst.msk [vmem:[#allocation4 + $0xa8] sm:$0xff] %vm841_vm5, %v3961_v32  ;;  %11380 = vmatmul.msk.bf16.gmra.mxu2 %vm841_vm5, %v11874_v15  ;;  %v5331_v52 = vunpack.c.l.b16 %v5260_v42  ;;  %v4599_v53 = vshll.u32 %v4375_v6, 16  ;;  %v5101_v32 = vld [vmem:[#allocation2 + $0x88] sm:$0xf] }
 0x21b   : > { %v2708_v59 = vpop.f32.mrf.mxu3  ;;  %v4858_v51 = vpack.c.b16 %v4832_v20, %v4831_v56  ;;  %v2020_v15 = vld [vmem:[#allocation4 + $0xd8] sm:$0xff]  ;;  %v4587_v33 = vrot.slane %v4586_v29, 4  ;;  %v4597_v46 = vrot.slane %v4596_v48, 4  ;;  %v11417_v56 = vrot.slane %v5100_v60, 9  ;;  %v4378_v29 = vld [vmem:[#allocation2 + $0x74] sm:$0x1] }
 0x21c   : > { %v2752_v58 = vadd.f32 %v2708_v59, %v2498_v9  ;;  %v3917_v11 = vpop.f32.mrf.mxu1  ;;  %v4376_v9 = vld [vmem:[#allocation2 + $0x6c] sm:$0xf]  ;;  %v4377_v59 = vld [vmem:[#allocation2 + $0x70] sm:$0xf]  ;;  %v4601_v27 = vrot.slane %v4599_v53, 5 }
 0x21d   : > { %v2863_v28 = vld [vmem:[#allocation4 + $0xb8] sm:$0xff]  ;;  %v2363_v8 = vpop.f32.mrf.mxu2  ;;  %v13280_v21 = vpop.f32.mrf.mxu0  ;;  %v4607_v2 = vshll.u32 %v4376_v9, 16  ;;  %v4613_v0 = vshll.u32 %v4377_v59, 16 }
 0x21e   : > { %2784 = vst.msk [vmem:[#allocation4 + $0xc0] sm:$0xff] %vm841_vm5, %v2752_v58  ;;  %v3469_v3 = vadd.f32 %v13163_v24, %v2863_v28  ;;  %v2404_v1 = vadd.f32 %v2363_v8, %v2019_v13  ;;  %v5263_v24 = vsel %vm12537_vm2, %v5261_v49, %v5262_v25  ;;  %v4617_v49 = vshrl.u32 %v4377_v59, 16 }
 0x21f   : > { %v3580_v47 = vld [vmem:[#allocation4 + $0xb0] sm:$0xff]  ;;  %v5332_v50 = vunpack.c.l.b16 %v5263_v24  ;;  %v4602_v8 = vsel %vm12116_vm13, %v4597_v46, %v4601_v27  ;;  %v4609_v24 = vrot.slane %v4607_v2, 5 }
 0x220   : > { %v3962_v39 = vadd.f32 %v3915_v57, %v3580_v47  ;;  %3501 = vst.msk [vmem:[#allocation4 + $0xb8] sm:$0xff] %vm841_vm5, %v3469_v3  ;;  %v2499_v14 = vld [vmem:[#allocation4 + $0xc8] sm:$0xff]  ;;  %v4592_v3 = vsel %vm12116_vm13, %v4587_v33, %v13282_v22  ;;  %v13308_v22 = vrot.slane %v4613_v0, 5  ;;  %v4619_v6 = vrot.slane %v4617_v49, 4  ;;  %v5104_v33 = vld [vmem:[#allocation2 + $0x94] sm:$0xf] }
 0x221   : > { %2436 = vst.msk [vmem:[#allocation4 + $0xd0] sm:$0xff] %vm841_vm5, %v2404_v1  ;;  %v5355_v63 = vpack.c.b16 %v5332_v50, %v5331_v52  ;;  %v4380_v0 = vld [vmem:[#allocation2 + $0x7c] sm:$0xf]  ;;  %v5103_v49 = vld [vmem:[#allocation2 + $0x90] sm:$0xe] }
 0x222   : > { %3994 = vst.msk [vmem:[#allocation4 + $0xb0] sm:$0xff] %vm841_vm5, %v3962_v39  ;;  %v5269_v39 = vrot.slane %v5102_v31, 5  ;;  %v4620_v53 = vor.u32 %v4619_v6, %v13308_v22 }
 0x223   : > { %v2710_v37 = vpop.f32.mrf.mxu3 }
 0x224   : > { %v2753_v57 = vadd.f32 %v2710_v37, %v2499_v14  ;;  %v3920_v54 = vpop.f32.mrf.mxu1  ;;  %v4621_v27 = vrot.slane %v4620_v53, 4 }
 0x225   : > { %v2864_v38 = vld [vmem:[#allocation4 + $0xc0] sm:$0xff]  ;;  %v2365_v44 = vpop.f32.mrf.mxu2  ;;  %v13295_v58 = vpop.f32.mrf.mxu0 }
 0x226   : > { %2785 = vst.msk [vmem:[#allocation4 + $0xc8] sm:$0xff] %vm841_vm5, %v2753_v57  ;;  %v3470_v16 = vadd.f32 %v13177_v5, %v2864_v38  ;;  %v2405_v10 = vadd.f32 %v2365_v44, %v2020_v15  ;;  %v5266_v5 = vrot.slane %v5101_v32, 5  ;;  %v4834_v57 = vunpack.c.l.b16 %v4602_v8 }
 0x227   : > { %v3581_v55 = vld [vmem:[#allocation4 + $0xb8] sm:$0xff] }
 0x228   : > { %v3963_v17 = vadd.f32 %v3917_v11, %v3581_v55  ;;  %11397 = vmatmul.msk.bf16.gmra.mxu3 %vm841_vm5, %v4858_v51  ;;  %3502 = vst.msk [vmem:[#allocation4 + $0xc0] sm:$0xff] %vm841_vm5, %v3470_v16  ;;  %v2500_v36 = vld [vmem:[#allocation4 + $0xd0] sm:$0xff]  ;;  %v4604_v11 = vshrl.u32 %v4376_v9, 16  ;;  %11433 = vmatmul.msk.bf16.gmra.mxu0 %vm841_vm5, %v5355_v63  ;;  %v5268_v20 = vrot.slane %v5266_v5, 4  ;;  %v4833_v51 = vunpack.c.l.b16 %v4592_v3  ;;  %v2022_v9 = vld [vmem:[#allocation4 + $0xe8] sm:$0xff] }
 0x229   : > { %2437 = vst.msk [vmem:[#allocation4 + $0xd8] sm:$0xff] %vm841_vm5, %v2405_v10  ;;  %v4623_v16 = vshll.u32 %v4378_v29, 16 }
 0x22a   : > { %3995 = vst.msk [vmem:[#allocation4 + $0xb8] sm:$0xff] %vm841_vm5, %v3963_v17  ;;  %11381 = vmatmul.msk.bf16.gmra.mxu2 %vm841_vm5, %v11875_v40  ;;  %v4606_v42 = vrot.slane %v4604_v11, 4  ;;  %v5270_v50 = vsel %vm12537_vm2, %v5268_v20, %v5269_v39  ;;  %v4859_v55 = vpack.c.b16 %v4834_v57, %v4833_v51  ;;  %v4379_v11 = vld [vmem:[#allocation2 + $0x78] sm:$0xf]  ;;  %v11521_v20 = vld [vmem:[%s16312_s3 + $0x2] sm:$0x3] }
 0x22b   : > { %v2713_v28 = vpop.f32.mrf.mxu3  ;;  %v5334_v44 = vunpack.c.l.b16 %v5270_v50  ;;  %v2023_v57 = vld [vmem:[#allocation4 + $0xf0] sm:$0xff] }
 0x22c   : > { %v2754_v25 = vadd.f32 %v2713_v28, %v2500_v36  ;;  %v3922_v13 = vpop.f32.mrf.mxu1  ;;  %v4610_v48 = vor.u32 %v4609_v24, %v4606_v42  ;;  %v11876_v36 = vld [vmem:[#allocation2 + $0x6c] sm:$0xff]  ;;  %v4641_v24 = vshrl.u32 %v4380_v0, 16 }
 0x22d   : > { %v2865_v47 = vld [vmem:[#allocation4 + $0xc8] sm:$0xff]  ;;  %v2368_v30 = vpop.f32.mrf.mxu2  ;;  %v13311_v52 = vpop.f32.mrf.mxu0 }
 0x22e   : > { %2786 = vst.msk [vmem:[#allocation4 + $0xd0] sm:$0xff] %vm841_vm5, %v2754_v25  ;;  %v3471_v1 = vadd.f32 %v13192_v7, %v2865_v47  ;;  %v2406_v37 = vadd.f32 %v2368_v30, %v2021_v23  ;;  %v5267_v7 = vsel %vm12537_vm2, %v11417_v56, %v5266_v5  ;;  %v4611_v46 = vrot.slane %v4610_v48, 4  ;;  %v5105_v25 = vld [vmem:[#allocation2 + $0x98] sm:$0x1] }
 0x22f   : > { %v3582_v18 = vld [vmem:[#allocation4 + $0xc0] sm:$0xff]  ;;  %v5333_v15 = vunpack.c.l.b16 %v5267_v7  ;;  %v4625_v5 = vrot.slane %v4623_v16, 5  ;;  %v4628_v56 = vshrl.u32 %v4379_v11, 16  ;;  %v7211_v23 = vsel %vm1067_vm0, %v11521_v20, 0 }
 0x230   : > { %v3964_v14 = vadd.f32 %v3920_v54, %v3582_v18  ;;  %3503 = vst.msk [vmem:[#allocation4 + $0xc8] sm:$0xff] %vm841_vm5, %v3471_v1  ;;  %v2501_v38 = vld [vmem:[#allocation4 + $0xd8] sm:$0xff]  ;;  %v4631_v1 = vshll.u32 %v4379_v11, 16  ;;  %v4637_v18 = vshll.u32 %v4380_v0, 16  ;;  %7220 = vmatpush.bf16.msrb.mxu2 %v7211_v23  ;;  %v11877_v0 = vld [vmem:[#allocation2 + $0x78] sm:$0xff] }
 0x231   : > { %2438 = vst.msk [vmem:[#allocation4 + $0xe0] sm:$0xff] %vm841_vm5, %v2406_v37  ;;  %v5356_v28 = vpack.c.b16 %v5334_v44, %v5333_v15  ;;  %v4626_v8 = vsel %vm12116_vm13, %v4621_v27, %v4625_v5  ;;  %v4630_v48 = vrot.slane %v4628_v56, 4  ;;  %v4381_v44 = vld [vmem:[#allocation2 + $0x80] sm:$0x1] }
 0x232   : > { %3996 = vst.msk [vmem:[#allocation4 + $0xc0] sm:$0xff] %vm841_vm5, %v3964_v14  ;;  %v5276_v14 = vrot.slane %v5105_v25, 5  ;;  %v4836_v50 = vunpack.c.l.b16 %v4626_v8  ;;  %v4633_v53 = vrot.slane %v4631_v1, 5  ;;  %v4647_v5 = vshll.u32 %v4381_v44, 16  ;;  %v4383_v8 = vld [vmem:[#allocation2 + $0x88] sm:$0xf] }
 0x233   : > { %v2715_v54 = vpop.f32.mrf.mxu3  ;;  %v5106_v1 = vld [vmem:[#allocation2 + $0x9c] sm:$0xe] }
 0x234   : > { %v2755_v32 = vadd.f32 %v2715_v54, %v2501_v38  ;;  %v3925_v17 = vpop.f32.mrf.mxu1  ;;  %v4649_v20 = vrot.slane %v4647_v5, 5 }
 0x235   : > { %v2866_v40 = vld [vmem:[#allocation4 + $0xd0] sm:$0xff]  ;;  %v2370_v59 = vpop.f32.mrf.mxu2  ;;  %v13324_v2 = vpop.f32.mrf.mxu0 }
 0x236   : > { %2787 = vst.msk [vmem:[#allocation4 + $0xd8] sm:$0xff] %vm841_vm5, %v2755_v32  ;;  %v3472_v10 = vadd.f32 %v13206_v34, %v2866_v40  ;;  %v2407_v31 = vadd.f32 %v2370_v59, %v2022_v9  ;;  %v5273_v34 = vrot.slane %v5104_v33, 5  ;;  %v13344_v32 = vrot.slane %v4637_v18, 5  ;;  %v5108_v18 = vld [vmem:[#allocation2 + $0xa4] sm:$0x1] }
 0x237   : > { %v3583_v63 = vld [vmem:[#allocation4 + $0xc8] sm:$0xff] }
 0x238   : > { %v3965_v60 = vadd.f32 %v3922_v13, %v3583_v63  ;;  %11398 = vmatmul.msk.bf16.gmra.mxu3 %vm841_vm5, %v4859_v55  ;;  %3504 = vst.msk [vmem:[#allocation4 + $0xd0] sm:$0xff] %vm841_vm5, %v3472_v10  ;;  %v2502_v3 = vld [vmem:[#allocation4 + $0xe0] sm:$0xff]  ;;  %v4616_v13 = vsel %vm12116_vm13, %v4611_v46, %v13308_v22  ;;  %11434 = vmatmul.msk.bf16.gmra.mxu0 %vm841_vm5, %v5356_v28  ;;  %v11418_v22 = vrot.slane %v5103_v49, 9  ;;  %v5275_v6 = vrot.slane %v5273_v34, 4  ;;  %v2024_v28 = vld [vmem:[#allocation4 + $0xf8] sm:$0xff] }
 0x239   : > { %2439 = vst.msk [vmem:[#allocation4 + $0xe8] sm:$0xff] %vm841_vm5, %v2407_v31  ;;  %v4835_v7 = vunpack.c.l.b16 %v4616_v13  ;;  %v4643_v55 = vrot.slane %v4641_v24, 4  ;;  %v4634_v63 = vor.u32 %v4633_v53, %v4630_v48  ;;  %v5107_v31 = vld [vmem:[#allocation2 + $0xa0] sm:$0xf]  ;;  %v4382_v13 = vld [vmem:[#allocation2 + $0x84] sm:$0xf] }
 0x23a   : > { %3997 = vst.msk [vmem:[#allocation4 + $0xc8] sm:$0xff] %vm841_vm5, %v3965_v60  ;;  %11382 = vmatmul.msk.bf16.gmra.mxu2 %vm841_vm5, %v11876_v36  ;;  %v5274_v15 = vsel %vm12537_vm2, %v11418_v22, %v5273_v34  ;;  %v4655_v24 = vshll.u32 %v4382_v13, 16  ;;  %v4661_v22 = vshll.u32 %v4383_v8, 16  ;;  %v4037_v48 = vld [vmem:[#allocation4] sm:$0xff] }
 0x23b   : > { %v2718_v47 = vpop.f32.mrf.mxu3  ;;  %v4860_v10 = vpack.c.b16 %v4836_v50, %v4835_v7  ;;  %v5335_v9 = vunpack.c.l.b16 %v5274_v15  ;;  %v4644_v27 = vor.u32 %v4643_v55, %v13344_v32  ;;  %v5283_v50 = vrot.slane %v5108_v18, 5 }
 0x23c   : > { %v2756_v39 = vadd.f32 %v2718_v47, %v2502_v3  ;;  %v3927_v42 = vpop.f32.mrf.mxu1  ;;  %v4635_v3 = vrot.slane %v4634_v63, 4  ;;  %v4657_v15 = vrot.slane %v4655_v24, 5  ;;  %v11878_v24 = vld [vmem:[#allocation2 + $0x84] sm:$0xff] }
 0x23d   : > { %v2867_v30 = vld [vmem:[#allocation4 + $0xd8] sm:$0xff]  ;;  %v2373_v29 = vpop.f32.mrf.mxu2  ;;  %v13342_v16 = vpop.f32.mrf.mxu0  ;;  %v4645_v56 = vrot.slane %v4644_v27, 4 }
 0x23e   : > { %2788 = vst.msk [vmem:[#allocation4 + $0xe0] sm:$0xff] %vm841_vm5, %v2756_v39  ;;  %v3473_v37 = vadd.f32 %v13221_v26, %v2867_v30  ;;  %v2408_v54 = vadd.f32 %v2373_v29, %v2023_v57  ;;  %v5277_v26 = vsel %vm12537_vm2, %v5275_v6, %v5276_v14  ;;  %v4665_v6 = vshrl.u32 %v4383_v8, 16 }
 0x23f   : > { %v3584_v51 = vld [vmem:[#allocation4 + $0xd0] sm:$0xff]  ;;  %v5336_v59 = vunpack.c.l.b16 %v5277_v26  ;;  %v4650_v57 = vsel %vm12116_vm13, %v4645_v56, %v4649_v20  ;;  %v11419_v29 = vrot.slane %v5106_v1, 9  ;;  %v13370_v26 = vrot.slane %v4661_v22, 5 }
 0x240   : > { %v3966_v38 = vadd.f32 %v3925_v17, %v3584_v51  ;;  %3505 = vst.msk [vmem:[#allocation4 + $0xd8] sm:$0xff] %vm841_vm5, %v3473_v37  ;;  %v2503_v40 = vld [vmem:[#allocation4 + $0xe8] sm:$0xff]  ;;  %v4640_v37 = vsel %vm12116_vm13, %v4635_v3, %v13344_v32  ;;  %v4667_v32 = vrot.slane %v4665_v6, 4  ;;  %v4386_v6 = vld [vmem:[#allocation2 + $0x94] sm:$0xf] }
 0x241   : > { %2440 = vst.msk [vmem:[#allocation4 + $0xf0] sm:$0xff] %vm841_vm5, %v2408_v54  ;;  %v5357_v47 = vpack.c.b16 %v5336_v59, %v5335_v9 }
 0x242   : > { %3998 = vst.msk [vmem:[#allocation4 + $0xd0] sm:$0xff] %vm841_vm5, %v3966_v38 }
 0x243   : > { %v2720_v17 = vpop.f32.mrf.mxu3 }
 0x244   : > { %v2757_v33 = vadd.f32 %v2720_v17, %v2503_v40  ;;  %v3930_v34 = vpop.f32.mrf.mxu1  ;;  %v4837_v17 = vunpack.c.l.b16 %v4640_v37 }
 0x245   : > { %v2868_v46 = vld [vmem:[#allocation4 + $0xe0] sm:$0xff]  ;;  %v2375_v11 = vpop.f32.mrf.mxu2  ;;  %v13357_v39 = vpop.f32.mrf.mxu0 }
 0x246   : > { %2789 = vst.msk [vmem:[#allocation4 + $0xe8] sm:$0xff] %vm841_vm5, %v2757_v33  ;;  %v3474_v60 = vadd.f32 %v13235_v41, %v2868_v46  ;;  %v2409_v25 = vadd.f32 %v2375_v11, %v2024_v28  ;;  %v5280_v41 = vrot.slane %v5107_v31, 5  ;;  %v4384_v33 = vld [vmem:[#allocation2 + $0x8c] sm:$0x1]  ;;  %v5575_v46 = vld [vmem:[#allocation3 + $0xc] sm:$0x1] }
 0x247   : > { %v3585_v36 = vld [vmem:[#allocation4 + $0xd8] sm:$0xff]  ;;  %v5576_v27 = vsel %vm12006_vm4, 0, %v5575_v46  ;;  %v4671_v28 = vshll.u32 %v4384_v33, 16  ;;  %v11885_v11 = vld [vmem:[#allocation3] sm:$0xff]  ;;  %v4039_v46 = vld [vmem:[#allocation4 + $0x10] sm:$0xff] }
 0x248   : > { %v3967_v49 = vadd.f32 %v3927_v42, %v3585_v36  ;;  %11399 = vmatmul.msk.bf16.gmra.mxu3 %vm841_vm5, %v4860_v10  ;;  %3506 = vst.msk [vmem:[#allocation4 + $0xe0] sm:$0xff] %vm841_vm5, %v3474_v60  ;;  %v2504_v23 = vld [vmem:[#allocation4 + $0xf0] sm:$0xff]  ;;  %v4652_v42 = vshrl.u32 %v4382_v13, 16  ;;  %11435 = vmatmul.msk.bf16.gmra.mxu0 %vm841_vm5, %v5357_v47  ;;  %v5282_v7 = vrot.slane %v5280_v41, 4  ;;  %v4838_v10 = vunpack.c.l.b16 %v4650_v57  ;;  %v5110_v47 = vld [vmem:[#allocation2 + $0xac] sm:$0xf] }
 0x249   : > { %2441 = vst.msk [vmem:[#allocation4 + $0xf8] sm:$0xff] %vm841_vm5, %v2409_v25  ;;  %v4668_v36 = vor.u32 %v4667_v32, %v13370_v26  ;;  %11505 = vmatmul.msk.bf16.vlgmr.msra.gmra.mxu1 %vm841_vm5, %v11885_v11  ;;  %v4038_v13 = vld [vmem:[#allocation4 + $0x8] sm:$0xff]  ;;  %v4673_v18 = vrot.slane %v4671_v28, 5  ;;  %v5623_v57 = vld [vmem:[#allocation3 + $0x14] sm:$0x1]  ;;  %v4689_v32 = vshrl.u32 %v4386_v6, 16 }
 0x24a   : > { %3999 = vst.msk [vmem:[#allocation4 + $0xd8] sm:$0xff] %vm841_vm5, %v3967_v49  ;;  %11383 = vmatmul.msk.bf16.gmra.mxu2 %vm841_vm5, %v11877_v0  ;;  %v4654_v55 = vrot.slane %v4652_v42, 4  ;;  %v5284_v59 = vsel %vm12537_vm2, %v5282_v7, %v5283_v50  ;;  %v5624_v50 = vsel %vm12039_vm8, 0, %v5623_v57 }
 0x24b   : > { %v2723_v30 = vpop.f32.mrf.mxu3  ;;  %v5338_v25 = vunpack.c.l.b16 %v5284_v59  ;;  %5577 = vst [vmem:[#allocation3 + $0xc] sm:$0x1] %v5576_v27  ;;  %v4669_v1 = vrot.slane %v4668_v36, 4  ;;  %v4691_v36 = vrot.slane %v4689_v32, 4 }
 0x24c   : > { %v2758_v14 = vadd.f32 %v2723_v30, %v2504_v23  ;;  %v3932_v63 = vpop.f32.mrf.mxu1  ;;  %v4658_v31 = vor.u32 %v4657_v15, %v4654_v55  ;;  %v4385_v23 = vld [vmem:[#allocation2 + $0x90] sm:$0xf]  ;;  %v4685_v15 = vshll.u32 %v4386_v6, 16  ;;  %5625 = vst [vmem:[#allocation3 + $0x14] sm:$0x1] %v5624_v50 }
 0x24d   : > { %v2869_v51 = vld [vmem:[#allocation4 + $0xe8] sm:$0xff]  ;;  %v4211_v53 = vpop.f32.mrf.mxu2  ;;  %v13373_v9 = vpop.f32.mrf.mxu0  ;;  %v4679_v7 = vshll.u32 %v4385_v23, 16  ;;  %v4674_v55 = vsel %vm12116_vm13, %v4669_v1, %v4673_v18 }
 0x24e   : > { %2790 = vst.msk [vmem:[#allocation4 + $0xf0] sm:$0xff] %vm841_vm5, %v2758_v14  ;;  %v3475_v38 = vadd.f32 %v13250_v12, %v2869_v51  ;;  %v4291_v40 = vadd.f32 %v4211_v53, %v4037_v48  ;;  %v5281_v12 = vsel %vm12537_vm2, %v11419_v29, %v5280_v41  ;;  %v4659_v41 = vrot.slane %v4658_v31, 4  ;;  %v5109_v51 = vld [vmem:[#allocation2 + $0xa8] sm:$0xe]  ;;  %v4388_v6 = vld [vmem:[#allocation2 + $0x9c] sm:$0xf] }
 0x24f   : > { %v3586_v54 = vld [vmem:[#allocation4 + $0xe0] sm:$0xff]  ;;  %v5337_v49 = vunpack.c.l.b16 %v5281_v12  ;;  %v5287_v14 = vrot.slane %v5110_v47, 5  ;;  %v4676_v29 = vshrl.u32 %v4385_v23, 16  ;;  %v4681_v12 = vrot.slane %v4679_v7, 5 }
 0x250   : > { %v3968_v44 = vadd.f32 %v3930_v34, %v3586_v54  ;;  %3507 = vst.msk [vmem:[#allocation4 + $0xe8] sm:$0xff] %vm841_vm5, %v3475_v38  ;;  %v2505_v5 = vld [vmem:[#allocation4 + $0xf8] sm:$0xff]  ;;  %v4861_v34 = vpack.c.b16 %v4838_v10, %v4837_v17  ;;  %v4664_v53 = vsel %vm12116_vm13, %v4659_v41, %v13370_v26  ;;  %v13404_v31 = vrot.slane %v4685_v15, 5  ;;  %v5578_v47 = vld [vmem:[#allocation3 + $0x18] sm:$0x1] }
 0x251   : > { %4323 = vst.msk [vmem:[#allocation4] sm:$0xff] %vm841_vm5, %v4291_v40  ;;  %v5358_v22 = vpack.c.b16 %v5338_v25, %v5337_v49  ;;  %v11420_v40 = vrot.slane %v5109_v51, 9  ;;  %v5289_v17 = vrot.slane %v5287_v14, 4  ;;  %v4678_v26 = vrot.slane %v4676_v29, 4  ;;  %v4389_v51 = vld [vmem:[#allocation2 + $0xa0] sm:$0xf] }
 0x252   : > { %4000 = vst.msk [vmem:[#allocation4 + $0xe0] sm:$0xff] %vm841_vm5, %v3968_v44  ;;  %v4692_v41 = vor.u32 %v4691_v36, %v13404_v31  ;;  %v4040_v29 = vld [vmem:[#allocation4 + $0x18] sm:$0xff]  ;;  %v11879_v15 = vld [vmem:[#allocation2 + $0x90] sm:$0xff]  ;;  %v4700_v32 = vshrl.u32 %v4388_v6, 16 }
 0x253   : > { %v2725_v60 = vpop.f32.mrf.mxu3 }
 0x254   : > { %v2759_v0 = vadd.f32 %v2725_v60, %v2505_v5  ;;  %v3935_v48 = vpop.f32.mrf.mxu1  ;;  %v4839_v5 = vunpack.c.l.b16 %v4664_v53  ;;  %v4840_v60 = vunpack.c.l.b16 %v4674_v55 }
 0x255   : > { %v2870_v3 = vld [vmem:[#allocation4 + $0xf0] sm:$0xff]  ;;  %v4213_v20 = vpop.f32.mrf.mxu2  ;;  %v13389_v37 = vpop.f32.mrf.mxu0 }
 0x256   : > { %2791 = vst.msk [vmem:[#allocation4 + $0xf8] sm:$0xff] %vm841_vm5, %v2759_v0  ;;  %v3476_v8 = vadd.f32 %v13266_v45, %v2870_v3  ;;  %v4292_v42 = vadd.f32 %v4213_v20, %v4038_v13  ;;  %v5111_v45 = vld [vmem:[#allocation2 + $0xb0] sm:$0x1]  ;;  %v11554_v0 = vld [vmem:[%s16312_s3 + $0x4] sm:$0x3]  ;;  %v4682_v13 = vor.u32 %v4681_v12, %v4678_v26 }
 0x257   : > { %v3587_v56 = vld [vmem:[#allocation4 + $0xe8] sm:$0xff]  ;;  %v5290_v10 = vrot.slane %v5111_v45, 5  ;;  %v7705_v25 = vsel %vm1067_vm0, %v11554_v0, 0 }
 0x258   : > { %v3969_v30 = vadd.f32 %v3932_v63, %v3587_v56  ;;  %11400 = vmatmul.msk.bf16.gmra.mxu3 %vm841_vm5, %v4861_v34  ;;  %3508 = vst.msk [vmem:[#allocation4 + $0xf0] sm:$0xff] %vm841_vm5, %v3476_v8  ;;  %v4403_v38 = vld [vmem:[#allocation4] sm:$0xff]  ;;  %11436 = vmatmul.msk.bf16.gmra.mxu0 %vm841_vm5, %v5358_v22  ;;  %v4387_v34 = vld [vmem:[#allocation2 + $0x98] sm:$0x1]  ;;  %v5579_v8 = vsel %vm12006_vm4, 0, %v5578_v47  ;;  %v4683_v50 = vrot.slane %v4682_v13, 4 }
 0x259   : > { %4324 = vst.msk [vmem:[#allocation4 + $0x8] sm:$0xff] %vm841_vm5, %v4292_v42  ;;  %v5291_v49 = vsel %vm12537_vm2, %v5289_v17, %v5290_v10  ;;  %7714 = vmatpush.bf16.msrb.mxu3 %v7705_v25  ;;  %v4695_v1 = vshll.u32 %v4387_v34, 16  ;;  %v4862_v42 = vpack.c.b16 %v4840_v60, %v4839_v5  ;;  %v5113_v45 = vld [vmem:[#allocation2 + $0xb8] sm:$0xf]  ;;  %v4713_v10 = vshrl.u32 %v4389_v51, 16  ;;  %v4041_v47 = vld [vmem:[#allocation4 + $0x20] sm:$0xff] }
 0x25a   : > { %4001 = vst.msk [vmem:[#allocation4 + $0xe8] sm:$0xff] %vm841_vm5, %v3969_v30  ;;  %11384 = vmatmul.msk.bf16.gmra.mxu2 %vm841_vm5, %v11878_v24  ;;  %v5340_v23 = vunpack.c.l.b16 %v5291_v49  ;;  %v5294_v17 = vrot.slane %v5113_v45, 5  ;;  %v4702_v5 = vrot.slane %v4700_v32, 4 }
 0x25b   : > { %v4929_v54 = vpop.f32.mrf.mxu3  ;;  %5580 = vst [vmem:[#allocation3 + $0x18] sm:$0x1] %v5579_v8  ;;  %v4715_v49 = vrot.slane %v4713_v10, 4 }
 0x25c   : > { %v5009_v44 = vadd.f32 %v4929_v54, %v4403_v38  ;;  %v3937_v22 = vpop.f32.mrf.mxu1  ;;  %v4693_v38 = vrot.slane %v4692_v41, 4  ;;  %v4697_v54 = vrot.slane %v4695_v1, 5  ;;  %v11571_v1 = vld [vmem:[%s16312_s3 + $0x6] sm:$0x3] }
 0x25d   : > { %v2871_v33 = vld [vmem:[#allocation4 + $0xf8] sm:$0xff]  ;;  %v4216_v27 = vpop.f32.mrf.mxu2  ;;  %v13415_v3 = vpop.f32.mrf.mxu0 }
 0x25e   : > { %5041 = vst.msk [vmem:[#allocation4] sm:$0xff] %vm841_vm5, %v5009_v44  ;;  %v3477_v63 = vadd.f32 %v13280_v21, %v2871_v33  ;;  %v4293_v11 = vadd.f32 %v4216_v27, %v4039_v46  ;;  %v5288_v21 = vsel %vm12537_vm2, %v11420_v40, %v5287_v14  ;;  %v4709_v40 = vshll.u32 %v4389_v51, 16  ;;  %v5112_v33 = vld [vmem:[#allocation2 + $0xb4] sm:$0xe] }
 0x25f   : > { %v3588_v59 = vld [vmem:[#allocation4 + $0xf0] sm:$0xff]  ;;  %v5339_v18 = vunpack.c.l.b16 %v5288_v21  ;;  %v4698_v27 = vsel %vm12116_vm13, %v4693_v38, %v4697_v54 }
 0x260   : > { %v3970_v28 = vadd.f32 %v3935_v48, %v3588_v59  ;;  %3509 = vst.msk [vmem:[#allocation4 + $0xf8] sm:$0xff] %vm841_vm5, %v3477_v63  ;;  %v4404_v56 = vld [vmem:[#allocation4 + $0x8] sm:$0xff]  ;;  %v4688_v59 = vsel %vm12116_vm13, %v4683_v50, %v13404_v31  ;;  %v4390_v21 = vld [vmem:[#allocation2 + $0xa4] sm:$0x1]  ;;  %v13439_v31 = vrot.slane %v4709_v40, 5 }
 0x261   : > { %4325 = vst.msk [vmem:[#allocation4 + $0x10] sm:$0xff] %vm841_vm5, %v4293_v11  ;;  %v5359_v48 = vpack.c.b16 %v5340_v23, %v5339_v18  ;;  %v5114_v63 = vld [vmem:[#allocation2 + $0xbc] sm:$0x1]  ;;  %v5296_v11 = vrot.slane %v5294_v17, 4  ;;  %v4841_v8 = vunpack.c.l.b16 %v4688_v59  ;;  %v8055_v18 = vsel %vm1067_vm0, %v11571_v1, 0 }
 0x262   : > { %4002 = vst.msk [vmem:[#allocation4 + $0xf0] sm:$0xff] %vm841_vm5, %v3970_v28  ;;  %v11421_v28 = vrot.slane %v5112_v33, 9  ;;  %v5297_v0 = vrot.slane %v5114_v63, 5  ;;  %8064 = vmatpush.bf16.msrb.mxu0 %v8055_v18  ;;  %v13460_v33 = vld [vmem:[#allocation2 + $0xc4] sm:$0xf] }
 0x263   : > { %v4931_v20 = vpop.f32.mrf.mxu3  ;;  %v4391_v59 = vld [vmem:[#allocation2 + $0xa8] sm:$0xf] }
 0x264   : > { %v5010_v30 = vadd.f32 %v4931_v20, %v4404_v56  ;;  %v4842_v56 = vunpack.c.l.b16 %v4698_v27 }
 0x265   : > { %v5121_v24 = vld [vmem:[#allocation4] sm:$0xff]  ;;  %v4218_v7 = vpop.f32.mrf.mxu2  ;;  %v13426_v44 = vpop.f32.mrf.mxu0 }
 0x266   : > { %v5503_v14 = vadd.f32 %v13295_v58, %v5121_v24  ;;  %5042 = vst.msk [vmem:[#allocation4 + $0x8] sm:$0xff] %vm841_vm5, %v5010_v30  ;;  %v4294_v55 = vadd.f32 %v4218_v7, %v4040_v29  ;;  %v4703_v58 = vshll.u32 %v4388_v6, 16  ;;  %v4719_v30 = vshll.u32 %v4390_v21, 16 }
 0x267   : > { %v3589_v57 = vld [vmem:[#allocation4 + $0xf8] sm:$0xff]  ;;  %v5298_v24 = vsel %vm12537_vm2, %v5296_v11, %v5297_v0  ;;  %v4863_v29 = vpack.c.b16 %v4842_v56, %v4841_v8 }
 0x268   : > { %5535 = vst.msk [vmem:[#allocation4] sm:$0xff] %vm841_vm5, %v5503_v14  ;;  %v3971_v53 = vadd.f32 %v3937_v22, %v3589_v57  ;;  %11401 = vmatmul.msk.bf16.gmra.mxu3 %vm841_vm5, %v4862_v42  ;;  %v4405_v26 = vld [vmem:[#allocation4 + $0x10] sm:$0xff]  ;;  %11437 = vmatmul.msk.bf16.gmra.mxu0 %vm841_vm5, %v5359_v48  ;;  %v4705_v60 = vrot.slane %v4703_v58, 5  ;;  %v5295_v42 = vsel %vm12537_vm2, %v11421_v28, %v5294_v17  ;;  %v5581_v22 = vld [vmem:[#allocation3 + $0x24] sm:$0x1]  ;;  %v5342_v54 = vunpack.c.l.b16 %v5298_v24 }
 0x269   : > { %4326 = vst.msk [vmem:[#allocation4 + $0x18] sm:$0xff] %vm841_vm5, %v4294_v55  ;;  %v4716_v14 = vor.u32 %v4715_v49, %v13439_v31  ;;  %v5582_v51 = vsel %vm12006_vm4, 0, %v5581_v22  ;;  %v5341_v38 = vunpack.c.l.b16 %v5295_v42  ;;  %v11880_v17 = vld [vmem:[#allocation2 + $0x9c] sm:$0xff]  ;;  %v5117_v8 = vld [vmem:[#allocation2 + $0xc8] sm:$0x1] }
 0x26a   : > { %4003 = vst.msk [vmem:[#allocation4 + $0xf8] sm:$0xff] %vm841_vm5, %v3971_v53  ;;  %11385 = vmatmul.msk.bf16.gmra.mxu2 %vm841_vm5, %v11879_v15  ;;  %v4042_v53 = vld [vmem:[#allocation4 + $0x28] sm:$0xff]  ;;  %v4721_v15 = vrot.slane %v4719_v30, 5 }
 0x26b   : > { %v4934_v12 = vpop.f32.mrf.mxu3  ;;  %5583 = vst [vmem:[#allocation3 + $0x24] sm:$0x1] %v5582_v51  ;;  %v4717_v10 = vrot.slane %v4716_v14, 4  ;;  %v5304_v14 = vrot.slane %v5117_v8, 5  ;;  %v4394_v8 = vld [vmem:[#allocation2 + $0xb4] sm:$0xf] }
 0x26c   : > { %v5011_v46 = vadd.f32 %v4934_v12, %v4405_v26  ;;  %v6087_v12 = vld [vmem:[#allocation3 + $0xc] sm:$0xf] }
 0x26d   : > { %v5122_v36 = vld [vmem:[#allocation4 + $0x8] sm:$0xff]  ;;  %v4221_v13 = vpop.f32.mrf.mxu2  ;;  %v13446_v23 = vpop.f32.mrf.mxu0  ;;  %v4722_v49 = vsel %vm12116_vm13, %v4717_v10, %v4721_v15 }
 0x26e   : > { %v5504_v34 = vadd.f32 %v13311_v52, %v5122_v36  ;;  %5043 = vst.msk [vmem:[#allocation4 + $0x10] sm:$0xff] %vm841_vm5, %v5011_v46  ;;  %v4295_v41 = vadd.f32 %v4221_v13, %v4041_v47  ;;  %v4706_v52 = vor.u32 %v4705_v60, %v4702_v5  ;;  %v5360_v60 = vpack.c.b16 %v5342_v54, %v5341_v38  ;;  %v4392_v36 = vld [vmem:[#allocation2 + $0xac] sm:$0xf]  ;;  %v5115_v13 = vld [vmem:[#allocation2 + $0xc0] sm:$0xe] }
 0x26f   : > { %v5671_v25 = vld [vmem:[#allocation4] sm:$0xff]  ;;  %v4724_v47 = vshrl.u32 %v4391_v59, 16  ;;  %v4737_v1 = vshrl.u32 %v4392_v36, 16  ;;  %v13484_v24 = vunpack.c.l.b16 %v4722_v49  ;;  %v11422_v22 = vrot.slane %v5115_v13, 9  ;;  %v4043_v38 = vld [vmem:[#allocation4 + $0x30] sm:$0xff] }
 0x270   : > { %v5703_v20 = vmax.f32 %v5671_v25, 0.0  ;;  %5536 = vst.msk [vmem:[#allocation4 + $0x8] sm:$0xff] %vm841_vm5, %v5504_v34  ;;  %v4406_v45 = vld [vmem:[#allocation4 + $0x18] sm:$0xff]  ;;  %v4707_v55 = vrot.slane %v4706_v52, 4  ;;  %v5301_v34 = vrot.slane %v13460_v33, 5 }
 0x271   : > { %4327 = vst.msk [vmem:[#allocation4 + $0x20] sm:$0xff] %vm841_vm5, %v4295_v41  ;;  %v4733_v41 = vshll.u32 %v4392_v36, 16  ;;  %v4739_v15 = vrot.slane %v4737_v1, 4 }
 0x272   : > { %v5735_v6 = vpack.c.bf16 %v5703_v20, %v5703_v20  ;;  %v4712_v11 = vsel %vm12116_vm13, %v4707_v55, %v13439_v31  ;;  %v4727_v31 = vshll.u32 %v4391_v59, 16 }
 0x273   : > { %v4936_v57 = vpop.f32.mrf.mxu3  ;;  %v13481_v30 = vunpack.c.l.b16 %v4712_v11  ;;  %v13489_v55 = vrot.slane %v4733_v41, 5  ;;  %v13513_v41 = vld [vmem:[#allocation2 + $0xd0] sm:$0xf] }
 0x274   : > { %v5768_v7 = vshrl.u32 %v5735_v6, 16  ;;  %v5012_v50 = vadd.f32 %v4936_v57, %v4406_v45  ;;  %v5771_v58 = vshll.u32 %v5735_v6, 16  ;;  %v5303_v6 = vrot.slane %v5301_v34, 4 }
 0x275   : > { %v5123_v48 = vld [vmem:[#allocation4 + $0x10] sm:$0xff]  ;;  %v4223_v26 = vpop.f32.mrf.mxu2  ;;  %v13472_v0 = vpop.f32.mrf.mxu0 }
 0x276   : > { %v13456_v32 = vrot.slane %v5768_v7, 7  ;;  %v5505_v40 = vadd.f32 %v13324_v2, %v5123_v48  ;;  %5044 = vst.msk [vmem:[#allocation4 + $0x18] sm:$0xff] %vm841_vm5, %v5012_v50  ;;  %v4296_v5 = vadd.f32 %v4223_v26, %v4042_v53  ;;  %v11652_v2 = vld [vmem:[%s16312_s3 + $0x8] sm:$0x3]  ;;  %v6091_v7 = vld [vmem:[#allocation3 + $0x14] sm:$0x1]  ;;  %v5305_v26 = vsel %vm12537_vm2, %v5303_v6, %v5304_v14 }
 0x277   : > { %v5672_v63 = vld [vmem:[#allocation4 + $0x8] sm:$0xff]  ;;  %v8773_v28 = vsel %vm1067_vm0, %v11652_v2, 0  ;;  %v4729_v53 = vrot.slane %v4727_v31, 5  ;;  %v5344_v13 = vunpack.c.l.b16 %v5305_v26 }
 0x278   : > { %v5773_v46 = vor.u32 %v5771_v58, %v13456_v32  ;;  %v5704_v27 = vmax.f32 %v5672_v63, 0.0  ;;  %5537 = vst.msk [vmem:[#allocation4 + $0x10] sm:$0xff] %vm841_vm5, %v5505_v40  ;;  %11402 = vmatmul.msk.bf16.gmra.mxu3 %vm841_vm5, %v4863_v29  ;;  %8782 = vmatpush.bf16.msrb.mxu1 %v8773_v28  ;;  %v4407_v56 = vld [vmem:[#allocation4 + $0x20] sm:$0xff]  ;;  %v4726_v29 = vrot.slane %v4724_v47, 4  ;;  %v5774_v48 = vrot.slane %v13456_v32, 4 }
 0x279   : > { %4328 = vst.msk [vmem:[#allocation4 + $0x28] sm:$0xff] %vm841_vm5, %v4296_v5  ;;  %11438 = vmatmul.msk.bf16.gmra.mxu0 %vm841_vm5, %v5360_v60  ;;  %v5302_v63 = vsel %vm12537_vm2, %v11422_v22, %v5301_v34  ;;  %v5584_v32 = vld [vmem:[#allocation3 + $0x30] sm:$0x1]  ;;  %v4864_v34 = vpack.c.b16 %v13484_v24, %v13481_v30  ;;  %v4395_v24 = vld [vmem:[#allocation2 + $0xb8] sm:$0xf] }
 0x27a   : > { %v5736_v21 = vpack.c.bf16 %v5704_v27, %v5704_v27  ;;  %v6088_v25 = vsel %vm12064_vm10, %v5773_v46, %v6087_v12  ;;  %11386 = vmatmul.msk.bf16.gmra.mxu2 %vm841_vm5, %v11880_v17  ;;  %v5585_v46 = vsel %vm12006_vm4, 0, %v5584_v32  ;;  %v4730_v60 = vor.u32 %v4729_v53, %v4726_v29 }
 0x27b   : > { %v4939_v20 = vpop.f32.mrf.mxu3  ;;  %6089 = vst [vmem:[#allocation3 + $0xc] sm:$0xf] %v6088_v25  ;;  %v6094_v25 = vld [vmem:[#allocation3 + $0x18] sm:$0xf]  ;;  %v5343_v47 = vunpack.c.l.b16 %v5302_v63  ;;  %v4748_v29 = vshrl.u32 %v4394_v8, 16  ;;  %v4757_v53 = vshll.u32 %v4395_v24, 16 }
 0x27c   : > { %v5776_v52 = vshrl.u32 %v5736_v21, 16  ;;  %v5013_v18 = vadd.f32 %v4939_v20, %v4407_v56  ;;  %v5779_v45 = vshll.u32 %v5736_v21, 16  ;;  %v4740_v21 = vor.u32 %v4739_v15, %v13489_v55  ;;  %5586 = vst [vmem:[#allocation3 + $0x30] sm:$0x1] %v5585_v46  ;;  %v5118_v15 = vld [vmem:[#allocation2 + $0xcc] sm:$0xe] }
 0x27d   : > { %v5124_v42 = vld [vmem:[#allocation4 + $0x18] sm:$0xff]  ;;  %v4226_v54 = vpop.f32.mrf.mxu2  ;;  %v13492_v33 = vpop.f32.mrf.mxu0  ;;  %v4731_v30 = vrot.slane %v4730_v60, 4 }
 0x27e   : > { %v5778_v51 = vrot.slane %v5776_v52, 7  ;;  %v5506_v57 = vadd.f32 %v13342_v16, %v5124_v42  ;;  %5045 = vst.msk [vmem:[#allocation4 + $0x20] sm:$0xff] %vm841_vm5, %v5013_v18  ;;  %v4297_v17 = vadd.f32 %v4226_v54, %v4043_v38  ;;  %v4393_v16 = vld [vmem:[#allocation2 + $0xb0] sm:$0x1]  ;;  %v4044_v52 = vld [vmem:[#allocation4 + $0x38] sm:$0xff] }
 0x27f   : > { %v5673_v50 = vld [vmem:[#allocation4 + $0x10] sm:$0xff]  ;;  %v4743_v36 = vshll.u32 %v4393_v16, 16  ;;  %v4736_v26 = vsel %vm12116_vm13, %v4731_v30, %v13489_v55  ;;  %v4045_v55 = vld [vmem:[#allocation4 + $0x40] sm:$0xff] }
 0x280   : > { %v5783_v58 = vrot.slane %v5778_v51, 4  ;;  %v5705_v40 = vmax.f32 %v5673_v50, 0.0  ;;  %5538 = vst.msk [vmem:[#allocation4 + $0x18] sm:$0xff] %vm841_vm5, %v5506_v57  ;;  %v5781_v10 = vor.u32 %v5779_v45, %v5778_v51  ;;  %v4408_v5 = vld [vmem:[#allocation4 + $0x28] sm:$0xff]  ;;  %v11881_v51 = vld [vmem:[#allocation2 + $0xa8] sm:$0xff]  ;;  %v5361_v57 = vpack.c.b16 %v5344_v13, %v5343_v47 }
 0x281   : > { %4329 = vst.msk [vmem:[#allocation4 + $0x30] sm:$0xff] %vm841_vm5, %v4297_v17  ;;  %v4745_v42 = vrot.slane %v4743_v36, 5  ;;  %v5308_v50 = vrot.slane %v13513_v41, 5  ;;  %v4761_v17 = vshrl.u32 %v4395_v24, 16 }
 0x282   : > { %v5737_v12 = vpack.c.bf16 %v5705_v40, %v5705_v40  ;;  %v5782_v59 = vsel %vm12055_vm9, %v5774_v48, %v5781_v10  ;;  %v6092_v27 = vsel %vm12006_vm4, %v5783_v58, %v6091_v7  ;;  %v4751_v7 = vshll.u32 %v4394_v8, 16  ;;  %v5120_v10 = vld [vmem:[#allocation2 + $0xd4] sm:$0x1] }
 0x283   : > { %v4941_v2 = vpop.f32.mrf.mxu3  ;;  %6090 = vst.msk [vmem:[#allocation3 + $0x10] sm:$0xf] %vm226_vm1, %v5782_v59  ;;  %v4750_v59 = vrot.slane %v4748_v29, 4  ;;  %v4763_v47 = vrot.slane %v4761_v17, 4  ;;  %v6101_v17 = vld [vmem:[#allocation3 + $0x24] sm:$0xf] }
 0x284   : > { %v5785_v28 = vshrl.u32 %v5737_v12, 16  ;;  %v5014_v11 = vadd.f32 %v4941_v2, %v4408_v5  ;;  %6093 = vst [vmem:[#allocation3 + $0x14] sm:$0x1] %v6092_v27  ;;  %v5788_v20 = vshll.u32 %v5737_v12, 16  ;;  %v4753_v46 = vrot.slane %v4751_v7, 5 }
 0x285   : > { %v5125_v49 = vld [vmem:[#allocation4 + $0x20] sm:$0xff]  ;;  %v4228_v18 = vpop.f32.mrf.mxu2  ;;  %v13518_v45 = vpop.f32.mrf.mxu0  ;;  %v11423_v27 = vrot.slane %v5118_v15, 9  ;;  %v5310_v5 = vrot.slane %v5308_v50, 4  ;;  %v4397_v7 = vld [vmem:[#allocation2 + $0xc0] sm:$0xf] }
 0x286   : > { %v13509_v56 = vrot.slane %v5785_v28, 7  ;;  %v5507_v31 = vadd.f32 %v13357_v39, %v5125_v49  ;;  %5046 = vst.msk [vmem:[#allocation4 + $0x28] sm:$0xff] %vm841_vm5, %v5014_v11  ;;  %v4298_v14 = vadd.f32 %v4228_v18, %v4044_v52  ;;  %v4741_v39 = vrot.slane %v4740_v21, 4  ;;  %v5587_v18 = vld [vmem:[#allocation3 + $0x3c] sm:$0x1] }
 0x287   : > { %v5674_v1 = vld [vmem:[#allocation4 + $0x18] sm:$0xff]  ;;  %v5311_v28 = vrot.slane %v5120_v10, 5  ;;  %v4845_v21 = vunpack.c.l.b16 %v4736_v26  ;;  %v5309_v52 = vsel %vm12537_vm2, %v11423_v27, %v5308_v50  ;;  %v4398_v26 = vld [vmem:[#allocation2 + $0xc4] sm:$0xf] }
 0x288   : > { %v5790_v22 = vor.u32 %v5788_v20, %v13509_v56  ;;  %v5706_v6 = vmax.f32 %v5674_v1, 0.0  ;;  %5539 = vst.msk [vmem:[#allocation4 + $0x20] sm:$0xff] %vm841_vm5, %v5507_v31  ;;  %11403 = vmatmul.msk.bf16.gmra.mxu3 %vm841_vm5, %v4864_v34  ;;  %v4409_v58 = vld [vmem:[#allocation4 + $0x30] sm:$0xff]  ;;  %v4746_v32 = vsel %vm12116_vm13, %v4741_v39, %v4745_v42  ;;  %v5791_v20 = vrot.slane %v13509_v56, 4 }
 0x289   : > { %4330 = vst.msk [vmem:[#allocation4 + $0x38] sm:$0xff] %vm841_vm5, %v4298_v14  ;;  %11439 = vmatmul.msk.bf16.gmra.mxu0 %vm841_vm5, %v5361_v57  ;;  %v4846_v49 = vunpack.c.l.b16 %v4746_v32  ;;  %v4754_v1 = vor.u32 %v4753_v46, %v4750_v59  ;;  %v5312_v24 = vsel %vm12537_vm2, %v5310_v5, %v5311_v28  ;;  %v5588_v56 = vsel %vm12006_vm4, 0, %v5587_v18  ;;  %v11882_v5 = vld [vmem:[#allocation2 + $0xb4] sm:$0xff] }
 0x28a   : > { %v5738_v38 = vpack.c.bf16 %v5706_v6, %v5706_v6  ;;  %v11886_v54 = vld [vmem:[#allocation3 + $0xc] sm:$0xff]  ;;  %v6095_v48 = vsel %vm12064_vm10, %v5790_v22, %v6094_v25  ;;  %11387 = vmatmul.msk.bf16.gmra.mxu2 %vm841_vm5, %v11881_v51  ;;  %v13536_v25 = vrot.slane %v4757_v53, 5  ;;  %5589 = vst [vmem:[#allocation3 + $0x3c] sm:$0x1] %v5588_v56  ;;  %v4772_v32 = vshrl.u32 %v4397_v7, 16 }
 0x28b   : > { %v4944_v40 = vpop.f32.mrf.mxu3  ;;  %6096 = vst [vmem:[#allocation3 + $0x18] sm:$0xf] %v6095_v48  ;;  %11506 = vmatmul.msk.bf16.gmra.mxu1 %vm841_vm5, %v11886_v54  ;;  %v4865_v57 = vpack.c.b16 %v4846_v49, %v4845_v21  ;;  %v5345_v54 = vunpack.c.l.b16 %v5309_v52  ;;  %v5346_v48 = vunpack.c.l.b16 %v5312_v24  ;;  %v4047_v56 = vld [vmem:[#allocation4 + $0x50] sm:$0xff] }
 0x28c   : > { %v5793_v16 = vshrl.u32 %v5738_v38, 16  ;;  %v5015_v63 = vadd.f32 %v4944_v40, %v4409_v58  ;;  %v5796_v60 = vshll.u32 %v5738_v38, 16  ;;  %v4764_v29 = vor.u32 %v4763_v47, %v13536_v25  ;;  %v4046_v38 = vld [vmem:[#allocation4 + $0x48] sm:$0xff] }
 0x28d   : > { %v5126_v12 = vld [vmem:[#allocation4 + $0x28] sm:$0xff]  ;;  %v4231_v34 = vpop.f32.mrf.mxu2  ;;  %v13541_v41 = vpop.f32.mrf.mxu0  ;;  %v4755_v40 = vrot.slane %v4754_v1, 4 }
 0x28e   : > { %v13532_v2 = vrot.slane %v5793_v16, 7  ;;  %v5508_v36 = vadd.f32 %v13373_v9, %v5126_v12  ;;  %5047 = vst.msk [vmem:[#allocation4 + $0x30] sm:$0xff] %vm841_vm5, %v5015_v63  ;;  %v4299_v8 = vadd.f32 %v4231_v34, %v4045_v55  ;;  %v4396_v9 = vld [vmem:[#allocation2 + $0xbc] sm:$0x1]  ;;  %v4775_v12 = vshll.u32 %v4397_v7, 16 }
 0x28f   : > { %v5675_v11 = vld [vmem:[#allocation4 + $0x20] sm:$0xff]  ;;  %v4767_v14 = vshll.u32 %v4396_v9, 16  ;;  %v4781_v34 = vshll.u32 %v4398_v26, 16  ;;  %v4760_v47 = vsel %vm12116_vm13, %v4755_v40, %v13536_v25 }
 0x290   : > { %v5707_v13 = vmax.f32 %v5675_v11, 0.0  ;;  %5540 = vst.msk [vmem:[#allocation4 + $0x28] sm:$0xff] %vm841_vm5, %v5508_v36  ;;  %v5798_v31 = vor.u32 %v5796_v60, %v13532_v2  ;;  %v4410_v22 = vld [vmem:[#allocation4 + $0x38] sm:$0xff]  ;;  %v5362_v36 = vpack.c.b16 %v5346_v48, %v5345_v54 }
 0x291   : > { %4331 = vst.msk [vmem:[#allocation4 + $0x40] sm:$0xff] %vm841_vm5, %v4299_v8  ;;  %v4769_v63 = vrot.slane %v4767_v14, 5  ;;  %v4777_v8 = vrot.slane %v4775_v12, 5  ;;  %v5590_v12 = vld [vmem:[#allocation3 + $0x48] sm:$0x1] }
 0x292   : > { %v5739_v30 = vpack.c.bf16 %v5707_v13, %v5707_v13  ;;  %v5799_v42 = vsel %vm12055_vm9, %v5791_v20, %v5798_v31  ;;  %v4774_v13 = vrot.slane %v4772_v32, 4  ;;  %v4785_v20 = vshrl.u32 %v4398_v26, 16 }
 0x293   : > { %v4946_v6 = vpop.f32.mrf.mxu3  ;;  %6097 = vst.msk [vmem:[#allocation3 + $0x1c] sm:$0xf] %vm226_vm1, %v5799_v42  ;;  %v4847_v42 = vunpack.c.l.b16 %v4760_v47  ;;  %v6108_v47 = vld [vmem:[#allocation3 + $0x30] sm:$0xf] }
 0x294   : > { %v5802_v51 = vshrl.u32 %v5739_v30, 16  ;;  %v5016_v39 = vadd.f32 %v4946_v6, %v4410_v22  ;;  %v5805_v15 = vshll.u32 %v5739_v30, 16  ;;  %v4778_v14 = vor.u32 %v4777_v8, %v4774_v13 }
 0x295   : > { %v5127_v50 = vld [vmem:[#allocation4 + $0x30] sm:$0xff]  ;;  %v4233_v16 = vpop.f32.mrf.mxu2  ;;  %v13561_v60 = vpop.f32.mrf.mxu0  ;;  %v5591_v13 = vsel %vm12006_vm4, 0, %v5590_v12 }
 0x296   : > { %v13554_v53 = vrot.slane %v5802_v51, 7  ;;  %v5509_v58 = vadd.f32 %v13389_v37, %v5127_v50  ;;  %5048 = vst.msk [vmem:[#allocation4 + $0x38] sm:$0xff] %vm841_vm5, %v5016_v39  ;;  %v4300_v27 = vadd.f32 %v4233_v16, %v4046_v38  ;;  %v4765_v37 = vrot.slane %v4764_v29, 4 }
 0x297   : > { %v5676_v10 = vld [vmem:[#allocation4 + $0x28] sm:$0xff]  ;;  %v4783_v51 = vrot.slane %v4781_v34, 5  ;;  %v4787_v39 = vrot.slane %v4785_v20, 4  ;;  %5592 = vst [vmem:[#allocation3 + $0x48] sm:$0x1] %v5591_v13 }
 0x298   : > { %v5807_v59 = vor.u32 %v5805_v15, %v13554_v53  ;;  %v5708_v46 = vmax.f32 %v5676_v10, 0.0  ;;  %5541 = vst.msk [vmem:[#allocation4 + $0x30] sm:$0xff] %vm841_vm5, %v5509_v58  ;;  %11404 = vmatmul.msk.bf16.gmra.mxu3 %vm841_vm5, %v4865_v57  ;;  %v4411_v21 = vld [vmem:[#allocation4 + $0x40] sm:$0xff]  ;;  %v4770_v1 = vsel %vm12116_vm13, %v4765_v37, %v4769_v63  ;;  %v5626_v57 = vld [vmem:[#allocation3 + $0x20] sm:$0x1]  ;;  %v5808_v50 = vrot.slane %v13554_v53, 4 }
 0x299   : > { %4332 = vst.msk [vmem:[#allocation4 + $0x48] sm:$0xff] %vm841_vm5, %v4300_v27  ;;  %11440 = vmatmul.msk.bf16.gmra.mxu0 %vm841_vm5, %v5362_v36  ;;  %v4848_v6 = vunpack.c.l.b16 %v4770_v1  ;;  %v5627_v58 = vsel %vm12039_vm8, 0, %v5626_v57  ;;  %v4779_v10 = vrot.slane %v4778_v14, 4  ;;  %v4788_v53 = vor.u32 %v4787_v39, %v4783_v51  ;;  %v4048_v36 = vld [vmem:[#allocation4 + $0x58] sm:$0xff] }
 0x29a   : > { %v5740_v28 = vpack.c.bf16 %v5708_v46, %v5708_v46  ;;  %v11887_v11 = vld [vmem:[#allocation3 + $0x18] sm:$0xff]  ;;  %v6102_v55 = vsel %vm12064_vm10, %v5807_v59, %v6101_v17  ;;  %11388 = vmatmul.msk.bf16.gmra.mxu2 %vm841_vm5, %v11882_v5  ;;  %v4400_v46 = vld [vmem:[#allocation2 + $0xcc] sm:$0xf]  ;;  %5628 = vst [vmem:[#allocation3 + $0x20] sm:$0x1] %v5627_v58  ;;  %v5800_v1 = vrot.slane %v13532_v2, 4 }
 0x29b   : > { %v4949_v49 = vpop.f32.mrf.mxu3  ;;  %6103 = vst [vmem:[#allocation3 + $0x24] sm:$0xf] %v6102_v55  ;;  %11507 = vmatmul.msk.bf16.gmra.mxu1 %vm841_vm5, %v11887_v11  ;;  %v4866_v32 = vpack.c.b16 %v4848_v6, %v4847_v42  ;;  %v4784_v34 = vsel %vm12116_vm13, %v4779_v10, %v4783_v51  ;;  %v11901_v39 = vld [vmem:[#allocation3 + $0xc] sm:$0xff] }
 0x29c   : > { %v5810_v31 = vshrl.u32 %v5740_v28, 16  ;;  %v5017_v9 = vadd.f32 %v4949_v49, %v4411_v21  ;;  %v5813_v30 = vshll.u32 %v5740_v28, 16  ;;  %v4401_v28 = vld [vmem:[#allocation2 + $0xd0] sm:$0xf]  ;;  %v4789_v21 = vrot.slane %v4788_v53, 4 }
 0x29d   : > { %v5128_v52 = vld [vmem:[#allocation4 + $0x38] sm:$0xff]  ;;  %v4236_v22 = vpop.f32.mrf.mxu2  ;;  %v13581_v54 = vpop.f32.mrf.mxu0  ;;  %v13606_v51 = vunpack.c.l.b16 %v4784_v34  ;;  %v4809_v2 = vshrl.u32 %v4401_v28, 16 }
 0x29e   : > { %v13574_v18 = vrot.slane %v5810_v31, 7  ;;  %v5510_v25 = vadd.f32 %v13415_v3, %v5128_v52  ;;  %5049 = vst.msk [vmem:[#allocation4 + $0x40] sm:$0xff] %vm841_vm5, %v5017_v9  ;;  %v4301_v7 = vadd.f32 %v4236_v22, %v4047_v56  ;;  %v4399_v3 = vld [vmem:[#allocation2 + $0xc8] sm:$0x1]  ;;  %v11883_v31 = vld [vmem:[#allocation2 + $0xc0] sm:$0xff]  ;;  %v4796_v9 = vshrl.u32 %v4400_v46, 16 }
 0x29f   : > { %v5677_v24 = vld [vmem:[#allocation4 + $0x30] sm:$0xff]  ;;  %v4791_v16 = vshll.u32 %v4399_v3, 16  ;;  %v4799_v52 = vshll.u32 %v4400_v46, 16  ;;  %v6648_v22 = vld [vmem:[#allocation3] sm:$0xf]  ;;  %v4811_v46 = vrot.slane %v4809_v2, 4 }
 0x2a0   : > { %v5709_v29 = vmax.f32 %v5677_v24, 0.0  ;;  %5542 = vst.msk [vmem:[#allocation4 + $0x38] sm:$0xff] %vm841_vm5, %v5510_v25  ;;  %v5815_v38 = vor.u32 %v5813_v30, %v13574_v18  ;;  %v4412_v40 = vld [vmem:[#allocation4 + $0x48] sm:$0xff]  ;;  %v4805_v30 = vshll.u32 %v4401_v28, 16 }
 0x2a1   : > { %4333 = vst.msk [vmem:[#allocation4 + $0x50] sm:$0xff] %vm841_vm5, %v4301_v7  ;;  %v4793_v49 = vrot.slane %v4791_v16, 5  ;;  %v6098_v3 = vld [vmem:[#allocation3 + $0x20] sm:$0x1] }
 0x2a2   : > { %v5741_v48 = vpack.c.bf16 %v5709_v29, %v5709_v29  ;;  %v5816_v15 = vsel %vm12055_vm9, %v5808_v50, %v5815_v38  ;;  %v4798_v50 = vrot.slane %v4796_v9, 4  ;;  %v6649_v38 = vld [vmem:[#allocation3 + $0x4] sm:$0xf]  ;;  %v13613_v58 = vrot.slane %v4805_v30, 5 }
 0x2a3   : > { %v4951_v17 = vpop.f32.mrf.mxu3  ;;  %6104 = vst.msk [vmem:[#allocation3 + $0x28] sm:$0xf] %vm226_vm1, %v5816_v15  ;;  %v4794_v7 = vsel %vm12116_vm13, %v4789_v21, %v4793_v49  ;;  %v4801_v15 = vrot.slane %v4799_v52, 5 }
 0x2a4   : > { %v5819_v63 = vshrl.u32 %v5741_v48, 16  ;;  %v5018_v26 = vadd.f32 %v4951_v17, %v4412_v40  ;;  %v5822_v5 = vshll.u32 %v5741_v48, 16  ;;  %v6729_v40 = vshrl.u32 %v6648_v22, 16 }
 0x2a5   : > { %v5129_v59 = vld [vmem:[#allocation4 + $0x40] sm:$0xff]  ;;  %v4238_v55 = vpop.f32.mrf.mxu2  ;;  %v13602_v24 = vpop.f32.mrf.mxu0  ;;  %v6099_v17 = vsel %vm12006_vm4, %v5800_v1, %v6098_v3 }
 0x2a6   : > { %v13589_v27 = vrot.slane %v5819_v63, 7  ;;  %v5511_v37 = vadd.f32 %v13426_v44, %v5129_v59  ;;  %5050 = vst.msk [vmem:[#allocation4 + $0x48] sm:$0xff] %vm841_vm5, %v5018_v26  ;;  %v4302_v44 = vadd.f32 %v4238_v55, %v4048_v36  ;;  %v4049_v63 = vld [vmem:[#allocation4 + $0x60] sm:$0xff]  ;;  %v6732_v26 = vshll.u32 %v6648_v22, 16 }
 0x2a7   : > { %v5678_v11 = vld [vmem:[#allocation4 + $0x38] sm:$0xff]  ;;  %v4850_v59 = vunpack.c.l.b16 %v4794_v7  ;;  %6100 = vst [vmem:[#allocation3 + $0x20] sm:$0x1] %v6099_v17  ;;  %v6731_v49 = vrot.slane %v6729_v40, 4 }
 0x2a8   : > { %v5824_v8 = vor.u32 %v5822_v5, %v13589_v27  ;;  %v5710_v20 = vmax.f32 %v5678_v11, 0.0  ;;  %5543 = vst.msk [vmem:[#allocation4 + $0x40] sm:$0xff] %vm841_vm5, %v5511_v37  ;;  %11405 = vmatmul.msk.bf16.gmra.mxu3 %vm841_vm5, %v4866_v32  ;;  %v4413_v6 = vld [vmem:[#allocation4 + $0x50] sm:$0xff]  ;;  %v6738_v5 = vshll.u32 %v6649_v38, 16  ;;  %v6742_v37 = vshrl.u32 %v6649_v38, 16 }
 0x2a9   : > { %4334 = vst.msk [vmem:[#allocation4 + $0x58] sm:$0xff] %vm841_vm5, %v4302_v44  ;;  %11636 = vmatmul.msk.bf16.vlgmr.msrb.gmra.mxu0 %vm841_vm5, %v11901_v39  ;;  %v5825_v11 = vrot.slane %v13589_v27, 4  ;;  %v4812_v44 = vor.u32 %v4811_v46, %v13613_v58  ;;  %v4867_v52 = vpack.c.b16 %v4850_v59, %v13606_v51  ;;  %v4050_v39 = vld [vmem:[#allocation4 + $0x68] sm:$0xff]  ;;  %v6115_v38 = vld [vmem:[#allocation3 + $0x3c] sm:$0xf] }
 0x2aa   : > { %v5742_v25 = vpack.c.bf16 %v5710_v20, %v5710_v20  ;;  %v11888_v42 = vld [vmem:[#allocation3 + $0x24] sm:$0xff]  ;;  %v6109_v56 = vsel %vm12064_vm10, %v5824_v8, %v6108_v47  ;;  %11389 = vmatmul.msk.bf16.gmra.mxu2 %vm841_vm5, %v11883_v31  ;;  %v6734_v47 = vrot.slane %v6732_v26, 5  ;;  %v4802_v20 = vor.u32 %v4801_v15, %v4798_v50 }
 0x2ab   : > { %v4954_v14 = vpop.f32.mrf.mxu3  ;;  %6110 = vst [vmem:[#allocation3 + $0x30] sm:$0xf] %v6109_v56  ;;  %11508 = vmatmul.msk.bf16.gmra.mxu1 %vm841_vm5, %v11888_v42  ;;  %v13629_v31 = vrot.slane %v6738_v5, 5  ;;  %v6744_v27 = vrot.slane %v6742_v37, 4  ;;  %v6650_v42 = vld [vmem:[#allocation3 + $0x8] sm:$0x1] }
 0x2ac   : > { %v5827_v57 = vshrl.u32 %v5742_v25, 16  ;;  %v5019_v29 = vadd.f32 %v4954_v14, %v4413_v6  ;;  %v5830_v53 = vshll.u32 %v5742_v25, 16  ;;  %v6735_v2 = vor.u32 %v6734_v47, %v6731_v49 }
 0x2ad   : > { %v5130_v48 = vld [vmem:[#allocation4 + $0x48] sm:$0xff]  ;;  %v4241_v12 = vpop.f32.mrf.mxu2  ;;  %v13632_v30 = vpop.f32.mrf.mxu0  ;;  %v4803_v7 = vrot.slane %v4802_v20, 4  ;;  %v4813_v50 = vrot.slane %v4812_v44, 4  ;;  %v6745_v51 = vor.u32 %v6744_v27, %v13629_v31  ;;  %v6748_v3 = vshll.u32 %v6650_v42, 16  ;;  %v6652_v20 = vld [vmem:[#allocation3 + $0x10] sm:$0xf] }
 0x2ae   : > { %v13617_v10 = vrot.slane %v5827_v57, 7  ;;  %v5512_v16 = vadd.f32 %v13446_v23, %v5130_v48  ;;  %5051 = vst.msk [vmem:[#allocation4 + $0x50] sm:$0xff] %vm841_vm5, %v5019_v29  ;;  %v4303_v28 = vadd.f32 %v4241_v12, %v4049_v63  ;;  %v4402_v23 = vld [vmem:[#allocation2 + $0xd4] sm:$0x1]  ;;  %v5632_v42 = vld [vmem:[#allocation3 + $0x38] sm:$0x1] }
 0x2af   : > { %v5679_v32 = vld [vmem:[#allocation4 + $0x40] sm:$0xff]  ;;  %v4815_v25 = vshll.u32 %v4402_v23, 16  ;;  %v4808_v5 = vsel %vm12116_vm13, %v4803_v7, %v13613_v58  ;;  %v6746_v37 = vrot.slane %v6745_v51, 4  ;;  %v5817_v58 = vrot.slane %v13574_v18, 4  ;;  %v7366_v7 = vld [vmem:[#allocation3] sm:$0xe] }
 0x2b0   : > { %v5711_v36 = vmax.f32 %v5679_v32, 0.0  ;;  %5544 = vst.msk [vmem:[#allocation4 + $0x48] sm:$0xff] %vm841_vm5, %v5512_v16  ;;  %v5832_v55 = vor.u32 %v5830_v53, %v13617_v10  ;;  %v4414_v13 = vld [vmem:[#allocation4 + $0x58] sm:$0xff]  ;;  %v5629_v53 = vld [vmem:[#allocation3 + $0x2c] sm:$0x1]  ;;  %v6736_v32 = vrot.slane %v6735_v2, 4 }
 0x2b1   : > { %4335 = vst.msk [vmem:[#allocation4 + $0x60] sm:$0xff] %vm841_vm5, %v4303_v28  ;;  %v4817_v17 = vrot.slane %v4815_v25, 5  ;;  %v11902_v12 = vld [vmem:[#allocation3 + $0x18] sm:$0xff]  ;;  %v5630_v28 = vsel %vm12039_vm8, 0, %v5629_v53  ;;  %v6651_v25 = vld [vmem:[#allocation3 + $0xc] sm:$0xf] }
 0x2b2   : > { %v5743_v34 = vpack.c.bf16 %v5711_v36, %v5711_v36  ;;  %v5833_v21 = vsel %vm12055_vm9, %v5825_v11, %v5832_v55  ;;  %v6750_v36 = vrot.slane %v6748_v3, 5  ;;  %5631 = vst [vmem:[#allocation3 + $0x2c] sm:$0x1] %v5630_v28  ;;  %v6762_v2 = vshll.u32 %v6652_v20, 16  ;;  %v6653_v28 = vld [vmem:[#allocation3 + $0x14] sm:$0x1] }
 0x2b3   : > { %v4956_v8 = vpop.f32.mrf.mxu3  ;;  %6111 = vst.msk [vmem:[#allocation3 + $0x34] sm:$0xf] %vm226_vm1, %v5833_v21  ;;  %v4818_v23 = vsel %vm12116_vm13, %v4813_v50, %v4817_v17  ;;  %v4051_v21 = vld [vmem:[#allocation4 + $0x70] sm:$0xff]  ;;  %v6753_v50 = vshrl.u32 %v6651_v25, 16 }
 0x2b4   : > { %v5836_v9 = vshrl.u32 %v5743_v34, 16  ;;  %v5020_v1 = vadd.f32 %v4956_v8, %v4414_v13  ;;  %v5839_v6 = vshll.u32 %v5743_v34, 16  ;;  %v6751_v18 = vsel %vm12116_vm13, %v6746_v37, %v6750_v36 }
 0x2b5   : > { %v5131_v56 = vld [vmem:[#allocation4 + $0x50] sm:$0xff]  ;;  %v4243_v29 = vpop.f32.mrf.mxu2  ;;  %v13660_v8 = vpop.f32.mrf.mxu0 }
 0x2b6   : > { %v13634_v22 = vrot.slane %v5836_v9, 7  ;;  %v5513_v14 = vadd.f32 %v13472_v0, %v5131_v56  ;;  %5052 = vst.msk [vmem:[#allocation4 + $0x58] sm:$0xff] %vm841_vm5, %v5020_v1  ;;  %v4304_v40 = vadd.f32 %v4243_v29, %v4050_v39  ;;  %v11884_v0 = vld [vmem:[#allocation2 + $0xcc] sm:$0xff]  ;;  %v4851_v9 = vunpack.c.l.b16 %v4808_v5  ;;  %v13670_v39 = vld [vmem:[#allocation3 + $0x4] sm:$0xf] }
 0x2b7   : > { %v5680_v57 = vld [vmem:[#allocation4 + $0x48] sm:$0xff]  ;;  %v4852_v1 = vunpack.c.l.b16 %v4818_v23 }
 0x2b8   : > { %v5841_v48 = vor.u32 %v5839_v6, %v13634_v22  ;;  %v5712_v15 = vmax.f32 %v5680_v57, 0.0  ;;  %5545 = vst.msk [vmem:[#allocation4 + $0x50] sm:$0xff] %vm841_vm5, %v5513_v14  ;;  %11406 = vmatmul.msk.bf16.gmra.mxu3 %vm841_vm5, %v4867_v52  ;;  %v4415_v59 = vld [vmem:[#allocation4 + $0x60] sm:$0xff]  ;;  %v6741_v52 = vsel %vm12116_vm13, %v6736_v32, %v13629_v31  ;;  %v5842_v6 = vrot.slane %v13634_v22, 4 }
 0x2b9   : > { %4336 = vst.msk [vmem:[#allocation4 + $0x68] sm:$0xff] %vm841_vm5, %v4304_v40  ;;  %11637 = vmatmul.msk.bf16.gmra.mxu0 %vm841_vm5, %v11902_v12  ;;  %v6766_v57 = vshrl.u32 %v6652_v20, 16  ;;  %v4868_v22 = vpack.c.b16 %v4852_v1, %v4851_v9  ;;  %v6756_v40 = vshll.u32 %v6651_v25, 16  ;;  %v4052_v12 = vld [vmem:[#allocation4 + $0x78] sm:$0xff] }
 0x2ba   : > { %v5744_v16 = vpack.c.bf16 %v5712_v15, %v5712_v15  ;;  %v11889_v63 = vld [vmem:[#allocation3 + $0x30] sm:$0xff]  ;;  %v6116_v26 = vsel %vm12064_vm10, %v5841_v48, %v6115_v38  ;;  %11390 = vmatmul.msk.bf16.gmra.mxu2 %vm841_vm5, %v11884_v0  ;;  %v5633_v38 = vsel %vm12039_vm8, 0, %v5632_v42  ;;  %v7114_v48 = vunpack.c.l.b16 %v6741_v52  ;;  %v6105_v0 = vld [vmem:[#allocation3 + $0x2c] sm:$0x1] }
 0x2bb   : > { %v4959_v46 = vpop.f32.mrf.mxu3  ;;  %6117 = vst [vmem:[#allocation3 + $0x3c] sm:$0xf] %v6116_v26  ;;  %11509 = vmatmul.msk.bf16.gmra.mxu1 %vm841_vm5, %v11889_v63  ;;  %v7115_v15 = vunpack.c.l.b16 %v6751_v18  ;;  %v7496_v63 = vrot.slane %v13670_v39, 5  ;;  %v6106_v26 = vsel %vm12006_vm4, %v5817_v58, %v6105_v0  ;;  %v5834_v52 = vrot.slane %v13617_v10, 4  ;;  %v11903_v39 = vld [vmem:[#allocation3 + $0x24] sm:$0xff] }
 0x2bc   : > { %v5844_v11 = vshrl.u32 %v5744_v16, 16  ;;  %v5021_v55 = vadd.f32 %v4959_v46, %v4415_v59  ;;  %v5847_v47 = vshll.u32 %v5744_v16, 16  ;;  %v7368_v16 = vld [vmem:[#allocation3 + $0x8] sm:$0x1]  ;;  %5634 = vst [vmem:[#allocation3 + $0x38] sm:$0x1] %v5633_v38 }
 0x2bd   : > { %v5132_v34 = vld [vmem:[#allocation4 + $0x58] sm:$0xff]  ;;  %v4246_v27 = vpop.f32.mrf.mxu2  ;;  %v13681_v59 = vrot.slane %v6762_v2, 5  ;;  %v6768_v46 = vrot.slane %v6766_v57, 4  ;;  %6107 = vst [vmem:[#allocation3 + $0x2c] sm:$0x1] %v6106_v26  ;;  %v7499_v58 = vrot.slane %v7368_v16, 5 }
 0x2be   : > { %v13656_v49 = vrot.slane %v5844_v11, 7  ;;  %v5514_v13 = vadd.f32 %v13492_v33, %v5132_v34  ;;  %5053 = vst.msk [vmem:[#allocation4 + $0x60] sm:$0xff] %vm841_vm5, %v5021_v55  ;;  %v4305_v33 = vadd.f32 %v4246_v27, %v4051_v21  ;;  %v6755_v11 = vrot.slane %v6753_v50, 4  ;;  %v5635_v0 = vld [vmem:[#allocation3 + $0x44] sm:$0x1] }
 0x2bf   : > { %v5681_v44 = vld [vmem:[#allocation4 + $0x50] sm:$0xff]  ;;  %v7146_v34 = vpack.c.b16 %v7115_v15, %v7114_v48  ;;  %v11538_v21 = vrot.slane %v7366_v7, 9  ;;  %v7498_v9 = vrot.slane %v7496_v63, 4  ;;  %v6769_v1 = vor.u32 %v6768_v46, %v13681_v59  ;;  %v5593_v7 = vld [vmem:[#allocation3 + $0x54] sm:$0x1] }
 0x2c0   : > { %v5713_v56 = vmax.f32 %v5681_v44, 0.0  ;;  %5546 = vst.msk [vmem:[#allocation4 + $0x58] sm:$0xff] %vm841_vm5, %v5514_v13  ;;  %v5849_v14 = vor.u32 %v5847_v47, %v13656_v49  ;;  %v4416_v51 = vld [vmem:[#allocation4 + $0x68] sm:$0xff]  ;;  %v6122_v47 = vld [vmem:[#allocation3 + $0x48] sm:$0xf]  ;;  %v6758_v13 = vrot.slane %v6756_v40, 5 }
 0x2c1   : > { %4337 = vst.msk [vmem:[#allocation4 + $0x70] sm:$0xff] %vm841_vm5, %v4305_v33  ;;  %v7497_v10 = vsel %vm12537_vm2, %v11538_v21, %v7496_v63  ;;  %v6770_v38 = vrot.slane %v6769_v1, 4 }
 0x2c2   : > { %v5745_v29 = vpack.c.bf16 %v5713_v56, %v5713_v56  ;;  %v5850_v31 = vsel %vm12055_vm9, %v5842_v6, %v5849_v14  ;;  %v6772_v56 = vshll.u32 %v6653_v28, 16  ;;  %v6759_v14 = vor.u32 %v6758_v13, %v6755_v11  ;;  %v13715_v28 = vld [vmem:[#allocation3 + $0x10] sm:$0xf] }
 0x2c3   : > { %v4961_v3 = vpop.f32.mrf.mxu3  ;;  %6118 = vst.msk [vmem:[#allocation3 + $0x40] sm:$0xf] %vm226_vm1, %v5850_v31  ;;  %v6112_v2 = vld [vmem:[#allocation3 + $0x38] sm:$0x1]  ;;  %v7500_v31 = vsel %vm12537_vm2, %v7498_v9, %v7499_v58  ;;  %v7608_v63 = vunpack.c.l.b16 %v7497_v10  ;;  %v5638_v9 = vld [vmem:[#allocation3 + $0x50] sm:$0x1] }
 0x2c4   : > { %v5853_v17 = vshrl.u32 %v5745_v29, 16  ;;  %v5022_v53 = vadd.f32 %v4961_v3, %v4416_v51  ;;  %v5856_v37 = vshll.u32 %v5745_v29, 16  ;;  %v5594_v51 = vsel %vm12006_vm4, 0, %v5593_v7  ;;  %v6655_v3 = vld [vmem:[#allocation3 + $0x1c] sm:$0xf] }
 0x2c5   : > { %v5133_v32 = vld [vmem:[#allocation4 + $0x60] sm:$0xff]  ;;  %v4248_v23 = vpop.f32.mrf.mxu2  ;;  %v6113_v40 = vsel %vm12006_vm4, %v5834_v52, %v6112_v2  ;;  %v7609_v26 = vunpack.c.l.b16 %v7500_v31  ;;  %5595 = vst [vmem:[#allocation3 + $0x54] sm:$0x1] %v5594_v51  ;;  %v6656_v10 = vld [vmem:[#allocation3 + $0x20] sm:$0x1]  ;;  %v5639_v31 = vsel %vm12039_vm8, 0, %v5638_v9 }
 0x2c6   : > { %v13683_v5 = vrot.slane %v5853_v17, 7  ;;  %v5515_v36 = vadd.f32 %v13518_v45, %v5133_v32  ;;  %5054 = vst.msk [vmem:[#allocation4 + $0x68] sm:$0xff] %vm841_vm5, %v5022_v53  ;;  %v4306_v27 = vadd.f32 %v4248_v23, %v4052_v12  ;;  %v13690_v45 = vpop.f32.mrf.mxu0  ;;  %v4053_v53 = vld [vmem:[#allocation4 + $0x80] sm:$0xff]  ;;  %v6760_v32 = vrot.slane %v6759_v14, 4 }
 0x2c7   : > { %v5682_v55 = vld [vmem:[#allocation4 + $0x58] sm:$0xff]  ;;  %v6774_v12 = vrot.slane %v6772_v56, 5  ;;  %v6790_v23 = vshrl.u32 %v6655_v3, 16  ;;  %6114 = vst [vmem:[#allocation3 + $0x38] sm:$0x1] %v6113_v40 }
 0x2c8   : > { %v5858_v20 = vor.u32 %v5856_v37, %v13683_v5  ;;  %v5714_v44 = vmax.f32 %v5682_v55, 0.0  ;;  %5547 = vst.msk [vmem:[#allocation4 + $0x60] sm:$0xff] %vm841_vm5, %v5515_v36  ;;  %11407 = vmatmul.msk.bf16.gmra.mxu3 %vm841_vm5, %v4868_v22  ;;  %v4417_v33 = vld [vmem:[#allocation4 + $0x70] sm:$0xff]  ;;  %v6786_v55 = vshll.u32 %v6655_v3, 16 }
 0x2c9   : > { %4338 = vst.msk [vmem:[#allocation4 + $0x78] sm:$0xff] %vm841_vm5, %v4306_v27  ;;  %11638 = vmatmul.msk.bf16.gmra.mxu0 %vm841_vm5, %v11903_v39  ;;  %v6775_v11 = vsel %vm12116_vm13, %v6770_v38, %v6774_v12  ;;  %v7503_v27 = vrot.slane %v13715_v28, 5  ;;  %v6792_v2 = vrot.slane %v6790_v23, 4 }
 0x2ca   : > { %v5746_v18 = vpack.c.bf16 %v5714_v44, %v5714_v44  ;;  %v11890_v25 = vld [vmem:[#allocation3 + $0x3c] sm:$0xff]  ;;  %v6123_v42 = vsel %vm12064_vm10, %v5858_v20, %v6122_v47  ;;  %11522 = vmatmul.msk.bf16.vlgmr.msrb.gmra.mxu2 %vm841_vm5, %v7146_v34  ;;  %v5636_v34 = vsel %vm12039_vm8, 0, %v5635_v0  ;;  %v6654_v47 = vld [vmem:[#allocation3 + $0x18] sm:$0xf]  ;;  %v6765_v44 = vsel %vm12116_vm13, %v6760_v32, %v13681_v59  ;;  %5640 = vst [vmem:[#allocation3 + $0x50] sm:$0x1] %v5639_v31 }
 0x2cb   : > { %v4964_v6 = vpop.f32.mrf.mxu3  ;;  %6124 = vst [vmem:[#allocation3 + $0x48] sm:$0xf] %v6123_v42  ;;  %11510 = vmatmul.msk.bf16.gmra.mxu1 %vm841_vm5, %v11890_v25  ;;  %v7117_v25 = vunpack.c.l.b16 %v6775_v11  ;;  %v7371_v42 = vld [vmem:[#allocation3 + $0x14] sm:$0x1]  ;;  %v6780_v14 = vshll.u32 %v6654_v47, 16  ;;  %v13731_v39 = vrot.slane %v6786_v55, 5  ;;  %v7116_v38 = vunpack.c.l.b16 %v6765_v44 }
 0x2cc   : > { %v5861_v57 = vshrl.u32 %v5746_v18, 16  ;;  %v5023_v29 = vadd.f32 %v4964_v6, %v4417_v33  ;;  %v5864_v48 = vshll.u32 %v5746_v18, 16  ;;  %v7640_v18 = vpack.c.b16 %v7609_v26, %v7608_v63  ;;  %5637 = vst [vmem:[#allocation3 + $0x44] sm:$0x1] %v5636_v34  ;;  %v4054_v33 = vld [vmem:[#allocation4 + $0x88] sm:$0xff] }
 0x2cd   : > { %v5134_v50 = vld [vmem:[#allocation4 + $0x68] sm:$0xff]  ;;  %v4251_v16 = vpop.f32.mrf.mxu2  ;;  %v6777_v6 = vshrl.u32 %v6654_v47, 16  ;;  %v7506_v51 = vrot.slane %v7371_v42, 5  ;;  %v6129_v3 = vld [vmem:[#allocation3 + $0x54] sm:$0xf]  ;;  %v5851_v0 = vrot.slane %v13656_v49, 4 }
 0x2ce   : > { %v13706_v22 = vrot.slane %v5861_v57, 7  ;;  %v5516_v15 = vadd.f32 %v13541_v41, %v5134_v50  ;;  %5055 = vst.msk [vmem:[#allocation4 + $0x70] sm:$0xff] %vm841_vm5, %v5023_v29  ;;  %v4307_v37 = vadd.f32 %v4251_v16, %v4053_v53  ;;  %v5859_v41 = vrot.slane %v13683_v5, 4  ;;  %v13722_v58 = vpop.f32.mrf.mxu0  ;;  %v7369_v32 = vld [vmem:[#allocation3 + $0xc] sm:$0xe] }
 0x2cf   : > { %v5683_v17 = vld [vmem:[#allocation4 + $0x60] sm:$0xff]  ;;  %v6779_v53 = vrot.slane %v6777_v6, 4  ;;  %v6782_v16 = vrot.slane %v6780_v14, 5  ;;  %v4055_v47 = vld [vmem:[#allocation4 + $0x90] sm:$0xff] }
 0x2d0   : > { %v5715_v46 = vmax.f32 %v5683_v17, 0.0  ;;  %5548 = vst.msk [vmem:[#allocation4 + $0x68] sm:$0xff] %vm841_vm5, %v5516_v15  ;;  %v5866_v36 = vor.u32 %v5864_v48, %v13706_v22  ;;  %v4418_v13 = vld [vmem:[#allocation4 + $0x78] sm:$0xff]  ;;  %v7147_v17 = vpack.c.b16 %v7117_v25, %v7116_v38  ;;  %v6658_v6 = vld [vmem:[#allocation3 + $0x28] sm:$0xf] }
 0x2d1   : > { %4339 = vst.msk [vmem:[#allocation4 + $0x80] sm:$0xff] %vm841_vm5, %v4307_v37  ;;  %v6796_v37 = vshll.u32 %v6656_v10, 16  ;;  %v6783_v44 = vor.u32 %v6782_v16, %v6779_v53  ;;  %v6126_v25 = vld [vmem:[#allocation3 + $0x50] sm:$0x1]  ;;  %v5641_v10 = vld [vmem:[#allocation3 + $0x5c] sm:$0x1] }
 0x2d2   : > { %v5747_v21 = vpack.c.bf16 %v5715_v46, %v5715_v46  ;;  %v5867_v5 = vsel %vm12055_vm9, %v5859_v41, %v5866_v36  ;;  %v6793_v46 = vor.u32 %v6792_v2, %v13731_v39  ;;  %v11904_v41 = vld [vmem:[#allocation3 + $0x30] sm:$0xff]  ;;  %v5868_v36 = vrot.slane %v13706_v22, 4 }
 0x2d3   : > { %v4966_v20 = vpop.f32.mrf.mxu3  ;;  %6125 = vst.msk [vmem:[#allocation3 + $0x4c] sm:$0xf] %vm226_vm1, %v5867_v5  ;;  %v6119_v49 = vld [vmem:[#allocation3 + $0x44] sm:$0x1] }
 0x2d4   : > { %v5870_v1 = vshrl.u32 %v5747_v21, 16  ;;  %v5024_v52 = vadd.f32 %v4966_v20, %v4418_v13  ;;  %v5873_v29 = vshll.u32 %v5747_v21, 16  ;;  %v11539_v13 = vrot.slane %v7369_v32, 9 }
 0x2d5   : > { %v5135_v56 = vld [vmem:[#allocation4 + $0x70] sm:$0xff]  ;;  %v4253_v50 = vpop.f32.mrf.mxu2  ;;  %v6120_v22 = vsel %vm12006_vm4, %v5851_v0, %v6119_v49  ;;  %v6127_v14 = vsel %vm12006_vm4, %v5868_v36, %v6126_v25  ;;  %v4056_v36 = vld [vmem:[#allocation4 + $0x98] sm:$0xff]  ;;  %v7372_v25 = vld [vmem:[#allocation3 + $0x18] sm:$0xe] }
 0x2d6   : > { %v13733_v57 = vrot.slane %v5870_v1, 7  ;;  %v5517_v59 = vadd.f32 %v13561_v60, %v5135_v56  ;;  %5056 = vst.msk [vmem:[#allocation4 + $0x78] sm:$0xff] %vm841_vm5, %v5024_v52  ;;  %v4308_v40 = vadd.f32 %v4253_v50, %v4054_v33  ;;  %v7505_v60 = vrot.slane %v7503_v27, 4  ;;  %v13752_v21 = vpop.f32.mrf.mxu0 }
 0x2d7   : > { %v5684_v7 = vld [vmem:[#allocation4 + $0x68] sm:$0xff]  ;;  %v6798_v33 = vrot.slane %v6796_v37, 5  ;;  %6121 = vst [vmem:[#allocation3 + $0x44] sm:$0x1] %v6120_v22  ;;  %v7504_v31 = vsel %vm12537_vm2, %v11539_v13, %v7503_v27  ;;  %v6810_v27 = vshll.u32 %v6658_v6, 16  ;;  %v6199_v22 = vld [vmem:[%s12021_s25] sm:$0xff] }
 0x2d8   : > { %v5875_v48 = vor.u32 %v5873_v29, %v13733_v57  ;;  %v5716_v15 = vmax.f32 %v5684_v7, 0.0  ;;  %5549 = vst.msk [vmem:[#allocation4 + $0x70] sm:$0xff] %vm841_vm5, %v5517_v59  ;;  %11555 = vmatmul.msk.bf16.vlgmr.msrb.gmra.mxu3 %vm841_vm5, %v7640_v18  ;;  %v4419_v11 = vld [vmem:[#allocation4 + $0x80] sm:$0xff]  ;;  %v7507_v20 = vsel %vm12537_vm2, %v7505_v60, %v7506_v51  ;;  %v6794_v18 = vrot.slane %v6793_v46, 4 }
 0x2d9   : > { %4340 = vst.msk [vmem:[#allocation4 + $0x88] sm:$0xff] %vm841_vm5, %v4308_v40  ;;  %11639 = vmatmul.msk.bf16.gmra.mxu0 %vm841_vm5, %v11904_v41  ;;  %v5876_v59 = vrot.slane %v13733_v57, 4  ;;  %v7611_v7 = vunpack.c.l.b16 %v7507_v20  ;;  %v6784_v51 = vrot.slane %v6783_v44, 4  ;;  %v6814_v40 = vshrl.u32 %v6658_v6, 16 }
 0x2da   : > { %v5748_v63 = vpack.c.bf16 %v5716_v15, %v5716_v15  ;;  %v11891_v26 = vld [vmem:[#allocation3 + $0x48] sm:$0xff]  ;;  %v6130_v12 = vsel %vm12064_vm10, %v5875_v48, %v6129_v3  ;;  %11523 = vmatmul.msk.bf16.gmra.mxu2 %vm841_vm5, %v7147_v17  ;;  %6128 = vst [vmem:[#allocation3 + $0x50] sm:$0x1] %v6127_v14  ;;  %v6799_v57 = vsel %vm12116_vm13, %v6794_v18, %v6798_v33  ;;  %v13777_v3 = vld [vmem:[#allocation3 + $0x1c] sm:$0xf]  ;;  %v5642_v60 = vsel %vm12039_vm8, 0, %v5641_v10 }
 0x2db   : > { %v4969_v55 = vpop.f32.mrf.mxu3  ;;  %6131 = vst [vmem:[#allocation3 + $0x54] sm:$0xf] %v6130_v12  ;;  %11511 = vmatmul.msk.bf16.gmra.mxu1 %vm841_vm5, %v11891_v26  ;;  %v6657_v48 = vld [vmem:[#allocation3 + $0x24] sm:$0xf]  ;;  %v7610_v53 = vunpack.c.l.b16 %v7504_v31  ;;  %v6789_v16 = vsel %vm12116_vm13, %v6784_v51, %v13731_v39  ;;  %v7119_v32 = vunpack.c.l.b16 %v6799_v57  ;;  %v7510_v12 = vrot.slane %v13777_v3, 5 }
 0x2dc   : > { %v5878_v23 = vshrl.u32 %v5748_v63, 16  ;;  %v5025_v34 = vadd.f32 %v4969_v55, %v4419_v11  ;;  %v5881_v1 = vshll.u32 %v5748_v63, 16  ;;  %v5596_v63 = vld [vmem:[#allocation3 + $0x60] sm:$0x1]  ;;  %5643 = vst [vmem:[#allocation3 + $0x5c] sm:$0x1] %v5642_v60  ;;  %v6504_v60 = vpop.f32.mrf.mxu1 }
 0x2dd   : > { %v5136_v5 = vld [vmem:[#allocation4 + $0x78] sm:$0xff]  ;;  %v4256_v56 = vpop.f32.mrf.mxu2  ;;  %v5597_v46 = vsel %vm12006_vm4, 0, %v5596_v63  ;;  %v6801_v37 = vshrl.u32 %v6657_v48, 16  ;;  %v7641_v11 = vpack.c.b16 %v7611_v7, %v7610_v53  ;;  %v7374_v39 = vld [vmem:[#allocation3 + $0x20] sm:$0x1]  ;;  %v6804_v49 = vshll.u32 %v6657_v48, 16 }
 0x2de   : > { %v13759_v9 = vrot.slane %v5878_v23, 7  ;;  %v5518_v52 = vadd.f32 %v13581_v54, %v5136_v5  ;;  %5057 = vst.msk [vmem:[#allocation4 + $0x80] sm:$0xff] %vm841_vm5, %v5025_v34  ;;  %v4309_v29 = vadd.f32 %v4256_v56, %v4055_v47  ;;  %v13790_v55 = vpop.f32.mrf.mxu0  ;;  %v7118_v47 = vunpack.c.l.b16 %v6789_v16  ;;  %v13830_v16 = vld [vmem:[#allocation3 + $0x24] sm:$0xe] }
 0x2df   : > { %v5685_v42 = vld [vmem:[#allocation4 + $0x70] sm:$0xff]  ;;  %5598 = vst [vmem:[#allocation3 + $0x60] sm:$0x1] %v5597_v46  ;;  %v13794_v13 = vrot.slane %v6810_v27, 5  ;;  %v6816_v20 = vrot.slane %v6814_v40, 4  ;;  %v6803_v56 = vrot.slane %v6801_v37, 4 }
 0x2e0   : > { %v5717_v2 = vmax.f32 %v5685_v42, 0.0  ;;  %5550 = vst.msk [vmem:[#allocation4 + $0x78] sm:$0xff] %vm841_vm5, %v5518_v52  ;;  %v5883_v54 = vor.u32 %v5881_v1, %v13759_v9  ;;  %v4420_v15 = vld [vmem:[#allocation4 + $0x88] sm:$0xff]  ;;  %v13802_v1 = vld [vmem:[%s16313_s4] ss:$0 sm:$0xff]  ;;  %v7148_v18 = vpack.c.b16 %v7119_v32, %v7118_v47  ;;  %v7512_v42 = vrot.slane %v7510_v12, 4 }
 0x2e1   : > { %4341 = vst.msk [vmem:[#allocation4 + $0x90] sm:$0xff] %vm841_vm5, %v4309_v29  ;;  %v5885_v33 = vrot.slane %v13759_v9, 4  ;;  %v6659_v29 = vld [vmem:[#allocation3 + $0x2c] sm:$0x1]  ;;  %v7513_v7 = vrot.slane %v7374_v39, 5  ;;  %v11540_v57 = vrot.slane %v7372_v25, 9 }
 0x2e2   : > { %v5749_v50 = vpack.c.bf16 %v5717_v2, %v5717_v2  ;;  %v5884_v38 = vsel %vm12055_vm9, %v5876_v59, %v5883_v54  ;;  %v6235_v2 = vadd.f32 %v13802_v1, %v6199_v22  ;;  %v6806_v59 = vrot.slane %v6804_v49, 5  ;;  %v4057_v40 = vld [vmem:[#allocation4 + $0xa0] sm:$0xff]  ;;  %v6660_v39 = vld [vmem:[#allocation3 + $0x30] sm:$0xf] }
 0x2e3   : > { %v4971_v28 = vpop.f32.mrf.mxu3  ;;  %6132 = vst.msk [vmem:[#allocation3 + $0x58] sm:$0xf] %vm226_vm1, %v5884_v38  ;;  %v11905_v38 = vld [vmem:[#allocation3 + $0x3c] sm:$0xff] }
 0x2e4   : > { %v5887_v0 = vshrl.u32 %v5749_v50, 16  ;;  %v5026_v17 = vadd.f32 %v4971_v28, %v4420_v15  ;;  %v5890_v52 = vshll.u32 %v5749_v50, 16  ;;  %v6817_v50 = vor.u32 %v6816_v20, %v13794_v13  ;;  %v6133_v51 = vld [vmem:[#allocation3 + $0x5c] sm:$0x1]  ;;  %6267 = vst.msk [vmem:[%s13809_s12] sm:$0xff] %vm841_vm5, %v6235_v2 }
 0x2e5   : > { %v5137_v26 = vld [vmem:[#allocation4 + $0x80] sm:$0xff]  ;;  %v4258_v5 = vpop.f32.mrf.mxu2  ;;  %v7514_v15 = vsel %vm12537_vm2, %v7512_v42, %v7513_v7  ;;  %v6820_v28 = vshll.u32 %v6659_v29, 16  ;;  %v6807_v53 = vor.u32 %v6806_v59, %v6803_v56  ;;  %v6134_v63 = vsel %vm12006_vm4, %v5885_v33, %v6133_v51 }
 0x2e6   : > { %v5519_v41 = vadd.f32 %v13602_v24, %v5137_v26  ;;  %5058 = vst.msk [vmem:[#allocation4 + $0x88] sm:$0xff] %vm841_vm5, %v5026_v17  ;;  %v13792_v23 = vrot.slane %v5887_v0, 7  ;;  %v4310_v44 = vadd.f32 %v4258_v5, %v4056_v36  ;;  %v7511_v0 = vsel %vm12537_vm2, %v11540_v57, %v7510_v12  ;;  %v6136_v17 = vld [vmem:[#allocation3 + $0x60] sm:$0xf]  ;;  %v13834_v46 = vpop.f32.mrf.mxu0  ;;  %v6200_v5 = vld [vmem:[%s12021_s25 + $0x8] sm:$0xff] }
 0x2e7   : > { %v5686_v34 = vld [vmem:[#allocation4 + $0x78] sm:$0xff]  ;;  %v6818_v37 = vrot.slane %v6817_v50, 4  ;;  %6135 = vst [vmem:[#allocation3 + $0x5c] sm:$0x1] %v6134_v63  ;;  %v6822_v47 = vrot.slane %v6820_v28, 5  ;;  %v6236_v20 = vadd.f32 %v13802_v1, %v6200_v5  ;;  %v6828_v51 = vshll.u32 %v6660_v39, 16  ;;  %v6506_v63 = vpop.f32.mrf.mxu1 }
 0x2e8   : > { %v5718_v24 = vmax.f32 %v5686_v34, 0.0  ;;  %5551 = vst.msk [vmem:[#allocation4 + $0x80] sm:$0xff] %vm841_vm5, %v5519_v41  ;;  %11556 = vmatmul.msk.bf16.gmra.mxu3 %vm841_vm5, %v7641_v11  ;;  %v5892_v54 = vor.u32 %v5890_v52, %v13792_v23  ;;  %v4421_v10 = vld [vmem:[#allocation4 + $0x90] sm:$0xff]  ;;  %v6661_v41 = vld [vmem:[#allocation3 + $0x34] sm:$0xf]  ;;  %v7613_v11 = vunpack.c.l.b16 %v7514_v15  ;;  %v7612_v34 = vunpack.c.l.b16 %v7511_v0  ;;  %v4058_v57 = vld [vmem:[#allocation4 + $0xa8] sm:$0xff] }
 0x2e9   : > { %4342 = vst.msk [vmem:[#allocation4 + $0x98] sm:$0xff] %vm841_vm5, %v4310_v44  ;;  %11640 = vmatmul.msk.bf16.gmra.mxu0 %vm841_vm5, %v11905_v38  ;;  %v11541_v44 = vrot.slane %v13830_v16, 9  ;;  %v6834_v22 = vshll.u32 %v6661_v41, 16  ;;  %v6823_v33 = vsel %vm12116_vm13, %v6818_v37, %v6822_v47  ;;  %v6838_v2 = vshrl.u32 %v6661_v41, 16  ;;  %v5599_v38 = vld [vmem:[#allocation3 + $0x6c] sm:$0x1] }
 0x2ea   : > { %v13812_v6 = vpack.c.bf16 %v5718_v24, %v5718_v24  ;;  %v11892_v14 = vld [vmem:[#allocation3 + $0x54] sm:$0xff]  ;;  %11524 = vmatmul.msk.bf16.gmra.mxu2 %vm841_vm5, %v7148_v18  ;;  %v6808_v24 = vrot.slane %v6807_v53, 4  ;;  %6268 = vst.msk [vmem:[%s13809_s12 + $0x8] sm:$0xff] %vm841_vm5, %v6236_v20  ;;  %v5600_v53 = vsel %vm12006_vm4, 0, %v5599_v38  ;;  %v6830_v37 = vrot.slane %v6828_v51, 5 }
 0x2eb   : > { %v4974_v31 = vpop.f32.mrf.mxu3  ;;  %11512 = vmatmul.msk.bf16.gmra.mxu1 %vm841_vm5, %v11892_v14  ;;  %v6331_v25 = vld [vmem:[%s13809_s12] sm:$0xff]  ;;  %v13861_v15 = vrot.slane %v6834_v22, 5  ;;  %v13874_v41 = vld [vmem:[#allocation3 + $0x34] sm:$0xf]  ;;  %5601 = vst [vmem:[#allocation3 + $0x6c] sm:$0x1] %v5600_v53 }
 0x2ec   : > { %v5027_v9 = vadd.f32 %v4974_v31, %v4421_v10  ;;  %v5895_v3 = vshrl.u32 %v13812_v6, 16  ;;  %v5898_v52 = vshll.u32 %v13812_v6, 16  ;;  %v7376_v14 = vld [vmem:[#allocation3 + $0x28] sm:$0xf]  ;;  %v6584_v29 = vadd.f32 %v6504_v60, %v6331_v25 }
 0x2ed   : > { %v5138_v48 = vld [vmem:[#allocation4 + $0x88] sm:$0xff]  ;;  %v4261_v32 = vpop.f32.mrf.mxu2  ;;  %v6825_v10 = vshrl.u32 %v6660_v39, 16  ;;  %v5893_v6 = vrot.slane %v13792_v23, 4  ;;  %v6813_v50 = vsel %vm12116_vm13, %v6808_v24, %v13794_v13  ;;  %v5644_v60 = vld [vmem:[#allocation3 + $0x68] sm:$0x1] }
 0x2ee   : > { %v5520_v27 = vadd.f32 %v13632_v30, %v5138_v48  ;;  %5059 = vst.msk [vmem:[#allocation4 + $0x90] sm:$0xff] %vm841_vm5, %v5027_v9  ;;  %v6137_v30 = vsel %vm12064_vm10, %v5892_v54, %v6136_v17  ;;  %v4311_v12 = vadd.f32 %v4261_v32, %v4057_v40  ;;  %v13839_v49 = vrot.slane %v5895_v3, 7  ;;  %v7377_v32 = vld [vmem:[#allocation3 + $0x2c] sm:$0x1]  ;;  %v6662_v39 = vld [vmem:[#allocation3 + $0x38] sm:$0x1] }
 0x2ef   : > { %v5687_v26 = vld [vmem:[#allocation4 + $0x80] sm:$0xff]  ;;  %6138 = vst [vmem:[#allocation3 + $0x60] sm:$0xf] %v6137_v30  ;;  %v7642_v54 = vpack.c.b16 %v7613_v11, %v7612_v34  ;;  %v7121_v3 = vunpack.c.l.b16 %v6823_v33  ;;  %v7517_v48 = vrot.slane %v7376_v14, 5  ;;  %v6840_v40 = vrot.slane %v6838_v2, 4 }
 0x2f0   : > { %v5719_v36 = vmax.f32 %v5687_v26, 0.0  ;;  %5552 = vst.msk [vmem:[#allocation4 + $0x88] sm:$0xff] %vm841_vm5, %v5520_v27  ;;  %v4422_v42 = vld [vmem:[#allocation4 + $0x98] sm:$0xff]  ;;  %v5900_v7 = vor.u32 %v5898_v52, %v13839_v49  ;;  %v7120_v17 = vunpack.c.l.b16 %v6813_v50  ;;  %v13871_v26 = vpop.f32.mrf.mxu0  ;;  %v6827_v30 = vrot.slane %v6825_v10, 4  ;;  %v11906_v52 = vld [vmem:[#allocation3 + $0x48] sm:$0xff] }
 0x2f1   : > { %4343 = vst.msk [vmem:[#allocation4 + $0xa0] sm:$0xff] %vm841_vm5, %v4311_v12  ;;  %v7519_v11 = vrot.slane %v7517_v48, 4  ;;  %v5645_v34 = vsel %vm12039_vm8, 0, %v5644_v60  ;;  %v6332_v47 = vld [vmem:[%s13809_s12 + $0x8] sm:$0xff]  ;;  %v6841_v22 = vor.u32 %v6840_v40, %v13861_v15  ;;  %v7520_v33 = vrot.slane %v7377_v32, 5 }
 0x2f2   : > { %v13846_v18 = vpack.c.bf16 %v5719_v36, %v5719_v36  ;;  %6616 = vst.msk [vmem:[%s13809_s12] sm:$0xff] %vm841_vm5, %v6584_v29  ;;  %v5901_v13 = vsel %vm12055_vm9, %v5893_v6, %v5900_v7  ;;  %v7149_v12 = vpack.c.b16 %v7121_v3, %v7120_v17  ;;  %v13887_v14 = vld [vmem:[#allocation3 + $0x3c] sm:$0xf]  ;;  %v7518_v29 = vsel %vm12537_vm2, %v11541_v44, %v7517_v48 }
 0x2f3   : > { %v4976_v56 = vpop.f32.mrf.mxu3  ;;  %6139 = vst.msk [vmem:[#allocation3 + $0x64] sm:$0xf] %vm226_vm1, %v5901_v13  ;;  %v7521_v6 = vsel %vm12537_vm2, %v7519_v11, %v7520_v33  ;;  %v7524_v7 = vrot.slane %v13874_v41, 5  ;;  %v6842_v38 = vrot.slane %v6841_v22, 4  ;;  %v6849_v51 = vshrl.u32 %v13887_v14, 16 }
 0x2f4   : > { %v5028_v59 = vadd.f32 %v4976_v56, %v4422_v42  ;;  %v5904_v28 = vshrl.u32 %v13846_v18, 16  ;;  %v6585_v42 = vadd.f32 %v6506_v63, %v6332_v47  ;;  %5646 = vst [vmem:[#allocation3 + $0x68] sm:$0x1] %v5645_v34  ;;  %v5907_v2 = vshll.u32 %v13846_v18, 16  ;;  %v6664_v13 = vld [vmem:[#allocation3 + $0x40] sm:$0xf] }
 0x2f5   : > { %v5139_v31 = vld [vmem:[#allocation4 + $0x90] sm:$0xff]  ;;  %v4263_v27 = vpop.f32.mrf.mxu2  ;;  %v6852_v32 = vshll.u32 %v13887_v14, 16  ;;  %v6862_v34 = vshrl.u32 %v6664_v13, 16  ;;  %v13934_v33 = vrot.slane %v6849_v51, 4  ;;  %v6202_v51 = vld [vmem:[%s12021_s25 + $0x18] sm:$0xff] }
 0x2f6   : > { %v5521_v9 = vadd.f32 %v13660_v8, %v5139_v31  ;;  %5060 = vst.msk [vmem:[#allocation4 + $0x98] sm:$0xff] %vm841_vm5, %v5028_v59  ;;  %v4312_v8 = vadd.f32 %v4263_v27, %v4058_v57  ;;  %v13881_v5 = vrot.slane %v5904_v28, 7  ;;  %v6831_v59 = vor.u32 %v6830_v37, %v6827_v30  ;;  %v4059_v31 = vld [vmem:[#allocation4 + $0xb0] sm:$0xff]  ;;  %v6201_v27 = vld [vmem:[%s12021_s25 + $0x10] sm:$0xff] }
 0x2f7   : > { %v5688_v23 = vld [vmem:[#allocation4 + $0x88] sm:$0xff]  ;;  %6617 = vst.msk [vmem:[%s13809_s12 + $0x8] sm:$0xff] %vm841_vm5, %v6585_v42  ;;  %v6237_v60 = vadd.f32 %v13802_v1, %v6201_v27  ;;  %v6143_v63 = vld [vmem:[#allocation3 + $0x6c] sm:$0xf]  ;;  %v7378_v27 = vld [vmem:[#allocation3 + $0x30] sm:$0xe] }
 0x2f8   : > { %v5720_v0 = vmax.f32 %v5688_v23, 0.0  ;;  %5553 = vst.msk [vmem:[#allocation4 + $0x90] sm:$0xff] %vm841_vm5, %v5521_v9  ;;  %11557 = vmatmul.msk.bf16.gmra.mxu3 %vm841_vm5, %v7642_v54  ;;  %v4423_v20 = vld [vmem:[#allocation4 + $0xa0] sm:$0xff]  ;;  %v6844_v54 = vshll.u32 %v6662_v39, 16  ;;  %v5909_v18 = vor.u32 %v5907_v2, %v13881_v5  ;;  %v5647_v9 = vld [vmem:[#allocation3 + $0x74] sm:$0x1]  ;;  %v7614_v23 = vunpack.c.l.b16 %v7518_v29  ;;  %v13908_v40 = vpop.f32.mrf.mxu0 }
 0x2f9   : > { %4344 = vst.msk [vmem:[#allocation4 + $0xa8] sm:$0xff] %vm841_vm5, %v4312_v8  ;;  %11641 = vmatmul.msk.bf16.gmra.mxu0 %vm841_vm5, %v11906_v52  ;;  %v5648_v30 = vsel %vm12039_vm8, 0, %v5647_v9  ;;  %v6858_v39 = vshll.u32 %v6664_v13, 16  ;;  %v5602_v52 = vld [vmem:[#allocation3 + $0x78] sm:$0x1]  ;;  %v7526_v9 = vrot.slane %v7524_v7, 4 }
 0x2fa   : > { %v13876_v36 = vpack.c.bf16 %v5720_v0, %v5720_v0  ;;  %11525 = vmatmul.msk.bf16.gmra.mxu2 %vm841_vm5, %v7149_v12  ;;  %v11893_v48 = vld [vmem:[#allocation3 + $0x60] sm:$0xff]  ;;  %v6832_v0 = vrot.slane %v6831_v59, 4  ;;  %v6846_v8 = vrot.slane %v6844_v54, 5  ;;  %6269 = vst.msk [vmem:[%s13809_s12 + $0x10] sm:$0xff] %vm841_vm5, %v6237_v60  ;;  %v6144_v11 = vsel %vm12064_vm10, %v5909_v18, %v6143_v63 }
 0x2fb   : > { %v4979_v24 = vpop.f32.mrf.mxu3  ;;  %11513 = vmatmul.msk.bf16.gmra.mxu1 %vm841_vm5, %v11893_v48  ;;  %6145 = vst [vmem:[#allocation3 + $0x6c] sm:$0xf] %v6144_v11  ;;  %v6854_v59 = vrot.slane %v6852_v32, 5  ;;  %v6140_v54 = vld [vmem:[#allocation3 + $0x68] sm:$0x1]  ;;  %v6864_v18 = vrot.slane %v6862_v34, 4 }
 0x2fc   : > { %v5912_v25 = vshrl.u32 %v13876_v36, 16  ;;  %v5029_v56 = vadd.f32 %v4979_v24, %v4423_v20  ;;  %v5915_v17 = vshll.u32 %v13876_v36, 16  ;;  %v6847_v36 = vsel %vm12116_vm13, %v6842_v38, %v6846_v8  ;;  %5649 = vst [vmem:[#allocation3 + $0x74] sm:$0x1] %v5648_v30  ;;  %v6665_v8 = vld [vmem:[#allocation3 + $0x44] sm:$0x1] }
 0x2fd   : > { %v5140_v10 = vld [vmem:[#allocation4 + $0x98] sm:$0xff]  ;;  %v4266_v44 = vpop.f32.mrf.mxu2  ;;  %v5910_v24 = vrot.slane %v13881_v5, 4  ;;  %v6837_v42 = vsel %vm12116_vm13, %v6832_v0, %v13861_v15 }
 0x2fe   : > { %v5522_v50 = vadd.f32 %v13690_v45, %v5140_v10  ;;  %5061 = vst.msk [vmem:[#allocation4 + $0xa0] sm:$0xff] %vm841_vm5, %v5029_v56  ;;  %v13904_v57 = vrot.slane %v5912_v25, 7  ;;  %v4313_v28 = vadd.f32 %v4266_v44, %v4059_v31  ;;  %v7615_v45 = vunpack.c.l.b16 %v7521_v6  ;;  %v4060_v5 = vld [vmem:[#allocation4 + $0xb8] sm:$0xff]  ;;  %v7380_v31 = vld [vmem:[#allocation3 + $0x38] sm:$0x1] }
 0x2ff   : > { %v5689_v16 = vld [vmem:[#allocation4 + $0x90] sm:$0xff]  ;;  %v5902_v25 = vrot.slane %v13839_v49, 4  ;;  %v5603_v56 = vsel %vm12006_vm4, 0, %v5602_v52  ;;  %v7123_v49 = vunpack.c.l.b16 %v6847_v36  ;;  %v13941_v6 = vrot.slane %v6858_v39, 5  ;;  %v11907_v11 = vld [vmem:[#allocation3 + $0x54] sm:$0xff] }
 0x300   : > { %v5721_v3 = vmax.f32 %v5689_v16, 0.0  ;;  %5554 = vst.msk [vmem:[#allocation4 + $0x98] sm:$0xff] %vm841_vm5, %v5522_v50  ;;  %v4424_v37 = vld [vmem:[#allocation4 + $0xa8] sm:$0xff]  ;;  %v5917_v22 = vor.u32 %v5915_v17, %v13904_v57  ;;  %v7643_v2 = vpack.c.b16 %v7615_v45, %v7614_v23  ;;  %v7122_v38 = vunpack.c.l.b16 %v6837_v42 }
 0x301   : > { %4345 = vst.msk [vmem:[#allocation4 + $0xb0] sm:$0xff] %vm841_vm5, %v4313_v28  ;;  %v13951_v28 = vpop.f32.mrf.mxu0  ;;  %v6238_v23 = vadd.f32 %v13802_v1, %v6202_v51  ;;  %v6141_v13 = vsel %vm12006_vm4, %v5902_v25, %v6140_v54  ;;  %v6333_v60 = vld [vmem:[%s13809_s12 + $0x10] sm:$0xff]  ;;  %v11542_v39 = vrot.slane %v7378_v27, 9  ;;  %v6868_v52 = vshll.u32 %v6665_v8, 16  ;;  %v6667_v25 = vld [vmem:[#allocation3 + $0x4c] sm:$0xf] }
 0x302   : > { %v13912_v53 = vpack.c.bf16 %v5721_v3, %v5721_v3  ;;  %v5918_v29 = vsel %vm12055_vm9, %v5910_v24, %v5917_v22  ;;  %5604 = vst [vmem:[#allocation3 + $0x78] sm:$0x1] %v5603_v56  ;;  %v7150_v0 = vpack.c.b16 %v7123_v49, %v7122_v38  ;;  %v4061_v22 = vld [vmem:[#allocation4 + $0xc0] sm:$0xff]  ;;  %v6882_v41 = vshll.u32 %v6667_v25, 16 }
 0x303   : > { %v4981_v12 = vpop.f32.mrf.mxu3  ;;  %6146 = vst.msk [vmem:[#allocation3 + $0x70] sm:$0xf] %vm226_vm1, %v5918_v29  ;;  %v7525_v29 = vsel %vm12537_vm2, %v11542_v39, %v7524_v7 }
 0x304   : > { %v5921_v47 = vshrl.u32 %v13912_v53, 16  ;;  %v5030_v20 = vadd.f32 %v4981_v12, %v4424_v37  ;;  %v5924_v45 = vshll.u32 %v13912_v53, 16  ;;  %6270 = vst.msk [vmem:[%s13809_s12 + $0x18] sm:$0xff] %vm841_vm5, %v6238_v23  ;;  %v6855_v37 = vor.u32 %v6854_v59, %v13934_v33 }
 0x305   : > { %v5141_v14 = vld [vmem:[#allocation4 + $0xa0] sm:$0xff]  ;;  %v4268_v10 = vpop.f32.mrf.mxu2  ;;  %v6865_v12 = vor.u32 %v6864_v18, %v13941_v6  ;;  %6142 = vst [vmem:[#allocation3 + $0x68] sm:$0x1] %v6141_v13  ;;  %v6203_v18 = vld [vmem:[%s12021_s25 + $0x20] sm:$0xff]  ;;  %v7616_v23 = vunpack.c.l.b16 %v7525_v29  ;;  %v14015_v39 = vrot.slane %v6882_v41, 5 }
 0x306   : > { %5062 = vst.msk [vmem:[#allocation4 + $0xa8] sm:$0xff] %vm841_vm5, %v5030_v20  ;;  %v5523_v15 = vadd.f32 %v13722_v58, %v5141_v14  ;;  %v13943_v16 = vrot.slane %v5921_v47, 7  ;;  %v4314_v44 = vadd.f32 %v4268_v10, %v4060_v5  ;;  %v5919_v58 = vrot.slane %v13904_v57, 4  ;;  %v6147_v47 = vld [vmem:[#allocation3 + $0x74] sm:$0x1] }
 0x307   : > { %v5690_v50 = vld [vmem:[#allocation4 + $0x98] sm:$0xff]  ;;  %v7527_v57 = vrot.slane %v7380_v31, 5  ;;  %v13977_v14 = vld [vmem:[#allocation3 + $0x40] sm:$0xf]  ;;  %v13979_v5 = vld [vmem:[#allocation3 + $0x48] sm:$0xf]  ;;  %v6239_v51 = vadd.f32 %v13802_v1, %v6203_v18 }
 0x308   : > { %11558 = vmatmul.msk.bf16.gmra.mxu3 %vm841_vm5, %v7643_v2  ;;  %v5722_v3 = vmax.f32 %v5690_v50, 0.0  ;;  %5555 = vst.msk [vmem:[#allocation4 + $0xa0] sm:$0xff] %vm841_vm5, %v5523_v15  ;;  %v6509_v48 = vpop.f32.mrf.mxu1  ;;  %v4425_v32 = vld [vmem:[#allocation4 + $0xb0] sm:$0xff]  ;;  %v5926_v53 = vor.u32 %v5924_v45, %v13943_v16  ;;  %v6148_v42 = vsel %vm12006_vm4, %v5919_v58, %v6147_v47  ;;  %v6856_v54 = vrot.slane %v6855_v37, 4  ;;  %v7381_v37 = vld [vmem:[#allocation3 + $0x3c] sm:$0xe] }
 0x309   : > { %4346 = vst.msk [vmem:[#allocation4 + $0xb8] sm:$0xff] %vm841_vm5, %v4314_v44  ;;  %v6586_v63 = vadd.f32 %v6509_v48, %v6333_v60  ;;  %v7528_v34 = vsel %vm12537_vm2, %v7526_v9, %v7527_v57  ;;  %11642 = vmatmul.msk.bf16.gmra.mxu0 %vm841_vm5, %v11907_v11  ;;  %v6150_v59 = vld [vmem:[#allocation3 + $0x78] sm:$0xf]  ;;  %v6866_v15 = vrot.slane %v6865_v12, 4  ;;  %v13991_v7 = vpop.f32.mrf.mxu0  ;;  %v6870_v9 = vrot.slane %v6868_v52, 5 }
 0x30a   : > { %v13959_v17 = vpack.c.bf16 %v5722_v3, %v5722_v3  ;;  %11526 = vmatmul.msk.bf16.gmra.mxu2 %vm841_vm5, %v7150_v0  ;;  %v11894_v33 = vld [vmem:[#allocation3 + $0x6c] sm:$0xff]  ;;  %v7617_v49 = vunpack.c.l.b16 %v7528_v34  ;;  %6149 = vst [vmem:[#allocation3 + $0x74] sm:$0x1] %v6148_v42  ;;  %v6151_v50 = vsel %vm12064_vm10, %v5926_v53, %v6150_v59  ;;  %v6886_v58 = vshrl.u32 %v6667_v25, 16  ;;  %v5605_v12 = vld [vmem:[#allocation3 + $0x84] sm:$0x1] }
 0x30b   : > { %v4984_v30 = vpop.f32.mrf.mxu3  ;;  %6618 = vst.msk [vmem:[%s13809_s12 + $0x10] sm:$0xff] %vm841_vm5, %v6586_v63  ;;  %11514 = vmatmul.msk.bf16.gmra.mxu1 %vm841_vm5, %v11894_v33  ;;  %v6334_v48 = vld [vmem:[%s13809_s12 + $0x18] sm:$0xff]  ;;  %v6861_v27 = vsel %vm12116_vm13, %v6856_v54, %v13941_v6  ;;  %v7531_v13 = vrot.slane %v13977_v14, 5  ;;  %v6871_v8 = vsel %vm12116_vm13, %v6866_v15, %v6870_v9 }
 0x30c   : > { %v5031_v36 = vadd.f32 %v4984_v30, %v4425_v32  ;;  %v5929_v20 = vshrl.u32 %v13959_v17, 16  ;;  %6152 = vst [vmem:[#allocation3 + $0x78] sm:$0xf] %v6151_v50  ;;  %v5932_v3 = vshll.u32 %v13959_v17, 16  ;;  %v6873_v17 = vshrl.u32 %v13979_v5, 16 }
 0x30d   : > { %v5142_v24 = vld [vmem:[#allocation4 + $0xa8] sm:$0xff]  ;;  %v4271_v2 = vpop.f32.mrf.mxu2  ;;  %6271 = vst.msk [vmem:[%s13809_s12 + $0x20] sm:$0xff] %vm841_vm5, %v6239_v51  ;;  %v7644_v32 = vpack.c.b16 %v7617_v49, %v7616_v23  ;;  %v5927_v30 = vrot.slane %v13943_v16, 4  ;;  %v6888_v34 = vrot.slane %v6886_v58, 4  ;;  %v7533_v29 = vrot.slane %v7531_v13, 4 }
 0x30e   : > { %v5524_v56 = vadd.f32 %v13752_v21, %v5142_v24  ;;  %5063 = vst.msk [vmem:[#allocation4 + $0xb0] sm:$0xff] %vm841_vm5, %v5031_v36  ;;  %v13985_v21 = vrot.slane %v5929_v20, 7  ;;  %v4315_v31 = vadd.f32 %v4271_v2, %v4061_v22  ;;  %v6876_v36 = vshll.u32 %v13979_v5, 16  ;;  %v4062_v16 = vld [vmem:[#allocation4 + $0xc8] sm:$0xff]  ;;  %v6204_v2 = vld [vmem:[%s12021_s25 + $0x28] sm:$0xff] }
 0x30f   : > { %v5691_v10 = vld [vmem:[#allocation4 + $0xa0] sm:$0xff]  ;;  %v7125_v24 = vunpack.c.l.b16 %v6871_v8  ;;  %v5606_v22 = vsel %vm12006_vm4, 0, %v5605_v12  ;;  %v7383_v42 = vld [vmem:[#allocation3 + $0x44] sm:$0x1]  ;;  %v7124_v5 = vunpack.c.l.b16 %v6861_v27  ;;  %v6668_v49 = vld [vmem:[#allocation3 + $0x50] sm:$0x1] }
 0x310   : > { %5556 = vst.msk [vmem:[#allocation4 + $0xa8] sm:$0xff] %vm841_vm5, %v5524_v56  ;;  %v5723_v44 = vmax.f32 %v5691_v10, 0.0  ;;  %v6511_v38 = vpop.f32.mrf.mxu1  ;;  %v4426_v0 = vld [vmem:[#allocation4 + $0xb8] sm:$0xff]  ;;  %v5934_v6 = vor.u32 %v5932_v3, %v13985_v21  ;;  %v11543_v56 = vrot.slane %v7381_v37, 9  ;;  %v6240_v10 = vadd.f32 %v13802_v1, %v6204_v2  ;;  %v14039_v51 = vld [vmem:[#allocation3 + $0x4c] sm:$0xf] }
 0x311   : > { %4347 = vst.msk [vmem:[#allocation4 + $0xc0] sm:$0xff] %vm841_vm5, %v4315_v31  ;;  %v6587_v60 = vadd.f32 %v6511_v38, %v6334_v48  ;;  %v14031_v15 = vpop.f32.mrf.mxu0  ;;  %v6875_v31 = vrot.slane %v6873_v17, 4  ;;  %v6878_v18 = vrot.slane %v6876_v36, 5  ;;  %v6889_v38 = vor.u32 %v6888_v34, %v14015_v39  ;;  %v5650_v9 = vld [vmem:[#allocation3 + $0x80] sm:$0x1] }
 0x312   : > { %v14002_v45 = vpack.c.bf16 %v5723_v44, %v5723_v44  ;;  %v5935_v20 = vsel %vm12055_vm9, %v5927_v30, %v5934_v6  ;;  %5607 = vst [vmem:[#allocation3 + $0x84] sm:$0x1] %v5606_v22  ;;  %v7151_v44 = vpack.c.b16 %v7125_v24, %v7124_v5  ;;  %v7534_v27 = vrot.slane %v7383_v42, 5 }
 0x313   : > { %v4986_v57 = vpop.f32.mrf.mxu3  ;;  %6619 = vst.msk [vmem:[%s13809_s12 + $0x18] sm:$0xff] %vm841_vm5, %v6587_v60  ;;  %v6892_v60 = vshll.u32 %v6668_v49, 16  ;;  %v7532_v17 = vsel %vm12537_vm2, %v11543_v56, %v7531_v13  ;;  %v6879_v6 = vor.u32 %v6878_v18, %v6875_v31  ;;  %v5651_v37 = vsel %vm12039_vm8, 0, %v5650_v9 }
 0x314   : > { %v5032_v63 = vadd.f32 %v4986_v57, %v4426_v0  ;;  %v5938_v11 = vshrl.u32 %v14002_v45, 16  ;;  %6153 = vst.msk [vmem:[#allocation3 + $0x7c] sm:$0xf] %vm226_vm1, %v5935_v20  ;;  %v6335_v41 = vld [vmem:[%s13809_s12 + $0x20] sm:$0xff]  ;;  %v5941_v58 = vshll.u32 %v14002_v45, 16  ;;  %v11908_v0 = vld [vmem:[#allocation3 + $0x60] sm:$0xff]  ;;  %v7535_v30 = vsel %vm12537_vm2, %v7533_v29, %v7534_v27 }
 0x315   : > { %v5143_v53 = vld [vmem:[#allocation4 + $0xb0] sm:$0xff]  ;;  %v4273_v25 = vpop.f32.mrf.mxu2  ;;  %6272 = vst.msk [vmem:[%s13809_s12 + $0x28] sm:$0xff] %vm841_vm5, %v6240_v10  ;;  %v6890_v12 = vrot.slane %v6889_v38, 4  ;;  %v14061_v20 = vld [vmem:[#allocation3 + $0x54] sm:$0xf]  ;;  %v6880_v2 = vrot.slane %v6879_v6, 4 }
 0x316   : > { %v5525_v47 = vadd.f32 %v13790_v55, %v5143_v53  ;;  %5064 = vst.msk [vmem:[#allocation4 + $0xb8] sm:$0xff] %vm841_vm5, %v5032_v63  ;;  %v4316_v55 = vadd.f32 %v4273_v25, %v4062_v16  ;;  %v14029_v59 = vrot.slane %v5938_v11, 7  ;;  %v7538_v11 = vrot.slane %v14039_v51, 5  ;;  %v6670_v53 = vld [vmem:[#allocation3 + $0x58] sm:$0xf] }
 0x317   : > { %v5692_v52 = vld [vmem:[#allocation4 + $0xa8] sm:$0xff]  ;;  %v6894_v16 = vrot.slane %v6892_v60, 5  ;;  %5652 = vst [vmem:[#allocation3 + $0x80] sm:$0x1] %v5651_v37  ;;  %v6205_v25 = vld [vmem:[%s12021_s25 + $0x30] sm:$0xff]  ;;  %v6906_v29 = vshll.u32 %v6670_v53, 16 }
 0x318   : > { %v5724_v33 = vmax.f32 %v5692_v52, 0.0  ;;  %5557 = vst.msk [vmem:[#allocation4 + $0xb0] sm:$0xff] %vm841_vm5, %v5525_v47  ;;  %11559 = vmatmul.msk.bf16.gmra.mxu3 %vm841_vm5, %v7644_v32  ;;  %v6514_v54 = vpop.f32.mrf.mxu1  ;;  %v4427_v48 = vld [vmem:[#allocation4 + $0xc0] sm:$0xff]  ;;  %v5943_v45 = vor.u32 %v5941_v58, %v14029_v59  ;;  %v4063_v32 = vld [vmem:[#allocation4 + $0xd0] sm:$0xff]  ;;  %v7618_v47 = vunpack.c.l.b16 %v7532_v17  ;;  %v7619_v52 = vunpack.c.l.b16 %v7535_v30  ;;  %v5608_v60 = vld [vmem:[#allocation3 + $0x90] sm:$0x1] }
 0x319   : > { %4348 = vst.msk [vmem:[#allocation4 + $0xc8] sm:$0xff] %vm841_vm5, %v4316_v55  ;;  %v6588_v3 = vadd.f32 %v6514_v54, %v6335_v41  ;;  %11643 = vmatmul.msk.bf16.gmra.mxu0 %vm841_vm5, %v11908_v0  ;;  %v6157_v42 = vld [vmem:[#allocation3 + $0x84] sm:$0xf]  ;;  %v6241_v55 = vadd.f32 %v13802_v1, %v6205_v25  ;;  %v6895_v31 = vsel %vm12116_vm13, %v6890_v12, %v6894_v16  ;;  %v6910_v18 = vshrl.u32 %v6670_v53, 16  ;;  %v14138_v51 = vld [vmem:[#allocation3 + $0x58] sm:$0xf] }
 0x31a   : > { %v14034_v50 = vpack.c.bf16 %v5724_v33, %v5724_v33  ;;  %11527 = vmatmul.msk.bf16.gmra.mxu2 %vm841_vm5, %v7151_v44  ;;  %v14067_v33 = vpop.f32.mrf.mxu0  ;;  %v6158_v5 = vsel %vm12064_vm10, %v5943_v45, %v6157_v42  ;;  %v6897_v9 = vshrl.u32 %v14061_v20, 16  ;;  %v6900_v58 = vshll.u32 %v14061_v20, 16 }
 0x31b   : > { %v4989_v23 = vpop.f32.mrf.mxu3  ;;  %6620 = vst.msk [vmem:[%s13809_s12 + $0x20] sm:$0xff] %vm841_vm5, %v6588_v3  ;;  %v11895_v13 = vld [vmem:[#allocation3 + $0x78] sm:$0xff]  ;;  %v5936_v0 = vrot.slane %v13985_v21, 4  ;;  %v14093_v17 = vrot.slane %v6906_v29, 5  ;;  %v5609_v21 = vsel %vm12006_vm4, 0, %v5608_v60  ;;  %v6912_v30 = vrot.slane %v6910_v18, 4 }
 0x31c   : > { %v5946_v57 = vshrl.u32 %v14034_v50, 16  ;;  %v5033_v8 = vadd.f32 %v4989_v23, %v4427_v48  ;;  %v5949_v49 = vshll.u32 %v14034_v50, 16  ;;  %11515 = vmatmul.msk.bf16.gmra.mxu1 %vm841_vm5, %v11895_v13  ;;  %v6336_v10 = vld [vmem:[%s13809_s12 + $0x28] sm:$0xff]  ;;  %6273 = vst.msk [vmem:[%s13809_s12 + $0x30] sm:$0xff] %vm841_vm5, %v6241_v55  ;;  %v6885_v50 = vsel %vm12116_vm13, %v6880_v2, %v14015_v39 }
 0x31d   : > { %v5144_v63 = vld [vmem:[#allocation4 + $0xb8] sm:$0xff]  ;;  %v4276_v34 = vpop.f32.mrf.mxu2  ;;  %v7645_v48 = vpack.c.b16 %v7619_v52, %v7618_v47  ;;  %v5944_v23 = vrot.slane %v14029_v59, 4  ;;  %6159 = vst [vmem:[#allocation3 + $0x84] sm:$0xf] %v6158_v5  ;;  %v7127_v39 = vunpack.c.l.b16 %v6895_v31  ;;  %v6671_v47 = vld [vmem:[#allocation3 + $0x5c] sm:$0x1] }
 0x31e   : > { %v5526_v14 = vadd.f32 %v13834_v46, %v5144_v63  ;;  %5065 = vst.msk [vmem:[#allocation4 + $0xc0] sm:$0xff] %vm841_vm5, %v5033_v8  ;;  %v14063_v24 = vrot.slane %v5946_v57, 7  ;;  %v4317_v46 = vadd.f32 %v4276_v34, %v4063_v32  ;;  %v4064_v63 = vld [vmem:[#allocation4 + $0xd8] sm:$0xff]  ;;  %v7384_v32 = vld [vmem:[#allocation3 + $0x48] sm:$0xe]  ;;  %v6206_v34 = vld [vmem:[%s12021_s25 + $0x38] sm:$0xff] }
 0x31f   : > { %v5693_v36 = vld [vmem:[#allocation4 + $0xb0] sm:$0xff]  ;;  %v6154_v6 = vld [vmem:[#allocation3 + $0x80] sm:$0x1]  ;;  %v7386_v13 = vld [vmem:[#allocation3 + $0x50] sm:$0x1]  ;;  %v6899_v16 = vrot.slane %v6897_v9, 4  ;;  %v6242_v52 = vadd.f32 %v13802_v1, %v6206_v34 }
 0x320   : > { %v5725_v22 = vmax.f32 %v5693_v36, 0.0  ;;  %5558 = vst.msk [vmem:[#allocation4 + $0xb8] sm:$0xff] %vm841_vm5, %v5526_v14  ;;  %v6516_v56 = vpop.f32.mrf.mxu1  ;;  %v4428_v44 = vld [vmem:[#allocation4 + $0xc8] sm:$0xff]  ;;  %v5951_v27 = vor.u32 %v5949_v49, %v14063_v24  ;;  %v7126_v36 = vunpack.c.l.b16 %v6885_v50  ;;  %v6902_v25 = vrot.slane %v6900_v58, 5  ;;  %v11909_v50 = vld [vmem:[#allocation3 + $0x6c] sm:$0xff] }
 0x321   : > { %4349 = vst.msk [vmem:[#allocation4 + $0xd0] sm:$0xff] %vm841_vm5, %v4317_v46  ;;  %v6589_v41 = vadd.f32 %v6516_v56, %v6336_v10  ;;  %v6155_v42 = vsel %vm12006_vm4, %v5936_v0, %v6154_v6  ;;  %v5653_v56 = vld [vmem:[#allocation3 + $0x8c] sm:$0x1]  ;;  %v7541_v29 = vrot.slane %v7386_v13, 5  ;;  %v6913_v49 = vor.u32 %v6912_v30, %v14093_v17  ;;  %v14149_v34 = vld [vmem:[#allocation3 + $0x60] sm:$0xf] }
 0x322   : > { %v14073_v54 = vpack.c.bf16 %v5725_v22, %v5725_v22  ;;  %v5952_v59 = vsel %vm12055_vm9, %v5944_v23, %v5951_v27  ;;  %v14109_v46 = vpop.f32.mrf.mxu0  ;;  %5610 = vst [vmem:[#allocation3 + $0x90] sm:$0x1] %v5609_v21  ;;  %v7152_v2 = vpack.c.b16 %v7127_v39, %v7126_v36  ;;  %v6903_v60 = vor.u32 %v6902_v25, %v6899_v16 }
 0x323   : > { %v4991_v38 = vpop.f32.mrf.mxu3  ;;  %6621 = vst.msk [vmem:[%s13809_s12 + $0x28] sm:$0xff] %vm841_vm5, %v6589_v41  ;;  %v6337_v5 = vld [vmem:[%s13809_s12 + $0x30] sm:$0xff]  ;;  %v6914_v39 = vrot.slane %v6913_v49, 4 }
 0x324   : > { %v5034_v3 = vadd.f32 %v4991_v38, %v4428_v44  ;;  %v5955_v57 = vshrl.u32 %v14073_v54, 16  ;;  %6160 = vst.msk [vmem:[#allocation3 + $0x88] sm:$0xf] %vm226_vm1, %v5952_v59  ;;  %v5958_v10 = vshll.u32 %v14073_v54, 16  ;;  %v11544_v44 = vrot.slane %v7384_v32, 9 }
 0x325   : > { %v5145_v8 = vld [vmem:[#allocation4 + $0xc0] sm:$0xff]  ;;  %v4278_v14 = vpop.f32.mrf.mxu2  ;;  %6274 = vst.msk [vmem:[%s13809_s12 + $0x38] sm:$0xff] %vm841_vm5, %v6242_v52  ;;  %v6916_v38 = vshll.u32 %v6671_v47, 16  ;;  %v5654_v54 = vsel %vm12039_vm8, 0, %v5653_v56  ;;  %v6904_v36 = vrot.slane %v6903_v60, 4 }
 0x326   : > { %v5527_v45 = vadd.f32 %v13871_v26, %v5145_v8  ;;  %5066 = vst.msk [vmem:[#allocation4 + $0xc8] sm:$0xff] %vm841_vm5, %v5034_v3  ;;  %v7540_v26 = vrot.slane %v7538_v11, 4  ;;  %v4318_v53 = vadd.f32 %v4278_v14, %v4064_v63  ;;  %v14107_v20 = vrot.slane %v5955_v57, 7  ;;  %v4065_v8 = vld [vmem:[#allocation4 + $0xe0] sm:$0xff] }
 0x327   : > { %v5694_v37 = vld [vmem:[#allocation4 + $0xb8] sm:$0xff]  ;;  %6156 = vst [vmem:[#allocation3 + $0x80] sm:$0x1] %v6155_v42  ;;  %v7539_v27 = vsel %vm12537_vm2, %v11544_v44, %v7538_v11  ;;  %v6918_v21 = vrot.slane %v6916_v38, 5  ;;  %v6921_v44 = vshrl.u32 %v14149_v34, 16  ;;  %v5953_v38 = vrot.slane %v14063_v24, 4 }
 0x328   : > { %v5726_v12 = vmax.f32 %v5694_v37, 0.0  ;;  %5559 = vst.msk [vmem:[#allocation4 + $0xc0] sm:$0xff] %vm841_vm5, %v5527_v45  ;;  %11560 = vmatmul.msk.bf16.gmra.mxu3 %vm841_vm5, %v7645_v48  ;;  %v6519_v22 = vpop.f32.mrf.mxu1  ;;  %v4429_v18 = vld [vmem:[#allocation4 + $0xd0] sm:$0xff]  ;;  %v7542_v3 = vsel %vm12537_vm2, %v7540_v26, %v7541_v29  ;;  %v5960_v48 = vor.u32 %v5958_v10, %v14107_v20  ;;  %v6673_v45 = vld [vmem:[#allocation3 + $0x64] sm:$0xf]  ;;  %v7620_v6 = vunpack.c.l.b16 %v7539_v27 }
 0x329   : > { %4350 = vst.msk [vmem:[#allocation4 + $0xd8] sm:$0xff] %vm841_vm5, %v4318_v53  ;;  %v6590_v31 = vadd.f32 %v6519_v22, %v6337_v5  ;;  %11644 = vmatmul.msk.bf16.gmra.mxu0 %vm841_vm5, %v11909_v50  ;;  %v7621_v32 = vunpack.c.l.b16 %v7542_v3  ;;  %v6207_v37 = vld [vmem:[%s12021_s25 + $0x40] sm:$0xff]  ;;  %v6164_v14 = vld [vmem:[#allocation3 + $0x90] sm:$0xf]  ;;  %v6930_v47 = vshll.u32 %v6673_v45, 16  ;;  %v6934_v25 = vshrl.u32 %v6673_v45, 16 }
 0x32a   : > { %v14114_v55 = vpack.c.bf16 %v5726_v12, %v5726_v12  ;;  %11528 = vmatmul.msk.bf16.gmra.mxu2 %vm841_vm5, %v7152_v2  ;;  %5655 = vst [vmem:[#allocation3 + $0x8c] sm:$0x1] %v5654_v54  ;;  %v14144_v26 = vpop.f32.mrf.mxu0  ;;  %v6243_v12 = vadd.f32 %v13802_v1, %v6207_v37  ;;  %v6165_v53 = vsel %vm12064_vm10, %v5960_v48, %v6164_v14  ;;  %v7545_v29 = vrot.slane %v14138_v51, 5  ;;  %v4066_v27 = vld [vmem:[#allocation4 + $0xe8] sm:$0xff] }
 0x32b   : > { %v4994_v41 = vpop.f32.mrf.mxu3  ;;  %6622 = vst.msk [vmem:[%s13809_s12 + $0x30] sm:$0xff] %vm841_vm5, %v6590_v31  ;;  %v11896_v57 = vld [vmem:[#allocation3 + $0x84] sm:$0xff]  ;;  %v6919_v1 = vsel %vm12116_vm13, %v6914_v39, %v6918_v21  ;;  %v7646_v2 = vpack.c.b16 %v7621_v32, %v7620_v6  ;;  %v5961_v10 = vrot.slane %v14107_v20, 4  ;;  %v6936_v24 = vrot.slane %v6934_v25, 4  ;;  %v6208_v39 = vld [vmem:[%s12021_s25 + $0x48] sm:$0xff] }
 0x32c   : > { %v5963_v9 = vshrl.u32 %v14114_v55, 16  ;;  %v5035_v58 = vadd.f32 %v4994_v41, %v4429_v18  ;;  %v5966_v16 = vshll.u32 %v14114_v55, 16  ;;  %11516 = vmatmul.msk.bf16.gmra.mxu1 %vm841_vm5, %v11896_v57  ;;  %v6338_v52 = vld [vmem:[%s13809_s12 + $0x38] sm:$0xff]  ;;  %6275 = vst.msk [vmem:[%s13809_s12 + $0x40] sm:$0xff] %vm841_vm5, %v6243_v12  ;;  %v6909_v55 = vsel %vm12116_vm13, %v6904_v36, %v14093_v17  ;;  %v7389_v18 = vld [vmem:[#allocation3 + $0x5c] sm:$0x1] }
 0x32d   : > { %v5146_v23 = vld [vmem:[#allocation4 + $0xc8] sm:$0xff]  ;;  %v4281_v59 = vpop.f32.mrf.mxu2  ;;  %6166 = vst [vmem:[#allocation3 + $0x90] sm:$0xf] %v6165_v53  ;;  %v5611_v41 = vld [vmem:[#allocation3 + $0x9c] sm:$0x1]  ;;  %v7129_v17 = vunpack.c.l.b16 %v6919_v1  ;;  %v7547_v45 = vrot.slane %v7545_v29, 4 }
 0x32e   : > { %v5528_v0 = vadd.f32 %v13908_v40, %v5146_v23  ;;  %5067 = vst.msk [vmem:[#allocation4 + $0xd0] sm:$0xff] %vm841_vm5, %v5035_v58  ;;  %v14140_v11 = vrot.slane %v5963_v9, 7  ;;  %v4319_v40 = vadd.f32 %v4281_v59, %v4065_v8  ;;  %v14172_v58 = vrot.slane %v6930_v47, 5  ;;  %v7387_v53 = vld [vmem:[#allocation3 + $0x54] sm:$0xe] }
 0x32f   : > { %v5695_v63 = vld [vmem:[#allocation4 + $0xc0] sm:$0xff]  ;;  %v5612_v54 = vsel %vm12006_vm4, 0, %v5611_v41  ;;  %v7128_v8 = vunpack.c.l.b16 %v6909_v55  ;;  %v7548_v6 = vrot.slane %v7389_v18, 5  ;;  %v6923_v36 = vrot.slane %v6921_v44, 4  ;;  %v6676_v44 = vld [vmem:[#allocation3 + $0x70] sm:$0xf] }
 0x330   : > { %v5727_v30 = vmax.f32 %v5695_v63, 0.0  ;;  %5560 = vst.msk [vmem:[#allocation4 + $0xc8] sm:$0xff] %vm841_vm5, %v5528_v0  ;;  %v6521_v13 = vpop.f32.mrf.mxu1  ;;  %v4430_v56 = vld [vmem:[#allocation4 + $0xd8] sm:$0xff]  ;;  %v5968_v31 = vor.u32 %v5966_v16, %v14140_v11  ;;  %v6924_v0 = vshll.u32 %v14149_v34, 16  ;;  %v6674_v63 = vld [vmem:[#allocation3 + $0x68] sm:$0x1]  ;;  %v6937_v34 = vor.u32 %v6936_v24, %v14172_v58 }
 0x331   : > { %4351 = vst.msk [vmem:[#allocation4 + $0xe0] sm:$0xff] %vm841_vm5, %v4319_v40  ;;  %v6591_v42 = vadd.f32 %v6521_v13, %v6338_v52  ;;  %v6161_v48 = vld [vmem:[#allocation3 + $0x8c] sm:$0x1]  ;;  %v7153_v12 = vpack.c.b16 %v7129_v17, %v7128_v8  ;;  %v6958_v8 = vshrl.u32 %v6676_v44, 16 }
 0x332   : > { %v14152_v22 = vpack.c.bf16 %v5727_v30, %v5727_v30  ;;  %v5969_v20 = vsel %vm12055_vm9, %v5961_v10, %v5968_v31  ;;  %v14189_v21 = vpop.f32.mrf.mxu0  ;;  %v14194_v30 = vld [vmem:[%s16313_s4] ss:$0 sm:$0xff]  ;;  %5613 = vst [vmem:[#allocation3 + $0x9c] sm:$0x1] %v5612_v54  ;;  %v6162_v37 = vsel %vm12006_vm4, %v5953_v38, %v6161_v48  ;;  %v6926_v25 = vrot.slane %v6924_v0, 5 }
 0x333   : > { %v4996_v5 = vpop.f32.mrf.mxu3  ;;  %6623 = vst.msk [vmem:[%s13809_s12 + $0x38] sm:$0xff] %vm841_vm5, %v6591_v42  ;;  %v6244_v40 = vadd.f32 %v14194_v30, %v6208_v39  ;;  %v6339_v13 = vld [vmem:[%s13809_s12 + $0x40] sm:$0xff]  ;;  %v6940_v42 = vshll.u32 %v6674_v63, 16  ;;  %v7549_v10 = vsel %vm12537_vm2, %v7547_v45, %v7548_v6  ;;  %v6938_v41 = vrot.slane %v6937_v34, 4  ;;  %v14238_v6 = vld [vmem:[#allocation3 + $0x64] sm:$0xf] }
 0x334   : > { %v5036_v49 = vadd.f32 %v4996_v5, %v4430_v56  ;;  %v5972_v50 = vshrl.u32 %v14152_v22, 16  ;;  %6167 = vst.msk [vmem:[#allocation3 + $0x94] sm:$0xf] %vm226_vm1, %v5969_v20  ;;  %v5975_v47 = vshll.u32 %v14152_v22, 16  ;;  %v11910_v56 = vld [vmem:[#allocation3 + $0x78] sm:$0xff]  ;;  %v11545_v22 = vrot.slane %v7387_v53, 9 }
 0x335   : > { %v5147_v9 = vld [vmem:[#allocation4 + $0xd0] sm:$0xff]  ;;  %v4283_v60 = vpop.f32.mrf.mxu2  ;;  %6276 = vst.msk [vmem:[%s13809_s12 + $0x48] sm:$0xff] %vm841_vm5, %v6244_v40  ;;  %v6942_v20 = vrot.slane %v6940_v42, 5 }
 0x336   : > { %v5529_v3 = vadd.f32 %v13951_v28, %v5147_v9  ;;  %5068 = vst.msk [vmem:[#allocation4 + $0xd8] sm:$0xff] %vm841_vm5, %v5036_v49  ;;  %v4320_v28 = vadd.f32 %v4283_v60, %v4066_v27  ;;  %v14187_v59 = vrot.slane %v5972_v50, 7  ;;  %v4067_v50 = vld [vmem:[#allocation4 + $0xf0] sm:$0xff]  ;;  %v7546_v17 = vsel %vm12537_vm2, %v11545_v22, %v7545_v29  ;;  %v6209_v27 = vld [vmem:[%s12021_s25 + $0x50] sm:$0xff]  ;;  %v4068_v22 = vld [vmem:[#allocation4 + $0xf8] sm:$0xff] }
 0x337   : > { %v5696_v23 = vld [vmem:[#allocation4 + $0xc8] sm:$0xff]  ;;  %6163 = vst [vmem:[#allocation3 + $0x8c] sm:$0x1] %v6162_v37  ;;  %v6675_v54 = vld [vmem:[#allocation3 + $0x6c] sm:$0xf]  ;;  %v6245_v51 = vadd.f32 %v14194_v30, %v6209_v27  ;;  %v6943_v40 = vsel %vm12116_vm13, %v6938_v41, %v6942_v20 }
 0x338   : > { %v5728_v57 = vmax.f32 %v5696_v23, 0.0  ;;  %5561 = vst.msk [vmem:[#allocation4 + $0xd0] sm:$0xff] %vm841_vm5, %v5529_v3  ;;  %11561 = vmatmul.msk.bf16.gmra.mxu3 %vm841_vm5, %v7646_v2  ;;  %v6524_v32 = vpop.f32.mrf.mxu1  ;;  %v4431_v52 = vld [vmem:[#allocation4 + $0xe0] sm:$0xff]  ;;  %v5977_v55 = vor.u32 %v5975_v47, %v14187_v59  ;;  %v6927_v3 = vor.u32 %v6926_v25, %v6923_v36  ;;  %v7623_v23 = vunpack.c.l.b16 %v7549_v10  ;;  %v14267_v20 = vld [vmem:[#allocation3 + $0x10] sm:$0xf] }
 0x339   : > { %4352 = vst.msk [vmem:[#allocation4 + $0xe8] sm:$0xff] %vm841_vm5, %v4320_v28  ;;  %v6592_v16 = vadd.f32 %v6524_v32, %v6339_v13  ;;  %11645 = vmatmul.msk.bf16.gmra.mxu0 %vm841_vm5, %v11910_v56  ;;  %v6171_v60 = vld [vmem:[#allocation3 + $0x9c] sm:$0xf]  ;;  %v6954_v28 = vshll.u32 %v6676_v44, 16  ;;  %v7622_v32 = vunpack.c.l.b16 %v7546_v17  ;;  %v6945_v53 = vshrl.u32 %v6675_v54, 16 }
 0x33a   : > { %v14199_v14 = vpack.c.bf16 %v5728_v57, %v5728_v57  ;;  %11529 = vmatmul.msk.bf16.gmra.mxu2 %vm841_vm5, %v7153_v12  ;;  %v14225_v57 = vpop.f32.mrf.mxu0  ;;  %v6172_v29 = vsel %vm12064_vm10, %v5977_v55, %v6171_v60  ;;  %6277 = vst.msk [vmem:[%s13809_s12 + $0x50] sm:$0xff] %vm841_vm5, %v6245_v51  ;;  %v6948_v36 = vshll.u32 %v6675_v54, 16  ;;  %v7131_v56 = vunpack.c.l.b16 %v6943_v40  ;;  %v14251_v55 = vld [vmem:[#allocation3 + $0xc] sm:$0xf] }
 0x33b   : > { %v4999_v1 = vpop.f32.mrf.mxu3  ;;  %6624 = vst.msk [vmem:[%s13809_s12 + $0x40] sm:$0xff] %vm841_vm5, %v6592_v16  ;;  %v11897_v18 = vld [vmem:[#allocation3 + $0x90] sm:$0xff]  ;;  %v7647_v47 = vpack.c.b16 %v7623_v23, %v7622_v32  ;;  %v5978_v16 = vrot.slane %v14187_v59, 4  ;;  %v7552_v44 = vrot.slane %v14238_v6, 5  ;;  %v8291_v60 = vshrl.u32 %v14251_v55, 16 }
 0x33c   : > { %v5980_v5 = vshrl.u32 %v14199_v14, 16  ;;  %v5037_v2 = vadd.f32 %v4999_v1, %v4431_v52  ;;  %v5983_v39 = vshll.u32 %v14199_v14, 16  ;;  %11517 = vmatmul.msk.bf16.gmra.mxu1 %vm841_vm5, %v11897_v18  ;;  %v6340_v63 = vld [vmem:[%s13809_s12 + $0x48] sm:$0xff]  ;;  %v6928_v14 = vrot.slane %v6927_v3, 4  ;;  %6173 = vst [vmem:[#allocation3 + $0x9c] sm:$0xf] %v6172_v29 }
 0x33d   : > { %v5148_v49 = vld [vmem:[#allocation4 + $0xd8] sm:$0xff]  ;;  %v4286_v9 = vpop.f32.mrf.mxu2  ;;  %v5614_v1 = vld [vmem:[#allocation3 + $0xa8] sm:$0x1]  ;;  %v6210_v3 = vld [vmem:[%s12021_s25 + $0x58] sm:$0xff] }
 0x33e   : > { %v5530_v31 = vadd.f32 %v13991_v7, %v5148_v49  ;;  %5069 = vst.msk [vmem:[#allocation4 + $0xe0] sm:$0xff] %vm841_vm5, %v5037_v2  ;;  %v14221_v24 = vrot.slane %v5980_v5, 7  ;;  %v4321_v48 = vadd.f32 %v4286_v9, %v4067_v50  ;;  %v6933_v42 = vsel %vm12116_vm13, %v6928_v14, %v14172_v58  ;;  %v6677_v23 = vld [vmem:[#allocation3 + $0x74] sm:$0x1] }
 0x33f   : > { %v5697_v38 = vld [vmem:[#allocation4 + $0xd0] sm:$0xff]  ;;  %v14249_v5 = vrot.slane %v6954_v28, 5  ;;  %v6960_v2 = vrot.slane %v6958_v8, 4  ;;  %v5615_v58 = vsel %vm12006_vm4, 0, %v5614_v1  ;;  %v7130_v17 = vunpack.c.l.b16 %v6933_v42 }
 0x340   : > { %v5729_v7 = vmax.f32 %v5697_v38, 0.0  ;;  %5562 = vst.msk [vmem:[#allocation4 + $0xd8] sm:$0xff] %vm841_vm5, %v5530_v31  ;;  %v6526_v0 = vpop.f32.mrf.mxu1  ;;  %v4432_v13 = vld [vmem:[#allocation4 + $0xe8] sm:$0xff]  ;;  %v5985_v52 = vor.u32 %v5983_v39, %v14221_v24  ;;  %v6947_v38 = vrot.slane %v6945_v53, 4  ;;  %v7392_v8 = vld [vmem:[#allocation3 + $0x68] sm:$0x1] }
 0x341   : > { %4353 = vst.msk [vmem:[#allocation4 + $0xf0] sm:$0xff] %vm841_vm5, %v4321_v48  ;;  %v6593_v37 = vadd.f32 %v6526_v0, %v6340_v63  ;;  %v14258_v31 = vld [vmem:[#allocation3 + $0x60] sm:$0xe]  ;;  %v6246_v48 = vadd.f32 %v14194_v30, %v6210_v3  ;;  %v6961_v27 = vor.u32 %v6960_v2, %v14249_v5  ;;  %v6341_v29 = vld [vmem:[%s13809_s12 + $0x50] sm:$0xff]  ;;  %v7154_v28 = vpack.c.b16 %v7131_v56, %v7130_v17  ;;  %v14312_v3 = vld [vmem:[#allocation3 + $0x70] sm:$0xf] }
 0x342   : > { %v14231_v45 = vpack.c.bf16 %v5729_v7, %v5729_v7  ;;  %v5986_v10 = vsel %vm12055_vm9, %v5978_v16, %v5985_v52  ;;  %v14269_v7 = vpop.f32.mrf.mxu0  ;;  %5616 = vst [vmem:[#allocation3 + $0xa8] sm:$0x1] %v5615_v58  ;;  %v11546_v39 = vrot.slane %v14258_v31, 9  ;;  %v8294_v14 = vshll.u32 %v14251_v55, 16 }
 0x343   : > { %v5001_v12 = vpop.f32.mrf.mxu3  ;;  %6625 = vst.msk [vmem:[%s13809_s12 + $0x48] sm:$0xff] %vm841_vm5, %v6593_v37  ;;  %v7554_v37 = vrot.slane %v7552_v44, 4  ;;  %v7555_v52 = vrot.slane %v7392_v8, 5  ;;  %v14288_v1 = vrot.slane %v6961_v27, 4  ;;  %v8300_v42 = vshll.u32 %v14267_v20, 16 }
 0x344   : > { %v5038_v34 = vadd.f32 %v5001_v12, %v4432_v13  ;;  %v5989_v49 = vshrl.u32 %v14231_v45, 16  ;;  %6174 = vst.msk [vmem:[#allocation3 + $0xa0] sm:$0xf] %vm226_vm1, %v5986_v10  ;;  %v11911_v12 = vld [vmem:[#allocation3 + $0x84] sm:$0xff]  ;;  %v5992_v53 = vshll.u32 %v14231_v45, 16 }
 0x345   : > { %v5149_v25 = vld [vmem:[#allocation4 + $0xe0] sm:$0xff]  ;;  %v4288_v41 = vpop.f32.mrf.mxu2  ;;  %6278 = vst.msk [vmem:[%s13809_s12 + $0x58] sm:$0xff] %vm841_vm5, %v6246_v48  ;;  %v7556_v31 = vsel %vm12537_vm2, %v7554_v37, %v7555_v52 }
 0x346   : > { %v5531_v59 = vadd.f32 %v14031_v15, %v5149_v25  ;;  %5070 = vst.msk [vmem:[#allocation4 + $0xe8] sm:$0xff] %vm841_vm5, %v5038_v34  ;;  %v6950_v15 = vrot.slane %v6948_v36, 5  ;;  %v4322_v9 = vadd.f32 %v4288_v41, %v4068_v22  ;;  %v14274_v0 = vrot.slane %v5989_v49, 7  ;;  %v6696_v22 = vld [vmem:[%s13809_s12] sm:$0xff] }
 0x347   : > { %v5698_v18 = vld [vmem:[#allocation4 + $0xd8] sm:$0xff]  ;;  %v14291_v25 = vrot.slane %v8291_v60, 4  ;;  %v14304_v41 = vrot.slane %v8294_v14, 5  ;;  %v7625_v8 = vunpack.c.l.b16 %v7556_v31 }
 0x348   : > { %v5730_v50 = vmax.f32 %v5698_v18, 0.0  ;;  %5563 = vst.msk [vmem:[#allocation4 + $0xe0] sm:$0xff] %vm841_vm5, %v5531_v59  ;;  %11562 = vmatmul.msk.bf16.gmra.mxu3 %vm841_vm5, %v7647_v47  ;;  %v6529_v54 = vpop.f32.mrf.mxu1  ;;  %v4433_v32 = vld [vmem:[#allocation4 + $0xf0] sm:$0xff]  ;;  %v6951_v13 = vor.u32 %v6950_v15, %v6947_v38  ;;  %v6964_v47 = vshll.u32 %v6677_v23, 16  ;;  %v5994_v45 = vor.u32 %v5992_v53, %v14274_v0  ;;  %v6679_v18 = vld [vmem:[#allocation3 + $0x7c] sm:$0xf] }
 0x349   : > { %4354 = vst.msk [vmem:[#allocation4 + $0xf8] sm:$0xff] %vm841_vm5, %v4322_v9  ;;  %v6594_v63 = vadd.f32 %v6529_v54, %v6341_v29  ;;  %11646 = vmatmul.msk.bf16.gmra.mxu0 %vm841_vm5, %v11911_v12  ;;  %v7553_v23 = vsel %vm12537_vm2, %v11546_v39, %v7552_v44  ;;  %v5995_v44 = vrot.slane %v14274_v0, 4  ;;  %v6978_v12 = vshll.u32 %v6679_v18, 16  ;;  %v5617_v31 = vld [vmem:[#allocation3 + $0xb4] sm:$0x1] }
 0x34a   : > { %v5762_v51 = vpack.c.bf16 %v5730_v50, %v5730_v50  ;;  %11530 = vmatmul.msk.bf16.gmra.mxu2 %vm841_vm5, %v7154_v28  ;;  %v14302_v58 = vrot.slane %v6951_v13, 4  ;;  %v6211_v50 = vld [vmem:[%s12021_s25 + $0x60] sm:$0xff]  ;;  %v6966_v17 = vrot.slane %v6964_v47, 5  ;;  %v14314_v48 = vpop.f32.mrf.mxu0  ;;  %v6678_v28 = vld [vmem:[#allocation3 + $0x78] sm:$0xf]  ;;  %v6982_v14 = vshrl.u32 %v6679_v18, 16 }
 0x34b   : > { %v5004_v40 = vpop.f32.mrf.mxu3  ;;  %6626 = vst.msk [vmem:[%s13809_s12 + $0x50] sm:$0xff] %vm841_vm5, %v6594_v63  ;;  %v11898_v49 = vld [vmem:[#allocation3 + $0x9c] sm:$0xff]  ;;  %v6247_v60 = vadd.f32 %v14194_v30, %v6211_v50  ;;  %v8304_v18 = vshrl.u32 %v14267_v20, 16 }
 0x34c   : > { %v5997_v36 = vshrl.u32 %v5762_v51, 16  ;;  %v5039_v34 = vadd.f32 %v5004_v40, %v4433_v32  ;;  %v6000_v2 = vshll.u32 %v5762_v51, 16  ;;  %v6178_v51 = vld [vmem:[#allocation3 + $0xa8] sm:$0xf]  ;;  %v6957_v29 = vsel %vm12116_vm13, %v14302_v58, %v14249_v5  ;;  %11518 = vmatmul.msk.bf16.gmra.mxu1 %vm841_vm5, %v11898_v49  ;;  %v6342_v6 = vld [vmem:[%s13809_s12 + $0x58] sm:$0xff]  ;;  %v6212_v32 = vld [vmem:[%s12021_s25 + $0x68] sm:$0xff] }
 0x34d   : > { %v5150_v16 = vld [vmem:[#allocation4 + $0xe8] sm:$0xff]  ;;  %v7222_v10 = vpop.f32.mrf.mxu2  ;;  %v6179_v39 = vsel %vm12064_vm10, %v5994_v45, %v6178_v51  ;;  %v6967_v63 = vsel %vm12116_vm13, %v14288_v1, %v6966_v17  ;;  %v11702_v5 = vld [vmem:[%s16312_s3 + $0xc] sm:$0x3]  ;;  %6279 = vst.msk [vmem:[%s13809_s12 + $0x60] sm:$0xff] %vm841_vm5, %v6247_v60  ;;  %v6248_v45 = vadd.f32 %v14194_v30, %v6212_v32  ;;  %v6972_v49 = vshll.u32 %v6678_v28, 16 }
 0x34e   : > { %v14295_v56 = vrot.slane %v5997_v36, 7  ;;  %v5532_v55 = vadd.f32 %v14067_v33, %v5150_v16  ;;  %5071 = vst.msk [vmem:[#allocation4 + $0xf0] sm:$0xff] %vm841_vm5, %v5039_v34  ;;  %v7302_v15 = vadd.f32 %v7222_v10, %v6696_v22  ;;  %v11685_v33 = vld [vmem:[%s16312_s3 + $0xa] sm:$0x3]  ;;  %v9618_v0 = vsel %vm1067_vm0, %v11702_v5, 0  ;;  %v6213_v16 = vld [vmem:[%s12021_s25 + $0x70] sm:$0xff] }
 0x34f   : > { %v5699_v59 = vld [vmem:[#allocation4 + $0xe0] sm:$0xff]  ;;  %v9267_v27 = vsel %vm1067_vm0, %v11685_v33, 0  ;;  %v7624_v34 = vunpack.c.l.b16 %v7553_v23  ;;  %6180 = vst [vmem:[#allocation3 + $0xa8] sm:$0xf] %v6179_v39  ;;  %9627 = vmatpush.bf16.msra.mxu3 %v9618_v0  ;;  %v6697_v1 = vld [vmem:[%s13809_s12 + $0x8] sm:$0xff]  ;;  %v7133_v10 = vunpack.c.l.b16 %v6967_v63  ;;  %v6249_v33 = vadd.f32 %v14194_v30, %v6213_v16  ;;  %v6214_v51 = vld [vmem:[%s12021_s25 + $0x78] sm:$0xff] }
 0x350   : > { %v5731_v38 = vmax.f32 %v5699_v59, 0.0  ;;  %5564 = vst.msk [vmem:[#allocation4 + $0xe8] sm:$0xff] %vm841_vm5, %v5532_v55  ;;  %v6002_v9 = vor.u32 %v6000_v2, %v14295_v56  ;;  %v6531_v54 = vpop.f32.mrf.mxu1  ;;  %9276 = vmatpush.bf16.msra.mxu2 %v9267_v27  ;;  %v4434_v37 = vld [vmem:[#allocation4 + $0xf8] sm:$0xff]  ;;  %v7559_v2 = vrot.slane %v14312_v3, 5  ;;  %v6969_v55 = vshrl.u32 %v6678_v28, 16 }
 0x351   : > { %7334 = vst.msk [vmem:[%s13809_s12] sm:$0xff] %vm841_vm5, %v7302_v15  ;;  %v6595_v40 = vadd.f32 %v6531_v54, %v6342_v6  ;;  %v7648_v22 = vpack.c.b16 %v7625_v8, %v7624_v34  ;;  %v11783_v58 = vld [vmem:[%s16312_s3 + $0xe] sm:$0x3]  ;;  %v6984_v50 = vrot.slane %v6982_v14, 4  ;;  %v7132_v27 = vunpack.c.l.b16 %v6957_v29  ;;  %v7395_v60 = vld [vmem:[#allocation3 + $0x74] sm:$0x1] }
 0x352   : > { %v14343_v53 = vpack.c.bf16 %v5731_v38, %v5731_v38  ;;  %v6003_v47 = vsel %vm12055_vm9, %v5995_v44, %v6002_v9  ;;  %v10336_v9 = vsel %vm1067_vm0, %v11783_v58, 0  ;;  %v14368_v6 = vpop.f32.mrf.mxu0  ;;  %6280 = vst.msk [vmem:[%s13809_s12 + $0x68] sm:$0xff] %vm841_vm5, %v6248_v45  ;;  %v7561_v8 = vrot.slane %v7559_v2, 4  ;;  %v11912_v16 = vld [vmem:[#allocation3 + $0x90] sm:$0xff] }
 0x353   : > { %v5006_v13 = vpop.f32.mrf.mxu3  ;;  %6627 = vst.msk [vmem:[%s13809_s12 + $0x58] sm:$0xff] %vm841_vm5, %v6595_v40  ;;  %10345 = vmatpush.bf16.msra.mxu0 %v10336_v9  ;;  %v5618_v44 = vsel %vm12006_vm4, 0, %v5617_v31  ;;  %v6971_v39 = vrot.slane %v6969_v55, 4  ;;  %v6974_v63 = vrot.slane %v6972_v49, 5  ;;  %v7155_v5 = vpack.c.b16 %v7133_v10, %v7132_v27  ;;  %v6680_v40 = vld [vmem:[#allocation3 + $0x80] sm:$0x1] }
 0x354   : > { %v5040_v36 = vadd.f32 %v5006_v13, %v4434_v37  ;;  %6181 = vst.msk [vmem:[#allocation3 + $0xac] sm:$0xf] %vm226_vm1, %v6003_v47  ;;  %v6006_v17 = vshrl.u32 %v14343_v53, 16  ;;  %v6343_v32 = vld [vmem:[%s13809_s12 + $0x60] sm:$0xff]  ;;  %v14382_v13 = vrot.slane %v8300_v42, 5  ;;  %v7562_v34 = vrot.slane %v7395_v60, 5 }
 0x355   : > { %v5151_v52 = vld [vmem:[#allocation4 + $0xf0] sm:$0xff]  ;;  %v7224_v15 = vpop.f32.mrf.mxu2  ;;  %6281 = vst.msk [vmem:[%s13809_s12 + $0x70] sm:$0xff] %vm841_vm5, %v6249_v33  ;;  %v14390_v20 = vrot.slane %v8304_v18, 4  ;;  %v6009_v31 = vshll.u32 %v14343_v53, 16  ;;  %v6698_v33 = vld [vmem:[%s13809_s12 + $0x10] sm:$0xff] }
 0x356   : > { %v5533_v59 = vadd.f32 %v14109_v46, %v5151_v52  ;;  %5072 = vst.msk [vmem:[#allocation4 + $0xf8] sm:$0xff] %vm841_vm5, %v5040_v36  ;;  %v14361_v46 = vrot.slane %v6978_v12, 5  ;;  %v7303_v23 = vadd.f32 %v7224_v15, %v6697_v1  ;;  %v6215_v37 = vld [vmem:[%s12021_s25 + $0x80] sm:$0xff]  ;;  %v6250_v52 = vadd.f32 %v14194_v30, %v6214_v51 }
 0x357   : > { %v5700_v38 = vld [vmem:[#allocation4 + $0xe8] sm:$0xff]  ;;  %v7393_v36 = vld [vmem:[#allocation3 + $0x6c] sm:$0xe]  ;;  %v6008_v1 = vrot.slane %v6006_v17, 7  ;;  %5619 = vst [vmem:[#allocation3 + $0xb4] sm:$0x1] %v5618_v44  ;;  %v7563_v49 = vsel %vm12537_vm2, %v7561_v8, %v7562_v34  ;;  %v6251_v10 = vadd.f32 %v14194_v30, %v6215_v37 }
 0x358   : > { %v5732_v54 = vmax.f32 %v5700_v38, 0.0  ;;  %5565 = vst.msk [vmem:[#allocation4 + $0xf0] sm:$0xff] %vm841_vm5, %v5533_v59  ;;  %11563 = vmatmul.msk.bf16.gmra.mxu3 %vm841_vm5, %v7648_v22  ;;  %v6534_v28 = vpop.f32.mrf.mxu1  ;;  %v7414_v12 = vld [vmem:[%s13809_s12] sm:$0xff]  ;;  %v6985_v47 = vor.u32 %v6984_v50, %v14361_v46  ;;  %v6975_v59 = vor.u32 %v6974_v63, %v6971_v39  ;;  %v6988_v22 = vshll.u32 %v6680_v40, 16 }
 0x359   : > { %7335 = vst.msk [vmem:[%s13809_s12 + $0x8] sm:$0xff] %vm841_vm5, %v7303_v23  ;;  %v6596_v0 = vadd.f32 %v6534_v28, %v6343_v32  ;;  %11647 = vmatmul.msk.bf16.gmra.mxu0 %vm841_vm5, %v11912_v16  ;;  %v11547_v9 = vrot.slane %v7393_v36, 9  ;;  %v6011_v23 = vor.u32 %v6009_v31, %v6008_v1  ;;  %v6344_v27 = vld [vmem:[%s13809_s12 + $0x68] sm:$0xff]  ;;  %v6012_v60 = vrot.slane %v6008_v1, 4 }
 0x35a   : > { %v5764_v29 = vpack.c.bf16 %v5732_v54, %v5732_v54  ;;  %11531 = vmatmul.msk.bf16.gmra.mxu2 %vm841_vm5, %v7155_v5  ;;  %v6986_v17 = vrot.slane %v6985_v47, 4  ;;  %6282 = vst.msk [vmem:[%s13809_s12 + $0x78] sm:$0xff] %vm841_vm5, %v6250_v52  ;;  %v6682_v54 = vld [vmem:[#allocation3 + $0x88] sm:$0xf]  ;;  %v14410_v28 = vpop.f32.mrf.mxu0  ;;  %v7627_v44 = vunpack.c.l.b16 %v7563_v49  ;;  %v6976_v39 = vrot.slane %v6975_v59, 4 }
 0x35b   : > { %v7716_v14 = vpop.f32.mrf.mxu3  ;;  %6628 = vst.msk [vmem:[%s13809_s12 + $0x60] sm:$0xff] %vm841_vm5, %v6596_v0  ;;  %v11899_v15 = vld [vmem:[#allocation3 + $0xa8] sm:$0xff]  ;;  %v7560_v8 = vsel %vm12537_vm2, %v11547_v9, %v7559_v2  ;;  %v6990_v63 = vrot.slane %v6988_v22, 5  ;;  %v7002_v40 = vshll.u32 %v6682_v54, 16  ;;  %v7006_v3 = vshrl.u32 %v6682_v54, 16 }
 0x35c   : > { %v6014_v45 = vshrl.u32 %v5764_v29, 16  ;;  %v7796_v55 = vadd.f32 %v7716_v14, %v7414_v12  ;;  %v6017_v18 = vshll.u32 %v5764_v29, 16  ;;  %6283 = vst.msk [vmem:[%s13809_s12 + $0x80] sm:$0xff] %vm841_vm5, %v6251_v10  ;;  %v6681_v29 = vld [vmem:[#allocation3 + $0x84] sm:$0xf]  ;;  %11519 = vmatmul.msk.bf16.gmra.mxu1 %vm841_vm5, %v11899_v15  ;;  %v7626_v47 = vunpack.c.l.b16 %v7560_v8  ;;  %v6345_v15 = vld [vmem:[%s13809_s12 + $0x70] sm:$0xff] }
 0x35d   : > { %v5152_v42 = vld [vmem:[#allocation4 + $0xf8] sm:$0xff]  ;;  %v7227_v50 = vpop.f32.mrf.mxu2  ;;  %v11816_v2 = vld [vmem:[%s16312_s3 + $0x10] sm:$0x3]  ;;  %v6991_v14 = vsel %vm12116_vm13, %v6986_v17, %v6990_v63  ;;  %v14435_v52 = vld [vmem:[#allocation3 + $0x7c] sm:$0xf]  ;;  %v8297_v1 = vor.u32 %v14304_v41, %v14291_v25  ;;  %v6996_v49 = vshll.u32 %v6681_v29, 16  ;;  %v8307_v25 = vor.u32 %v14390_v20, %v14382_v13 }
 0x35e   : > { %v14399_v58 = vrot.slane %v6014_v45, 7  ;;  %v5534_v38 = vadd.f32 %v14144_v26, %v5152_v42  ;;  %7828 = vst.msk [vmem:[%s13809_s12] sm:$0xff] %vm841_vm5, %v7796_v55  ;;  %v7304_v53 = vadd.f32 %v7227_v50, %v6698_v33  ;;  %v6185_v12 = vld [vmem:[#allocation3 + $0xb4] sm:$0xf]  ;;  %v10830_v36 = vsel %vm1067_vm0, %v11816_v2, 0  ;;  %v6699_v41 = vld [vmem:[%s13809_s12 + $0x18] sm:$0xff] }
 0x35f   : > { %v6186_v16 = vsel %vm12064_vm10, %v6011_v23, %v6185_v12  ;;  %10839 = vmatpush.bf16.msra.mxu1 %v10830_v36  ;;  %v6216_v45 = vld [vmem:[%s12021_s25 + $0x88] sm:$0xff]  ;;  %v6981_v55 = vsel %vm12116_vm13, %v6976_v39, %v14361_v46  ;;  %v6993_v42 = vshrl.u32 %v6681_v29, 16  ;;  %v7649_v10 = vpack.c.b16 %v7627_v44, %v7626_v47  ;;  %v8213_v23 = vld [vmem:[#allocation3 + $0x18] sm:$0xf]  ;;  %v8214_v8 = vld [vmem:[#allocation3 + $0x1c] sm:$0xf] }
 0x360   : > { %5566 = vst.msk [vmem:[#allocation4 + $0xf8] sm:$0xff] %vm841_vm5, %v5534_v38  ;;  %v6019_v26 = vor.u32 %v6017_v18, %v14399_v58  ;;  %v6536_v51 = vpop.f32.mrf.mxu1  ;;  %v7415_v37 = vld [vmem:[%s13809_s12 + $0x8] sm:$0xff]  ;;  %v6252_v22 = vadd.f32 %v14194_v30, %v6216_v45  ;;  %v7135_v31 = vunpack.c.l.b16 %v6991_v14  ;;  %v7396_v18 = vld [vmem:[#allocation3 + $0x78] sm:$0xe]  ;;  %v7566_v33 = vrot.slane %v14435_v52, 5 }
 0x361   : > { %7336 = vst.msk [vmem:[%s13809_s12 + $0x10] sm:$0xff] %vm841_vm5, %v7304_v53  ;;  %v6597_v32 = vadd.f32 %v6536_v51, %v6344_v27  ;;  %v8212_v59 = vld [vmem:[#allocation3 + $0x14] sm:$0x1]  ;;  %v14451_v46 = vrot.slane %v7002_v40, 5  ;;  %v7008_v50 = vrot.slane %v7006_v3, 4  ;;  %v7134_v17 = vunpack.c.l.b16 %v6981_v55 }
 0x362   : > { %v6020_v5 = vsel %vm12055_vm9, %v6012_v60, %v6019_v26  ;;  %6187 = vst [vmem:[#allocation3 + $0xb4] sm:$0xf] %v6186_v16  ;;  %v8310_v54 = vshll.u32 %v8212_v59, 16  ;;  %v14456_v20 = vpop.f32.mrf.mxu0  ;;  %v11548_v27 = vrot.slane %v7396_v18, 9  ;;  %v6995_v60 = vrot.slane %v6993_v42, 4  ;;  %v6346_v18 = vld [vmem:[%s13809_s12 + $0x78] sm:$0xff] }
 0x363   : > { %v7718_v0 = vpop.f32.mrf.mxu3  ;;  %6188 = vst.msk [vmem:[#allocation3 + $0xb8] sm:$0xf] %vm226_vm1, %v6020_v5  ;;  %v6998_v26 = vrot.slane %v6996_v49, 5  ;;  %v8298_v51 = vrot.slane %v8297_v1, 4  ;;  %v7156_v39 = vpack.c.b16 %v7135_v31, %v7134_v17  ;;  %v7398_v63 = vld [vmem:[#allocation3 + $0x80] sm:$0x1]  ;;  %v7009_v2 = vor.u32 %v7008_v50, %v14451_v46 }
 0x364   : > { %6629 = vst.msk [vmem:[%s13809_s12 + $0x68] sm:$0xff] %vm841_vm5, %v6597_v32  ;;  %v7797_v34 = vadd.f32 %v7718_v0, %v7415_v37  ;;  %v6683_v29 = vld [vmem:[#allocation3 + $0x8c] sm:$0x1]  ;;  %v8308_v32 = vrot.slane %v8307_v25, 4  ;;  %v7568_v3 = vrot.slane %v7566_v33, 4  ;;  %v11913_v37 = vld [vmem:[#allocation3 + $0x9c] sm:$0xff]  ;;  %v7567_v49 = vsel %vm12537_vm2, %v11548_v27, %v7566_v33 }
 0x365   : > { %v7229_v38 = vpop.f32.mrf.mxu2  ;;  %6284 = vst.msk [vmem:[%s13809_s12 + $0x88] sm:$0xff] %vm841_vm5, %v6252_v22  ;;  %v8315_v0 = vshrl.u32 %v8213_v23, 16  ;;  %v8318_v12 = vshll.u32 %v8213_v23, 16  ;;  %v8312_v36 = vrot.slane %v8310_v54, 5  ;;  %v8324_v47 = vshll.u32 %v8214_v8, 16 }
 0x366   : > { %7829 = vst.msk [vmem:[%s13809_s12 + $0x8] sm:$0xff] %vm841_vm5, %v7797_v34  ;;  %v7305_v9 = vadd.f32 %v7229_v38, %v6699_v41  ;;  %v6217_v34 = vld [vmem:[%s12021_s25 + $0x90] sm:$0xff]  ;;  %v8328_v16 = vshrl.u32 %v8214_v8, 16  ;;  %v7569_v52 = vrot.slane %v7398_v63, 5  ;;  %v6999_v1 = vor.u32 %v6998_v26, %v6995_v60  ;;  %v8215_v27 = vld [vmem:[#allocation3 + $0x20] sm:$0x1] }
 0x367   : > { %v7012_v45 = vshll.u32 %v6683_v29, 16  ;;  %v6253_v55 = vadd.f32 %v14194_v30, %v6217_v34  ;;  %v8303_v59 = vsel %vm12116_vm13, %v8298_v51, %v14382_v13  ;;  %v8313_v22 = vsel %vm12116_vm13, %v8308_v32, %v8312_v36  ;;  %v8216_v60 = vld [vmem:[#allocation3 + $0x24] sm:$0xf]  ;;  %v8217_v63 = vld [vmem:[#allocation3 + $0x28] sm:$0xf] }
 0x368   : > { %11564 = vmatmul.msk.bf16.gmra.mxu3 %vm841_vm5, %v7649_v10  ;;  %v6539_v53 = vpop.f32.mrf.mxu1  ;;  %7337 = vst.msk [vmem:[%s13809_s12 + $0x18] sm:$0xff] %vm841_vm5, %v7305_v9  ;;  %v7416_v5 = vld [vmem:[%s13809_s12 + $0x10] sm:$0xff]  ;;  %v6700_v10 = vld [vmem:[%s13809_s12 + $0x20] sm:$0xff]  ;;  %v7570_v25 = vsel %vm12537_vm2, %v7568_v3, %v7569_v52  ;;  %v7010_v41 = vrot.slane %v7009_v2, 4  ;;  %v8317_v38 = vrot.slane %v8315_v0, 4  ;;  %v14483_v50 = vrot.slane %v8324_v47, 5 }
 0x369   : > { %v6598_v44 = vadd.f32 %v6539_v53, %v6345_v15  ;;  %11648 = vmatmul.msk.bf16.gmra.mxu0 %vm841_vm5, %v11913_v37  ;;  %6285 = vst.msk [vmem:[%s13809_s12 + $0x90] sm:$0xff] %vm841_vm5, %v6253_v55  ;;  %v8320_v15 = vrot.slane %v8318_v12, 5  ;;  %v8330_v9 = vrot.slane %v8328_v16, 4  ;;  %v7000_v54 = vrot.slane %v6999_v1, 4  ;;  %v14504_v0 = vld [vmem:[#allocation3 + $0x88] sm:$0xf] }
 0x36a   : > { %11532 = vmatmul.msk.bf16.gmra.mxu2 %vm841_vm5, %v7156_v39  ;;  %v11900_v42 = vld [vmem:[#allocation3 + $0xb4] sm:$0xff]  ;;  %v14485_v17 = vpop.f32.mrf.mxu0  ;;  %v7014_v23 = vrot.slane %v7012_v45, 5  ;;  %v14487_v53 = vunpack.c.l.b16 %v8303_v59  ;;  %v7628_v51 = vunpack.c.l.b16 %v7567_v49  ;;  %v7629_v8 = vunpack.c.l.b16 %v7570_v25  ;;  %v6218_v36 = vld [vmem:[%s12021_s25 + $0x98] sm:$0xff] }
 0x36b   : > { %v7721_v40 = vpop.f32.mrf.mxu3  ;;  %6630 = vst.msk [vmem:[%s13809_s12 + $0x70] sm:$0xff] %vm841_vm5, %v6598_v44  ;;  %v14492_v44 = vunpack.c.l.b16 %v8313_v22  ;;  %v5656_v39 = vld [vmem:[#allocation3 + $0x98] sm:$0x1]  ;;  %v8321_v2 = vor.u32 %v8320_v15, %v8317_v38  ;;  %v8331_v12 = vor.u32 %v8330_v9, %v14483_v50  ;;  %v8339_v34 = vshrl.u32 %v8216_v60, 16  ;;  %v6701_v49 = vld [vmem:[%s13809_s12 + $0x28] sm:$0xff] }
 0x36c   : > { %v7798_v14 = vadd.f32 %v7721_v40, %v7416_v5  ;;  %11520 = vmatmul.msk.bf16.gmra.mxu1 %vm841_vm5, %v11900_v42  ;;  %v7005_v5 = vsel %vm12116_vm13, %v7000_v54, %v14451_v46  ;;  %v7015_v40 = vsel %vm12116_vm13, %v7010_v41, %v7014_v23  ;;  %v5657_v3 = vsel %vm12039_vm8, 0, %v5656_v39  ;;  %v14512_v42 = vld [vmem:[#allocation3 + $0x2c] sm:$0x1]  ;;  %v6685_v15 = vld [vmem:[#allocation3 + $0x94] sm:$0xf] }
 0x36d   : > { %v7232_v31 = vpop.f32.mrf.mxu2  ;;  %5658 = vst [vmem:[#allocation3 + $0x98] sm:$0x1] %v5657_v3  ;;  %v6254_v46 = vadd.f32 %v14194_v30, %v6218_v36  ;;  %v8342_v47 = vshll.u32 %v8216_v60, 16  ;;  %v8348_v16 = vshll.u32 %v8217_v63, 16  ;;  %v8352_v52 = vshrl.u32 %v8217_v63, 16 }
 0x36e   : > { %7830 = vst.msk [vmem:[%s13809_s12 + $0x10] sm:$0xff] %vm841_vm5, %v7798_v14  ;;  %v7306_v33 = vadd.f32 %v7232_v31, %v6700_v10  ;;  %v8334_v14 = vshll.u32 %v8215_v27, 16  ;;  %v5970_v1 = vrot.slane %v14140_v11, 4  ;;  %v7650_v45 = vpack.c.b16 %v7629_v8, %v7628_v51  ;;  %v8219_v11 = vld [vmem:[#allocation3 + $0x30] sm:$0xf] }
 0x36f   : > { %v7417_v29 = vld [vmem:[%s13809_s12 + $0x18] sm:$0xff]  ;;  %v7137_v55 = vunpack.c.l.b16 %v7015_v40  ;;  %v7136_v22 = vunpack.c.l.b16 %v7005_v5  ;;  %v8708_v10 = vpack.c.b16 %v14492_v44, %v14487_v53  ;;  %v7573_v31 = vrot.slane %v14504_v0, 5  ;;  %6286 = vst.msk [vmem:[%s13809_s12 + $0x98] sm:$0xff] %vm841_vm5, %v6254_v46  ;;  %v7401_v8 = vld [vmem:[#allocation3 + $0x8c] sm:$0x1] }
 0x370   : > { %v6541_v13 = vpop.f32.mrf.mxu1  ;;  %7338 = vst.msk [vmem:[%s13809_s12 + $0x20] sm:$0xff] %vm841_vm5, %v7306_v33  ;;  %v14518_v25 = vrot.slane %v8321_v2, 4  ;;  %v5987_v41 = vrot.slane %v14221_v24, 4  ;;  %v8332_v33 = vrot.slane %v8331_v12, 4  ;;  %v8336_v9 = vrot.slane %v8334_v14, 5  ;;  %v11914_v12 = vld [vmem:[#allocation3 + $0xa8] sm:$0xff] }
 0x371   : > { %v6599_v26 = vadd.f32 %v6541_v13, %v6346_v18  ;;  %v6684_v18 = vld [vmem:[#allocation3 + $0x90] sm:$0xf]  ;;  %v8341_v54 = vrot.slane %v8339_v34, 4  ;;  %v8344_v23 = vrot.slane %v8342_v47, 5  ;;  %v14526_v27 = vrot.slane %v8348_v16, 5  ;;  %v6219_v14 = vld [vmem:[%s12021_s25 + $0xa0] sm:$0xff] }
 0x372   : > { %v14524_v13 = vpop.f32.mrf.mxu0  ;;  %v14528_v60 = vrot.slane %v8352_v52, 4  ;;  %v7157_v51 = vpack.c.b16 %v7137_v55, %v7136_v22  ;;  %v7017_v39 = vshrl.u32 %v6684_v18, 16  ;;  %v7020_v63 = vshll.u32 %v6684_v18, 16  ;;  %v7399_v34 = vld [vmem:[#allocation3 + $0x84] sm:$0xe] }
 0x373   : > { %v7723_v32 = vpop.f32.mrf.mxu3  ;;  %6631 = vst.msk [vmem:[%s13809_s12 + $0x78] sm:$0xff] %vm841_vm5, %v6599_v26  ;;  %v14530_v26 = vld [vmem:[#allocation3 + $0x34] sm:$0xf]  ;;  %v7575_v40 = vrot.slane %v7573_v31, 4  ;;  %v7026_v3 = vshll.u32 %v6685_v15, 16  ;;  %v7030_v2 = vshrl.u32 %v6685_v15, 16  ;;  %v8337_v47 = vsel %vm12116_vm13, %v8332_v33, %v8336_v9 }
 0x374   : > { %v7799_v37 = vadd.f32 %v7723_v32, %v7417_v29  ;;  %v8358_v29 = vshll.u32 %v14512_v42, 16  ;;  %v6168_v46 = vld [vmem:[#allocation3 + $0x98] sm:$0x1]  ;;  %v8363_v16 = vshrl.u32 %v8219_v11, 16  ;;  %v8366_v52 = vshll.u32 %v8219_v11, 16 }
 0x375   : > { %v7234_v59 = vpop.f32.mrf.mxu2  ;;  %v7576_v55 = vrot.slane %v7401_v8, 5  ;;  %v6169_v42 = vsel %vm12006_vm4, %v5970_v1, %v6168_v46  ;;  %v7019_v22 = vrot.slane %v7017_v39, 4  ;;  %v7022_v18 = vrot.slane %v7020_v63, 5 }
 0x376   : > { %7831 = vst.msk [vmem:[%s13809_s12 + $0x18] sm:$0xff] %vm841_vm5, %v7799_v37  ;;  %v7307_v38 = vadd.f32 %v7234_v59, %v6701_v49  ;;  %v8327_v37 = vsel %vm12116_vm13, %v14518_v25, %v14483_v50  ;;  %v6255_v50 = vadd.f32 %v14194_v30, %v6219_v14  ;;  %v8345_v49 = vor.u32 %v8344_v23, %v8341_v54  ;;  %v6702_v59 = vld [vmem:[%s13809_s12 + $0x30] sm:$0xff]  ;;  %v5701_v14 = vld [vmem:[#allocation4 + $0xf0] sm:$0xff] }
 0x377   : > { %v7418_v32 = vld [vmem:[%s13809_s12 + $0x20] sm:$0xff]  ;;  %v8355_v25 = vor.u32 %v14528_v60, %v14526_v27  ;;  %v8372_v11 = vshll.u32 %v14530_v26, 16  ;;  %v11549_v1 = vrot.slane %v7399_v34, 9  ;;  %v7577_v9 = vsel %vm12537_vm2, %v7575_v40, %v7576_v55  ;;  %6170 = vst [vmem:[#allocation3 + $0x98] sm:$0x1] %v6169_v42  ;;  %v6220_v55 = vld [vmem:[%s12021_s25 + $0xa8] sm:$0xff] }
 0x378   : > { %11565 = vmatmul.msk.bf16.gmra.mxu3 %vm841_vm5, %v7650_v45  ;;  %7339 = vst.msk [vmem:[%s13809_s12 + $0x28] sm:$0xff] %vm841_vm5, %v7307_v38  ;;  %v6347_v45 = vld [vmem:[%s13809_s12 + $0x80] sm:$0xff]  ;;  %v5702_v38 = vld [vmem:[#allocation4 + $0xf8] sm:$0xff]  ;;  %v6544_v15 = vpop.f32.mrf.mxu1  ;;  %v14559_v54 = vrot.slane %v7026_v3, 5  ;;  %v7032_v23 = vrot.slane %v7030_v2, 4  ;;  %v8365_v39 = vrot.slane %v8363_v16, 4  ;;  %v14571_v40 = vunpack.c.l.b16 %v8337_v47 }
 0x379   : > { %11649 = vmatmul.msk.bf16.gmra.mxu0 %vm841_vm5, %v11914_v12  ;;  %6287 = vst.msk [vmem:[%s13809_s12 + $0xa0] sm:$0xff] %vm841_vm5, %v6255_v50  ;;  %v8368_v60 = vrot.slane %v8366_v52, 5  ;;  %v14573_v3 = vrot.slane %v8345_v49, 4  ;;  %v14575_v2 = vld [vmem:[#allocation3 + $0x38] sm:$0x1]  ;;  %v7631_v0 = vunpack.c.l.b16 %v7577_v9  ;;  %v14585_v34 = vrot.slane %v8358_v29, 5 }
 0x37a   : > { %11533 = vmatmul.msk.bf16.gmra.mxu2 %vm841_vm5, %v7157_v51  ;;  %v6600_v51 = vadd.f32 %v6544_v15, %v6347_v45  ;;  %v14563_v63 = vpop.f32.mrf.mxu0  ;;  %v14577_v12 = vld [vmem:[#allocation3 + $0x3c] sm:$0xf]  ;;  %v7033_v16 = vor.u32 %v7032_v23, %v14559_v54  ;;  %v14593_v53 = vrot.slane %v8355_v25, 4  ;;  %v14595_v44 = vrot.slane %v8372_v11, 5  ;;  %v14597_v29 = vld [vmem:[#allocation3 + $0x94] sm:$0xf] }
 0x37b   : > { %v7726_v5 = vpop.f32.mrf.mxu3  ;;  %v8369_v42 = vor.u32 %v8368_v60, %v8365_v39  ;;  %v8376_v50 = vshrl.u32 %v14530_v26, 16  ;;  %v5733_v49 = vmax.f32 %v5701_v14, 0.0  ;;  %v8382_v25 = vshll.u32 %v14575_v2, 16  ;;  %v6688_v9 = vld [vmem:[#allocation3 + $0xa0] sm:$0xf] }
 0x37c   : > { %v7800_v36 = vadd.f32 %v7726_v5, %v7418_v32  ;;  %v7574_v32 = vsel %vm12537_vm2, %v11549_v1, %v7573_v31  ;;  %v14569_v5 = vunpack.c.l.b16 %v8327_v37  ;;  %6632 = vst.msk [vmem:[%s13809_s12 + $0x80] sm:$0xff] %vm841_vm5, %v6600_v51  ;;  %11653 = vmatmul.msk.bf16.vlgmr.msrb.gmra.mxu1 %vm841_vm5, %v8708_v10  ;;  %v7023_v31 = vor.u32 %v7022_v18, %v7019_v22  ;;  %v5659_v37 = vld [vmem:[#allocation3 + $0xa4] sm:$0x1] }
 0x37d   : > { %v7237_v33 = vpop.f32.mrf.mxu2  ;;  %v5660_v52 = vsel %vm12039_vm8, 0, %v5659_v37  ;;  %v7630_v45 = vunpack.c.l.b16 %v7574_v32  ;;  %v6703_v22 = vld [vmem:[%s13809_s12 + $0x38] sm:$0xff]  ;;  %v6256_v18 = vadd.f32 %v14194_v30, %v6220_v55  ;;  %v7580_v60 = vrot.slane %v14597_v29, 5  ;;  %v6687_v32 = vld [vmem:[#allocation3 + $0x9c] sm:$0xf] }
 0x37e   : > { %7832 = vst.msk [vmem:[%s13809_s12 + $0x20] sm:$0xff] %vm841_vm5, %v7800_v36  ;;  %v7308_v8 = vadd.f32 %v7237_v33, %v6702_v59  ;;  %v5734_v36 = vmax.f32 %v5702_v38, 0.0  ;;  %v6348_v59 = vld [vmem:[%s13809_s12 + $0x88] sm:$0xff]  ;;  %v6686_v33 = vld [vmem:[#allocation3 + $0x98] sm:$0x1]  ;;  %v7024_v1 = vrot.slane %v7023_v31, 4  ;;  %v8709_v30 = vpack.c.b16 %v14571_v40, %v14569_v5 }
 0x37f   : > { %v7419_v46 = vld [vmem:[%s13809_s12 + $0x28] sm:$0xff]  ;;  %5661 = vst [vmem:[#allocation3 + $0xa4] sm:$0x1] %v5660_v52  ;;  %v7651_v15 = vpack.c.b16 %v7631_v0, %v7630_v45  ;;  %v7036_v39 = vshll.u32 %v6686_v33, 16  ;;  %v14617_v31 = vrot.slane %v8369_v42, 4  ;;  %v7054_v52 = vshrl.u32 %v6688_v9, 16 }
 0x380   : > { %7340 = vst.msk [vmem:[%s13809_s12 + $0x30] sm:$0xff] %vm841_vm5, %v7308_v8  ;;  %v14606_v38 = vpack.c.bf16 %v5734_v36, %v5734_v36  ;;  %v6546_v23 = vpop.f32.mrf.mxu1  ;;  %v7034_v8 = vrot.slane %v7033_v16, 4  ;;  %v7050_v16 = vshll.u32 %v6688_v9, 16  ;;  %v7404_v55 = vld [vmem:[#allocation3 + $0x98] sm:$0x1]  ;;  %v7044_v42 = vshll.u32 %v6687_v32, 16 }
 0x381   : > { %6288 = vst.msk [vmem:[%s13809_s12 + $0xa8] sm:$0xff] %vm841_vm5, %v6256_v18  ;;  %v6601_v36 = vadd.f32 %v6546_v23, %v6348_v59  ;;  %v7041_v59 = vshrl.u32 %v6687_v32, 16  ;;  %v8351_v33 = vsel %vm12116_vm13, %v14573_v3, %v14526_v27  ;;  %v11915_v9 = vld [vmem:[#allocation3 + $0xb4] sm:$0xff]  ;;  %v7583_v11 = vrot.slane %v7404_v55, 5 }
 0x382   : > { %v14619_v37 = vpop.f32.mrf.mxu0  ;;  %v6031_v45 = vshrl.u32 %v14606_v38, 16  ;;  %v14650_v14 = vrot.slane %v7050_v16, 5  ;;  %v14662_v16 = vld [vmem:[#allocation3 + $0x40] sm:$0xf] }
 0x383   : > { %v7728_v47 = vpop.f32.mrf.mxu3  ;;  %6633 = vst.msk [vmem:[%s13809_s12 + $0x88] sm:$0xff] %vm841_vm5, %v6601_v36  ;;  %v6221_v36 = vld [vmem:[%s12021_s25 + $0xb0] sm:$0xff]  ;;  %v7043_v55 = vrot.slane %v7041_v59, 4  ;;  %v14675_v59 = vrot.slane %v8382_v25, 5 }
 0x384   : > { %v7801_v10 = vadd.f32 %v7728_v47, %v7419_v46  ;;  %v7029_v46 = vsel %vm12116_vm13, %v7024_v1, %v14559_v54  ;;  %v7038_v47 = vrot.slane %v7036_v39, 5  ;;  %v8361_v1 = vsel %vm12116_vm13, %v14593_v53, %v14585_v34  ;;  %v14656_v53 = vld [vmem:[%s16313_s4] ss:$0 sm:$0xff] }
 0x385   : > { %v7239_v51 = vpop.f32.mrf.mxu2  ;;  %v7056_v34 = vrot.slane %v7054_v52, 4  ;;  %v6257_v24 = vadd.f32 %v14656_v53, %v6221_v36  ;;  %v6704_v52 = vld [vmem:[%s13809_s12 + $0x40] sm:$0xff]  ;;  %v5662_v36 = vld [vmem:[#allocation3 + $0xb0] sm:$0x1] }
 0x386   : > { %7833 = vst.msk [vmem:[%s13809_s12 + $0x28] sm:$0xff] %vm841_vm5, %v7801_v10  ;;  %v7309_v0 = vadd.f32 %v7239_v51, %v6703_v22  ;;  %v14624_v10 = vpack.c.bf16 %v5733_v49, %v5733_v49  ;;  %v7039_v54 = vsel %vm12116_vm13, %v7034_v8, %v7038_v47  ;;  %v7582_v49 = vrot.slane %v7580_v60, 4  ;;  %v7402_v8 = vld [vmem:[#allocation3 + $0x90] sm:$0xe]  ;;  %v6349_v47 = vld [vmem:[%s13809_s12 + $0x90] sm:$0xff] }
 0x387   : > { %v7420_v22 = vld [vmem:[%s13809_s12 + $0x30] sm:$0xff]  ;;  %v7138_v51 = vunpack.c.l.b16 %v7029_v46  ;;  %v7139_v39 = vunpack.c.l.b16 %v7039_v54  ;;  %6289 = vst.msk [vmem:[%s13809_s12 + $0xb0] sm:$0xff] %vm841_vm5, %v6257_v24  ;;  %v7057_v2 = vor.u32 %v7056_v34, %v14650_v14  ;;  %v14699_v34 = vunpack.c.l.b16 %v8361_v1  ;;  %v14701_v24 = vld [vmem:[#allocation3 + $0xa0] sm:$0xf] }
 0x388   : > { %11566 = vmatmul.msk.bf16.gmra.mxu3 %vm841_vm5, %v7651_v15  ;;  %7341 = vst.msk [vmem:[%s13809_s12 + $0x38] sm:$0xff] %vm841_vm5, %v7309_v0  ;;  %v6175_v15 = vld [vmem:[#allocation3 + $0xa4] sm:$0x1]  ;;  %v9773_v0 = vld [vmem:[#allocation3 + $0x18] sm:$0xf]  ;;  %v5663_v5 = vsel %vm12039_vm8, 0, %v5662_v36  ;;  %v14716_v1 = vunpack.c.l.b16 %v8351_v33 }
 0x389   : > { %v6176_v32 = vsel %vm12006_vm4, %v5987_v41, %v6175_v15  ;;  %11650 = vmatmul.msk.bf16.gmra.mxu0 %vm841_vm5, %v11915_v9  ;;  %v6023_v41 = vshrl.u32 %v14624_v10, 16  ;;  %v7158_v46 = vpack.c.b16 %v7139_v39, %v7138_v51  ;;  %v11550_v15 = vrot.slane %v7402_v8, 9  ;;  %5664 = vst [vmem:[#allocation3 + $0xb0] sm:$0x1] %v5663_v5  ;;  %v6690_v36 = vld [vmem:[#allocation3 + $0xa8] sm:$0xf] }
 0x38a   : > { %6177 = vst [vmem:[#allocation3 + $0xa4] sm:$0x1] %v6176_v32  ;;  %v7584_v9 = vsel %vm12537_vm2, %v7582_v49, %v7583_v11  ;;  %v14671_v32 = vrot.slane %v8376_v50, 4  ;;  %v9854_v51 = vshrl.u32 %v9773_v0, 16  ;;  %v9857_v39 = vshll.u32 %v9773_v0, 16  ;;  %v14680_v11 = vpop.f32.mrf.mxu0 }
 0x38b   : > { %v7731_v18 = vpop.f32.mrf.mxu3  ;;  %11534 = vmatmul.msk.bf16.gmra.mxu2 %vm841_vm5, %v7158_v46  ;;  %v14678_v8 = vrot.slane %v6031_v45, 7  ;;  %v7581_v26 = vsel %vm12537_vm2, %v11550_v15, %v7580_v60  ;;  %v8390_v50 = vshll.u32 %v14577_v12, 16  ;;  %v6025_v25 = vrot.slane %v6023_v41, 7 }
 0x38c   : > { %v7802_v23 = vadd.f32 %v7731_v18, %v7420_v22  ;;  %v7046_v22 = vrot.slane %v7044_v42, 5  ;;  %v6549_v18 = vpop.f32.mrf.mxu1  ;;  %11654 = vmatmul.msk.bf16.gmra.mxu1 %vm841_vm5, %v8709_v30  ;;  %v7633_v45 = vunpack.c.l.b16 %v7584_v9  ;;  %v6034_v60 = vshll.u32 %v14606_v38, 16  ;;  %v6350_v38 = vld [vmem:[%s13809_s12 + $0x98] sm:$0xff]  ;;  %v14719_v9 = vld [vmem:[#allocation3 + $0x1c] sm:$0xf] }
 0x38d   : > { %v7242_v54 = vpop.f32.mrf.mxu2  ;;  %v6602_v42 = vadd.f32 %v6549_v18, %v6349_v47  ;;  %v7632_v30 = vunpack.c.l.b16 %v7581_v26  ;;  %v14705_v46 = vrot.slane %v9854_v51, 4  ;;  %v7058_v18 = vrot.slane %v7057_v2, 4 }
 0x38e   : > { %7834 = vst.msk [vmem:[%s13809_s12 + $0x30] sm:$0xff] %vm841_vm5, %v7802_v23  ;;  %v7310_v23 = vadd.f32 %v7242_v54, %v6704_v52  ;;  %v7047_v49 = vor.u32 %v7046_v22, %v7043_v55  ;;  %v14707_v55 = vrot.slane %v9857_v39, 5  ;;  %v6705_v22 = vld [vmem:[%s13809_s12 + $0x48] sm:$0xff]  ;;  %v5620_v54 = vld [vmem:[#allocation3 + $0xc0] sm:$0x1]  ;;  %v6036_v15 = vor.u32 %v6034_v60, %v14678_v8 }
 0x38f   : > { %6634 = vst.msk [vmem:[%s13809_s12 + $0x90] sm:$0xff] %vm841_vm5, %v6602_v42  ;;  %v7421_v0 = vld [vmem:[%s13809_s12 + $0x38] sm:$0xff]  ;;  %v7652_v42 = vpack.c.b16 %v7633_v45, %v7632_v30  ;;  %v7587_v51 = vrot.slane %v14701_v24, 5  ;;  %v6691_v39 = vld [vmem:[#allocation3 + $0xac] sm:$0xf]  ;;  %v5621_v26 = vsel %vm12006_vm4, 0, %v5620_v54  ;;  %v8710_v33 = vpack.c.b16 %v14699_v34, %v14716_v1 }
 0x390   : > { %7342 = vst.msk [vmem:[%s13809_s12 + $0x40] sm:$0xff] %vm841_vm5, %v7310_v23  ;;  %v7048_v23 = vrot.slane %v7047_v49, 4  ;;  %v8379_v60 = vor.u32 %v14671_v32, %v14595_v44  ;;  %v6029_v45 = vrot.slane %v6025_v25, 4  ;;  %v6026_v49 = vshll.u32 %v14624_v10, 16 }
 0x391   : > { %v6689_v41 = vld [vmem:[#allocation3 + $0xa4] sm:$0x1]  ;;  %5622 = vst [vmem:[#allocation3 + $0xc0] sm:$0x1] %v5621_v26  ;;  %v7078_v54 = vshrl.u32 %v6691_v39, 16  ;;  %v7068_v35 = vshll.u32 %v6690_v36, 16 }
 0x392   : > { %v7060_v52 = vshll.u32 %v6689_v41, 16  ;;  %v7053_v5 = vsel %vm12116_vm13, %v7048_v23, %v14650_v14  ;;  %v14736_v30 = vpop.f32.mrf.mxu0  ;;  %v7405_v41 = vld [vmem:[#allocation3 + $0x9c] sm:$0xe]  ;;  %v6037_v10 = vsel %vm12055_vm9, %v6029_v45, %v6036_v15  ;;  %v7589_v14 = vrot.slane %v7587_v51, 4 }
 0x393   : > { %v7733_v47 = vpop.f32.mrf.mxu3  ;;  %v9863_v23 = vshll.u32 %v14719_v9, 16  ;;  %v6028_v26 = vor.u32 %v6026_v49, %v6025_v25  ;;  %6195 = vst.msk [vmem:[#allocation3 + $0xc4] sm:$0xf] %vm226_vm1, %v6037_v10  ;;  %v6351_v49 = vld [vmem:[%s13809_s12 + $0xa0] sm:$0xff]  ;;  %v8400_v10 = vshrl.u32 %v14662_v16, 16 }
 0x394   : > { %v7803_v40 = vadd.f32 %v7733_v47, %v7421_v0  ;;  %v6551_v2 = vpop.f32.mrf.mxu1  ;;  %v7062_v3 = vrot.slane %v7060_v52, 5  ;;  %v7074_v52 = vshll.u32 %v6691_v39, 16 }
 0x395   : > { %v7244_v27 = vpop.f32.mrf.mxu2  ;;  %v6603_v0 = vadd.f32 %v6551_v2, %v6350_v38  ;;  %v6182_v2 = vld [vmem:[#allocation3 + $0xb0] sm:$0x1]  ;;  %v14824_v1 = vrot.slane %v8400_v10, 4 }
 0x396   : > { %7835 = vst.msk [vmem:[%s13809_s12 + $0x38] sm:$0xff] %vm841_vm5, %v7803_v40  ;;  %v7311_v47 = vadd.f32 %v7244_v27, %v6705_v22  ;;  %v6222_v40 = vld [vmem:[%s12021_s25 + $0xb8] sm:$0xff]  ;;  %v7063_v32 = vsel %vm12116_vm13, %v7058_v18, %v7062_v3  ;;  %v6223_v3 = vld [vmem:[%s12021_s25 + $0xc0] sm:$0xff]  ;;  %v14763_v29 = vrot.slane %v7074_v52, 5 }
 0x397   : > { %6635 = vst.msk [vmem:[%s13809_s12 + $0x98] sm:$0xff] %vm841_vm5, %v6603_v0  ;;  %v7141_v38 = vunpack.c.l.b16 %v7063_v32  ;;  %v7407_v22 = vld [vmem:[#allocation3 + $0xa4] sm:$0x1]  ;;  %v7422_v18 = vld [vmem:[%s13809_s12 + $0x40] sm:$0xff]  ;;  %v6258_v27 = vadd.f32 %v14656_v53, %v6222_v40  ;;  %v7140_v0 = vunpack.c.l.b16 %v7053_v5  ;;  %v16327_v32 = vrot.slane %v14295_v56, 4 }
 0x398   : > { %11567 = vmatmul.msk.bf16.gmra.mxu3 %vm841_vm5, %v7652_v42  ;;  %v7065_v42 = vshrl.u32 %v6690_v36, 16  ;;  %7343 = vst.msk [vmem:[%s13809_s12 + $0x48] sm:$0xff] %vm841_vm5, %v7311_v47  ;;  %v9867_v36 = vshrl.u32 %v14719_v9, 16  ;;  %v7590_v47 = vrot.slane %v7407_v22, 5  ;;  %v7080_v40 = vrot.slane %v7078_v54, 4  ;;  %v6706_v9 = vld [vmem:[%s13809_s12 + $0x50] sm:$0xff] }
 0x399   : > { %v6183_v25 = vsel %vm12006_vm4, %v16327_v32, %v6182_v2  ;;  %v7159_v56 = vpack.c.b16 %v7141_v38, %v7140_v0  ;;  %v11551_v5 = vrot.slane %v7405_v41, 9  ;;  %v6192_v2 = vld [vmem:[#allocation3 + $0xc0] sm:$0xf]  ;;  %v7070_v54 = vrot.slane %v7068_v35, 5  ;;  %6290 = vst.msk [vmem:[%s13809_s12 + $0xb8] sm:$0xff] %vm841_vm5, %v6258_v27 }
 0x39a   : > { %6184 = vst [vmem:[#allocation3 + $0xb0] sm:$0x1] %v6183_v25  ;;  %v7591_v52 = vsel %vm12537_vm2, %v7589_v14, %v7590_v47  ;;  %v7067_v22 = vrot.slane %v7065_v42, 4  ;;  %v9869_v0 = vrot.slane %v9867_v36, 4  ;;  %v14783_v14 = vpop.f32.mrf.mxu0  ;;  %v7081_v42 = vor.u32 %v7080_v40, %v14763_v29 }
 0x39b   : > { %v7736_v39 = vpop.f32.mrf.mxu3  ;;  %11535 = vmatmul.msk.bf16.gmra.mxu2 %vm841_vm5, %v7159_v56  ;;  %v7588_v43 = vsel %vm12537_vm2, %v11551_v5, %v7587_v51  ;;  %v7635_v24 = vunpack.c.l.b16 %v7591_v52  ;;  %v5665_v51 = vld [vmem:[#allocation3 + $0xbc] sm:$0x1]  ;;  %v14806_v27 = vrot.slane %v8390_v50, 5  ;;  %v16329_v25 = vshll.u32 %v14662_v16, 16  ;;  %v14820_v50 = vld [vmem:[#allocation3 + $0xac] sm:$0xf] }
 0x39c   : > { %v7804_v45 = vadd.f32 %v7736_v39, %v7422_v18  ;;  %v6259_v18 = vadd.f32 %v14656_v53, %v6223_v3  ;;  %v14768_v39 = vrot.slane %v8379_v60, 4  ;;  %v6554_v32 = vpop.f32.mrf.mxu1  ;;  %v6193_v3 = vsel %vm12064_vm10, %v6028_v26, %v6192_v2  ;;  %v14778_v60 = vld [vmem:[#allocation3 + $0x44] sm:$0x1]  ;;  %11655 = vmatmul.msk.bf16.gmra.mxu1 %vm841_vm5, %v8710_v33  ;;  %v6352_v2 = vld [vmem:[%s13809_s12 + $0xa8] sm:$0xff] }
 0x39d   : > { %v7247_v15 = vpop.f32.mrf.mxu2  ;;  %v6604_v41 = vadd.f32 %v6554_v32, %v6351_v49  ;;  %6194 = vst [vmem:[#allocation3 + $0xc0] sm:$0xf] %v6193_v3  ;;  %v16328_v26 = vshrl.u32 %v14577_v12, 16  ;;  %v14810_v36 = vrot.slane %v16329_v25, 5  ;;  %v8406_v49 = vshll.u32 %v14778_v60, 16 }
 0x39e   : > { %7836 = vst.msk [vmem:[%s13809_s12 + $0x40] sm:$0xff] %vm841_vm5, %v7804_v45  ;;  %v7312_v38 = vadd.f32 %v7247_v15, %v6706_v9  ;;  %v14781_v45 = vrot.slane %v9863_v23, 5  ;;  %v9775_v23 = vld [vmem:[#allocation3 + $0x20] sm:$0x1]  ;;  %v9860_v15 = vor.u32 %v14707_v55, %v14705_v46  ;;  %v7071_v34 = vor.u32 %v7070_v54, %v7067_v22  ;;  %v6224_v9 = vld [vmem:[%s12021_s25 + $0xc8] sm:$0xff] }
 0x39f   : > { %6291 = vst.msk [vmem:[%s13809_s12 + $0xc0] sm:$0xff] %vm841_vm5, %v6259_v18  ;;  %v14794_v35 = vrot.slane %v16328_v26, 4  ;;  %v7423_v46 = vld [vmem:[%s13809_s12 + $0x48] sm:$0xff]  ;;  %v8385_v12 = vsel %vm12116_vm13, %v14768_v39, %v14675_v59  ;;  %v5666_v16 = vsel %vm12039_vm8, 0, %v5665_v51  ;;  %v7634_v47 = vunpack.c.l.b16 %v7588_v43  ;;  %v6694_v3 = vld [vmem:[#allocation3 + $0xb8] sm:$0xf] }
 0x3a0   : > { %6636 = vst.msk [vmem:[%s13809_s12 + $0xa0] sm:$0xff] %vm841_vm5, %v6604_v41  ;;  %v9870_v18 = vor.u32 %v9869_v0, %v14781_v45  ;;  %v9873_v56 = vshll.u32 %v9775_v23, 16  ;;  %v6021_v5 = vrot.slane %v14399_v58, 4  ;;  %v7082_v59 = vrot.slane %v7081_v42, 4  ;;  %v14843_v41 = vld [vmem:[#allocation3 + $0x28] sm:$0xf] }
 0x3a1   : > { %7344 = vst.msk [vmem:[%s13809_s12 + $0x50] sm:$0xff] %vm841_vm5, %v7312_v38  ;;  %v6692_v40 = vld [vmem:[#allocation3 + $0xb0] sm:$0x1]  ;;  %v14829_v32 = vrot.slane %v9860_v15, 4  ;;  %v7653_v10 = vpack.c.b16 %v7635_v24, %v7634_v47  ;;  %v16330_v52 = vsel %vm12116_vm13, %v14617_v31, %v14595_v44  ;;  %v7594_v54 = vrot.slane %v14820_v50, 5  ;;  %v6707_v0 = vld [vmem:[%s13809_s12 + $0x58] sm:$0xff] }
 0x3a2   : > { %5667 = vst [vmem:[#allocation3 + $0xbc] sm:$0x1] %v5666_v16  ;;  %v7084_v39 = vshll.u32 %v6692_v40, 16  ;;  %v14839_v22 = vunpack.c.l.b16 %v16330_v52  ;;  %v6260_v58 = vadd.f32 %v14656_v53, %v6224_v9  ;;  %v7072_v42 = vrot.slane %v7071_v34, 4  ;;  %v6693_v44 = vld [vmem:[#allocation3 + $0xb4] sm:$0xf] }
 0x3a3   : > { %v7738_v55 = vpop.f32.mrf.mxu3  ;;  %v14846_v23 = vunpack.c.l.b16 %v8385_v12  ;;  %v8393_v31 = vor.u32 %v14806_v27, %v14794_v35  ;;  %v14851_v25 = vrot.slane %v9870_v18, 4  ;;  %v7098_v27 = vshll.u32 %v6694_v3, 16  ;;  %v14863_v16 = vld [vmem:[#allocation3 + $0x24] sm:$0xf]  ;;  %v7410_v47 = vld [vmem:[#allocation3 + $0xb0] sm:$0x1] }
 0x3a4   : > { %v7805_v33 = vadd.f32 %v7738_v55, %v7423_v46  ;;  %v6556_v38 = vpop.f32.mrf.mxu1  ;;  %v7086_v26 = vrot.slane %v7084_v39, 5  ;;  %v11916_v15 = vld [vmem:[#allocation3 + $0xc0] sm:$0xff]  ;;  %v9875_v46 = vrot.slane %v9873_v56, 5  ;;  %6292 = vst.msk [vmem:[%s13809_s12 + $0xc8] sm:$0xff] %vm841_vm5, %v6260_v58  ;;  %v14855_v55 = vpop.f32.mrf.mxu0  ;;  %v7077_v34 = vsel %vm12116_vm13, %v7072_v42, %v14763_v29  ;;  %v6353_v42 = vld [vmem:[%s13809_s12 + $0xb0] sm:$0xff] }
 0x3a5   : > { %v7249_v43 = vpop.f32.mrf.mxu2  ;;  %v6605_v24 = vadd.f32 %v6556_v38, %v6352_v2  ;;  %11651 = vmatmul.msk.bf16.gmra.mxu0 %vm841_vm5, %v11916_v15  ;;  %v7102_v12 = vshrl.u32 %v6694_v3, 16  ;;  %v7596_v40 = vrot.slane %v7594_v54, 4  ;;  %v7089_v18 = vshrl.u32 %v6693_v44, 16  ;;  %v6225_v3 = vld [vmem:[%s12021_s25 + $0xd0] sm:$0xff]  ;;  %v9778_v50 = vld [vmem:[#allocation3 + $0x2c] sm:$0x1] }
 0x3a6   : > { %7837 = vst.msk [vmem:[%s13809_s12 + $0x48] sm:$0xff] %vm841_vm5, %v7805_v33  ;;  %v7313_v51 = vadd.f32 %v7249_v43, %v6707_v0  ;;  %v7087_v35 = vsel %vm12116_vm13, %v7082_v59, %v7086_v26  ;;  %v9887_v29 = vshll.u32 %v14843_v41, 16  ;;  %v8711_v59 = vpack.c.b16 %v14846_v23, %v14839_v22  ;;  %v7408_v0 = vld [vmem:[#allocation3 + $0xa8] sm:$0xe] }
 0x3a7   : > { %6637 = vst.msk [vmem:[%s13809_s12 + $0xa8] sm:$0xff] %vm841_vm5, %v6605_v24  ;;  %v7143_v33 = vunpack.c.l.b16 %v7087_v35  ;;  %v7092_v9 = vshll.u32 %v6693_v44, 16  ;;  %v9866_v52 = vsel %vm12116_vm13, %v14829_v32, %v14781_v45  ;;  %v7142_v38 = vunpack.c.l.b16 %v7077_v34  ;;  %v6708_v24 = vld [vmem:[%s13809_s12 + $0x60] sm:$0xff] }
 0x3a8   : > { %11568 = vmatmul.msk.bf16.gmra.mxu3 %vm841_vm5, %v7653_v10  ;;  %7345 = vst.msk [vmem:[%s13809_s12 + $0x58] sm:$0xff] %vm841_vm5, %v7313_v51  ;;  %v7424_v56 = vld [vmem:[%s13809_s12 + $0x50] sm:$0xff]  ;;  %v8403_v10 = vor.u32 %v14824_v1, %v14810_v36  ;;  %v9891_v22 = vshrl.u32 %v14843_v41, 16  ;;  %v7597_v26 = vrot.slane %v7410_v47, 5  ;;  %v14886_v1 = vrot.slane %v7098_v27, 5 }
 0x3a9   : > { %v6189_v39 = vld [vmem:[#allocation3 + $0xbc] sm:$0x1]  ;;  %v7104_v23 = vrot.slane %v7102_v12, 4  ;;  %v6261_v15 = vadd.f32 %v14656_v53, %v6225_v3  ;;  %v7160_v45 = vpack.c.b16 %v7143_v33, %v7142_v38  ;;  %v9876_v32 = vsel %vm12116_vm13, %v14851_v25, %v9875_v46 }
 0x3aa   : > { %v6190_v43 = vsel %vm12006_vm4, %v6021_v5, %v6189_v39  ;;  %v9878_v5 = vshrl.u32 %v14863_v16, 16  ;;  %v9881_v41 = vshll.u32 %v14863_v16, 16  ;;  %v11552_v34 = vrot.slane %v7408_v0, 9  ;;  %v6226_v0 = vld [vmem:[%s12021_s25 + $0xd8] sm:$0xff] }
 0x3ab   : > { %v7741_v2 = vpop.f32.mrf.mxu3  ;;  %6191 = vst [vmem:[#allocation3 + $0xbc] sm:$0x1] %v6190_v43  ;;  %v7598_v35 = vsel %vm12537_vm2, %v7596_v40, %v7597_v26  ;;  %v7091_v27 = vrot.slane %v7089_v18, 4  ;;  %v7094_v12 = vrot.slane %v7092_v9, 5  ;;  %11536 = vmatmul.msk.bf16.gmra.mxu2 %vm841_vm5, %v7160_v45  ;;  %v14902_v46 = vrot.slane %v9887_v29, 5 }
 0x3ac   : > { %v7806_v58 = vadd.f32 %v7741_v2, %v7424_v56  ;;  %v6559_v44 = vpop.f32.mrf.mxu1  ;;  %6293 = vst.msk [vmem:[%s13809_s12 + $0xd0] sm:$0xff] %vm841_vm5, %v6261_v15  ;;  %v9893_v16 = vrot.slane %v9891_v22, 4  ;;  %v14904_v47 = vpop.f32.mrf.mxu0  ;;  %v7595_v40 = vsel %vm12537_vm2, %v11552_v34, %v7594_v54  ;;  %v7105_v18 = vor.u32 %v7104_v23, %v14886_v1  ;;  %11656 = vmatmul.msk.bf16.gmra.mxu1 %vm841_vm5, %v8711_v59  ;;  %v6354_v23 = vld [vmem:[%s13809_s12 + $0xb8] sm:$0xff] }
 0x3ad   : > { %v7252_v51 = vpop.f32.mrf.mxu2  ;;  %v6606_v33 = vadd.f32 %v6559_v44, %v6353_v42  ;;  %v8394_v56 = vrot.slane %v8393_v31, 4  ;;  %v14913_v2 = vrot.slane %v8406_v49, 5  ;;  %v7637_v29 = vunpack.c.l.b16 %v7598_v35  ;;  %v6709_v35 = vld [vmem:[%s13809_s12 + $0x68] sm:$0xff] }
 0x3ae   : > { %7838 = vst.msk [vmem:[%s13809_s12 + $0x50] sm:$0xff] %vm841_vm5, %v7806_v58  ;;  %v7314_v25 = vadd.f32 %v7252_v51, %v6708_v24  ;;  %v14918_v39 = vrot.slane %v8403_v10, 4  ;;  %v10240_v9 = vunpack.c.l.b16 %v9876_v32  ;;  %v14920_v3 = vrot.slane %v9878_v5, 4  ;;  %v8226_v58 = vld [vmem:[#allocation3 + $0x4c] sm:$0xf] }
 0x3af   : > { %6638 = vst.msk [vmem:[%s13809_s12 + $0xb0] sm:$0xff] %vm841_vm5, %v6606_v33  ;;  %v7425_v54 = vld [vmem:[%s13809_s12 + $0x58] sm:$0xff]  ;;  %v7095_v60 = vor.u32 %v7094_v12, %v7091_v27  ;;  %v10239_v49 = vunpack.c.l.b16 %v9866_v52  ;;  %v9883_v38 = vrot.slane %v9881_v41, 5  ;;  %v7636_v59 = vunpack.c.l.b16 %v7595_v40  ;;  %v14926_v10 = vld [vmem:[#allocation3 + $0xb8] sm:$0xf] }
 0x3b0   : > { %7346 = vst.msk [vmem:[%s13809_s12 + $0x60] sm:$0xff] %vm841_vm5, %v7314_v25  ;;  %v9894_v42 = vor.u32 %v9893_v16, %v14902_v46  ;;  %v6262_v26 = vadd.f32 %v14656_v53, %v6226_v0  ;;  %v7106_v15 = vrot.slane %v7105_v18, 4  ;;  %v8399_v52 = vsel %vm12116_vm13, %v8394_v56, %v14810_v36  ;;  %v8225_v24 = vld [vmem:[#allocation3 + $0x48] sm:$0xf] }
 0x3b1   : > { %v9897_v32 = vshll.u32 %v9778_v50, 16  ;;  %v7654_v5 = vpack.c.b16 %v7637_v29, %v7636_v59  ;;  %v8409_v41 = vsel %vm12116_vm13, %v14918_v39, %v14913_v2  ;;  %v10271_v44 = vpack.c.b16 %v10240_v9, %v10239_v49  ;;  %v14954_v50 = vld [vmem:[#allocation3 + $0x10] sm:$0xf]  ;;  %v9780_v49 = vld [vmem:[#allocation3 + $0x34] sm:$0xf] }
 0x3b2   : > { %v6695_v22 = vld [vmem:[#allocation3 + $0xbc] sm:$0x1]  ;;  %v8420_v51 = vshll.u32 %v8226_v58, 16  ;;  %v7096_v12 = vrot.slane %v7095_v60, 4  ;;  %v7601_v36 = vrot.slane %v14926_v10, 5  ;;  %v8424_v25 = vshrl.u32 %v8226_v58, 16 }
 0x3b3   : > { %v7743_v31 = vpop.f32.mrf.mxu3  ;;  %v7108_v45 = vshll.u32 %v6695_v22, 16  ;;  %6294 = vst.msk [vmem:[%s13809_s12 + $0xd8] sm:$0xff] %vm841_vm5, %v6262_v26  ;;  %v9884_v18 = vor.u32 %v9883_v38, %v14920_v3  ;;  %v9895_v56 = vrot.slane %v9894_v42, 4  ;;  %v8411_v9 = vshrl.u32 %v8225_v24, 16  ;;  %v6227_v22 = vld [vmem:[%s12021_s25 + $0xe0] sm:$0xff] }
 0x3b4   : > { %v7807_v43 = vadd.f32 %v7743_v31, %v7425_v54  ;;  %v6561_v34 = vpop.f32.mrf.mxu1  ;;  %v14946_v2 = vpop.f32.mrf.mxu0  ;;  %v7101_v29 = vsel %vm12116_vm13, %v7096_v12, %v14886_v1  ;;  %v9899_v54 = vrot.slane %v9897_v32, 5  ;;  %v7413_v31 = vld [vmem:[#allocation3 + $0xbc] sm:$0x1]  ;;  %v8414_v60 = vshll.u32 %v8225_v24, 16 }
 0x3b5   : > { %v7254_v27 = vpop.f32.mrf.mxu2  ;;  %v7110_v33 = vrot.slane %v7108_v45, 5  ;;  %v6607_v16 = vadd.f32 %v6561_v34, %v6354_v23  ;;  %11784 = vmatmul.msk.bf16.vlgmr.msra.gmra.mxu0 %vm841_vm5, %v10271_v44  ;;  %v8684_v38 = vunpack.c.l.b16 %v8399_v52  ;;  %v7603_v0 = vrot.slane %v7601_v36, 4  ;;  %v7411_v23 = vld [vmem:[#allocation3 + $0xb4] sm:$0xe]  ;;  %v6355_v45 = vld [vmem:[%s13809_s12 + $0xc0] sm:$0xff] }
 0x3b6   : > { %7839 = vst.msk [vmem:[%s13809_s12 + $0x58] sm:$0xff] %vm841_vm5, %v7807_v43  ;;  %v7315_v40 = vadd.f32 %v7254_v27, %v6709_v35  ;;  %v14961_v43 = vrot.slane %v8420_v51, 5  ;;  %v8426_v59 = vrot.slane %v8424_v25, 4  ;;  %v7144_v42 = vunpack.c.l.b16 %v7101_v29  ;;  %v8227_v34 = vld [vmem:[#allocation3 + $0x50] sm:$0x1] }
 0x3b7   : > { %v7111_v39 = vsel %vm12116_vm13, %v7106_v15, %v7110_v33  ;;  %6639 = vst.msk [vmem:[%s13809_s12 + $0xb8] sm:$0xff] %vm841_vm5, %v6607_v16  ;;  %v7426_v1 = vld [vmem:[%s13809_s12 + $0x60] sm:$0xff]  ;;  %v8685_v26 = vunpack.c.l.b16 %v8409_v41  ;;  %v6263_v15 = vadd.f32 %v14656_v53, %v6227_v22  ;;  %v7604_v32 = vrot.slane %v7413_v31, 5  ;;  %v6710_v33 = vld [vmem:[%s13809_s12 + $0x70] sm:$0xff] }
 0x3b8   : > { %11569 = vmatmul.msk.bf16.gmra.mxu3 %vm841_vm5, %v7654_v5  ;;  %v7145_v3 = vunpack.c.l.b16 %v7111_v39  ;;  %7347 = vst.msk [vmem:[%s13809_s12 + $0x68] sm:$0xff] %vm841_vm5, %v7315_v40  ;;  %v8928_v5 = vld [vmem:[#allocation3 + $0xc] sm:$0xe]  ;;  %v9058_v44 = vrot.slane %v14954_v50, 5  ;;  %v9885_v52 = vrot.slane %v9884_v18, 4  ;;  %v9900_v24 = vsel %vm12116_vm13, %v9895_v56, %v9899_v54 }
 0x3b9   : > { %v8413_v35 = vrot.slane %v8411_v9, 4  ;;  %v8416_v41 = vrot.slane %v8414_v60, 5  ;;  %v9911_v27 = vshll.u32 %v9780_v49, 16  ;;  %v11553_v16 = vrot.slane %v7411_v23, 9  ;;  %6295 = vst.msk [vmem:[%s13809_s12 + $0xe0] sm:$0xff] %vm841_vm5, %v6263_v15 }
 0x3ba   : > { %v7161_v51 = vpack.c.b16 %v7145_v3, %v7144_v42  ;;  %v7605_v40 = vsel %vm12537_vm2, %v7603_v0, %v7604_v32  ;;  %v8427_v18 = vor.u32 %v8426_v59, %v14961_v43  ;;  %v9779_v56 = vld [vmem:[#allocation3 + $0x30] sm:$0xf]  ;;  %v9915_v29 = vshrl.u32 %v9780_v49, 16 }
 0x3bb   : > { %v7746_v58 = vpop.f32.mrf.mxu3  ;;  %v8712_v9 = vpack.c.b16 %v8685_v26, %v8684_v38  ;;  %v11669_v54 = vrot.slane %v8928_v5, 9  ;;  %v7602_v31 = vsel %vm12537_vm2, %v11553_v16, %v7601_v36  ;;  %v8430_v60 = vshll.u32 %v8227_v34, 16 }
 0x3bc   : > { %v7808_v10 = vadd.f32 %v7746_v58, %v7426_v1  ;;  %v6564_v12 = vpop.f32.mrf.mxu1  ;;  %11537 = vmatmul.msk.bf16.gmra.mxu2 %vm841_vm5, %v7161_v51  ;;  %v14978_v3 = vpop.f32.mrf.mxu0  ;;  %v8930_v1 = vld [vmem:[#allocation3 + $0x14] sm:$0x1]  ;;  %v9060_v58 = vrot.slane %v9058_v44, 4  ;;  %v9890_v49 = vsel %vm12116_vm13, %v9885_v52, %v14902_v46  ;;  %v7639_v38 = vunpack.c.l.b16 %v7605_v40 }
 0x3bd   : > { %v7257_v25 = vpop.f32.mrf.mxu2  ;;  %v6608_v39 = vadd.f32 %v6564_v12, %v6355_v45  ;;  %11657 = vmatmul.msk.bf16.gmra.mxu1 %vm841_vm5, %v8712_v9  ;;  %v10242_v0 = vunpack.c.l.b16 %v9900_v24  ;;  %v9902_v59 = vshrl.u32 %v9779_v56, 16  ;;  %v9905_v22 = vshll.u32 %v9779_v56, 16  ;;  %v6228_v46 = vld [vmem:[%s12021_s25 + $0xe8] sm:$0xff] }
 0x3be   : > { %7840 = vst.msk [vmem:[%s13809_s12 + $0x60] sm:$0xff] %vm841_vm5, %v7808_v10  ;;  %v7316_v50 = vadd.f32 %v7257_v25, %v6710_v33  ;;  %v8417_v42 = vor.u32 %v8416_v41, %v8413_v35  ;;  %v8428_v26 = vrot.slane %v8427_v18, 4  ;;  %v14991_v23 = vrot.slane %v9911_v27, 5  ;;  %v6356_v24 = vld [vmem:[%s13809_s12 + $0xc8] sm:$0xff]  ;;  %v8229_v33 = vld [vmem:[#allocation3 + $0x58] sm:$0xf] }
 0x3bf   : > { %6640 = vst.msk [vmem:[%s13809_s12 + $0xc0] sm:$0xff] %vm841_vm5, %v6608_v39  ;;  %v7427_v36 = vld [vmem:[%s13809_s12 + $0x68] sm:$0xff]  ;;  %v9917_v15 = vrot.slane %v9915_v29, 4  ;;  %v7638_v32 = vunpack.c.l.b16 %v7602_v31  ;;  %v9061_v5 = vrot.slane %v8930_v1, 5  ;;  %v6264_v52 = vadd.f32 %v14656_v53, %v6228_v46  ;;  %v9781_v27 = vld [vmem:[#allocation3 + $0x38] sm:$0x1] }
 0x3c0   : > { %7348 = vst.msk [vmem:[%s13809_s12 + $0x70] sm:$0xff] %vm841_vm5, %v7316_v50  ;;  %v8432_v51 = vrot.slane %v8430_v60, 5  ;;  %v9059_v34 = vsel %vm12537_vm2, %v11669_v54, %v9058_v44  ;;  %v10241_v12 = vunpack.c.l.b16 %v9890_v49  ;;  %v9904_v25 = vrot.slane %v9902_v59, 4  ;;  %v6711_v18 = vld [vmem:[%s13809_s12 + $0x78] sm:$0xff]  ;;  %v8228_v9 = vld [vmem:[#allocation3 + $0x54] sm:$0xf] }
 0x3c1   : > { %v7655_v35 = vpack.c.b16 %v7639_v38, %v7638_v32  ;;  %v9062_v41 = vsel %vm12537_vm2, %v9060_v58, %v9061_v5  ;;  %v9907_v16 = vrot.slane %v9905_v22, 5  ;;  %v8418_v29 = vrot.slane %v8417_v42, 4  ;;  %6296 = vst.msk [vmem:[%s13809_s12 + $0xe8] sm:$0xff] %vm841_vm5, %v6264_v52  ;;  %v15017_v22 = vld [vmem:[#allocation3 + $0x1c] sm:$0xf] }
 0x3c2   : > { %v8433_v44 = vsel %vm12116_vm13, %v8428_v26, %v8432_v51  ;;  %v10272_v39 = vpack.c.b16 %v10242_v0, %v10241_v12  ;;  %v9918_v50 = vor.u32 %v9917_v15, %v14991_v23  ;;  %v8444_v60 = vshll.u32 %v8229_v33, 16  ;;  %v6229_v32 = vld [vmem:[%s12021_s25 + $0xf0] sm:$0xff]  ;;  %v9783_v12 = vld [vmem:[#allocation3 + $0x40] sm:$0xf] }
 0x3c3   : > { %v7748_v10 = vpop.f32.mrf.mxu3  ;;  %v8448_v1 = vshrl.u32 %v8229_v33, 16  ;;  %v9921_v49 = vshll.u32 %v9781_v27, 16  ;;  %v8423_v38 = vsel %vm12116_vm13, %v8418_v29, %v14961_v43  ;;  %v9171_v0 = vunpack.c.l.b16 %v9062_v41  ;;  %v6357_v33 = vld [vmem:[%s13809_s12 + $0xd0] sm:$0xff]  ;;  %v8933_v41 = vld [vmem:[#allocation3 + $0x20] sm:$0x1] }
 0x3c4   : > { %v7809_v45 = vadd.f32 %v7748_v10, %v7427_v36  ;;  %v6566_v40 = vpop.f32.mrf.mxu1  ;;  %v15009_v58 = vpop.f32.mrf.mxu0  ;;  %v8435_v59 = vshrl.u32 %v8228_v9, 16  ;;  %v9908_v36 = vor.u32 %v9907_v16, %v9904_v25  ;;  %v8687_v26 = vunpack.c.l.b16 %v8433_v44  ;;  %v6712_v44 = vld [vmem:[%s13809_s12 + $0x80] sm:$0xff] }
 0x3c5   : > { %v7259_v56 = vpop.f32.mrf.mxu2  ;;  %v6609_v54 = vadd.f32 %v6566_v40, %v6356_v24  ;;  %11785 = vmatmul.msk.bf16.gmra.mxu0 %vm841_vm5, %v10272_v39  ;;  %v9170_v15 = vunpack.c.l.b16 %v9059_v34  ;;  %v8438_v46 = vshll.u32 %v8228_v9, 16  ;;  %v15023_v52 = vrot.slane %v8444_v60, 5  ;;  %v8931_v24 = vld [vmem:[#allocation3 + $0x18] sm:$0xe]  ;;  %v8230_v9 = vld [vmem:[#allocation3 + $0x5c] sm:$0x1] }
 0x3c6   : > { %7841 = vst.msk [vmem:[%s13809_s12 + $0x68] sm:$0xff] %vm841_vm5, %v7809_v45  ;;  %v7317_v31 = vadd.f32 %v7259_v56, %v6711_v18  ;;  %v9919_v45 = vrot.slane %v9918_v50, 4  ;;  %v8450_v43 = vrot.slane %v8448_v1, 4  ;;  %v6265_v51 = vadd.f32 %v14656_v53, %v6229_v32  ;;  %v9782_v18 = vld [vmem:[#allocation3 + $0x3c] sm:$0xf] }
 0x3c7   : > { %6641 = vst.msk [vmem:[%s13809_s12 + $0xc8] sm:$0xff] %vm841_vm5, %v6609_v54  ;;  %v7428_v10 = vld [vmem:[%s13809_s12 + $0x70] sm:$0xff]  ;;  %v9065_v27 = vrot.slane %v15017_v22, 5  ;;  %v9923_v25 = vrot.slane %v9921_v49, 5  ;;  %v9202_v34 = vpack.c.b16 %v9171_v0, %v9170_v15  ;;  %v8437_v16 = vrot.slane %v8435_v59, 4 }
 0x3c8   : > { %11570 = vmatmul.msk.bf16.gmra.mxu3 %vm841_vm5, %v7655_v35  ;;  %7349 = vst.msk [vmem:[%s13809_s12 + $0x78] sm:$0xff] %vm841_vm5, %v7317_v31  ;;  %v8686_v35 = vunpack.c.l.b16 %v8423_v38  ;;  %v9909_v40 = vrot.slane %v9908_v36, 4  ;;  %v9935_v54 = vshll.u32 %v9783_v12, 16  ;;  %v9939_v31 = vshrl.u32 %v9783_v12, 16 }
 0x3c9   : > { %v9924_v50 = vsel %vm12116_vm13, %v9919_v45, %v9923_v25  ;;  %6297 = vst.msk [vmem:[%s13809_s12 + $0xf0] sm:$0xff] %vm841_vm5, %v6265_v51  ;;  %v8440_v49 = vrot.slane %v8438_v46, 5  ;;  %v8451_v38 = vor.u32 %v8450_v43, %v15023_v52  ;;  %v11670_v59 = vrot.slane %v8931_v24, 9  ;;  %v6230_v24 = vld [vmem:[%s12021_s25 + $0xf8] sm:$0xff] }
 0x3ca   : > { %v8713_v29 = vpack.c.b16 %v8687_v26, %v8686_v35  ;;  %v9067_v22 = vrot.slane %v9065_v27, 4  ;;  %v8454_v36 = vshll.u32 %v8230_v9, 16  ;;  %v9926_v26 = vshrl.u32 %v9782_v18, 16 }
 0x3cb   : > { %v7751_v42 = vpop.f32.mrf.mxu3  ;;  %v10244_v45 = vunpack.c.l.b16 %v9924_v50  ;;  %v9929_v32 = vshll.u32 %v9782_v18, 16  ;;  %v9941_v43 = vrot.slane %v9939_v31, 4  ;;  %v8441_v12 = vor.u32 %v8440_v49, %v8437_v16  ;;  %v6713_v16 = vld [vmem:[%s13809_s12 + $0x88] sm:$0xff]  ;;  %v15066_v49 = vld [vmem:[#allocation3 + $0x28] sm:$0xf] }
 0x3cc   : > { %v7810_v5 = vadd.f32 %v7751_v42, %v7428_v10  ;;  %v6569_v56 = vpop.f32.mrf.mxu1  ;;  %11686 = vmatmul.msk.bf16.vlgmr.msra.gmra.mxu2 %vm841_vm5, %v9202_v34  ;;  %v15037_v0 = vpop.f32.mrf.mxu0  ;;  %v9068_v10 = vrot.slane %v8933_v41, 5  ;;  %v9914_v42 = vsel %vm12116_vm13, %v9909_v40, %v14991_v23  ;;  %v6266_v35 = vadd.f32 %v14656_v53, %v6230_v24  ;;  %v6358_v41 = vld [vmem:[%s13809_s12 + $0xd8] sm:$0xff]  ;;  %v11917_v23 = vld [vmem:[#allocation3 + $0x18] sm:$0xff] }
 0x3cd   : > { %v7262_v39 = vpop.f32.mrf.mxu2  ;;  %v6610_v60 = vadd.f32 %v6569_v56, %v6357_v33  ;;  %11658 = vmatmul.msk.bf16.gmra.mxu1 %vm841_vm5, %v8713_v29  ;;  %v8452_v33 = vrot.slane %v8451_v38, 4  ;;  %v10243_v25 = vunpack.c.l.b16 %v9914_v42  ;;  %v8456_v34 = vrot.slane %v8454_v36, 5  ;;  %v8232_v56 = vld [vmem:[#allocation3 + $0x64] sm:$0xf] }
 0x3ce   : > { %7842 = vst.msk [vmem:[%s13809_s12 + $0x70] sm:$0xff] %vm841_vm5, %v7810_v5  ;;  %v7318_v1 = vadd.f32 %v7262_v39, %v6712_v44  ;;  %v15048_v5 = vrot.slane %v9935_v54, 5  ;;  %v9066_v40 = vsel %vm12537_vm2, %v11670_v59, %v9065_v27  ;;  %v9069_v18 = vsel %vm12537_vm2, %v9067_v22, %v9068_v10  ;;  %v9784_v29 = vld [vmem:[#allocation3 + $0x44] sm:$0x1]  ;;  %v8231_v59 = vld [vmem:[#allocation3 + $0x60] sm:$0xf] }
 0x3cf   : > { %6642 = vst.msk [vmem:[%s13809_s12 + $0xd0] sm:$0xff] %vm841_vm5, %v6610_v60  ;;  %v7429_v15 = vld [vmem:[%s13809_s12 + $0x78] sm:$0xff]  ;;  %v10273_v9 = vpack.c.b16 %v10244_v45, %v10243_v25  ;;  %v9928_v53 = vrot.slane %v9926_v26, 4  ;;  %v9931_v50 = vrot.slane %v9929_v32, 5  ;;  %v8442_v27 = vrot.slane %v8441_v12, 4  ;;  %v7892_v12 = vld [vmem:[%s13809_s12] sm:$0xff] }
 0x3d0   : > { %7350 = vst.msk [vmem:[%s13809_s12 + $0x80] sm:$0xff] %vm841_vm5, %v7318_v1  ;;  %v9942_v54 = vor.u32 %v9941_v43, %v15048_v5  ;;  %v8457_v1 = vsel %vm12116_vm13, %v8452_v33, %v8456_v34  ;;  %v8468_v22 = vshll.u32 %v8232_v56, 16  ;;  %v8472_v36 = vshrl.u32 %v8232_v56, 16  ;;  %v9786_v56 = vld [vmem:[#allocation3 + $0x4c] sm:$0xf] }
 0x3d1   : > { %6298 = vst.msk [vmem:[%s13809_s12 + $0xf8] sm:$0xff] %vm841_vm5, %v6266_v35  ;;  %v9945_v10 = vshll.u32 %v9784_v29, 16  ;;  %v8447_v42 = vsel %vm12116_vm13, %v8442_v27, %v15023_v52  ;;  %v9172_v26 = vunpack.c.l.b16 %v9066_v40  ;;  %v8689_v32 = vunpack.c.l.b16 %v8457_v1  ;;  %v6359_v52 = vld [vmem:[%s13809_s12 + $0xe0] sm:$0xff] }
 0x3d2   : > { %v9072_v43 = vrot.slane %v15066_v49, 5  ;;  %v9932_v24 = vor.u32 %v9931_v50, %v9928_v53  ;;  %v8459_v35 = vshrl.u32 %v8231_v59, 16  ;;  %v8688_v25 = vunpack.c.l.b16 %v8447_v42  ;;  %v8233_v1 = vld [vmem:[#allocation3 + $0x68] sm:$0x1]  ;;  %v8934_v49 = vld [vmem:[#allocation3 + $0x24] sm:$0xe] }
 0x3d3   : > { %v7753_v46 = vpop.f32.mrf.mxu3  ;;  %v15083_v34 = vrot.slane %v8468_v22, 5  ;;  %v8474_v40 = vrot.slane %v8472_v36, 4  ;;  %v9963_v22 = vshrl.u32 %v9786_v56, 16 }
 0x3d4   : > { %v7811_v51 = vadd.f32 %v7753_v46, %v7429_v15  ;;  %v6571_v44 = vpop.f32.mrf.mxu1  ;;  %v15068_v38 = vpop.f32.mrf.mxu0  ;;  %v9173_v15 = vunpack.c.l.b16 %v9069_v18  ;;  %v9947_v18 = vrot.slane %v9945_v10, 5  ;;  %v9074_v50 = vrot.slane %v9072_v43, 4 }
 0x3d5   : > { %v7264_v39 = vpop.f32.mrf.mxu2  ;;  %v6611_v31 = vadd.f32 %v6571_v44, %v6358_v41  ;;  %11786 = vmatmul.msk.bf16.gmra.mxu0 %vm841_vm5, %v10273_v9  ;;  %v8462_v41 = vshll.u32 %v8231_v59, 16  ;;  %v8936_v44 = vld [vmem:[#allocation3 + $0x2c] sm:$0x1]  ;;  %v6714_v9 = vld [vmem:[%s13809_s12 + $0x90] sm:$0xff]  ;;  %v9959_v59 = vshll.u32 %v9786_v56, 16  ;;  %v8461_v10 = vrot.slane %v8459_v35, 4 }
 0x3d6   : > { %7843 = vst.msk [vmem:[%s13809_s12 + $0x78] sm:$0xff] %vm841_vm5, %v7811_v51  ;;  %v7319_v60 = vadd.f32 %v7264_v39, %v6713_v16  ;;  %v9943_v51 = vrot.slane %v9942_v54, 4  ;;  %v9203_v29 = vpack.c.b16 %v9173_v15, %v9172_v26  ;;  %v8714_v39 = vpack.c.b16 %v8689_v32, %v8688_v25 }
 0x3d7   : > { %6643 = vst.msk [vmem:[%s13809_s12 + $0xd8] sm:$0xff] %vm841_vm5, %v6611_v31  ;;  %v7430_v46 = vld [vmem:[%s13809_s12 + $0x80] sm:$0xff]  ;;  %v9933_v54 = vrot.slane %v9932_v24, 4  ;;  %v8464_v42 = vrot.slane %v8462_v41, 5  ;;  %v8475_v26 = vor.u32 %v8474_v40, %v15083_v34  ;;  %v9075_v15 = vrot.slane %v8936_v44, 5 }
 0x3d8   : > { %11767 = vmatmul.msk.bf16.vlgmr.msra.gmra.mxu3 %vm841_vm5, %v11917_v23  ;;  %7351 = vst.msk [vmem:[%s13809_s12 + $0x88] sm:$0xff] %vm841_vm5, %v7319_v60  ;;  %v8146_v23 = vadd.f32 %v14189_v21, %v7892_v12  ;;  %v9948_v21 = vsel %vm12116_vm13, %v9943_v51, %v9947_v18  ;;  %v9785_v31 = vld [vmem:[#allocation3 + $0x48] sm:$0xf]  ;;  %v8478_v12 = vshll.u32 %v8233_v1, 16  ;;  %v15108_v25 = vrot.slane %v9959_v59, 5  ;;  %v6360_v18 = vld [vmem:[%s13809_s12 + $0xe8] sm:$0xff] }
 0x3d9   : > { %v9953_v32 = vshll.u32 %v9785_v31, 16  ;;  %v9076_v35 = vsel %vm12537_vm2, %v9074_v50, %v9075_v15  ;;  %v10246_v41 = vunpack.c.l.b16 %v9948_v21  ;;  %v9965_v40 = vrot.slane %v9963_v22, 4  ;;  %v6715_v21 = vld [vmem:[%s13809_s12 + $0x98] sm:$0xff]  ;;  %v9787_v1 = vld [vmem:[#allocation3 + $0x50] sm:$0x1] }
 0x3da   : > { %8178 = vst.msk [vmem:[%s13809_s12] sm:$0xff] %vm841_vm5, %v8146_v23  ;;  %v7893_v23 = vld [vmem:[%s13809_s12 + $0x8] sm:$0xff]  ;;  %v8465_v56 = vor.u32 %v8464_v42, %v8461_v10 }
 0x3db   : > { %v7756_v45 = vpop.f32.mrf.mxu3  ;;  %v9955_v50 = vrot.slane %v9953_v32, 5  ;;  %v9966_v22 = vor.u32 %v9965_v40, %v15108_v25 }
 0x3dc   : > { %v7812_v33 = vadd.f32 %v7756_v45, %v7430_v46  ;;  %v6574_v16 = vpop.f32.mrf.mxu1  ;;  %11687 = vmatmul.msk.bf16.gmra.mxu2 %vm841_vm5, %v9203_v29  ;;  %v15093_v36 = vpop.f32.mrf.mxu0  ;;  %v9938_v46 = vsel %vm12116_vm13, %v9933_v54, %v15048_v5  ;;  %v9950_v45 = vshrl.u32 %v9785_v31, 16  ;;  %v8147_v5 = vadd.f32 %v14225_v57, %v7893_v23  ;;  %v7894_v23 = vld [vmem:[%s13809_s12 + $0x10] sm:$0xff] }
 0x3dd   : > { %v7267_v53 = vpop.f32.mrf.mxu2  ;;  %v6612_v60 = vadd.f32 %v6574_v16, %v6359_v52  ;;  %11659 = vmatmul.msk.bf16.gmra.mxu1 %vm841_vm5, %v8714_v39  ;;  %v8476_v29 = vrot.slane %v8475_v26, 4  ;;  %v10245_v16 = vunpack.c.l.b16 %v9938_v46  ;;  %v11918_v39 = vld [vmem:[#allocation3 + $0x24] sm:$0xff]  ;;  %v9175_v57 = vunpack.c.l.b16 %v9076_v35 }
 0x3de   : > { %7844 = vst.msk [vmem:[%s13809_s12 + $0x80] sm:$0xff] %vm841_vm5, %v7812_v33  ;;  %v7320_v27 = vadd.f32 %v7267_v53, %v6714_v9  ;;  %v11671_v33 = vrot.slane %v8934_v49, 9  ;;  %v8235_v9 = vld [vmem:[#allocation3 + $0x70] sm:$0xf]  ;;  %v9952_v53 = vrot.slane %v9950_v45, 4  ;;  %v8466_v42 = vrot.slane %v8465_v56, 4 }
 0x3df   : > { %6644 = vst.msk [vmem:[%s13809_s12 + $0xe0] sm:$0xff] %vm841_vm5, %v6612_v60  ;;  %v7431_v24 = vld [vmem:[%s13809_s12 + $0x88] sm:$0xff]  ;;  %v8480_v60 = vrot.slane %v8478_v12, 5  ;;  %v8492_v15 = vshll.u32 %v8235_v9, 16  ;;  %v8496_v46 = vshrl.u32 %v8235_v9, 16 }
 0x3e0   : > { %7352 = vst.msk [vmem:[%s13809_s12 + $0x90] sm:$0xff] %vm841_vm5, %v7320_v27  ;;  %v9073_v44 = vsel %vm12537_vm2, %v11671_v33, %v9072_v43  ;;  %v10274_v27 = vpack.c.b16 %v10246_v41, %v10245_v16  ;;  %v8234_v45 = vld [vmem:[#allocation3 + $0x6c] sm:$0xf]  ;;  %v9956_v32 = vor.u32 %v9955_v50, %v9952_v53  ;;  %v8471_v33 = vsel %vm12116_vm13, %v8466_v42, %v15083_v34  ;;  %v15134_v41 = vld [vmem:[#allocation3 + $0x34] sm:$0xf] }
 0x3e1   : > { %8179 = vst.msk [vmem:[%s13809_s12 + $0x8] sm:$0xff] %vm841_vm5, %v8147_v5  ;;  %v9174_v59 = vunpack.c.l.b16 %v9073_v44  ;;  %v8481_v26 = vsel %vm12116_vm13, %v8476_v29, %v8480_v60  ;;  %v9967_v5 = vrot.slane %v9966_v22, 4  ;;  %v9789_v56 = vld [vmem:[#allocation3 + $0x58] sm:$0xf]  ;;  %v8483_v44 = vshrl.u32 %v8234_v45, 16 }
 0x3e2   : > { %v8691_v40 = vunpack.c.l.b16 %v8481_v26  ;;  %v6361_v29 = vld [vmem:[%s13809_s12 + $0xf0] sm:$0xff]  ;;  %v8486_v16 = vshll.u32 %v8234_v45, 16  ;;  %v8498_v9 = vrot.slane %v8496_v46, 4  ;;  %v8690_v34 = vunpack.c.l.b16 %v8471_v33 }
 0x3e3   : > { %v7758_v51 = vpop.f32.mrf.mxu3  ;;  %v9204_v35 = vpack.c.b16 %v9175_v57, %v9174_v59  ;;  %v9079_v53 = vrot.slane %v15134_v41, 5  ;;  %v9957_v50 = vrot.slane %v9956_v32, 4  ;;  %v9983_v57 = vshll.u32 %v9789_v56, 16  ;;  %v8236_v59 = vld [vmem:[#allocation3 + $0x74] sm:$0x1] }
 0x3e4   : > { %v7813_v52 = vadd.f32 %v7758_v51, %v7431_v24  ;;  %v6576_v54 = vpop.f32.mrf.mxu1  ;;  %v15121_v10 = vpop.f32.mrf.mxu0  ;;  %v9969_v24 = vshll.u32 %v9787_v1, 16  ;;  %v8485_v26 = vrot.slane %v8483_v44, 4  ;;  %v8939_v45 = vld [vmem:[#allocation3 + $0x38] sm:$0x1]  ;;  %v8937_v32 = vld [vmem:[#allocation3 + $0x30] sm:$0xe] }
 0x3e5   : > { %v7269_v31 = vpop.f32.mrf.mxu2  ;;  %v6613_v49 = vadd.f32 %v6576_v54, %v6360_v18  ;;  %11787 = vmatmul.msk.bf16.gmra.mxu0 %vm841_vm5, %v10274_v27  ;;  %v8148_v18 = vadd.f32 %v14269_v7, %v7894_v23  ;;  %v9788_v7 = vld [vmem:[#allocation3 + $0x54] sm:$0xf]  ;;  %v9987_v27 = vshrl.u32 %v9789_v56, 16  ;;  %v8502_v23 = vshll.u32 %v8236_v59, 16 }
 0x3e6   : > { %7845 = vst.msk [vmem:[%s13809_s12 + $0x88] sm:$0xff] %vm841_vm5, %v7813_v52  ;;  %v7321_v43 = vadd.f32 %v7269_v31, %v6715_v21  ;;  %v9971_v54 = vrot.slane %v9969_v24, 5  ;;  %v6716_v31 = vld [vmem:[%s13809_s12 + $0xa0] sm:$0xff]  ;;  %v9081_v24 = vrot.slane %v9079_v53, 4  ;;  %v9977_v33 = vshll.u32 %v9788_v7, 16  ;;  %v11919_v44 = vld [vmem:[#allocation3 + $0x30] sm:$0xff] }
 0x3e7   : > { %6645 = vst.msk [vmem:[%s13809_s12 + $0xe8] sm:$0xff] %vm841_vm5, %v6613_v49  ;;  %v7432_v51 = vld [vmem:[%s13809_s12 + $0x90] sm:$0xff]  ;;  %v8715_v49 = vpack.c.b16 %v8691_v40, %v8690_v34  ;;  %v15162_v40 = vrot.slane %v9983_v57, 5  ;;  %v9082_v56 = vrot.slane %v8939_v45, 5 }
 0x3e8   : > { %11768 = vmatmul.msk.bf16.gmra.mxu3 %vm841_vm5, %v11918_v39  ;;  %7353 = vst.msk [vmem:[%s13809_s12 + $0x98] sm:$0xff] %vm841_vm5, %v7321_v43  ;;  %v15139_v39 = vrot.slane %v8492_v15, 5  ;;  %v9972_v22 = vsel %vm12116_vm13, %v9967_v5, %v9971_v54  ;;  %v8488_v15 = vrot.slane %v8486_v16, 5  ;;  %v9989_v5 = vrot.slane %v9987_v27, 4  ;;  %v6717_v27 = vld [vmem:[%s13809_s12 + $0xa8] sm:$0xff] }
 0x3e9   : > { %8180 = vst.msk [vmem:[%s13809_s12 + $0x10] sm:$0xff] %vm841_vm5, %v8148_v18  ;;  %v9083_v54 = vsel %vm12537_vm2, %v9081_v24, %v9082_v56 }
 0x3ea   : > { %v8499_v46 = vor.u32 %v8498_v9, %v15139_v39  ;;  %v8489_v16 = vor.u32 %v8488_v15, %v8485_v26  ;;  %v11672_v9 = vrot.slane %v8937_v32, 9  ;;  %v9990_v59 = vor.u32 %v9989_v5, %v15162_v40 }
 0x3eb   : > { %v7761_v12 = vpop.f32.mrf.mxu3 }
 0x3ec   : > { %v7814_v52 = vadd.f32 %v7761_v12, %v7432_v51  ;;  %v6579_v21 = vpop.f32.mrf.mxu1  ;;  %11688 = vmatmul.msk.bf16.gmra.mxu2 %vm841_vm5, %v9204_v35  ;;  %v15150_v42 = vpop.f32.mrf.mxu0  ;;  %v9962_v51 = vsel %vm12116_vm13, %v9957_v50, %v15108_v25  ;;  %v9974_v12 = vshrl.u32 %v9788_v7, 16  ;;  %v8500_v25 = vrot.slane %v8499_v46, 4  ;;  %v9790_v50 = vld [vmem:[#allocation3 + $0x5c] sm:$0x1]  ;;  %v7895_v7 = vld [vmem:[%s13809_s12 + $0x18] sm:$0xff] }
 0x3ed   : > { %v7272_v60 = vpop.f32.mrf.mxu2  ;;  %v6614_v1 = vadd.f32 %v6579_v21, %v6361_v29  ;;  %11660 = vmatmul.msk.bf16.gmra.mxu1 %vm841_vm5, %v8715_v49  ;;  %v6362_v29 = vld [vmem:[%s13809_s12 + $0xf8] sm:$0xff]  ;;  %v10247_v34 = vunpack.c.l.b16 %v9962_v51  ;;  %v8238_v21 = vld [vmem:[#allocation3 + $0x7c] sm:$0xf]  ;;  %v8504_v49 = vrot.slane %v8502_v23, 5  ;;  %v9080_v46 = vsel %vm12537_vm2, %v11672_v9, %v9079_v53 }
 0x3ee   : > { %7846 = vst.msk [vmem:[%s13809_s12 + $0x90] sm:$0xff] %vm841_vm5, %v7814_v52  ;;  %v7322_v43 = vadd.f32 %v7272_v60, %v6716_v31  ;;  %v10248_v52 = vunpack.c.l.b16 %v9972_v22  ;;  %v9976_v31 = vrot.slane %v9974_v12, 4  ;;  %v9979_v60 = vrot.slane %v9977_v33, 5 }
 0x3ef   : > { %6646 = vst.msk [vmem:[%s13809_s12 + $0xf0] sm:$0xff] %vm841_vm5, %v6614_v1  ;;  %v7433_v35 = vld [vmem:[%s13809_s12 + $0x98] sm:$0xff]  ;;  %v8149_v22 = vadd.f32 %v14314_v48, %v7895_v7  ;;  %v9993_v45 = vshll.u32 %v9790_v50, 16  ;;  %v8490_v24 = vrot.slane %v8489_v16, 4  ;;  %v8505_v51 = vsel %vm12116_vm13, %v8500_v25, %v8504_v49  ;;  %v8940_v7 = vld [vmem:[#allocation3 + $0x3c] sm:$0xe] }
 0x3f0   : > { %7354 = vst.msk [vmem:[%s13809_s12 + $0xa0] sm:$0xff] %vm841_vm5, %v7322_v43  ;;  %v10275_v43 = vpack.c.b16 %v10248_v52, %v10247_v34  ;;  %v8516_v12 = vshll.u32 %v8238_v21, 16  ;;  %v8520_v48 = vshrl.u32 %v8238_v21, 16  ;;  %v9177_v33 = vunpack.c.l.b16 %v9083_v54  ;;  %v8941_v52 = vld [vmem:[#allocation3 + $0x40] sm:$0xf] }
 0x3f1   : > { %8181 = vst.msk [vmem:[%s13809_s12 + $0x18] sm:$0xff] %vm841_vm5, %v8149_v22  ;;  %v8495_v23 = vsel %vm12116_vm13, %v8490_v24, %v15139_v39  ;;  %v9980_v5 = vor.u32 %v9979_v60, %v9976_v31  ;;  %v9995_v16 = vrot.slane %v9993_v45, 5  ;;  %v9792_v25 = vld [vmem:[#allocation3 + $0x64] sm:$0xf]  ;;  %v9086_v31 = vrot.slane %v8941_v52, 5  ;;  %v7896_v60 = vld [vmem:[%s13809_s12 + $0x20] sm:$0xff] }
 0x3f2   : > { %v15191_v50 = vrot.slane %v8516_v12, 5  ;;  %v8522_v54 = vrot.slane %v8520_v48, 4  ;;  %v8692_v21 = vunpack.c.l.b16 %v8495_v23  ;;  %v9791_v12 = vld [vmem:[#allocation3 + $0x60] sm:$0xf]  ;;  %v10011_v48 = vshrl.u32 %v9792_v25, 16 }
 0x3f3   : > { %v7763_v41 = vpop.f32.mrf.mxu3  ;;  %v9088_v23 = vrot.slane %v9086_v31, 4 }
 0x3f4   : > { %v7815_v18 = vadd.f32 %v7763_v41, %v7433_v35  ;;  %v6581_v57 = vpop.f32.mrf.mxu1  ;;  %v15176_v32 = vpop.f32.mrf.mxu0  ;;  %v8237_v35 = vld [vmem:[#allocation3 + $0x78] sm:$0xf] }
 0x3f5   : > { %v7274_v1 = vpop.f32.mrf.mxu2  ;;  %v6615_v26 = vadd.f32 %v6581_v57, %v6362_v29  ;;  %11788 = vmatmul.msk.bf16.gmra.mxu0 %vm841_vm5, %v10275_v43  ;;  %v8693_v29 = vunpack.c.l.b16 %v8505_v51  ;;  %v8507_v9 = vshrl.u32 %v8237_v35, 16  ;;  %v8510_v34 = vshll.u32 %v8237_v35, 16  ;;  %v8258_v57 = vld [vmem:[%s13809_s12] sm:$0xff]  ;;  %v8942_v43 = vld [vmem:[#allocation3 + $0x44] sm:$0x1] }
 0x3f6   : > { %7847 = vst.msk [vmem:[%s13809_s12 + $0x98] sm:$0xff] %vm841_vm5, %v7815_v18  ;;  %v7323_v15 = vadd.f32 %v7274_v1, %v6717_v27  ;;  %v9991_v18 = vrot.slane %v9990_v59, 4  ;;  %v6718_v1 = vld [vmem:[%s13809_s12 + $0xb0] sm:$0xff]  ;;  %v9981_v59 = vrot.slane %v9980_v5, 4  ;;  %v8239_v51 = vld [vmem:[#allocation3 + $0x80] sm:$0x1] }
 0x3f7   : > { %6647 = vst.msk [vmem:[%s13809_s12 + $0xf8] sm:$0xff] %vm841_vm5, %v6615_v26  ;;  %v7434_v53 = vld [vmem:[%s13809_s12 + $0xa0] sm:$0xff]  ;;  %v8150_v26 = vadd.f32 %v14368_v6, %v7896_v60  ;;  %v8716_v45 = vpack.c.b16 %v8693_v29, %v8692_v21  ;;  %v8509_v35 = vrot.slane %v8507_v9, 4  ;;  %v11673_v6 = vrot.slane %v8940_v7, 9 }
 0x3f8   : > { %11769 = vmatmul.msk.bf16.gmra.mxu3 %vm841_vm5, %v11919_v44  ;;  %7355 = vst.msk [vmem:[%s13809_s12 + $0xa8] sm:$0xff] %vm841_vm5, %v7323_v15  ;;  %v9176_v44 = vunpack.c.l.b16 %v9080_v46  ;;  %v9996_v22 = vsel %vm12116_vm13, %v9991_v18, %v9995_v16  ;;  %v10007_v15 = vshll.u32 %v9792_v25, 16  ;;  %v9986_v52 = vsel %vm12116_vm13, %v9981_v59, %v15162_v40  ;;  %v11920_v40 = vld [vmem:[#allocation3 + $0x3c] sm:$0xff] }
 0x3f9   : > { %8182 = vst.msk [vmem:[%s13809_s12 + $0x20] sm:$0xff] %vm841_vm5, %v8150_v26  ;;  %v9089_v29 = vrot.slane %v8942_v43, 5  ;;  %v9998_v16 = vshrl.u32 %v9791_v12, 16  ;;  %v10001_v9 = vshll.u32 %v9791_v12, 16  ;;  %v10249_v7 = vunpack.c.l.b16 %v9986_v52  ;;  %v6719_v59 = vld [vmem:[%s13809_s12 + $0xb8] sm:$0xff] }
 0x3fa   : > { %v9205_v39 = vpack.c.b16 %v9177_v33, %v9176_v44  ;;  %v10250_v44 = vunpack.c.l.b16 %v9996_v22  ;;  %v9087_v60 = vsel %vm12537_vm2, %v11673_v6, %v9086_v31  ;;  %v8240_v52 = vld [vmem:[#allocation3 + $0x84] sm:$0xf] }
 0x3fb   : > { %v7766_v41 = vpop.f32.mrf.mxu3  ;;  %v10003_v12 = vrot.slane %v10001_v9, 5 }
 0x3fc   : > { %v7816_v56 = vadd.f32 %v7766_v41, %v7434_v53  ;;  %v8784_v27 = vpop.f32.mrf.mxu1  ;;  %11689 = vmatmul.msk.bf16.gmra.mxu2 %vm841_vm5, %v9205_v39  ;;  %v15202_v33 = vpop.f32.mrf.mxu0  ;;  %v8512_v53 = vrot.slane %v8510_v34, 5  ;;  %v8523_v41 = vor.u32 %v8522_v54, %v15191_v50  ;;  %v15216_v34 = vrot.slane %v10007_v15, 5 }
 0x3fd   : > { %v7277_v49 = vpop.f32.mrf.mxu2  ;;  %v8864_v46 = vadd.f32 %v8784_v27, %v8258_v57  ;;  %11661 = vmatmul.msk.bf16.gmra.mxu1 %vm841_vm5, %v8716_v45  ;;  %v10013_v54 = vrot.slane %v10011_v48, 4  ;;  %v9090_v57 = vsel %vm12537_vm2, %v9088_v23, %v9089_v29  ;;  %v8241_v27 = vld [vmem:[#allocation3 + $0x88] sm:$0xf]  ;;  %v10276_v15 = vpack.c.b16 %v10250_v44, %v10249_v7 }
 0x3fe   : > { %7848 = vst.msk [vmem:[%s13809_s12 + $0xa0] sm:$0xff] %vm841_vm5, %v7816_v56  ;;  %v7324_v24 = vadd.f32 %v7277_v49, %v6718_v1  ;;  %v8526_v56 = vshll.u32 %v8239_v51, 16  ;;  %v8513_v21 = vor.u32 %v8512_v53, %v8509_v35  ;;  %v8524_v39 = vrot.slane %v8523_v41, 4  ;;  %v7897_v1 = vld [vmem:[%s13809_s12 + $0x28] sm:$0xff] }
 0x3ff   : > { %8896 = vst.msk [vmem:[%s13809_s12] sm:$0xff] %vm841_vm5, %v8864_v46  ;;  %v7435_v5 = vld [vmem:[%s13809_s12 + $0xa8] sm:$0xff]  ;;  %v9793_v46 = vld [vmem:[#allocation3 + $0x68] sm:$0x1]  ;;  %v10000_v45 = vrot.slane %v9998_v16, 4  ;;  %v10014_v48 = vor.u32 %v10013_v54, %v15216_v34  ;;  %v8540_v6 = vshll.u32 %v8241_v27, 16  ;;  %v9178_v44 = vunpack.c.l.b16 %v9087_v60 }
 0x400   : > { %7356 = vst.msk [vmem:[%s13809_s12 + $0xb0] sm:$0xff] %vm841_vm5, %v7324_v24  ;;  %v8259_v49 = vld [vmem:[%s13809_s12 + $0x8] sm:$0xff]  ;;  %v8528_v26 = vrot.slane %v8526_v56, 5  ;;  %v8151_v24 = vadd.f32 %v14410_v28, %v7897_v1  ;;  %v8514_v53 = vrot.slane %v8513_v21, 4  ;;  %v8544_v23 = vshrl.u32 %v8241_v27, 16 }
 0x401   : > { %v9179_v28 = vunpack.c.l.b16 %v9090_v57  ;;  %v15245_v16 = vld [vmem:[#allocation3 + $0x4c] sm:$0xf]  ;;  %v10004_v54 = vor.u32 %v10003_v12, %v10000_v45  ;;  %v10015_v21 = vrot.slane %v10014_v48, 4  ;;  %v8531_v7 = vshrl.u32 %v8240_v52, 16 }
 0x402   : > { %v8529_v41 = vsel %vm12116_vm13, %v8524_v39, %v8528_v26  ;;  %8183 = vst.msk [vmem:[%s13809_s12 + $0x28] sm:$0xff] %vm841_vm5, %v8151_v24  ;;  %v8519_v29 = vsel %vm12116_vm13, %v8514_v53, %v15191_v50  ;;  %v9795_v39 = vld [vmem:[#allocation3 + $0x70] sm:$0xf]  ;;  %v15247_v57 = vrot.slane %v8540_v6, 5  ;;  %v8546_v27 = vrot.slane %v8544_v23, 4 }
 0x403   : > { %v7768_v18 = vpop.f32.mrf.mxu3  ;;  %v8695_v9 = vunpack.c.l.b16 %v8529_v41  ;;  %v8694_v1 = vunpack.c.l.b16 %v8519_v29  ;;  %v9093_v50 = vrot.slane %v15245_v16, 5  ;;  %v10035_v45 = vshrl.u32 %v9795_v39, 16  ;;  %v8945_v23 = vld [vmem:[#allocation3 + $0x50] sm:$0x1]  ;;  %v6720_v29 = vld [vmem:[%s13809_s12 + $0xc0] sm:$0xff] }
 0x404   : > { %v7817_v25 = vadd.f32 %v7768_v18, %v7435_v5  ;;  %v8786_v43 = vpop.f32.mrf.mxu1  ;;  %v15230_v35 = vpop.f32.mrf.mxu0  ;;  %v10017_v5 = vshll.u32 %v9793_v46, 16  ;;  %v10031_v46 = vshll.u32 %v9795_v39, 16  ;;  %v10005_v12 = vrot.slane %v10004_v54, 4 }
 0x405   : > { %v7279_v22 = vpop.f32.mrf.mxu2  ;;  %v8865_v51 = vadd.f32 %v8786_v43, %v8259_v49  ;;  %11789 = vmatmul.msk.bf16.gmra.mxu0 %vm841_vm5, %v10276_v15  ;;  %v9206_v49 = vpack.c.b16 %v9179_v28, %v9178_v44  ;;  %v7898_v43 = vld [vmem:[%s13809_s12 + $0x30] sm:$0xff]  ;;  %v9794_v15 = vld [vmem:[#allocation3 + $0x6c] sm:$0xf]  ;;  %v8533_v41 = vrot.slane %v8531_v7, 4  ;;  %v8943_v28 = vld [vmem:[#allocation3 + $0x48] sm:$0xe] }
 0x406   : > { %7849 = vst.msk [vmem:[%s13809_s12 + $0xa8] sm:$0xff] %vm841_vm5, %v7817_v25  ;;  %v7325_v31 = vadd.f32 %v7279_v22, %v6719_v59  ;;  %v10019_v60 = vrot.slane %v10017_v5, 5  ;;  %v8260_v59 = vld [vmem:[%s13809_s12 + $0x10] sm:$0xff]  ;;  %v8152_v26 = vadd.f32 %v14456_v20, %v7898_v43  ;;  %v8547_v20 = vor.u32 %v8546_v27, %v15247_v57 }
 0x407   : > { %8897 = vst.msk [vmem:[%s13809_s12 + $0x8] sm:$0xff] %vm841_vm5, %v8865_v51  ;;  %v7436_v18 = vld [vmem:[%s13809_s12 + $0xb0] sm:$0xff]  ;;  %v8717_v51 = vpack.c.b16 %v8695_v9, %v8694_v1  ;;  %v10010_v5 = vsel %vm12116_vm13, %v10005_v12, %v15216_v34  ;;  %v10037_v39 = vrot.slane %v10035_v45, 4  ;;  %v9096_v27 = vrot.slane %v8945_v23, 5  ;;  %v11921_v1 = vld [vmem:[#allocation3 + $0x48] sm:$0xff]  ;;  %v7899_v45 = vld [vmem:[%s13809_s12 + $0x38] sm:$0xff] }
 0x408   : > { %11770 = vmatmul.msk.bf16.gmra.mxu3 %vm841_vm5, %v11920_v40  ;;  %7357 = vst.msk [vmem:[%s13809_s12 + $0xb8] sm:$0xff] %vm841_vm5, %v7325_v31  ;;  %v8534_v40 = vshll.u32 %v8240_v52, 16  ;;  %v8242_v31 = vld [vmem:[#allocation3 + $0x8c] sm:$0x1]  ;;  %v10020_v48 = vsel %vm12116_vm13, %v10015_v21, %v10019_v60  ;;  %v9095_v52 = vrot.slane %v9093_v50, 4  ;;  %v15271_v21 = vrot.slane %v10031_v46, 5 }
 0x409   : > { %8184 = vst.msk [vmem:[%s13809_s12 + $0x30] sm:$0xff] %vm841_vm5, %v8152_v26  ;;  %v8550_v9 = vshll.u32 %v8242_v31, 16  ;;  %v10252_v54 = vunpack.c.l.b16 %v10020_v48  ;;  %v11674_v60 = vrot.slane %v8943_v28, 9  ;;  %v10251_v43 = vunpack.c.l.b16 %v10010_v5  ;;  %v8244_v26 = vld [vmem:[#allocation3 + $0x94] sm:$0xf] }
 0x40a   : > { %v8536_v6 = vrot.slane %v8534_v40, 5  ;;  %v10038_v48 = vor.u32 %v10037_v39, %v15271_v21  ;;  %v8947_v23 = vld [vmem:[#allocation3 + $0x58] sm:$0xf] }
 0x40b   : > { %v7771_v56 = vpop.f32.mrf.mxu3  ;;  %v8552_v31 = vrot.slane %v8550_v9, 5  ;;  %v10277_v12 = vpack.c.b16 %v10252_v54, %v10251_v43  ;;  %v8946_v54 = vld [vmem:[#allocation3 + $0x54] sm:$0xe]  ;;  %v9100_v39 = vrot.slane %v8947_v23, 5 }
 0x40c   : > { %v7818_v25 = vadd.f32 %v7771_v56, %v7436_v18  ;;  %v8789_v22 = vpop.f32.mrf.mxu1  ;;  %11690 = vmatmul.msk.bf16.gmra.mxu2 %vm841_vm5, %v9206_v49  ;;  %v15258_v53 = vpop.f32.mrf.mxu0  ;;  %v10022_v18 = vshrl.u32 %v9794_v15, 16  ;;  %v10025_v56 = vshll.u32 %v9794_v15, 16  ;;  %v8537_v34 = vor.u32 %v8536_v6, %v8533_v41 }
 0x40d   : > { %v8866_v24 = vadd.f32 %v8789_v22, %v8260_v59  ;;  %11662 = vmatmul.msk.bf16.gmra.mxu1 %vm841_vm5, %v8717_v51  ;;  %v8548_v49 = vrot.slane %v8547_v20, 4  ;;  %v9796_v59 = vld [vmem:[#allocation3 + $0x74] sm:$0x1]  ;;  %v9097_v22 = vsel %vm12537_vm2, %v9095_v52, %v9096_v27  ;;  %v8153_v41 = vadd.f32 %v14485_v17, %v7899_v45 }
 0x40e   : > { %7850 = vst.msk [vmem:[%s13809_s12 + $0xb0] sm:$0xff] %vm841_vm5, %v7818_v25  ;;  %v7282_v44 = vpop.f32.mrf.mxu2  ;;  %v10024_v15 = vrot.slane %v10022_v18, 4  ;;  %v10027_v46 = vrot.slane %v10025_v56, 5  ;;  %v9094_v20 = vsel %vm12537_vm2, %v11674_v60, %v9093_v50  ;;  %v10041_v28 = vshll.u32 %v9796_v59, 16  ;;  %v6721_v50 = vld [vmem:[%s13809_s12 + $0xc8] sm:$0xff] }
 0x40f   : > { %8898 = vst.msk [vmem:[%s13809_s12 + $0x10] sm:$0xff] %vm841_vm5, %v8866_v24  ;;  %v7437_v16 = vld [vmem:[%s13809_s12 + $0xb8] sm:$0xff]  ;;  %v7326_v7 = vadd.f32 %v7282_v44, %v6720_v29  ;;  %v8538_v5 = vrot.slane %v8537_v34, 4  ;;  %v8553_v18 = vsel %vm12116_vm13, %v8548_v49, %v8552_v31  ;;  %v8564_v56 = vshll.u32 %v8244_v26, 16  ;;  %v8243_v44 = vld [vmem:[#allocation3 + $0x90] sm:$0xf] }
 0x410   : > { %v8261_v24 = vld [vmem:[%s13809_s12 + $0x18] sm:$0xff]  ;;  %v8568_v29 = vshrl.u32 %v8244_v26, 16  ;;  %8185 = vst.msk [vmem:[%s13809_s12 + $0x38] sm:$0xff] %vm841_vm5, %v8153_v41  ;;  %v9181_v17 = vunpack.c.l.b16 %v9097_v22  ;;  %v9180_v34 = vunpack.c.l.b16 %v9094_v20  ;;  %v10043_v49 = vrot.slane %v10041_v28, 5  ;;  %v9798_v60 = vld [vmem:[#allocation3 + $0x7c] sm:$0xf] }
 0x411   : > { %7358 = vst.msk [vmem:[%s13809_s12 + $0xc0] sm:$0xff] %vm841_vm5, %v7326_v7  ;;  %v8543_v9 = vsel %vm12116_vm13, %v8538_v5, %v15247_v57  ;;  %v10028_v7 = vor.u32 %v10027_v46, %v10024_v15  ;;  %v8555_v59 = vshrl.u32 %v8243_v44, 16  ;;  %v8558_v22 = vshll.u32 %v8243_v44, 16  ;;  %v8948_v46 = vld [vmem:[#allocation3 + $0x5c] sm:$0x1]  ;;  %v7900_v31 = vld [vmem:[%s13809_s12 + $0x40] sm:$0xff] }
 0x412   : > { %v15300_v26 = vrot.slane %v8564_v56, 5  ;;  %v8570_v45 = vrot.slane %v8568_v29, 4  ;;  %v9207_v15 = vpack.c.b16 %v9181_v17, %v9180_v34  ;;  %v9102_v41 = vrot.slane %v9100_v39, 4  ;;  %v9797_v28 = vld [vmem:[#allocation3 + $0x78] sm:$0xf] }
 0x413   : > { %v7773_v25 = vpop.f32.mrf.mxu3  ;;  %v8154_v23 = vadd.f32 %v14524_v13, %v7900_v31  ;;  %v8245_v56 = vld [vmem:[#allocation3 + $0x98] sm:$0x1]  ;;  %v10055_v29 = vshll.u32 %v9798_v60, 16  ;;  %v10059_v17 = vshrl.u32 %v9798_v60, 16  ;;  %v10046_v60 = vshrl.u32 %v9797_v28, 16 }
 0x414   : > { %v7819_v40 = vadd.f32 %v7773_v25, %v7437_v16  ;;  %v8791_v51 = vpop.f32.mrf.mxu1  ;;  %v15286_v52 = vpop.f32.mrf.mxu0  ;;  %v8247_v31 = vld [vmem:[#allocation3 + $0xa0] sm:$0xf] }
 0x415   : > { %v8867_v6 = vadd.f32 %v8791_v51, %v8261_v24  ;;  %11790 = vmatmul.msk.bf16.gmra.mxu0 %vm841_vm5, %v10277_v12  ;;  %v8696_v24 = vunpack.c.l.b16 %v8543_v9  ;;  %v11675_v51 = vrot.slane %v8946_v54, 9  ;;  %v8262_v12 = vld [vmem:[%s13809_s12 + $0x20] sm:$0xff]  ;;  %v9103_v9 = vrot.slane %v8948_v46, 5  ;;  %8186 = vst.msk [vmem:[%s13809_s12 + $0x40] sm:$0xff] %vm841_vm5, %v8154_v23  ;;  %v11922_v46 = vld [vmem:[#allocation3 + $0x54] sm:$0xff] }
 0x416   : > { %7851 = vst.msk [vmem:[%s13809_s12 + $0xb8] sm:$0xff] %vm841_vm5, %v7819_v40  ;;  %v7284_v16 = vpop.f32.mrf.mxu2  ;;  %v10039_v40 = vrot.slane %v10038_v48, 4 }
 0x417   : > { %8899 = vst.msk [vmem:[%s13809_s12 + $0x18] sm:$0xff] %vm841_vm5, %v8867_v6  ;;  %v7327_v27 = vadd.f32 %v7284_v16, %v6721_v50  ;;  %v10029_v6 = vrot.slane %v10028_v7, 4  ;;  %v8557_v50 = vrot.slane %v8555_v59, 4  ;;  %v8560_v16 = vrot.slane %v8558_v22, 5  ;;  %v6722_v7 = vld [vmem:[%s13809_s12 + $0xd0] sm:$0xff] }
 0x418   : > { %11771 = vmatmul.msk.bf16.gmra.mxu3 %vm841_vm5, %v11921_v1  ;;  %v8697_v1 = vunpack.c.l.b16 %v8553_v18  ;;  %v7438_v43 = vld [vmem:[%s13809_s12 + $0xc0] sm:$0xff]  ;;  %v10044_v20 = vsel %vm12116_vm13, %v10039_v40, %v10043_v49  ;;  %v9101_v13 = vsel %vm12537_vm2, %v11675_v51, %v9100_v39  ;;  %v9104_v34 = vsel %vm12537_vm2, %v9102_v41, %v9103_v9 }
 0x419   : > { %7359 = vst.msk [vmem:[%s13809_s12 + $0xc8] sm:$0xff] %vm841_vm5, %v7327_v27  ;;  %v10034_v54 = vsel %vm12116_vm13, %v10029_v6, %v15271_v21  ;;  %v10254_v49 = vunpack.c.l.b16 %v10044_v20  ;;  %v10049_v59 = vshll.u32 %v9797_v28, 16  ;;  %v15328_v22 = vrot.slane %v10055_v29, 5  ;;  %v9799_v28 = vld [vmem:[#allocation3 + $0x80] sm:$0x1] }
 0x41a   : > { %v8718_v18 = vpack.c.b16 %v8697_v1, %v8696_v24  ;;  %v8574_v1 = vshll.u32 %v8245_v56, 16  ;;  %v10061_v39 = vrot.slane %v10059_v17, 4  ;;  %v10253_v24 = vunpack.c.l.b16 %v10034_v54 }
 0x41b   : > { %v7776_v25 = vpop.f32.mrf.mxu3  ;;  %v9182_v51 = vunpack.c.l.b16 %v9101_v13  ;;  %v9183_v20 = vunpack.c.l.b16 %v9104_v34  ;;  %v10048_v56 = vrot.slane %v10046_v60, 4  ;;  %v10051_v29 = vrot.slane %v10049_v59, 5  ;;  %v8246_v13 = vld [vmem:[#allocation3 + $0x9c] sm:$0xf] }
 0x41c   : > { %v7820_v57 = vadd.f32 %v7776_v25, %v7438_v43  ;;  %v8794_v48 = vpop.f32.mrf.mxu1  ;;  %11691 = vmatmul.msk.bf16.gmra.mxu2 %vm841_vm5, %v9207_v15  ;;  %v15312_v44 = vpop.f32.mrf.mxu0  ;;  %v8571_v25 = vor.u32 %v8570_v45, %v15300_v26  ;;  %v8576_v6 = vrot.slane %v8574_v1, 5  ;;  %v10278_v23 = vpack.c.b16 %v10254_v49, %v10253_v24  ;;  %v15353_v49 = vld [vmem:[#allocation3 + $0x64] sm:$0xf] }
 0x41d   : > { %v8868_v5 = vadd.f32 %v8794_v48, %v8262_v12  ;;  %11663 = vmatmul.msk.bf16.gmra.mxu1 %vm841_vm5, %v8718_v18  ;;  %v7901_v12 = vld [vmem:[%s13809_s12 + $0x48] sm:$0xff]  ;;  %v10062_v17 = vor.u32 %v10061_v39, %v15328_v22  ;;  %v8588_v9 = vshll.u32 %v8247_v31, 16  ;;  %v10065_v54 = vshll.u32 %v9799_v28, 16 }
 0x41e   : > { %7852 = vst.msk [vmem:[%s13809_s12 + $0xc0] sm:$0xff] %vm841_vm5, %v7820_v57  ;;  %v7287_v40 = vpop.f32.mrf.mxu2  ;;  %v8561_v57 = vor.u32 %v8560_v16, %v8557_v50  ;;  %v8572_v21 = vrot.slane %v8571_v25, 4  ;;  %v8263_v48 = vld [vmem:[%s13809_s12 + $0x28] sm:$0xff]  ;;  %v9208_v34 = vpack.c.b16 %v9183_v20, %v9182_v51  ;;  %v10052_v59 = vor.u32 %v10051_v29, %v10048_v56  ;;  %v8248_v29 = vld [vmem:[#allocation3 + $0xa4] sm:$0x1] }
 0x41f   : > { %8900 = vst.msk [vmem:[%s13809_s12 + $0x20] sm:$0xff] %vm841_vm5, %v8868_v5  ;;  %v7328_v43 = vadd.f32 %v7287_v40, %v6722_v7  ;;  %v8155_v5 = vadd.f32 %v14563_v63, %v7901_v12  ;;  %v8592_v63 = vshrl.u32 %v8247_v31, 16  ;;  %v6723_v7 = vld [vmem:[%s13809_s12 + $0xd8] sm:$0xff]  ;;  %v10063_v39 = vrot.slane %v10062_v17, 4 }
 0x420   : > { %v7439_v45 = vld [vmem:[%s13809_s12 + $0xc8] sm:$0xff]  ;;  %v8562_v16 = vrot.slane %v8561_v57, 4  ;;  %v8577_v25 = vsel %vm12116_vm13, %v8572_v21, %v8576_v6  ;;  %v8579_v21 = vshrl.u32 %v8246_v13, 16  ;;  %v8582_v24 = vshll.u32 %v8246_v13, 16  ;;  %v8951_v13 = vld [vmem:[#allocation3 + $0x68] sm:$0x1] }
 0x421   : > { %7360 = vst.msk [vmem:[%s13809_s12 + $0xd0] sm:$0xff] %vm841_vm5, %v7328_v43  ;;  %v8699_v43 = vunpack.c.l.b16 %v8577_v25  ;;  %v9107_v31 = vrot.slane %v15353_v49, 5  ;;  %v10067_v12 = vrot.slane %v10065_v54, 5  ;;  %v10053_v17 = vrot.slane %v10052_v59, 4  ;;  %v8949_v54 = vld [vmem:[#allocation3 + $0x60] sm:$0xe] }
 0x422   : > { %8187 = vst.msk [vmem:[%s13809_s12 + $0x48] sm:$0xff] %vm841_vm5, %v8155_v5  ;;  %v8567_v1 = vsel %vm12116_vm13, %v8562_v16, %v15300_v26 }
 0x423   : > { %v7778_v27 = vpop.f32.mrf.mxu3  ;;  %v8698_v51 = vunpack.c.l.b16 %v8567_v1  ;;  %v10068_v16 = vsel %vm12116_vm13, %v10063_v39, %v10067_v12 }
 0x424   : > { %v7821_v15 = vadd.f32 %v7778_v27, %v7439_v45  ;;  %v8796_v41 = vpop.f32.mrf.mxu1  ;;  %v15340_v50 = vpop.f32.mrf.mxu0  ;;  %v9801_v45 = vld [vmem:[#allocation3 + $0x88] sm:$0xf]  ;;  %v10256_v59 = vunpack.c.l.b16 %v10068_v16 }
 0x425   : > { %v8869_v18 = vadd.f32 %v8796_v41, %v8263_v48  ;;  %11791 = vmatmul.msk.bf16.gmra.mxu0 %vm841_vm5, %v10278_v23  ;;  %v7902_v48 = vld [vmem:[%s13809_s12 + $0x50] sm:$0xff]  ;;  %v9800_v23 = vld [vmem:[#allocation3 + $0x84] sm:$0xf]  ;;  %v10079_v28 = vshll.u32 %v9801_v45, 16  ;;  %v10083_v5 = vshrl.u32 %v9801_v45, 16  ;;  %v8719_v56 = vpack.c.b16 %v8699_v43, %v8698_v51 }
 0x426   : > { %7853 = vst.msk [vmem:[%s13809_s12 + $0xc8] sm:$0xff] %vm841_vm5, %v7821_v15  ;;  %v7289_v40 = vpop.f32.mrf.mxu2  ;;  %v15356_v15 = vrot.slane %v8588_v9, 5  ;;  %v8264_v41 = vld [vmem:[%s13809_s12 + $0x30] sm:$0xff]  ;;  %v8156_v20 = vadd.f32 %v14619_v37, %v7902_v48  ;;  %v8581_v37 = vrot.slane %v8579_v21, 4  ;;  %v8584_v9 = vrot.slane %v8582_v24, 5 }
 0x427   : > { %8901 = vst.msk [vmem:[%s13809_s12 + $0x28] sm:$0xff] %vm841_vm5, %v8869_v18  ;;  %v7329_v60 = vadd.f32 %v7289_v40, %v6723_v7  ;;  %v9109_v7 = vrot.slane %v9107_v31, 4  ;;  %v10058_v40 = vsel %vm12116_vm13, %v10053_v17, %v15328_v22  ;;  %v10073_v1 = vshll.u32 %v9800_v23, 16  ;;  %v9802_v48 = vld [vmem:[#allocation3 + $0x8c] sm:$0x1] }
 0x428   : > { %11772 = vmatmul.msk.bf16.gmra.mxu3 %vm841_vm5, %v11922_v46  ;;  %v7440_v57 = vld [vmem:[%s13809_s12 + $0xd0] sm:$0xff]  ;;  %v8594_v46 = vrot.slane %v8592_v63, 4  ;;  %8188 = vst.msk [vmem:[%s13809_s12 + $0x50] sm:$0xff] %vm841_vm5, %v8156_v20  ;;  %v8598_v43 = vshll.u32 %v8248_v29, 16  ;;  %v15381_v39 = vrot.slane %v10079_v28, 5  ;;  %v10085_v45 = vrot.slane %v10083_v5, 4 }
 0x429   : > { %7361 = vst.msk [vmem:[%s13809_s12 + $0xd8] sm:$0xff] %vm841_vm5, %v7329_v60  ;;  %v9110_v21 = vrot.slane %v8951_v13, 5  ;;  %v11676_v22 = vrot.slane %v8949_v54, 9  ;;  %v10255_v12 = vunpack.c.l.b16 %v10058_v40  ;;  %v8250_v20 = vld [vmem:[#allocation3 + $0xac] sm:$0xf]  ;;  %v10075_v28 = vrot.slane %v10073_v1, 5 }
 0x42a   : > { %v8595_v63 = vor.u32 %v8594_v46, %v15356_v15  ;;  %v11923_v46 = vld [vmem:[#allocation3 + $0x60] sm:$0xff]  ;;  %v8600_v29 = vrot.slane %v8598_v43, 5  ;;  %v10086_v16 = vor.u32 %v10085_v45, %v15381_v39  ;;  %v10089_v13 = vshll.u32 %v9802_v48, 16 }
 0x42b   : > { %v7781_v27 = vpop.f32.mrf.mxu3  ;;  %v7903_v5 = vld [vmem:[%s13809_s12 + $0x58] sm:$0xff]  ;;  %v10279_v17 = vpack.c.b16 %v10256_v59, %v10255_v12  ;;  %v15410_v59 = vld [vmem:[#allocation3 + $0x70] sm:$0xf] }
 0x42c   : > { %v7822_v26 = vadd.f32 %v7781_v27, %v7440_v57  ;;  %v8799_v6 = vpop.f32.mrf.mxu1  ;;  %11692 = vmatmul.msk.bf16.gmra.mxu2 %vm841_vm5, %v9208_v34  ;;  %v15369_v25 = vpop.f32.mrf.mxu0  ;;  %v10070_v27 = vshrl.u32 %v9800_v23, 16  ;;  %v6724_v34 = vld [vmem:[%s13809_s12 + $0xe0] sm:$0xff]  ;;  %v8596_v51 = vrot.slane %v8595_v63, 4  ;;  %v9108_v63 = vsel %vm12537_vm2, %v11676_v22, %v9107_v31 }
 0x42d   : > { %v8870_v18 = vadd.f32 %v8799_v6, %v8264_v41  ;;  %11664 = vmatmul.msk.bf16.gmra.mxu1 %vm841_vm5, %v8719_v56  ;;  %v9111_v6 = vsel %vm12537_vm2, %v9109_v7, %v9110_v21 }
 0x42e   : > { %7854 = vst.msk [vmem:[%s13809_s12 + $0xd0] sm:$0xff] %vm841_vm5, %v7822_v26  ;;  %v7292_v49 = vpop.f32.mrf.mxu2  ;;  %v8585_v26 = vor.u32 %v8584_v9, %v8581_v37  ;;  %v10072_v23 = vrot.slane %v10070_v27, 4  ;;  %v8157_v37 = vadd.f32 %v14680_v11, %v7903_v5  ;;  %v8601_v40 = vsel %vm12116_vm13, %v8596_v51, %v8600_v29  ;;  %v9804_v51 = vld [vmem:[#allocation3 + $0x94] sm:$0xf]  ;;  %v7904_v5 = vld [vmem:[%s13809_s12 + $0x60] sm:$0xff] }
 0x42f   : > { %8902 = vst.msk [vmem:[%s13809_s12 + $0x30] sm:$0xff] %vm841_vm5, %v8870_v18  ;;  %v7330_v57 = vadd.f32 %v7292_v49, %v6724_v34  ;;  %v8265_v18 = vld [vmem:[%s13809_s12 + $0x38] sm:$0xff]  ;;  %v8612_v27 = vshll.u32 %v8250_v20, 16  ;;  %v8616_v11 = vshrl.u32 %v8250_v20, 16  ;;  %v9185_v1 = vunpack.c.l.b16 %v9111_v6  ;;  %v8249_v34 = vld [vmem:[#allocation3 + $0xa8] sm:$0xf] }
 0x430   : > { %v7441_v24 = vld [vmem:[%s13809_s12 + $0xd8] sm:$0xff]  ;;  %v8586_v7 = vrot.slane %v8585_v26, 4  ;;  %8189 = vst.msk [vmem:[%s13809_s12 + $0x58] sm:$0xff] %vm841_vm5, %v8157_v37  ;;  %v6725_v49 = vld [vmem:[%s13809_s12 + $0xe8] sm:$0xff]  ;;  %v10076_v45 = vor.u32 %v10075_v28, %v10072_v23  ;;  %v10091_v26 = vrot.slane %v10089_v13, 5  ;;  %v8603_v12 = vshrl.u32 %v8249_v34, 16 }
 0x431   : > { %7362 = vst.msk [vmem:[%s13809_s12 + $0xe0] sm:$0xff] %vm841_vm5, %v7330_v57  ;;  %v10087_v57 = vrot.slane %v10086_v16, 4  ;;  %v8606_v48 = vshll.u32 %v8249_v34, 16  ;;  %v8618_v6 = vrot.slane %v8616_v11, 4  ;;  %v9114_v28 = vrot.slane %v15410_v59, 5  ;;  %v6726_v59 = vld [vmem:[%s13809_s12 + $0xf0] sm:$0xff] }
 0x432   : > { %v8591_v43 = vsel %vm12116_vm13, %v8586_v7, %v15356_v15  ;;  %v10077_v29 = vrot.slane %v10076_v45, 4  ;;  %v8158_v16 = vadd.f32 %v14736_v30, %v7904_v5  ;;  %v9803_v37 = vld [vmem:[#allocation3 + $0x90] sm:$0xf]  ;;  %v10103_v7 = vshll.u32 %v9804_v51, 16  ;;  %v8952_v30 = vld [vmem:[#allocation3 + $0x6c] sm:$0xe] }
 0x433   : > { %v7783_v60 = vpop.f32.mrf.mxu3  ;;  %v8700_v20 = vunpack.c.l.b16 %v8591_v43  ;;  %v8251_v13 = vld [vmem:[#allocation3 + $0xb0] sm:$0x1]  ;;  %v8605_v11 = vrot.slane %v8603_v12, 4  ;;  %v10094_v43 = vshrl.u32 %v9803_v37, 16 }
 0x434   : > { %v7823_v41 = vadd.f32 %v7783_v60, %v7441_v24  ;;  %v8801_v56 = vpop.f32.mrf.mxu1  ;;  %v15397_v54 = vpop.f32.mrf.mxu0  ;;  %v8701_v24 = vunpack.c.l.b16 %v8601_v40  ;;  %v10107_v40 = vshrl.u32 %v9804_v51, 16  ;;  %8190 = vst.msk [vmem:[%s13809_s12 + $0x60] sm:$0xff] %vm841_vm5, %v8158_v16  ;;  %v11924_v5 = vld [vmem:[#allocation3 + $0x6c] sm:$0xff] }
 0x435   : > { %v8871_v9 = vadd.f32 %v8801_v56, %v8265_v18  ;;  %11792 = vmatmul.msk.bf16.gmra.mxu0 %vm841_vm5, %v10279_v17  ;;  %v8266_v18 = vld [vmem:[%s13809_s12 + $0x40] sm:$0xff]  ;;  %v10092_v17 = vsel %vm12116_vm13, %v10087_v57, %v10091_v26  ;;  %v8267_v16 = vld [vmem:[%s13809_s12 + $0x48] sm:$0xff] }
 0x436   : > { %7855 = vst.msk [vmem:[%s13809_s12 + $0xd8] sm:$0xff] %vm841_vm5, %v7823_v41  ;;  %v7294_v31 = vpop.f32.mrf.mxu2  ;;  %v15413_v41 = vrot.slane %v8612_v27, 5  ;;  %v10109_v12 = vrot.slane %v10107_v40, 4 }
 0x437   : > { %8903 = vst.msk [vmem:[%s13809_s12 + $0x38] sm:$0xff] %vm841_vm5, %v8871_v9  ;;  %v7331_v21 = vadd.f32 %v7294_v31, %v6725_v49  ;;  %v8954_v49 = vld [vmem:[#allocation3 + $0x74] sm:$0x1]  ;;  %v9116_v31 = vrot.slane %v9114_v28, 4 }
 0x438   : > { %11773 = vmatmul.msk.bf16.gmra.mxu3 %vm841_vm5, %v11923_v46  ;;  %v9184_v46 = vunpack.c.l.b16 %v9108_v63  ;;  %v7442_v22 = vld [vmem:[%s13809_s12 + $0xe0] sm:$0xff]  ;;  %v8720_v63 = vpack.c.b16 %v8701_v24, %v8700_v20  ;;  %v8619_v34 = vor.u32 %v8618_v6, %v15413_v41  ;;  %v10258_v24 = vunpack.c.l.b16 %v10092_v17  ;;  %v7905_v17 = vld [vmem:[%s13809_s12 + $0x68] sm:$0xff] }
 0x439   : > { %7363 = vst.msk [vmem:[%s13809_s12 + $0xe8] sm:$0xff] %vm841_vm5, %v7331_v21  ;;  %v8622_v21 = vshll.u32 %v8251_v13, 16  ;;  %v9117_v51 = vrot.slane %v8954_v49, 5  ;;  %v11677_v20 = vrot.slane %v8952_v30, 9  ;;  %v9805_v13 = vld [vmem:[#allocation3 + $0x98] sm:$0x1]  ;;  %v8159_v40 = vadd.f32 %v14783_v14, %v7905_v17 }
 0x43a   : > { %v9209_v23 = vpack.c.b16 %v9185_v1, %v9184_v46  ;;  %v8608_v1 = vrot.slane %v8606_v48, 5  ;;  %v10097_v46 = vshll.u32 %v9803_v37, 16  ;;  %v8955_v17 = vld [vmem:[#allocation3 + $0x78] sm:$0xe] }
 0x43b   : > { %v7786_v60 = vpop.f32.mrf.mxu3  ;;  %8191 = vst.msk [vmem:[%s13809_s12 + $0x68] sm:$0xff] %vm841_vm5, %v8159_v40 }
 0x43c   : > { %v7824_v15 = vadd.f32 %v7786_v60, %v7442_v22  ;;  %v8804_v56 = vpop.f32.mrf.mxu1  ;;  %11693 = vmatmul.msk.bf16.gmra.mxu2 %vm841_vm5, %v9209_v23  ;;  %v15426_v27 = vpop.f32.mrf.mxu0  ;;  %v10082_v60 = vsel %vm12116_vm13, %v10077_v29, %v15381_v39  ;;  %v15438_v22 = vrot.slane %v10103_v7, 5  ;;  %v8609_v6 = vor.u32 %v8608_v1, %v8605_v11 }
 0x43d   : > { %v8872_v9 = vadd.f32 %v8804_v56, %v8266_v18  ;;  %11665 = vmatmul.msk.bf16.gmra.mxu1 %vm841_vm5, %v8720_v63  ;;  %v10257_v39 = vunpack.c.l.b16 %v10082_v60  ;;  %v9118_v18 = vsel %vm12537_vm2, %v9116_v31, %v9117_v51  ;;  %v8253_v56 = vld [vmem:[#allocation3 + $0xb8] sm:$0xf]  ;;  %v10096_v29 = vrot.slane %v10094_v43, 4 }
 0x43e   : > { %7856 = vst.msk [vmem:[%s13809_s12 + $0xe0] sm:$0xff] %vm841_vm5, %v7824_v15  ;;  %v8620_v15 = vrot.slane %v8619_v34, 4  ;;  %v10099_v7 = vrot.slane %v10097_v46, 5  ;;  %v9115_v1 = vsel %vm12537_vm2, %v11677_v20, %v9114_v28  ;;  %v10110_v34 = vor.u32 %v10109_v12, %v15438_v22 }
 0x43f   : > { %8904 = vst.msk [vmem:[%s13809_s12 + $0x40] sm:$0xff] %vm841_vm5, %v8872_v9  ;;  %v7297_v45 = vpop.f32.mrf.mxu2  ;;  %v8624_v9 = vrot.slane %v8622_v21, 5  ;;  %v10280_v63 = vpack.c.b16 %v10258_v24, %v10257_v39  ;;  %v8610_v30 = vrot.slane %v8609_v6, 4  ;;  %v8636_v14 = vshll.u32 %v8253_v56, 16 }
 0x440   : > { %v7332_v26 = vadd.f32 %v7297_v45, %v6726_v59  ;;  %v7443_v48 = vld [vmem:[%s13809_s12 + $0xe8] sm:$0xff]  ;;  %v8640_v60 = vshrl.u32 %v8253_v56, 16  ;;  %v9187_v43 = vunpack.c.l.b16 %v9118_v18  ;;  %v10113_v28 = vshll.u32 %v9805_v13, 16  ;;  %v6727_v45 = vld [vmem:[%s13809_s12 + $0xf8] sm:$0xff] }
 0x441   : > { %v8625_v31 = vsel %vm12116_vm13, %v8620_v15, %v8624_v9  ;;  %v8252_v59 = vld [vmem:[#allocation3 + $0xb4] sm:$0xf]  ;;  %v8615_v24 = vsel %vm12116_vm13, %v8610_v30, %v15413_v41  ;;  %v10100_v46 = vor.u32 %v10099_v7, %v10096_v29  ;;  %v9186_v12 = vunpack.c.l.b16 %v9115_v1  ;;  %v9807_v15 = vld [vmem:[#allocation3 + $0xa0] sm:$0xf]  ;;  %v8268_v9 = vld [vmem:[%s13809_s12 + $0x50] sm:$0xff] }
 0x442   : > { %7364 = vst.msk [vmem:[%s13809_s12 + $0xf0] sm:$0xff] %vm841_vm5, %v7332_v26  ;;  %v8703_v51 = vunpack.c.l.b16 %v8625_v31  ;;  %v10111_v6 = vrot.slane %v10110_v34, 4  ;;  %v8627_v39 = vshrl.u32 %v8252_v59, 16  ;;  %v8642_v18 = vrot.slane %v8640_v60, 4  ;;  %v8254_v31 = vld [vmem:[#allocation3 + $0xbc] sm:$0x1] }
 0x443   : > { %v7788_v57 = vpop.f32.mrf.mxu3  ;;  %v8702_v56 = vunpack.c.l.b16 %v8615_v24  ;;  %v9210_v29 = vpack.c.b16 %v9187_v43, %v9186_v12  ;;  %v10101_v7 = vrot.slane %v10100_v46, 4  ;;  %v10127_v1 = vshll.u32 %v9807_v15, 16  ;;  %v5668_v60 = vld [vmem:[#allocation3 + $0xc8] sm:$0x1] }
 0x444   : > { %v7825_v23 = vadd.f32 %v7788_v57, %v7443_v48  ;;  %v8806_v37 = vpop.f32.mrf.mxu1  ;;  %v15454_v49 = vpop.f32.mrf.mxu0  ;;  %v15467_v48 = vld [vmem:[#allocation3 + $0x7c] sm:$0xf]  ;;  %v10131_v43 = vshrl.u32 %v9807_v15, 16  ;;  %v11678_v24 = vrot.slane %v8955_v17, 9 }
 0x445   : > { %v8873_v11 = vadd.f32 %v8806_v37, %v8267_v16  ;;  %11793 = vmatmul.msk.bf16.gmra.mxu0 %vm841_vm5, %v10280_v63  ;;  %v10115_v16 = vrot.slane %v10113_v28, 5  ;;  %v7906_v37 = vld [vmem:[%s13809_s12 + $0x70] sm:$0xff]  ;;  %v9121_v13 = vrot.slane %v15467_v48, 5  ;;  %v8721_v30 = vpack.c.b16 %v8703_v51, %v8702_v56 }
 0x446   : > { %7857 = vst.msk [vmem:[%s13809_s12 + $0xe8] sm:$0xff] %vm841_vm5, %v7825_v23  ;;  %v8630_v23 = vshll.u32 %v8252_v59, 16  ;;  %v8160_v40 = vadd.f32 %v14855_v55, %v7906_v37  ;;  %v8629_v28 = vrot.slane %v8627_v39, 4  ;;  %v10106_v46 = vsel %vm12116_vm13, %v10101_v7, %v15438_v22  ;;  %v8256_v7 = vld [vmem:[#allocation3 + $0xc4] sm:$0xf] }
 0x447   : > { %8905 = vst.msk [vmem:[%s13809_s12 + $0x48] sm:$0xff] %vm841_vm5, %v8873_v11  ;;  %v7299_v57 = vpop.f32.mrf.mxu2  ;;  %v9806_v11 = vld [vmem:[#allocation3 + $0x9c] sm:$0xf]  ;;  %v8646_v48 = vshll.u32 %v8254_v31, 16  ;;  %v10259_v17 = vunpack.c.l.b16 %v10106_v46 }
 0x448   : > { %11774 = vmatmul.msk.bf16.gmra.mxu3 %vm841_vm5, %v11924_v5  ;;  %v7333_v26 = vadd.f32 %v7299_v57, %v6727_v45  ;;  %v15470_v5 = vrot.slane %v8636_v14, 5  ;;  %v10116_v14 = vsel %vm12116_vm13, %v10111_v6, %v10115_v16  ;;  %v8632_v55 = vrot.slane %v8630_v23, 5  ;;  %8192 = vst.msk [vmem:[%s13809_s12 + $0x70] sm:$0xff] %vm841_vm5, %v8160_v40  ;;  %v7907_v40 = vld [vmem:[%s13809_s12 + $0x78] sm:$0xff] }
 0x449   : > { %v7444_v20 = vld [vmem:[%s13809_s12 + $0xf0] sm:$0xff]  ;;  %v5669_v57 = vsel %vm12039_vm8, 0, %v5668_v60  ;;  %v9123_v6 = vrot.slane %v9121_v13, 4  ;;  %v10260_v15 = vunpack.c.l.b16 %v10116_v14  ;;  %v10118_v19 = vshrl.u32 %v9806_v11, 16  ;;  %v9808_v14 = vld [vmem:[#allocation3 + $0xa4] sm:$0x1] }
 0x44a   : > { %7365 = vst.msk [vmem:[%s13809_s12 + $0xf8] sm:$0xff] %vm841_vm5, %v7333_v26  ;;  %v8643_v45 = vor.u32 %v8642_v18, %v15470_v5  ;;  %v8976_v26 = vld [vmem:[%s13809_s12] sm:$0xff]  ;;  %v10121_v39 = vshll.u32 %v9806_v11, 16  ;;  %v15497_v23 = vrot.slane %v10127_v1, 5  ;;  %v10133_v18 = vrot.slane %v10131_v43, 4  ;;  %v8269_v11 = vld [vmem:[%s13809_s12 + $0x58] sm:$0xff] }
 0x44b   : > { %v7791_v21 = vpop.f32.mrf.mxu3  ;;  %5670 = vst [vmem:[#allocation3 + $0xc8] sm:$0x1] %v5669_v57  ;;  %v8633_v56 = vor.u32 %v8632_v55, %v8629_v28  ;;  %v6038_v16 = vrot.slane %v14678_v8, 4  ;;  %v10281_v31 = vpack.c.b16 %v10260_v15, %v10259_v17  ;;  %v8161_v8 = vadd.f32 %v14904_v47, %v7907_v40  ;;  %v7908_v40 = vld [vmem:[%s13809_s12 + $0x80] sm:$0xff] }
 0x44c   : > { %v7826_v41 = vadd.f32 %v7791_v21, %v7444_v20  ;;  %v8809_v63 = vpop.f32.mrf.mxu1  ;;  %11694 = vmatmul.msk.bf16.gmra.mxu2 %vm841_vm5, %v9210_v29  ;;  %v15483_v59 = vpop.f32.mrf.mxu0  ;;  %v8957_v21 = vld [vmem:[#allocation3 + $0x80] sm:$0x1]  ;;  %v8644_v29 = vrot.slane %v8643_v45, 4  ;;  %v10123_v43 = vrot.slane %v10121_v39, 5  ;;  %v10134_v28 = vor.u32 %v10133_v18, %v15497_v23 }
 0x44d   : > { %v8874_v34 = vadd.f32 %v8809_v63, %v8268_v9  ;;  %11666 = vmatmul.msk.bf16.gmra.mxu1 %vm841_vm5, %v8721_v30  ;;  %v9124_v22 = vrot.slane %v8957_v21, 5  ;;  %v11925_v9 = vld [vmem:[#allocation3 + $0x78] sm:$0xff]  ;;  %v9122_v63 = vsel %vm12537_vm2, %v11678_v24, %v9121_v13  ;;  %v10120_v13 = vrot.slane %v10118_v19, 4  ;;  %8193 = vst.msk [vmem:[%s13809_s12 + $0x78] sm:$0xff] %vm841_vm5, %v8161_v8 }
 0x44e   : > { %7858 = vst.msk [vmem:[%s13809_s12 + $0xf0] sm:$0xff] %vm841_vm5, %v7826_v41  ;;  %v8634_v45 = vrot.slane %v8633_v56, 4  ;;  %v8660_v21 = vshll.u32 %v8256_v7, 16  ;;  %v8664_v47 = vshrl.u32 %v8256_v7, 16  ;;  %v9188_v19 = vunpack.c.l.b16 %v9122_v63 }
 0x44f   : > { %8906 = vst.msk [vmem:[%s13809_s12 + $0x50] sm:$0xff] %vm841_vm5, %v8874_v34  ;;  %v9278_v51 = vpop.f32.mrf.mxu2  ;;  %v8648_v34 = vrot.slane %v8646_v48, 5  ;;  %v9125_v30 = vsel %vm12537_vm2, %v9123_v6, %v9124_v22  ;;  %v10124_v56 = vor.u32 %v10123_v43, %v10120_v13 }
 0x450   : > { %v9358_v20 = vadd.f32 %v9278_v51, %v8976_v26  ;;  %v9189_v24 = vunpack.c.l.b16 %v9125_v30  ;;  %v8255_v26 = vld [vmem:[#allocation3 + $0xc0] sm:$0xf]  ;;  %v10137_v51 = vshll.u32 %v9808_v14, 16  ;;  %v8639_v15 = vsel %vm12116_vm13, %v8634_v45, %v15470_v5 }
 0x451   : > { %v7445_v41 = vld [vmem:[%s13809_s12 + $0xf8] sm:$0xff]  ;;  %v8649_v57 = vsel %vm12116_vm13, %v8644_v29, %v8648_v34  ;;  %v10135_v29 = vrot.slane %v10134_v28, 4  ;;  %v8651_v17 = vshrl.u32 %v8255_v26, 16  ;;  %v8666_v7 = vrot.slane %v8664_v47, 4 }
 0x452   : > { %9390 = vst.msk [vmem:[%s13809_s12] sm:$0xff] %vm841_vm5, %v9358_v20  ;;  %v6196_v46 = vld [vmem:[#allocation3 + $0xc8] sm:$0x1]  ;;  %v8705_v18 = vunpack.c.l.b16 %v8649_v57  ;;  %v8704_v4 = vunpack.c.l.b16 %v8639_v15  ;;  %v10139_v63 = vrot.slane %v10137_v51, 5  ;;  %v8958_v34 = vld [vmem:[#allocation3 + $0x84] sm:$0xe] }
 0x453   : > { %v7793_v12 = vpop.f32.mrf.mxu3  ;;  %v6197_v20 = vsel %vm12006_vm4, %v6038_v16, %v6196_v46  ;;  %v9211_v16 = vpack.c.b16 %v9189_v24, %v9188_v19  ;;  %v8653_v28 = vrot.slane %v8651_v17, 4  ;;  %v9809_v24 = vld [vmem:[#allocation3 + $0xa8] sm:$0xf]  ;;  %v9810_v46 = vld [vmem:[#allocation3 + $0xac] sm:$0xf] }
 0x454   : > { %v7827_v37 = vadd.f32 %v7793_v12, %v7445_v41  ;;  %v8811_v1 = vpop.f32.mrf.mxu1  ;;  %v15514_v55 = vpop.f32.mrf.mxu0  ;;  %v8977_v12 = vld [vmem:[%s13809_s12 + $0x8] sm:$0xff]  ;;  %6198 = vst [vmem:[#allocation3 + $0xc8] sm:$0x1] %v6197_v20  ;;  %v8959_v41 = vld [vmem:[#allocation3 + $0x88] sm:$0xf]  ;;  %v8722_v8 = vpack.c.b16 %v8705_v18, %v8704_v4  ;;  %v10140_v13 = vsel %vm12116_vm13, %v10135_v29, %v10139_v63  ;;  %v10142_v19 = vshrl.u32 %v9809_v24, 16 }
 0x455   : > { %v8875_v60 = vadd.f32 %v8811_v1, %v8269_v11  ;;  %11794 = vmatmul.msk.bf16.gmra.mxu0 %vm841_vm5, %v10281_v31  ;;  %v8270_v11 = vld [vmem:[%s13809_s12 + $0x60] sm:$0xff]  ;;  %v9128_v30 = vrot.slane %v8959_v41, 5  ;;  %v8162_v31 = vadd.f32 %v14946_v2, %v7908_v40  ;;  %v11679_v2 = vrot.slane %v8958_v34, 9  ;;  %v7909_v40 = vld [vmem:[%s13809_s12 + $0x88] sm:$0xff] }
 0x456   : > { %7859 = vst.msk [vmem:[%s13809_s12 + $0xf8] sm:$0xff] %vm841_vm5, %v7827_v37  ;;  %v8654_v37 = vshll.u32 %v8255_v26, 16  ;;  %v8978_v26 = vld [vmem:[%s13809_s12 + $0x10] sm:$0xff]  ;;  %v10262_v15 = vunpack.c.l.b16 %v10140_v13  ;;  %v10145_v20 = vshll.u32 %v9809_v24, 16  ;;  %v10151_v41 = vshll.u32 %v9810_v46, 16 }
 0x457   : > { %8907 = vst.msk [vmem:[%s13809_s12 + $0x58] sm:$0xff] %vm841_vm5, %v8875_v60  ;;  %v9280_v48 = vpop.f32.mrf.mxu2  ;;  %v10125_v60 = vrot.slane %v10124_v56, 4  ;;  %v10155_v56 = vshrl.u32 %v9810_v46, 16  ;;  %v9129_v4 = vsel %vm12537_vm2, %v11679_v2, %v9128_v30  ;;  %v8979_v46 = vld [vmem:[%s13809_s12 + $0x18] sm:$0xff] }
 0x458   : > { %11775 = vmatmul.msk.bf16.gmra.mxu3 %vm841_vm5, %v11925_v9  ;;  %v9359_v39 = vadd.f32 %v9280_v48, %v8977_v12  ;;  %v15530_v9 = vrot.slane %v8660_v21, 5  ;;  %v8656_v45 = vrot.slane %v8654_v37, 5  ;;  %v8960_v21 = vld [vmem:[#allocation3 + $0x8c] sm:$0x1]  ;;  %8194 = vst.msk [vmem:[%s13809_s12 + $0x80] sm:$0xff] %vm841_vm5, %v8162_v31 }
 0x459   : > { %v9455_v22 = vld [vmem:[%s13809_s12] sm:$0xff]  ;;  %v10130_v47 = vsel %vm12116_vm13, %v10125_v60, %v15497_v23  ;;  %v9131_v17 = vrot.slane %v8960_v21, 5  ;;  %v10157_v63 = vrot.slane %v10155_v56, 4  ;;  %v8163_v60 = vadd.f32 %v14978_v3, %v7909_v40 }
 0x45a   : > { %9391 = vst.msk [vmem:[%s13809_s12 + $0x8] sm:$0xff] %vm841_vm5, %v9359_v39  ;;  %v8667_v57 = vor.u32 %v8666_v7, %v15530_v9  ;;  %v10261_v37 = vunpack.c.l.b16 %v10130_v47  ;;  %v15579_v47 = vld [vmem:[#allocation3 + $0x1c] sm:$0xf] }
 0x45b   : > { %v9629_v6 = vpop.f32.mrf.mxu3  ;;  %v8257_v48 = vld [vmem:[#allocation3 + $0xc8] sm:$0x1]  ;;  %8195 = vst.msk [vmem:[%s13809_s12 + $0x88] sm:$0xff] %vm841_vm5, %v8163_v60  ;;  %v9813_v60 = vld [vmem:[#allocation3 + $0xb8] sm:$0xf] }
 0x45c   : > { %v9709_v5 = vadd.f32 %v9629_v6, %v9455_v22  ;;  %v8814_v1 = vpop.f32.mrf.mxu1  ;;  %11695 = vmatmul.msk.bf16.gmra.mxu2 %vm841_vm5, %v9211_v16  ;;  %v15542_v43 = vpop.f32.mrf.mxu0  ;;  %v9130_v6 = vrot.slane %v9128_v30, 4  ;;  %v8670_v18 = vshll.u32 %v8257_v48, 16  ;;  %v8657_v22 = vor.u32 %v8656_v45, %v8653_v28 }
 0x45d   : > { %v8876_v14 = vadd.f32 %v8814_v1, %v8270_v11  ;;  %11667 = vmatmul.msk.bf16.gmra.mxu1 %vm841_vm5, %v8722_v8  ;;  %v8668_v23 = vrot.slane %v8667_v57, 4  ;;  %v15559_v16 = vrot.slane %v10151_v41, 5  ;;  %v8271_v11 = vld [vmem:[%s13809_s12 + $0x68] sm:$0xff]  ;;  %v10144_v30 = vrot.slane %v10142_v19, 4 }
 0x45e   : > { %9741 = vst.msk [vmem:[%s13809_s12] sm:$0xff] %vm841_vm5, %v9709_v5  ;;  %v11926_v5 = vld [vmem:[#allocation3 + $0x84] sm:$0xff]  ;;  %v8672_v34 = vrot.slane %v8670_v18, 5  ;;  %v9132_v31 = vsel %vm12537_vm2, %v9130_v6, %v9131_v17  ;;  %v9811_v8 = vld [vmem:[#allocation3 + $0xb0] sm:$0x1]  ;;  %v10147_v28 = vrot.slane %v10145_v20, 5  ;;  %v9190_v48 = vunpack.c.l.b16 %v9129_v4 }
 0x45f   : > { %8908 = vst.msk [vmem:[%s13809_s12 + $0x60] sm:$0xff] %vm841_vm5, %v8876_v14  ;;  %v9283_v51 = vpop.f32.mrf.mxu2  ;;  %v10282_v14 = vpack.c.b16 %v10262_v15, %v10261_v37  ;;  %v10158_v45 = vor.u32 %v10157_v63, %v15559_v16  ;;  %v8658_v21 = vrot.slane %v8657_v22, 4  ;;  %v9191_v3 = vunpack.c.l.b16 %v9132_v31  ;;  %v15585_v19 = vld [vmem:[#allocation3 + $0x94] sm:$0xf]  ;;  %v8272_v17 = vld [vmem:[%s13809_s12 + $0x70] sm:$0xff] }
 0x460   : > { %v9360_v39 = vadd.f32 %v9283_v51, %v8978_v26  ;;  %v8673_v2 = vsel %vm12116_vm13, %v8668_v23, %v8672_v34  ;;  %v10161_v24 = vshll.u32 %v9811_v8, 16  ;;  %v10148_v20 = vor.u32 %v10147_v28, %v10144_v30  ;;  %v8963_v34 = vld [vmem:[#allocation3 + $0x98] sm:$0x1]  ;;  %v10493_v31 = vld [vmem:[#allocation3 + $0x20] sm:$0x1] }
 0x461   : > { %v9456_v29 = vld [vmem:[%s13809_s12 + $0x8] sm:$0xff]  ;;  %v8707_v15 = vunpack.c.l.b16 %v8673_v2  ;;  %v10621_v41 = vrot.slane %v15579_v47, 5  ;;  %v9212_v22 = vpack.c.b16 %v9191_v3, %v9190_v48  ;;  %v10175_v3 = vshll.u32 %v9813_v60, 16 }
 0x462   : > { %9392 = vst.msk [vmem:[%s13809_s12 + $0x10] sm:$0xff] %vm841_vm5, %v9360_v39  ;;  %v10159_v39 = vrot.slane %v10158_v45, 4  ;;  %v10163_v23 = vrot.slane %v10161_v24, 5  ;;  %v10149_v40 = vrot.slane %v10148_v20, 4  ;;  %v9812_v8 = vld [vmem:[#allocation3 + $0xb4] sm:$0xf] }
 0x463   : > { %v9631_v12 = vpop.f32.mrf.mxu3  ;;  %v10179_v24 = vshrl.u32 %v9813_v60, 16  ;;  %v10169_v48 = vshll.u32 %v9812_v8, 16 }
 0x464   : > { %v9710_v7 = vadd.f32 %v9631_v12, %v9456_v29  ;;  %v8816_v1 = vpop.f32.mrf.mxu1  ;;  %v15570_v57 = vpop.f32.mrf.mxu0  ;;  %v8663_v12 = vsel %vm12116_vm13, %v8658_v21, %v15530_v9  ;;  %v7910_v9 = vld [vmem:[%s13809_s12 + $0x90] sm:$0xff] }
 0x465   : > { %v8877_v13 = vadd.f32 %v8816_v1, %v8271_v11  ;;  %11795 = vmatmul.msk.bf16.gmra.mxu0 %vm841_vm5, %v10282_v14  ;;  %v8706_v29 = vunpack.c.l.b16 %v8663_v12  ;;  %v10164_v11 = vsel %vm12116_vm13, %v10159_v39, %v10163_v23  ;;  %v10154_v14 = vsel %vm12116_vm13, %v10149_v40, %v15559_v16  ;;  %v10491_v21 = vld [vmem:[#allocation3 + $0x18] sm:$0xe]  ;;  %v8273_v23 = vld [vmem:[%s13809_s12 + $0x78] sm:$0xff] }
 0x466   : > { %9742 = vst.msk [vmem:[%s13809_s12 + $0x8] sm:$0xff] %vm841_vm5, %v9710_v7  ;;  %v9135_v7 = vrot.slane %v15585_v19, 5  ;;  %v10264_v2 = vunpack.c.l.b16 %v10164_v11  ;;  %v10166_v12 = vshrl.u32 %v9812_v8, 16  ;;  %v15614_v19 = vrot.slane %v10175_v3, 5  ;;  %v15645_v3 = vld [vmem:[#allocation3 + $0xa0] sm:$0xf] }
 0x467   : > { %8909 = vst.msk [vmem:[%s13809_s12 + $0x68] sm:$0xff] %vm841_vm5, %v8877_v13  ;;  %v9285_v26 = vpop.f32.mrf.mxu2  ;;  %v8723_v63 = vpack.c.b16 %v8707_v15, %v8706_v29  ;;  %v8980_v13 = vld [vmem:[%s13809_s12 + $0x20] sm:$0xff]  ;;  %v10263_v15 = vunpack.c.l.b16 %v10154_v14  ;;  %v10181_v20 = vrot.slane %v10179_v24, 4 }
 0x468   : > { %11776 = vmatmul.msk.bf16.gmra.mxu3 %vm841_vm5, %v11926_v5  ;;  %v9361_v6 = vadd.f32 %v9285_v26, %v8979_v46  ;;  %v8164_v5 = vadd.f32 %v15009_v58, %v7910_v9  ;;  %v10623_v58 = vrot.slane %v10621_v41, 4  ;;  %v9137_v45 = vrot.slane %v9135_v7, 4  ;;  %v8961_v26 = vld [vmem:[#allocation3 + $0x90] sm:$0xe] }
 0x469   : > { %v9457_v18 = vld [vmem:[%s13809_s12 + $0x10] sm:$0xff]  ;;  %v10168_v11 = vrot.slane %v10166_v12, 4 }
 0x46a   : > { %9393 = vst.msk [vmem:[%s13809_s12 + $0x18] sm:$0xff] %vm841_vm5, %v9361_v6  ;;  %v9138_v6 = vrot.slane %v8963_v34, 5  ;;  %v10171_v34 = vrot.slane %v10169_v48, 5 }
 0x46b   : > { %v9634_v51 = vpop.f32.mrf.mxu3  ;;  %8196 = vst.msk [vmem:[%s13809_s12 + $0x90] sm:$0xff] %vm841_vm5, %v8164_v5  ;;  %v10283_v5 = vpack.c.b16 %v10264_v2, %v10263_v15 }
 0x46c   : > { %v9711_v56 = vadd.f32 %v9634_v51, %v9457_v18  ;;  %v8819_v37 = vpop.f32.mrf.mxu1  ;;  %11696 = vmatmul.msk.bf16.gmra.mxu2 %vm841_vm5, %v9212_v22  ;;  %v15600_v1 = vpop.f32.mrf.mxu0  ;;  %v10624_v51 = vrot.slane %v10493_v31, 5  ;;  %v11927_v18 = vld [vmem:[#allocation3 + $0x90] sm:$0xff]  ;;  %v7911_v22 = vld [vmem:[%s13809_s12 + $0x98] sm:$0xff]  ;;  %v10182_v31 = vor.u32 %v10181_v20, %v15614_v19  ;;  %v10172_v24 = vor.u32 %v10171_v34, %v10168_v11 }
 0x46d   : > { %v8878_v4 = vadd.f32 %v8819_v37, %v8272_v17  ;;  %11668 = vmatmul.msk.bf16.gmra.mxu1 %vm841_vm5, %v8723_v63  ;;  %v11680_v17 = vrot.slane %v8961_v26, 9  ;;  %v9139_v37 = vsel %vm12537_vm2, %v9137_v45, %v9138_v6  ;;  %v8165_v63 = vadd.f32 %v15037_v0, %v7911_v22  ;;  %v15643_v45 = vld [vmem:[#allocation3 + $0x28] sm:$0xf] }
 0x46e   : > { %9743 = vst.msk [vmem:[%s13809_s12 + $0x10] sm:$0xff] %vm841_vm5, %v9711_v56  ;;  %v11800_v56 = vrot.slane %v10491_v21, 9  ;;  %v10625_v29 = vsel %vm12537_vm2, %v10623_v58, %v10624_v51  ;;  %v9193_v0 = vunpack.c.l.b16 %v9139_v37  ;;  %v10628_v12 = vrot.slane %v15643_v45, 5  ;;  %v8274_v6 = vld [vmem:[%s13809_s12 + $0x80] sm:$0xff] }
 0x46f   : > { %8910 = vst.msk [vmem:[%s13809_s12 + $0x70] sm:$0xff] %vm841_vm5, %v8878_v4  ;;  %v9288_v30 = vpop.f32.mrf.mxu2  ;;  %v9814_v4 = vld [vmem:[#allocation3 + $0xbc] sm:$0x1]  ;;  %v9136_v14 = vsel %vm12537_vm2, %v11680_v17, %v9135_v7  ;;  %v10734_v7 = vunpack.c.l.b16 %v10625_v29  ;;  %v9142_v20 = vrot.slane %v15645_v3, 5  ;;  %v10173_v29 = vrot.slane %v10172_v24, 4 }
 0x470   : > { %v9362_v46 = vadd.f32 %v9288_v30, %v8980_v13  ;;  %8197 = vst.msk [vmem:[%s13809_s12 + $0x98] sm:$0xff] %vm841_vm5, %v8165_v63  ;;  %v10622_v8 = vsel %vm12537_vm2, %v11800_v56, %v10621_v41  ;;  %v10185_v60 = vshll.u32 %v9814_v4, 16  ;;  %v8981_v13 = vld [vmem:[%s13809_s12 + $0x28] sm:$0xff]  ;;  %v9192_v2 = vunpack.c.l.b16 %v9136_v14  ;;  %v9816_v4 = vld [vmem:[#allocation3 + $0xc4] sm:$0xf]  ;;  %v8982_v63 = vld [vmem:[%s13809_s12 + $0x30] sm:$0xff] }
 0x471   : > { %v9458_v16 = vld [vmem:[%s13809_s12 + $0x18] sm:$0xff]  ;;  %v10733_v26 = vunpack.c.l.b16 %v10622_v8  ;;  %v10630_v17 = vrot.slane %v10628_v12, 4  ;;  %v10178_v37 = vsel %vm12116_vm13, %v10173_v29, %v15614_v19  ;;  %v9144_v34 = vrot.slane %v9142_v20, 4 }
 0x472   : > { %9394 = vst.msk [vmem:[%s13809_s12 + $0x20] sm:$0xff] %vm841_vm5, %v9362_v46  ;;  %v10183_v46 = vrot.slane %v10182_v31, 4  ;;  %v9213_v51 = vpack.c.b16 %v9193_v0, %v9192_v2  ;;  %v10187_v48 = vrot.slane %v10185_v60, 5  ;;  %v10199_v14 = vshll.u32 %v9816_v4, 16  ;;  %v8964_v60 = vld [vmem:[#allocation3 + $0x9c] sm:$0xe] }
 0x473   : > { %v9636_v28 = vpop.f32.mrf.mxu3  ;;  %v10765_v56 = vpack.c.b16 %v10734_v7, %v10733_v26  ;;  %v10203_v0 = vshrl.u32 %v9816_v4, 16  ;;  %v10265_v19 = vunpack.c.l.b16 %v10178_v37 }
 0x474   : > { %v9712_v39 = vadd.f32 %v9636_v28, %v9458_v16  ;;  %v8821_v9 = vpop.f32.mrf.mxu1  ;;  %v15629_v58 = vpop.f32.mrf.mxu0  ;;  %v7912_v16 = vld [vmem:[%s13809_s12 + $0xa0] sm:$0xff]  ;;  %v10188_v22 = vsel %vm12116_vm13, %v10183_v46, %v10187_v48  ;;  %v15674_v2 = vrot.slane %v10199_v14, 5  ;;  %v11928_v46 = vld [vmem:[#allocation3 + $0x9c] sm:$0xff] }
 0x475   : > { %v8879_v40 = vadd.f32 %v8821_v9, %v8273_v23  ;;  %11796 = vmatmul.msk.bf16.gmra.mxu0 %vm841_vm5, %v10283_v5  ;;  %v8966_v23 = vld [vmem:[#allocation3 + $0xa4] sm:$0x1]  ;;  %v10496_v9 = vld [vmem:[#allocation3 + $0x2c] sm:$0x1]  ;;  %v9815_v5 = vld [vmem:[#allocation3 + $0xc0] sm:$0xf]  ;;  %v10266_v31 = vunpack.c.l.b16 %v10188_v22 }
 0x476   : > { %9744 = vst.msk [vmem:[%s13809_s12 + $0x18] sm:$0xff] %vm841_vm5, %v9712_v39  ;;  %v8166_v39 = vadd.f32 %v15068_v38, %v7912_v16  ;;  %v10205_v3 = vrot.slane %v10203_v0, 4  ;;  %v11681_v16 = vrot.slane %v8964_v60, 9  ;;  %v8968_v14 = vld [vmem:[#allocation3 + $0xac] sm:$0xf] }
 0x477   : > { %8911 = vst.msk [vmem:[%s13809_s12 + $0x78] sm:$0xff] %vm841_vm5, %v8879_v40  ;;  %v9290_v30 = vpop.f32.mrf.mxu2 }
 0x478   : > { %11777 = vmatmul.msk.bf16.gmra.mxu3 %vm841_vm5, %v11927_v18  ;;  %v9363_v21 = vadd.f32 %v9290_v30, %v8981_v13  ;;  %8198 = vst.msk [vmem:[%s13809_s12 + $0xa0] sm:$0xff] %vm841_vm5, %v8166_v39  ;;  %v10631_v13 = vrot.slane %v10496_v9, 5  ;;  %v10190_v30 = vshrl.u32 %v9815_v5, 16  ;;  %v9817_v39 = vld [vmem:[#allocation3 + $0xc8] sm:$0x1]  ;;  %v9143_v9 = vsel %vm12537_vm2, %v11681_v16, %v9142_v20 }
 0x479   : > { %v9459_v47 = vld [vmem:[%s13809_s12 + $0x20] sm:$0xff]  ;;  %v10209_v37 = vshll.u32 %v9817_v39, 16 }
 0x47a   : > { %9395 = vst.msk [vmem:[%s13809_s12 + $0x28] sm:$0xff] %vm841_vm5, %v9363_v21  ;;  %v9145_v21 = vrot.slane %v8966_v23, 5  ;;  %v10632_v26 = vsel %vm12537_vm2, %v10630_v17, %v10631_v13  ;;  %v10192_v29 = vrot.slane %v10190_v30, 4  ;;  %v10206_v23 = vor.u32 %v10205_v3, %v15674_v2  ;;  %v8984_v16 = vld [vmem:[%s13809_s12 + $0x40] sm:$0xff] }
 0x47b   : > { %v9639_v28 = vpop.f32.mrf.mxu3  ;;  %v9149_v3 = vrot.slane %v8968_v14, 5 }
 0x47c   : > { %v9713_v41 = vadd.f32 %v9639_v28, %v9459_v47  ;;  %v8824_v15 = vpop.f32.mrf.mxu1  ;;  %11697 = vmatmul.msk.bf16.gmra.mxu2 %vm841_vm5, %v9213_v51  ;;  %v15665_v38 = vpop.f32.mrf.mxu0  ;;  %v10193_v28 = vshll.u32 %v9815_v5, 16  ;;  %v10494_v47 = vld [vmem:[#allocation3 + $0x24] sm:$0xe]  ;;  %v8275_v51 = vld [vmem:[%s13809_s12 + $0x88] sm:$0xff] }
 0x47d   : > { %v8880_v18 = vadd.f32 %v8824_v15, %v8274_v6  ;;  %11817 = vmatmul.msk.bf16.vlgmr.msra.gmra.mxu1 %vm841_vm5, %v10765_v56  ;;  %v9146_v6 = vsel %vm12537_vm2, %v9144_v34, %v9145_v21  ;;  %v10284_v15 = vpack.c.b16 %v10266_v31, %v10265_v19  ;;  %v11801_v17 = vrot.slane %v10494_v47, 9  ;;  %v8983_v5 = vld [vmem:[%s13809_s12 + $0x38] sm:$0xff]  ;;  %v8276_v21 = vld [vmem:[%s13809_s12 + $0x90] sm:$0xff] }
 0x47e   : > { %9745 = vst.msk [vmem:[%s13809_s12 + $0x20] sm:$0xff] %vm841_vm5, %v9713_v41  ;;  %v7913_v41 = vld [vmem:[%s13809_s12 + $0xa8] sm:$0xff]  ;;  %v10195_v22 = vrot.slane %v10193_v28, 5  ;;  %v9194_v31 = vunpack.c.l.b16 %v9143_v9  ;;  %v9151_v39 = vrot.slane %v9149_v3, 4 }
 0x47f   : > { %8912 = vst.msk [vmem:[%s13809_s12 + $0x80] sm:$0xff] %vm841_vm5, %v8880_v18  ;;  %v9293_v40 = vpop.f32.mrf.mxu2  ;;  %v8167_v18 = vadd.f32 %v15093_v36, %v7913_v41  ;;  %v9195_v36 = vunpack.c.l.b16 %v9146_v6  ;;  %v10629_v20 = vsel %vm12537_vm2, %v11801_v17, %v10628_v12  ;;  %v10498_v28 = vld [vmem:[#allocation3 + $0x34] sm:$0xf]  ;;  %v10211_v12 = vrot.slane %v10209_v37, 5 }
 0x480   : > { %v9364_v8 = vadd.f32 %v9293_v40, %v8982_v63  ;;  %v10736_v40 = vunpack.c.l.b16 %v10632_v26  ;;  %v10196_v0 = vor.u32 %v10195_v22, %v10192_v29  ;;  %v10735_v45 = vunpack.c.l.b16 %v10629_v20  ;;  %v8967_v22 = vld [vmem:[#allocation3 + $0xa8] sm:$0xe]  ;;  %v7915_v20 = vld [vmem:[%s13809_s12 + $0xb8] sm:$0xff] }
 0x481   : > { %v9460_v7 = vld [vmem:[%s13809_s12 + $0x28] sm:$0xff]  ;;  %8199 = vst.msk [vmem:[%s13809_s12 + $0xa8] sm:$0xff] %vm841_vm5, %v8167_v18  ;;  %v9214_v30 = vpack.c.b16 %v9195_v36, %v9194_v31  ;;  %v10499_v18 = vld [vmem:[#allocation3 + $0x38] sm:$0x1]  ;;  %v11682_v31 = vrot.slane %v8967_v22, 9 }
 0x482   : > { %9396 = vst.msk [vmem:[%s13809_s12 + $0x30] sm:$0xff] %vm841_vm5, %v9364_v8  ;;  %v10207_v8 = vrot.slane %v10206_v23, 4  ;;  %v10766_v47 = vpack.c.b16 %v10736_v40, %v10735_v45  ;;  %v10197_v26 = vrot.slane %v10196_v0, 4  ;;  %v8277_v40 = vld [vmem:[%s13809_s12 + $0x98] sm:$0xff] }
 0x483   : > { %v9641_v11 = vpop.f32.mrf.mxu3 }
 0x484   : > { %v9714_v24 = vadd.f32 %v9641_v11, %v9460_v7  ;;  %v8826_v48 = vpop.f32.mrf.mxu1  ;;  %v15701_v34 = vpop.f32.mrf.mxu0  ;;  %v7914_v7 = vld [vmem:[%s13809_s12 + $0xb0] sm:$0xff]  ;;  %v10212_v41 = vsel %vm12116_vm13, %v10207_v8, %v10211_v12  ;;  %v8169_v8 = vadd.f32 %v15150_v42, %v7915_v20 }
 0x485   : > { %v8881_v56 = vadd.f32 %v8826_v48, %v8275_v51  ;;  %11797 = vmatmul.msk.bf16.gmra.mxu0 %vm841_vm5, %v10284_v15  ;;  %v10635_v51 = vrot.slane %v10498_v28, 5  ;;  %v10202_v48 = vsel %vm12116_vm13, %v10197_v26, %v15674_v2  ;;  %v11929_v2 = vld [vmem:[#allocation3 + $0xa8] sm:$0xff]  ;;  %v8985_v28 = vld [vmem:[%s13809_s12 + $0x48] sm:$0xff] }
 0x486   : > { %9746 = vst.msk [vmem:[%s13809_s12 + $0x28] sm:$0xff] %vm841_vm5, %v9714_v24  ;;  %v8168_v24 = vadd.f32 %v15121_v10, %v7914_v7  ;;  %v8969_v10 = vld [vmem:[#allocation3 + $0xb0] sm:$0x1]  ;;  %v10267_v36 = vunpack.c.l.b16 %v10202_v48  ;;  %v10501_v48 = vld [vmem:[#allocation3 + $0x40] sm:$0xf] }
 0x487   : > { %8913 = vst.msk [vmem:[%s13809_s12 + $0x88] sm:$0xff] %vm841_vm5, %v8881_v56  ;;  %v9295_v4 = vpop.f32.mrf.mxu2  ;;  %v10268_v56 = vunpack.c.l.b16 %v10212_v41  ;;  %v9152_v9 = vrot.slane %v8969_v10, 5  ;;  %v10637_v17 = vrot.slane %v10635_v51, 4  ;;  %v10642_v22 = vrot.slane %v10501_v48, 5  ;;  %v8974_v48 = vld [vmem:[#allocation3 + $0xc4] sm:$0xf] }
 0x488   : > { %11778 = vmatmul.msk.bf16.gmra.mxu3 %vm841_vm5, %v11928_v46  ;;  %v9365_v11 = vadd.f32 %v9295_v4, %v8983_v5  ;;  %8200 = vst.msk [vmem:[%s13809_s12 + $0xb0] sm:$0xff] %vm841_vm5, %v8168_v24  ;;  %v10497_v4 = vld [vmem:[#allocation3 + $0x30] sm:$0xe] }
 0x489   : > { %v9461_v60 = vld [vmem:[%s13809_s12 + $0x30] sm:$0xff]  ;;  %v9153_v14 = vsel %vm12537_vm2, %v9151_v39, %v9152_v9  ;;  %v10285_v0 = vpack.c.b16 %v10268_v56, %v10267_v36  ;;  %8201 = vst.msk [vmem:[%s13809_s12 + $0xb8] sm:$0xff] %vm841_vm5, %v8169_v8  ;;  %v8279_v8 = vld [vmem:[%s13809_s12 + $0xa8] sm:$0xff] }
 0x48a   : > { %9397 = vst.msk [vmem:[%s13809_s12 + $0x38] sm:$0xff] %vm841_vm5, %v9365_v11  ;;  %v9197_v42 = vunpack.c.l.b16 %v9153_v14  ;;  %v10500_v14 = vld [vmem:[#allocation3 + $0x3c] sm:$0xe] }
 0x48b   : > { %v9644_v63 = vpop.f32.mrf.mxu3 }
 0x48c   : > { %v9715_v13 = vadd.f32 %v9644_v63, %v9461_v60  ;;  %v8829_v19 = vpop.f32.mrf.mxu1  ;;  %11698 = vmatmul.msk.bf16.gmra.mxu2 %vm841_vm5, %v9214_v30  ;;  %v15726_v5 = vpop.f32.mrf.mxu0  ;;  %v10638_v63 = vrot.slane %v10499_v18, 5  ;;  %v11802_v30 = vrot.slane %v10497_v4, 9  ;;  %v10502_v4 = vld [vmem:[#allocation3 + $0x44] sm:$0x1] }
 0x48d   : > { %v8882_v46 = vadd.f32 %v8829_v19, %v8276_v21  ;;  %11818 = vmatmul.msk.bf16.gmra.mxu1 %vm841_vm5, %v10766_v47 }
 0x48e   : > { %9747 = vst.msk [vmem:[%s13809_s12 + $0x30] sm:$0xff] %vm841_vm5, %v9715_v13  ;;  %v9150_v13 = vsel %vm12537_vm2, %v11682_v31, %v9149_v3  ;;  %v10639_v45 = vsel %vm12537_vm2, %v10637_v17, %v10638_v63  ;;  %v10636_v21 = vsel %vm12537_vm2, %v11802_v30, %v10635_v51  ;;  %v11930_v31 = vld [vmem:[#allocation3 + $0xb4] sm:$0xff] }
 0x48f   : > { %8914 = vst.msk [vmem:[%s13809_s12 + $0x90] sm:$0xff] %vm841_vm5, %v8882_v46  ;;  %v9298_v6 = vpop.f32.mrf.mxu2  ;;  %v9196_v3 = vunpack.c.l.b16 %v9150_v13  ;;  %v10738_v24 = vunpack.c.l.b16 %v10639_v45  ;;  %v8971_v46 = vld [vmem:[#allocation3 + $0xb8] sm:$0xf]  ;;  %v10737_v10 = vunpack.c.l.b16 %v10636_v21  ;;  %v10645_v45 = vrot.slane %v10502_v4, 5 }
 0x490   : > { %v9366_v29 = vadd.f32 %v9298_v6, %v8984_v16  ;;  %v7916_v16 = vld [vmem:[%s13809_s12 + $0xc0] sm:$0xff]  ;;  %v9156_v39 = vrot.slane %v8971_v46, 5 }
 0x491   : > { %v9462_v23 = vld [vmem:[%s13809_s12 + $0x38] sm:$0xff]  ;;  %v9215_v41 = vpack.c.b16 %v9197_v42, %v9196_v3  ;;  %v8278_v6 = vld [vmem:[%s13809_s12 + $0xa0] sm:$0xff]  ;;  %v8170_v51 = vadd.f32 %v15176_v32, %v7916_v16  ;;  %v8986_v32 = vld [vmem:[%s13809_s12 + $0x50] sm:$0xff] }
 0x492   : > { %9398 = vst.msk [vmem:[%s13809_s12 + $0x40] sm:$0xff] %vm841_vm5, %v9366_v29  ;;  %v10767_v29 = vpack.c.b16 %v10738_v24, %v10737_v10  ;;  %v9158_v36 = vrot.slane %v9156_v39, 4  ;;  %v8987_v3 = vld [vmem:[%s13809_s12 + $0x58] sm:$0xff] }
 0x493   : > { %v9646_v15 = vpop.f32.mrf.mxu3  ;;  %8202 = vst.msk [vmem:[%s13809_s12 + $0xc0] sm:$0xff] %vm841_vm5, %v8170_v51  ;;  %v10504_v51 = vld [vmem:[#allocation3 + $0x4c] sm:$0xf] }
 0x494   : > { %v9716_v37 = vadd.f32 %v9646_v15, %v9462_v23  ;;  %v8831_v11 = vpop.f32.mrf.mxu1  ;;  %v15756_v56 = vpop.f32.mrf.mxu0  ;;  %v8972_v23 = vld [vmem:[#allocation3 + $0xbc] sm:$0x1] }
 0x495   : > { %v8883_v60 = vadd.f32 %v8831_v11, %v8277_v40  ;;  %11798 = vmatmul.msk.bf16.gmra.mxu0 %vm841_vm5, %v10285_v0  ;;  %v9159_v20 = vrot.slane %v8972_v23, 5  ;;  %v10644_v40 = vrot.slane %v10642_v22, 4  ;;  %v7917_v0 = vld [vmem:[%s13809_s12 + $0xc8] sm:$0xff] }
 0x496   : > { %9748 = vst.msk [vmem:[%s13809_s12 + $0x38] sm:$0xff] %vm841_vm5, %v9716_v37  ;;  %v8171_v42 = vadd.f32 %v15202_v33, %v7917_v0 }
 0x497   : > { %8915 = vst.msk [vmem:[%s13809_s12 + $0x98] sm:$0xff] %vm841_vm5, %v8883_v60  ;;  %v9300_v12 = vpop.f32.mrf.mxu2  ;;  %v9160_v30 = vsel %vm12537_vm2, %v9158_v36, %v9159_v20  ;;  %v10646_v21 = vsel %vm12537_vm2, %v10644_v40, %v10645_v45  ;;  %v10649_v36 = vrot.slane %v10504_v51, 5  ;;  %v7919_v45 = vld [vmem:[%s13809_s12 + $0xd8] sm:$0xff] }
 0x498   : > { %11779 = vmatmul.msk.bf16.gmra.mxu3 %vm841_vm5, %v11929_v2  ;;  %v9367_v19 = vadd.f32 %v9300_v12, %v8985_v28  ;;  %v8970_v2 = vld [vmem:[#allocation3 + $0xb4] sm:$0xe]  ;;  %8203 = vst.msk [vmem:[%s13809_s12 + $0xc8] sm:$0xff] %vm841_vm5, %v8171_v42  ;;  %v9199_v33 = vunpack.c.l.b16 %v9160_v30  ;;  %v10740_v10 = vunpack.c.l.b16 %v10646_v21  ;;  %v10503_v30 = vld [vmem:[#allocation3 + $0x48] sm:$0xe]  ;;  %v8281_v42 = vld [vmem:[%s13809_s12 + $0xb8] sm:$0xff] }
 0x499   : > { %v9463_v47 = vld [vmem:[%s13809_s12 + $0x40] sm:$0xff]  ;;  %v11683_v13 = vrot.slane %v8970_v2, 9 }
 0x49a   : > { %9399 = vst.msk [vmem:[%s13809_s12 + $0x48] sm:$0xff] %vm841_vm5, %v9367_v19  ;;  %v8988_v2 = vld [vmem:[%s13809_s12 + $0x60] sm:$0xff] }
 0x49b   : > { %v9649_v7 = vpop.f32.mrf.mxu3  ;;  %v9157_v12 = vsel %vm12537_vm2, %v11683_v13, %v9156_v39  ;;  %v11931_v13 = vld [vmem:[#allocation3 + $0xc0] sm:$0xff]  ;;  %v8282_v51 = vld [vmem:[%s13809_s12 + $0xc0] sm:$0xff] }
 0x49c   : > { %v9717_v26 = vadd.f32 %v9649_v7, %v9463_v47  ;;  %v8834_v15 = vpop.f32.mrf.mxu1  ;;  %11699 = vmatmul.msk.bf16.gmra.mxu2 %vm841_vm5, %v9215_v41  ;;  %v11803_v7 = vrot.slane %v10500_v14, 9  ;;  %v15784_v19 = vpop.f32.mrf.mxu0  ;;  %v9198_v41 = vunpack.c.l.b16 %v9157_v12 }
 0x49d   : > { %v8884_v18 = vadd.f32 %v8834_v15, %v8278_v6  ;;  %11819 = vmatmul.msk.bf16.gmra.mxu1 %vm841_vm5, %v10767_v29  ;;  %v8280_v29 = vld [vmem:[%s13809_s12 + $0xb0] sm:$0xff] }
 0x49e   : > { %9749 = vst.msk [vmem:[%s13809_s12 + $0x40] sm:$0xff] %vm841_vm5, %v9717_v26  ;;  %v10643_v47 = vsel %vm12537_vm2, %v11803_v7, %v10642_v22  ;;  %v9216_v15 = vpack.c.b16 %v9199_v33, %v9198_v41  ;;  %v8173_v33 = vadd.f32 %v15258_v53, %v7919_v45  ;;  %v8989_v41 = vld [vmem:[%s13809_s12 + $0x68] sm:$0xff] }
 0x49f   : > { %8916 = vst.msk [vmem:[%s13809_s12 + $0xa0] sm:$0xff] %vm841_vm5, %v8884_v18  ;;  %v9303_v9 = vpop.f32.mrf.mxu2  ;;  %v10739_v39 = vunpack.c.l.b16 %v10643_v47  ;;  %v7918_v18 = vld [vmem:[%s13809_s12 + $0xd0] sm:$0xff] }
 0x4a0   : > { %v9368_v37 = vadd.f32 %v9303_v9, %v8986_v32  ;;  %v9163_v32 = vrot.slane %v8974_v48, 5  ;;  %v8172_v22 = vadd.f32 %v15230_v35, %v7918_v18  ;;  %8205 = vst.msk [vmem:[%s13809_s12 + $0xd8] sm:$0xff] %vm841_vm5, %v8173_v33 }
 0x4a1   : > { %v9464_v63 = vld [vmem:[%s13809_s12 + $0x48] sm:$0xff] }
 0x4a2   : > { %9400 = vst.msk [vmem:[%s13809_s12 + $0x50] sm:$0xff] %vm841_vm5, %v9368_v37  ;;  %v8975_v37 = vld [vmem:[#allocation3 + $0xc8] sm:$0x1] }
 0x4a3   : > { %v9651_v17 = vpop.f32.mrf.mxu3  ;;  %8204 = vst.msk [vmem:[%s13809_s12 + $0xd0] sm:$0xff] %vm841_vm5, %v8172_v22  ;;  %v9166_v0 = vrot.slane %v8975_v37, 5  ;;  %v9819_v37 = vld [vmem:[#allocation3 + $0xd0] sm:$0xf] }
 0x4a4   : > { %v9718_v11 = vadd.f32 %v9651_v17, %v9464_v63  ;;  %v8836_v60 = vpop.f32.mrf.mxu1  ;;  %v10768_v17 = vpack.c.b16 %v10740_v10, %v10739_v39  ;;  %v9165_v63 = vrot.slane %v9163_v32, 4  ;;  %v15804_v20 = vpop.f32.mrf.mxu0 }
 0x4a5   : > { %v8885_v28 = vadd.f32 %v8836_v60, %v8279_v8  ;;  %v10651_v8 = vrot.slane %v10649_v36, 4 }
 0x4a6   : > { %9750 = vst.msk [vmem:[%s13809_s12 + $0x48] sm:$0xff] %vm841_vm5, %v9718_v11  ;;  %v8973_v11 = vld [vmem:[#allocation3 + $0xc0] sm:$0xe]  ;;  %v9167_v7 = vsel %vm12537_vm2, %v9165_v63, %v9166_v0 }
 0x4a7   : > { %8917 = vst.msk [vmem:[%s13809_s12 + $0xa8] sm:$0xff] %vm841_vm5, %v8885_v28  ;;  %v9305_v24 = vpop.f32.mrf.mxu2  ;;  %v11684_v12 = vrot.slane %v8973_v11, 9  ;;  %v9201_v53 = vunpack.c.l.b16 %v9167_v7  ;;  %v10227_v11 = vshrl.u32 %v9819_v37, 16 }
 0x4a8   : > { %11780 = vmatmul.msk.bf16.gmra.mxu3 %vm841_vm5, %v11930_v31  ;;  %v9369_v26 = vadd.f32 %v9305_v24, %v8987_v3  ;;  %v10505_v31 = vld [vmem:[#allocation3 + $0x50] sm:$0x1] }
 0x4a9   : > { %v9465_v16 = vld [vmem:[%s13809_s12 + $0x50] sm:$0xff]  ;;  %v10652_v21 = vrot.slane %v10505_v31, 5  ;;  %v9164_v24 = vsel %vm12537_vm2, %v11684_v12, %v9163_v32  ;;  %v10229_v45 = vrot.slane %v10227_v11, 4 }
 0x4aa   : > { %9401 = vst.msk [vmem:[%s13809_s12 + $0x58] sm:$0xff] %vm841_vm5, %v9369_v26  ;;  %v15825_v26 = vld [vmem:[#allocation3 + $0x58] sm:$0xf] }
 0x4ab   : > { %v9654_v46 = vpop.f32.mrf.mxu3  ;;  %v10653_v47 = vsel %vm12537_vm2, %v10651_v8, %v10652_v21 }
 0x4ac   : > { %v9719_v6 = vadd.f32 %v9654_v46, %v9465_v16  ;;  %v8839_v23 = vpop.f32.mrf.mxu1  ;;  %11700 = vmatmul.msk.bf16.gmra.mxu2 %vm841_vm5, %v9216_v15  ;;  %v11804_v46 = vrot.slane %v10503_v30, 9  ;;  %v9200_v15 = vunpack.c.l.b16 %v9164_v24  ;;  %v10742_v39 = vunpack.c.l.b16 %v10653_v47  ;;  %v10508_v24 = vld [vmem:[#allocation3 + $0x5c] sm:$0x1] }
 0x4ad   : > { %v8886_v9 = vadd.f32 %v8839_v23, %v8280_v29  ;;  %11820 = vmatmul.msk.bf16.gmra.mxu1 %vm841_vm5, %v10768_v17  ;;  %v10656_v29 = vrot.slane %v15825_v26, 5  ;;  %v15833_v23 = vpop.f32.mrf.mxu0  ;;  %v9818_v17 = vld [vmem:[#allocation3 + $0xcc] sm:$0xf] }
 0x4ae   : > { %9751 = vst.msk [vmem:[%s13809_s12 + $0x50] sm:$0xff] %vm841_vm5, %v9719_v6  ;;  %v10650_v16 = vsel %vm12537_vm2, %v11804_v46, %v10649_v36  ;;  %v9217_v22 = vpack.c.b16 %v9201_v53, %v9200_v15  ;;  %v9820_v36 = vld [vmem:[#allocation3 + $0xd4] sm:$0x1]  ;;  %v10217_v63 = vshll.u32 %v9818_v17, 16 }
 0x4af   : > { %8918 = vst.msk [vmem:[%s13809_s12 + $0xb0] sm:$0xff] %vm841_vm5, %v8886_v9  ;;  %v9308_v35 = vpop.f32.mrf.mxu2  ;;  %v10741_v9 = vunpack.c.l.b16 %v10650_v16  ;;  %v10233_v0 = vshll.u32 %v9820_v36, 16  ;;  %v10658_v47 = vrot.slane %v10656_v29, 4  ;;  %v7921_v16 = vld [vmem:[%s13809_s12 + $0xe8] sm:$0xff] }
 0x4b0   : > { %v9370_v40 = vadd.f32 %v9308_v35, %v8988_v2  ;;  %v7920_v2 = vld [vmem:[%s13809_s12 + $0xe0] sm:$0xff] }
 0x4b1   : > { %v9466_v14 = vld [vmem:[%s13809_s12 + $0x58] sm:$0xff]  ;;  %v8174_v8 = vadd.f32 %v15286_v52, %v7920_v2  ;;  %v10235_v33 = vrot.slane %v10233_v0, 5 }
 0x4b2   : > { %9402 = vst.msk [vmem:[%s13809_s12 + $0x60] sm:$0xff] %vm841_vm5, %v9370_v40  ;;  %v10223_v40 = vshll.u32 %v9819_v37, 16 }
 0x4b3   : > { %v9656_v4 = vpop.f32.mrf.mxu3  ;;  %8206 = vst.msk [vmem:[%s13809_s12 + $0xe0] sm:$0xff] %vm841_vm5, %v8174_v8  ;;  %v10510_v8 = vld [vmem:[#allocation3 + $0x64] sm:$0xf] }
 0x4b4   : > { %v9720_v60 = vadd.f32 %v9656_v4, %v9466_v14  ;;  %v8841_v28 = vpop.f32.mrf.mxu1  ;;  %v10214_v4 = vshrl.u32 %v9818_v17, 16  ;;  %v10769_v14 = vpack.c.b16 %v10742_v39, %v10741_v9  ;;  %v10225_v30 = vrot.slane %v10223_v40, 5 }
 0x4b5   : > { %v8887_v3 = vadd.f32 %v8841_v28, %v8281_v42  ;;  %v8990_v42 = vld [vmem:[%s13809_s12 + $0x70] sm:$0xff]  ;;  %v10659_v39 = vrot.slane %v10508_v24, 5 }
 0x4b6   : > { %9752 = vst.msk [vmem:[%s13809_s12 + $0x58] sm:$0xff] %vm841_vm5, %v9720_v60  ;;  %v10216_v60 = vrot.slane %v10214_v4, 4  ;;  %v10230_v21 = vor.u32 %v10229_v45, %v10225_v30 }
 0x4b7   : > { %8919 = vst.msk [vmem:[%s13809_s12 + $0xb8] sm:$0xff] %vm841_vm5, %v8887_v3  ;;  %v9310_v10 = vpop.f32.mrf.mxu2  ;;  %v11932_v3 = vld [vmem:[#allocation3 + $0xcc] sm:$0xff] }
 0x4b8   : > { %11781 = vmatmul.msk.bf16.gmra.mxu3 %vm841_vm5, %v11931_v13  ;;  %v9371_v6 = vadd.f32 %v9310_v10, %v8989_v41  ;;  %v10219_v13 = vrot.slane %v10217_v63, 5  ;;  %v10231_v41 = vrot.slane %v10230_v21, 4 }
 0x4b9   : > { %v9467_v18 = vld [vmem:[%s13809_s12 + $0x60] sm:$0xff] }
 0x4ba   : > { %9403 = vst.msk [vmem:[%s13809_s12 + $0x68] sm:$0xff] %vm841_vm5, %v9371_v6  ;;  %v10220_v7 = vor.u32 %v10219_v13, %v10216_v60  ;;  %v8283_v6 = vld [vmem:[%s13809_s12 + $0xc8] sm:$0xff]  ;;  %v7922_v60 = vld [vmem:[%s13809_s12 + $0xf0] sm:$0xff] }
 0x4bb   : > { %v9659_v48 = vpop.f32.mrf.mxu3  ;;  %v8284_v13 = vld [vmem:[%s13809_s12 + $0xd0] sm:$0xff] }
 0x4bc   : > { %v9721_v32 = vadd.f32 %v9659_v48, %v9467_v18  ;;  %v8844_v35 = vpop.f32.mrf.mxu1  ;;  %11701 = vmatmul.msk.bf16.gmra.mxu2 %vm841_vm5, %v9217_v22  ;;  %v10221_v53 = vrot.slane %v10220_v7, 4  ;;  %v10506_v48 = vld [vmem:[#allocation3 + $0x54] sm:$0xe]  ;;  %v10236_v18 = vsel %vm12116_vm13, %v10231_v41, %v10235_v33  ;;  %v15860_v22 = vpop.f32.mrf.mxu0  ;;  %v10511_v33 = vld [vmem:[#allocation3 + $0x68] sm:$0x1] }
 0x4bd   : > { %v8888_v31 = vadd.f32 %v8844_v35, %v8282_v51  ;;  %11821 = vmatmul.msk.bf16.gmra.mxu1 %vm841_vm5, %v10769_v14  ;;  %v10270_v37 = vunpack.c.l.b16 %v10236_v18  ;;  %v11805_v2 = vrot.slane %v10506_v48, 9  ;;  %v10660_v35 = vsel %vm12537_vm2, %v10658_v47, %v10659_v39  ;;  %v7923_v47 = vld [vmem:[%s13809_s12 + $0xf8] sm:$0xff]  ;;  %v8993_v39 = vld [vmem:[%s13809_s12 + $0x88] sm:$0xff] }
 0x4be   : > { %9753 = vst.msk [vmem:[%s13809_s12 + $0x60] sm:$0xff] %vm841_vm5, %v9721_v32  ;;  %v10226_v51 = vsel %vm12116_vm13, %v10221_v53, %v10225_v30  ;;  %v8175_v32 = vadd.f32 %v15312_v44, %v7921_v16  ;;  %v8991_v44 = vld [vmem:[%s13809_s12 + $0x78] sm:$0xff]  ;;  %v10744_v11 = vunpack.c.l.b16 %v10660_v35  ;;  %v8176_v30 = vadd.f32 %v15340_v50, %v7922_v60 }
 0x4bf   : > { %8920 = vst.msk [vmem:[%s13809_s12 + $0xc0] sm:$0xff] %vm841_vm5, %v8888_v31  ;;  %v9313_v28 = vpop.f32.mrf.mxu2  ;;  %v10269_v17 = vunpack.c.l.b16 %v10226_v51  ;;  %v10657_v63 = vsel %vm12537_vm2, %v11805_v2, %v10656_v29  ;;  %v8285_v53 = vld [vmem:[%s13809_s12 + $0xd8] sm:$0xff]  ;;  %v8177_v48 = vadd.f32 %v15369_v25, %v7923_v47 }
 0x4c0   : > { %v9372_v52 = vadd.f32 %v9313_v28, %v8990_v42  ;;  %8207 = vst.msk [vmem:[%s13809_s12 + $0xe8] sm:$0xff] %vm841_vm5, %v8175_v32  ;;  %v10743_v0 = vunpack.c.l.b16 %v10657_v63  ;;  %v10663_v42 = vrot.slane %v10510_v8, 5 }
 0x4c1   : > { %v9468_v46 = vld [vmem:[%s13809_s12 + $0x68] sm:$0xff]  ;;  %v10286_v62 = vpack.c.b16 %v10270_v37, %v10269_v17  ;;  %8208 = vst.msk [vmem:[%s13809_s12 + $0xf0] sm:$0xff] %vm841_vm5, %v8176_v30 }
 0x4c2   : > { %9404 = vst.msk [vmem:[%s13809_s12 + $0x70] sm:$0xff] %vm841_vm5, %v9372_v52  ;;  %v10770_v45 = vpack.c.b16 %v10744_v11, %v10743_v0 }
 0x4c3   : > { %v9661_v12 = vpop.f32.mrf.mxu3  ;;  %11799 = vmatmul.msk.bf16.gmra.mxu0 %vm841_vm5, %v10286_v62  ;;  %8209 = vst.msk [vmem:[%s13809_s12 + $0xf8] sm:$0xff] %vm841_vm5, %v8177_v48  ;;  %v10513_v62 = vld [vmem:[#allocation3 + $0x70] sm:$0xf] }
 0x4c4   : > { %v9722_v10 = vadd.f32 %v9661_v12, %v9468_v46  ;;  %v8846_v15 = vpop.f32.mrf.mxu1  ;;  %v15887_v28 = vpop.f32.mrf.mxu0  ;;  %v8992_v12 = vld [vmem:[%s13809_s12 + $0x80] sm:$0xff]  ;;  %v10509_v46 = vld [vmem:[#allocation3 + $0x60] sm:$0xe] }
 0x4c5   : > { %v8889_v9 = vadd.f32 %v8846_v15, %v8283_v6  ;;  %v11806_v6 = vrot.slane %v10509_v46, 9 }
 0x4c6   : > { %9754 = vst.msk [vmem:[%s13809_s12 + $0x68] sm:$0xff] %vm841_vm5, %v9722_v10  ;;  %v10666_v10 = vrot.slane %v10511_v33, 5 }
 0x4c7   : > { %8921 = vst.msk [vmem:[%s13809_s12 + $0xc8] sm:$0xff] %vm841_vm5, %v8889_v9  ;;  %v9315_v36 = vpop.f32.mrf.mxu2  ;;  %v10664_v25 = vsel %vm12537_vm2, %v11806_v6, %v10663_v42  ;;  %v10516_v6 = vld [vmem:[#allocation3 + $0x7c] sm:$0xf] }
 0x4c8   : > { %11782 = vmatmul.msk.bf16.gmra.mxu3 %vm841_vm5, %v11932_v3  ;;  %v9373_v40 = vadd.f32 %v9315_v36, %v8991_v44  ;;  %v10665_v3 = vrot.slane %v10663_v42, 4  ;;  %v10745_v35 = vunpack.c.l.b16 %v10664_v25  ;;  %v9821_v44 = vld [vmem:[%s13809_s12] sm:$0xff]  ;;  %v9822_v42 = vld [vmem:[%s13809_s12 + $0x8] sm:$0xff] }
 0x4c9   : > { %v9469_v31 = vld [vmem:[%s13809_s12 + $0x70] sm:$0xff]  ;;  %v8286_v36 = vld [vmem:[%s13809_s12 + $0xe0] sm:$0xff]  ;;  %v10427_v63 = vadd.f32 %v15397_v54, %v9821_v44  ;;  %v10514_v54 = vld [vmem:[#allocation3 + $0x74] sm:$0x1] }
 0x4ca   : > { %9405 = vst.msk [vmem:[%s13809_s12 + $0x78] sm:$0xff] %vm841_vm5, %v9373_v40  ;;  %v10667_v15 = vsel %vm12537_vm2, %v10665_v3, %v10666_v10  ;;  %v10517_v44 = vld [vmem:[#allocation3 + $0x80] sm:$0x1] }
 0x4cb   : > { %v9664_v4 = vpop.f32.mrf.mxu3  ;;  %v10746_v17 = vunpack.c.l.b16 %v10667_v15  ;;  %10459 = vst.msk [vmem:[%s13809_s12] sm:$0xff] %vm841_vm5, %v10427_v63  ;;  %v9823_v15 = vld [vmem:[%s13809_s12 + $0x10] sm:$0xff] }
 0x4cc   : > { %v9723_v14 = vadd.f32 %v9664_v4, %v9469_v31  ;;  %v8849_v26 = vpop.f32.mrf.mxu1  ;;  %v15910_v32 = vpop.f32.mrf.mxu0  ;;  %v10670_v31 = vrot.slane %v10513_v62, 5 }
 0x4cd   : > { %v8890_v29 = vadd.f32 %v8849_v26, %v8284_v13  ;;  %11822 = vmatmul.msk.bf16.gmra.mxu1 %vm841_vm5, %v10770_v45  ;;  %v10771_v11 = vpack.c.b16 %v10746_v17, %v10745_v35  ;;  %v10512_v45 = vld [vmem:[#allocation3 + $0x6c] sm:$0xe] }
 0x4ce   : > { %9755 = vst.msk [vmem:[%s13809_s12 + $0x70] sm:$0xff] %vm841_vm5, %v9723_v14  ;;  %v8994_v14 = vld [vmem:[%s13809_s12 + $0x90] sm:$0xff]  ;;  %v10672_v26 = vrot.slane %v10670_v31, 4 }
 0x4cf   : > { %8922 = vst.msk [vmem:[%s13809_s12 + $0xd0] sm:$0xff] %vm841_vm5, %v8890_v29  ;;  %v9318_v7 = vpop.f32.mrf.mxu2 }
 0x4d0   : > { %v9374_v21 = vadd.f32 %v9318_v7, %v8992_v12  ;;  %v8287_v12 = vld [vmem:[%s13809_s12 + $0xe8] sm:$0xff] }
 0x4d1   : > { %v9470_v52 = vld [vmem:[%s13809_s12 + $0x78] sm:$0xff] }
 0x4d2   : > { %9406 = vst.msk [vmem:[%s13809_s12 + $0x80] sm:$0xff] %vm841_vm5, %v9374_v21  ;;  %v10428_v21 = vadd.f32 %v15426_v27, %v9822_v42 }
 0x4d3   : > { %v9666_v50 = vpop.f32.mrf.mxu3 }
 0x4d4   : > { %v9724_v24 = vadd.f32 %v9666_v50, %v9470_v52  ;;  %v8851_v41 = vpop.f32.mrf.mxu1  ;;  %v15927_v30 = vpop.f32.mrf.mxu0  ;;  %v10673_v50 = vrot.slane %v10514_v54, 5  ;;  %v11807_v52 = vrot.slane %v10512_v45, 9  ;;  %10460 = vst.msk [vmem:[%s13809_s12 + $0x8] sm:$0xff] %vm841_vm5, %v10428_v21 }
 0x4d5   : > { %v8891_v16 = vadd.f32 %v8851_v41, %v8285_v53 }
 0x4d6   : > { %9756 = vst.msk [vmem:[%s13809_s12 + $0x78] sm:$0xff] %vm841_vm5, %v9724_v24  ;;  %v10674_v3 = vsel %vm12537_vm2, %v10672_v26, %v10673_v50  ;;  %v8995_v24 = vld [vmem:[%s13809_s12 + $0x98] sm:$0xff]  ;;  %v10671_v27 = vsel %vm12537_vm2, %v11807_v52, %v10670_v31  ;;  %v10519_v52 = vld [vmem:[#allocation3 + $0x88] sm:$0xf] }
 0x4d7   : > { %8923 = vst.msk [vmem:[%s13809_s12 + $0xd8] sm:$0xff] %vm841_vm5, %v8891_v16  ;;  %v9320_v51 = vpop.f32.mrf.mxu2  ;;  %v10748_v41 = vunpack.c.l.b16 %v10674_v3  ;;  %v10747_v16 = vunpack.c.l.b16 %v10671_v27  ;;  %v8289_v31 = vld [vmem:[%s13809_s12 + $0xf8] sm:$0xff]  ;;  %v9825_v3 = vld [vmem:[%s13809_s12 + $0x20] sm:$0xff] }
 0x4d8   : > { %v9375_v9 = vadd.f32 %v9320_v51, %v8993_v39  ;;  %v8288_v39 = vld [vmem:[%s13809_s12 + $0xf0] sm:$0xff] }
 0x4d9   : > { %v9471_v37 = vld [vmem:[%s13809_s12 + $0x80] sm:$0xff]  ;;  %v10772_v17 = vpack.c.b16 %v10748_v41, %v10747_v16  ;;  %v10684_v41 = vrot.slane %v10519_v52, 5 }
 0x4da   : > { %9407 = vst.msk [vmem:[%s13809_s12 + $0x88] sm:$0xff] %vm841_vm5, %v9375_v9 }
 0x4db   : > { %v9669_v18 = vpop.f32.mrf.mxu3 }
 0x4dc   : > { %v9725_v2 = vadd.f32 %v9669_v18, %v9471_v37  ;;  %v8854_v4 = vpop.f32.mrf.mxu1  ;;  %v10429_v18 = vadd.f32 %v15454_v49, %v9823_v15  ;;  %v15951_v25 = vpop.f32.mrf.mxu0  ;;  %v10677_v37 = vrot.slane %v10516_v6, 5  ;;  %v10520_v15 = vld [vmem:[#allocation3 + $0x8c] sm:$0x1] }
 0x4dd   : > { %v8892_v40 = vadd.f32 %v8854_v4, %v8286_v36  ;;  %11823 = vmatmul.msk.bf16.gmra.mxu1 %vm841_vm5, %v10771_v11  ;;  %v9824_v11 = vld [vmem:[%s13809_s12 + $0x18] sm:$0xff] }
 0x4de   : > { %9757 = vst.msk [vmem:[%s13809_s12 + $0x80] sm:$0xff] %vm841_vm5, %v9725_v2  ;;  %v8996_v2 = vld [vmem:[%s13809_s12 + $0xa0] sm:$0xff]  ;;  %v10679_v4 = vrot.slane %v10677_v37, 4 }
 0x4df   : > { %8924 = vst.msk [vmem:[%s13809_s12 + $0xe0] sm:$0xff] %vm841_vm5, %v8892_v40  ;;  %v9323_v0 = vpop.f32.mrf.mxu2  ;;  %v10515_v40 = vld [vmem:[#allocation3 + $0x78] sm:$0xe] }
 0x4e0   : > { %v9376_v60 = vadd.f32 %v9323_v0, %v8994_v14  ;;  %10461 = vst.msk [vmem:[%s13809_s12 + $0x10] sm:$0xff] %vm841_vm5, %v10429_v18  ;;  %v10680_v0 = vrot.slane %v10517_v44, 5  ;;  %v11808_v54 = vrot.slane %v10515_v40, 9 }
 0x4e1   : > { %v9472_v13 = vld [vmem:[%s13809_s12 + $0x88] sm:$0xff] }
 0x4e2   : > { %9408 = vst.msk [vmem:[%s13809_s12 + $0x90] sm:$0xff] %vm841_vm5, %v9376_v60 }
 0x4e3   : > { %v9671_v8 = vpop.f32.mrf.mxu3 }
 0x4e4   : > { %v9726_v29 = vadd.f32 %v9671_v8, %v9472_v13  ;;  %v8856_v7 = vpop.f32.mrf.mxu1  ;;  %v10430_v8 = vadd.f32 %v15483_v59, %v9824_v11  ;;  %v10681_v13 = vsel %vm12537_vm2, %v10679_v4, %v10680_v0  ;;  %v15973_v26 = vpop.f32.mrf.mxu0  ;;  %v10678_v59 = vsel %vm12537_vm2, %v11808_v54, %v10677_v37  ;;  %v10540_v37 = vld [vmem:[%s13809_s12 + $0x8] sm:$0xff]  ;;  %v8999_v4 = vld [vmem:[%s13809_s12 + $0xb8] sm:$0xff] }
 0x4e5   : > { %v8893_v33 = vadd.f32 %v8856_v7, %v8287_v12  ;;  %v10750_v7 = vunpack.c.l.b16 %v10681_v13  ;;  %v10522_v54 = vld [vmem:[#allocation3 + $0x94] sm:$0xf]  ;;  %v9827_v13 = vld [vmem:[%s13809_s12 + $0x30] sm:$0xff] }
 0x4e6   : > { %9758 = vst.msk [vmem:[%s13809_s12 + $0x88] sm:$0xff] %vm841_vm5, %v9726_v29  ;;  %v8997_v29 = vld [vmem:[%s13809_s12 + $0xa8] sm:$0xff] }
 0x4e7   : > { %8925 = vst.msk [vmem:[%s13809_s12 + $0xe8] sm:$0xff] %vm841_vm5, %v8893_v33  ;;  %v9325_v46 = vpop.f32.mrf.mxu2  ;;  %v10749_v33 = vunpack.c.l.b16 %v10678_v59 }
 0x4e8   : > { %v9377_v53 = vadd.f32 %v9325_v46, %v8995_v24  ;;  %10462 = vst.msk [vmem:[%s13809_s12 + $0x18] sm:$0xff] %vm841_vm5, %v10430_v8  ;;  %v10539_v24 = vld [vmem:[%s13809_s12] sm:$0xff] }
 0x4e9   : > { %v9473_v10 = vld [vmem:[%s13809_s12 + $0x90] sm:$0xff] }
 0x4ea   : > { %9409 = vst.msk [vmem:[%s13809_s12 + $0x98] sm:$0xff] %vm841_vm5, %v9377_v53  ;;  %v10773_v53 = vpack.c.b16 %v10750_v7, %v10749_v33  ;;  %v10691_v7 = vrot.slane %v10522_v54, 5  ;;  %v10526_v54 = vld [vmem:[#allocation3 + $0xa4] sm:$0x1] }
 0x4eb   : > { %v9674_v47 = vpop.f32.mrf.mxu3 }
 0x4ec   : > { %v9727_v48 = vadd.f32 %v9674_v47, %v9473_v10  ;;  %v8859_v51 = vpop.f32.mrf.mxu1  ;;  %v10431_v47 = vadd.f32 %v15514_v55, %v9825_v3  ;;  %v8998_v10 = vld [vmem:[%s13809_s12 + $0xb0] sm:$0xff]  ;;  %v15994_v6 = vpop.f32.mrf.mxu0 }
 0x4ed   : > { %v8894_v9 = vadd.f32 %v8859_v51, %v8288_v39  ;;  %11824 = vmatmul.msk.bf16.gmra.mxu1 %vm841_vm5, %v10772_v17  ;;  %v10686_v51 = vrot.slane %v10684_v41, 4  ;;  %v9826_v17 = vld [vmem:[%s13809_s12 + $0x28] sm:$0xff]  ;;  %v10523_v3 = vld [vmem:[#allocation3 + $0x98] sm:$0x1] }
 0x4ee   : > { %9759 = vst.msk [vmem:[%s13809_s12 + $0x90] sm:$0xff] %vm841_vm5, %v9727_v48 }
 0x4ef   : > { %8926 = vst.msk [vmem:[%s13809_s12 + $0xf0] sm:$0xff] %vm841_vm5, %v8894_v9  ;;  %v9328_v35 = vpop.f32.mrf.mxu2  ;;  %v10518_v9 = vld [vmem:[#allocation3 + $0x84] sm:$0xe] }
 0x4f0   : > { %v9378_v62 = vadd.f32 %v9328_v35, %v8996_v2  ;;  %10463 = vst.msk [vmem:[%s13809_s12 + $0x20] sm:$0xff] %vm841_vm5, %v10431_v47  ;;  %v10687_v35 = vrot.slane %v10520_v15, 5  ;;  %v11809_v44 = vrot.slane %v10518_v9, 9  ;;  %v10521_v47 = vld [vmem:[#allocation3 + $0x90] sm:$0xe] }
 0x4f1   : > { %v9474_v36 = vld [vmem:[%s13809_s12 + $0x98] sm:$0xff]  ;;  %v11810_v15 = vrot.slane %v10521_v47, 9 }
 0x4f2   : > { %9410 = vst.msk [vmem:[%s13809_s12 + $0xa0] sm:$0xff] %vm841_vm5, %v9378_v62 }
 0x4f3   : > { %v9676_v49 = vpop.f32.mrf.mxu3 }
 0x4f4   : > { %v9728_v63 = vadd.f32 %v9676_v49, %v9474_v36  ;;  %v8861_v14 = vpop.f32.mrf.mxu1  ;;  %v10432_v49 = vadd.f32 %v15542_v43, %v9826_v17  ;;  %v10688_v36 = vsel %vm12537_vm2, %v10686_v51, %v10687_v35  ;;  %v10685_v43 = vsel %vm12537_vm2, %v11809_v44, %v10684_v41  ;;  %v16014_v0 = vpop.f32.mrf.mxu0  ;;  %v9001_v51 = vld [vmem:[%s13809_s12 + $0xc8] sm:$0xff]  ;;  %v9829_v44 = vld [vmem:[%s13809_s12 + $0x40] sm:$0xff] }
 0x4f5   : > { %v8895_v60 = vadd.f32 %v8861_v14, %v8289_v31  ;;  %v10752_v31 = vunpack.c.l.b16 %v10688_v36 }
 0x4f6   : > { %9760 = vst.msk [vmem:[%s13809_s12 + $0x98] sm:$0xff] %vm841_vm5, %v9728_v63 }
 0x4f7   : > { %8927 = vst.msk [vmem:[%s13809_s12 + $0xf8] sm:$0xff] %vm841_vm5, %v8895_v60  ;;  %v9330_v45 = vpop.f32.mrf.mxu2  ;;  %v10751_v60 = vunpack.c.l.b16 %v10685_v43  ;;  %v10543_v36 = vld [vmem:[%s13809_s12 + $0x20] sm:$0xff] }
 0x4f8   : > { %v9379_v12 = vadd.f32 %v9330_v45, %v8997_v29  ;;  %10464 = vst.msk [vmem:[%s13809_s12 + $0x28] sm:$0xff] %vm841_vm5, %v10432_v49  ;;  %v10541_v29 = vld [vmem:[%s13809_s12 + $0x10] sm:$0xff] }
 0x4f9   : > { %v9475_v50 = vld [vmem:[%s13809_s12 + $0xa0] sm:$0xff] }
 0x4fa   : > { %9411 = vst.msk [vmem:[%s13809_s12 + $0xa8] sm:$0xff] %vm841_vm5, %v9379_v12  ;;  %v10774_v12 = vpack.c.b16 %v10752_v31, %v10751_v60 }
 0x4fb   : > { %v9679_v42 = vpop.f32.mrf.mxu3 }
 0x4fc   : > { %v9729_v21 = vadd.f32 %v9679_v42, %v9475_v50  ;;  %v10841_v46 = vpop.f32.mrf.mxu1  ;;  %v10433_v42 = vadd.f32 %v15570_v57, %v9827_v13  ;;  %v9000_v50 = vld [vmem:[%s13809_s12 + $0xc0] sm:$0xff] }
 0x4fd   : > { %v10921_v27 = vadd.f32 %v10841_v46, %v10539_v24  ;;  %11825 = vmatmul.msk.bf16.gmra.mxu1 %vm841_vm5, %v10773_v53  ;;  %v10693_v24 = vrot.slane %v10691_v7, 4  ;;  %v10542_v53 = vld [vmem:[%s13809_s12 + $0x18] sm:$0xff] }
 0x4fe   : > { %9761 = vst.msk [vmem:[%s13809_s12 + $0xa0] sm:$0xff] %vm841_vm5, %v9729_v21 }
 0x4ff   : > { %10953 = vst.msk [vmem:[%s13809_s12] sm:$0xff] %vm841_vm5, %v10921_v27  ;;  %v9333_v48 = vpop.f32.mrf.mxu2  ;;  %v9828_v27 = vld [vmem:[%s13809_s12 + $0x38] sm:$0xff] }
 0x500   : > { %v9380_v55 = vadd.f32 %v9333_v48, %v8998_v10  ;;  %10465 = vst.msk [vmem:[%s13809_s12 + $0x30] sm:$0xff] %vm841_vm5, %v10433_v42  ;;  %v10694_v10 = vrot.slane %v10523_v3, 5  ;;  %v10434_v48 = vadd.f32 %v15600_v1, %v9828_v27  ;;  %v10692_v1 = vsel %vm12537_vm2, %v11810_v15, %v10691_v7  ;;  %v10524_v42 = vld [vmem:[#allocation3 + $0x9c] sm:$0xe] }
 0x501   : > { %v9476_v39 = vld [vmem:[%s13809_s12 + $0xa8] sm:$0xff]  ;;  %v10753_v49 = vunpack.c.l.b16 %v10692_v1  ;;  %v9831_v15 = vld [vmem:[%s13809_s12 + $0x50] sm:$0xff] }
 0x502   : > { %9412 = vst.msk [vmem:[%s13809_s12 + $0xb0] sm:$0xff] %vm841_vm5, %v9380_v55 }
 0x503   : > { %v9681_v16 = vpop.f32.mrf.mxu3  ;;  %10466 = vst.msk [vmem:[%s13809_s12 + $0x38] sm:$0xff] %vm841_vm5, %v10434_v48 }
 0x504   : > { %v9730_v18 = vadd.f32 %v9681_v16, %v9476_v39  ;;  %v10843_v2 = vpop.f32.mrf.mxu1  ;;  %v16035_v16 = vpop.f32.mrf.mxu0  ;;  %v10695_v39 = vsel %vm12537_vm2, %v10693_v24, %v10694_v10 }
 0x505   : > { %v10922_v62 = vadd.f32 %v10843_v2, %v10540_v37  ;;  %v10754_v37 = vunpack.c.l.b16 %v10695_v39 }
 0x506   : > { %9762 = vst.msk [vmem:[%s13809_s12 + $0xa8] sm:$0xff] %vm841_vm5, %v9730_v18 }
 0x507   : > { %10954 = vst.msk [vmem:[%s13809_s12 + $0x8] sm:$0xff] %vm841_vm5, %v10922_v62  ;;  %v9335_v63 = vpop.f32.mrf.mxu2  ;;  %v10525_v62 = vld [vmem:[#allocation3 + $0xa0] sm:$0xf]  ;;  %v10775_v43 = vpack.c.b16 %v10754_v37, %v10753_v49  ;;  %v10545_v39 = vld [vmem:[%s13809_s12 + $0x30] sm:$0xff] }
 0x508   : > { %v9381_v11 = vadd.f32 %v9335_v63, %v8999_v4  ;;  %v10435_v63 = vadd.f32 %v15629_v58, %v9829_v44  ;;  %v9832_v37 = vld [vmem:[%s13809_s12 + $0x58] sm:$0xff]  ;;  %v10529_v44 = vld [vmem:[#allocation3 + $0xb0] sm:$0x1] }
 0x509   : > { %v9477_v14 = vld [vmem:[%s13809_s12 + $0xb0] sm:$0xff] }
 0x50a   : > { %9413 = vst.msk [vmem:[%s13809_s12 + $0xb8] sm:$0xff] %vm841_vm5, %v9381_v11  ;;  %v10698_v11 = vrot.slane %v10525_v62, 5 }
 0x50b   : > { %v9684_v40 = vpop.f32.mrf.mxu3  ;;  %10467 = vst.msk [vmem:[%s13809_s12 + $0x40] sm:$0xff] %vm841_vm5, %v10435_v63 }
 0x50c   : > { %v9731_v8 = vadd.f32 %v9684_v40, %v9477_v14  ;;  %v10846_v45 = vpop.f32.mrf.mxu1  ;;  %v16058_v31 = vpop.f32.mrf.mxu0  ;;  %v9002_v14 = vld [vmem:[%s13809_s12 + $0xd0] sm:$0xff] }
 0x50d   : > { %v10923_v59 = vadd.f32 %v10846_v45, %v10541_v29  ;;  %11826 = vmatmul.msk.bf16.gmra.mxu1 %vm841_vm5, %v10774_v12  ;;  %v10700_v29 = vrot.slane %v10698_v11, 4  ;;  %v10544_v12 = vld [vmem:[%s13809_s12 + $0x28] sm:$0xff] }
 0x50e   : > { %9763 = vst.msk [vmem:[%s13809_s12 + $0xb0] sm:$0xff] %vm841_vm5, %v9731_v8 }
 0x50f   : > { %10955 = vst.msk [vmem:[%s13809_s12 + $0x10] sm:$0xff] %vm841_vm5, %v10923_v59  ;;  %v9338_v21 = vpop.f32.mrf.mxu2  ;;  %v9830_v59 = vld [vmem:[%s13809_s12 + $0x48] sm:$0xff] }
 0x510   : > { %v9382_v52 = vadd.f32 %v9338_v21, %v9000_v50  ;;  %v10701_v50 = vrot.slane %v10526_v54, 5  ;;  %v10436_v21 = vadd.f32 %v15665_v38, %v9830_v59  ;;  %v9005_v54 = vld [vmem:[%s13809_s12 + $0xe8] sm:$0xff] }
 0x511   : > { %v9478_v57 = vld [vmem:[%s13809_s12 + $0xb8] sm:$0xff] }
 0x512   : > { %9414 = vst.msk [vmem:[%s13809_s12 + $0xc0] sm:$0xff] %vm841_vm5, %v9382_v52  ;;  %v11811_v52 = vrot.slane %v10524_v42, 9  ;;  %v10702_v3 = vsel %vm12537_vm2, %v10700_v29, %v10701_v50  ;;  %v9833_v42 = vld [vmem:[%s13809_s12 + $0x60] sm:$0xff] }
 0x513   : > { %v9686_v33 = vpop.f32.mrf.mxu3  ;;  %10468 = vst.msk [vmem:[%s13809_s12 + $0x48] sm:$0xff] %vm841_vm5, %v10436_v21 }
 0x514   : > { %v9732_v46 = vadd.f32 %v9686_v33, %v9478_v57  ;;  %v10848_v41 = vpop.f32.mrf.mxu1  ;;  %v9003_v57 = vld [vmem:[%s13809_s12 + $0xd8] sm:$0xff]  ;;  %v10699_v38 = vsel %vm12537_vm2, %v11811_v52, %v10698_v11  ;;  %v16081_v47 = vpop.f32.mrf.mxu0  ;;  %v10531_v52 = vld [vmem:[#allocation3 + $0xb8] sm:$0xf] }
 0x515   : > { %v10924_v55 = vadd.f32 %v10848_v41, %v10542_v53  ;;  %v10756_v53 = vunpack.c.l.b16 %v10702_v3  ;;  %v10755_v48 = vunpack.c.l.b16 %v10699_v38  ;;  %v10546_v11 = vld [vmem:[%s13809_s12 + $0x38] sm:$0xff]  ;;  %v10547_v3 = vld [vmem:[%s13809_s12 + $0x40] sm:$0xff]  ;;  %v10712_v38 = vrot.slane %v10531_v52, 5 }
 0x516   : > { %9764 = vst.msk [vmem:[%s13809_s12 + $0xb8] sm:$0xff] %vm841_vm5, %v9732_v46  ;;  %v10533_v52 = vld [vmem:[#allocation3 + $0xc0] sm:$0xe] }
 0x517   : > { %10956 = vst.msk [vmem:[%s13809_s12 + $0x18] sm:$0xff] %vm841_vm5, %v10924_v55  ;;  %v9340_v18 = vpop.f32.mrf.mxu2  ;;  %v10528_v55 = vld [vmem:[#allocation3 + $0xac] sm:$0xf]  ;;  %v10776_v1 = vpack.c.b16 %v10756_v53, %v10755_v48 }
 0x518   : > { %v9383_v17 = vadd.f32 %v9340_v18, %v9001_v51  ;;  %v10437_v18 = vadd.f32 %v15701_v34, %v9831_v15  ;;  %v10438_v34 = vadd.f32 %v15726_v5, %v9832_v37  ;;  %v10708_v5 = vrot.slane %v10529_v44, 5 }
 0x519   : > { %v9479_v2 = vld [vmem:[%s13809_s12 + $0xc0] sm:$0xff] }
 0x51a   : > { %9415 = vst.msk [vmem:[%s13809_s12 + $0xc8] sm:$0xff] %vm841_vm5, %v9383_v17  ;;  %v10705_v17 = vrot.slane %v10528_v55, 5  ;;  %v10532_v55 = vld [vmem:[#allocation3 + $0xbc] sm:$0x1] }
 0x51b   : > { %v9689_v9 = vpop.f32.mrf.mxu3  ;;  %10469 = vst.msk [vmem:[%s13809_s12 + $0x50] sm:$0xff] %vm841_vm5, %v10437_v18  ;;  %v10715_v37 = vrot.slane %v10532_v55, 5 }
 0x51c   : > { %v9733_v35 = vadd.f32 %v9689_v9, %v9479_v2  ;;  %v10851_v4 = vpop.f32.mrf.mxu1  ;;  %v9004_v2 = vld [vmem:[%s13809_s12 + $0xe0] sm:$0xff]  ;;  %10470 = vst.msk [vmem:[%s13809_s12 + $0x58] sm:$0xff] %vm841_vm5, %v10438_v34  ;;  %v16102_v63 = vpop.f32.mrf.mxu0  ;;  %v9835_v34 = vld [vmem:[%s13809_s12 + $0x70] sm:$0xff] }
 0x51d   : > { %v10925_v40 = vadd.f32 %v10851_v4, %v10543_v36  ;;  %11827 = vmatmul.msk.bf16.gmra.mxu1 %vm841_vm5, %v10775_v43  ;;  %v10707_v4 = vrot.slane %v10705_v17, 4  ;;  %v10527_v43 = vld [vmem:[#allocation3 + $0xa8] sm:$0xe] }
 0x51e   : > { %9765 = vst.msk [vmem:[%s13809_s12 + $0xc0] sm:$0xff] %vm841_vm5, %v9733_v35 }
 0x51f   : > { %10957 = vst.msk [vmem:[%s13809_s12 + $0x20] sm:$0xff] %vm841_vm5, %v10925_v40  ;;  %v9343_v8 = vpop.f32.mrf.mxu2 }
 0x520   : > { %v9384_v60 = vadd.f32 %v9343_v8, %v9002_v14 }
 0x521   : > { %v9480_v13 = vld [vmem:[%s13809_s12 + $0xc8] sm:$0xff] }
 0x522   : > { %9416 = vst.msk [vmem:[%s13809_s12 + $0xd0] sm:$0xff] %vm841_vm5, %v9384_v60  ;;  %v10709_v60 = vsel %vm12537_vm2, %v10707_v4, %v10708_v5 }
 0x523   : > { %v9691_v58 = vpop.f32.mrf.mxu3 }
 0x524   : > { %v9734_v45 = vadd.f32 %v9691_v58, %v9480_v13  ;;  %v10853_v7 = vpop.f32.mrf.mxu1  ;;  %v11812_v58 = vrot.slane %v10527_v43, 9 }
 0x525   : > { %v10926_v33 = vadd.f32 %v10853_v7, %v10544_v12  ;;  %v10758_v12 = vunpack.c.l.b16 %v10709_v60  ;;  %v10439_v7 = vadd.f32 %v15756_v56, %v9833_v42  ;;  %v10549_v60 = vld [vmem:[%s13809_s12 + $0x50] sm:$0xff] }
 0x526   : > { %9766 = vst.msk [vmem:[%s13809_s12 + $0xc8] sm:$0xff] %vm841_vm5, %v9734_v45  ;;  %v10706_v45 = vsel %vm12537_vm2, %v11812_v58, %v10705_v17  ;;  %v10534_v58 = vld [vmem:[#allocation3 + $0xc4] sm:$0xf] }
 0x527   : > { %10958 = vst.msk [vmem:[%s13809_s12 + $0x28] sm:$0xff] %vm841_vm5, %v10926_v33  ;;  %v9345_v24 = vpop.f32.mrf.mxu2  ;;  %v10757_v33 = vunpack.c.l.b16 %v10706_v45  ;;  %v9836_v45 = vld [vmem:[%s13809_s12 + $0x78] sm:$0xff] }
 0x528   : > { %v9385_v27 = vadd.f32 %v9345_v24, %v9003_v57  ;;  %10471 = vst.msk [vmem:[%s13809_s12 + $0x60] sm:$0xff] %vm841_vm5, %v10439_v7  ;;  %v16124_v24 = vpop.f32.mrf.mxu0  ;;  %v10535_v7 = vld [vmem:[#allocation3 + $0xc8] sm:$0x1] }
 0x529   : > { %v9481_v41 = vld [vmem:[%s13809_s12 + $0xd0] sm:$0xff]  ;;  %v10777_v56 = vpack.c.b16 %v10758_v12, %v10757_v33  ;;  %v10442_v12 = vadd.f32 %v15833_v23, %v9836_v45 }
 0x52a   : > { %9417 = vst.msk [vmem:[%s13809_s12 + $0xd8] sm:$0xff] %vm841_vm5, %v9385_v27  ;;  %v9006_v27 = vld [vmem:[%s13809_s12 + $0xf0] sm:$0xff] }
 0x52b   : > { %v9694_v46 = vpop.f32.mrf.mxu3  ;;  %10474 = vst.msk [vmem:[%s13809_s12 + $0x78] sm:$0xff] %vm841_vm5, %v10442_v12  ;;  %v9841_v12 = vld [vmem:[%s13809_s12 + $0xa0] sm:$0xff] }
 0x52c   : > { %v9735_v10 = vadd.f32 %v9694_v46, %v9481_v41  ;;  %v10856_v51 = vpop.f32.mrf.mxu1 }
 0x52d   : > { %v10927_v9 = vadd.f32 %v10856_v51, %v10545_v39  ;;  %11828 = vmatmul.msk.bf16.gmra.mxu1 %vm841_vm5, %v10776_v1  ;;  %v10714_v51 = vrot.slane %v10712_v38, 4  ;;  %v10548_v1 = vld [vmem:[%s13809_s12 + $0x48] sm:$0xff] }
 0x52e   : > { %9767 = vst.msk [vmem:[%s13809_s12 + $0xd0] sm:$0xff] %vm841_vm5, %v9735_v10  ;;  %v9834_v10 = vld [vmem:[%s13809_s12 + $0x68] sm:$0xff] }
 0x52f   : > { %10959 = vst.msk [vmem:[%s13809_s12 + $0x30] sm:$0xff] %vm841_vm5, %v10927_v9  ;;  %v9348_v35 = vpop.f32.mrf.mxu2  ;;  %v10440_v15 = vadd.f32 %v15784_v19, %v9834_v10  ;;  %v10530_v9 = vld [vmem:[#allocation3 + $0xb4] sm:$0xe] }
 0x530   : > { %v9386_v62 = vadd.f32 %v9348_v35, %v9004_v2  ;;  %v11813_v19 = vrot.slane %v10530_v9, 9  ;;  %v10716_v35 = vsel %vm12537_vm2, %v10714_v51, %v10715_v37 }
 0x531   : > { %v9482_v36 = vld [vmem:[%s13809_s12 + $0xd8] sm:$0xff]  ;;  %10472 = vst.msk [vmem:[%s13809_s12 + $0x68] sm:$0xff] %vm841_vm5, %v10440_v15  ;;  %v10537_v15 = vld [vmem:[#allocation3 + $0xd0] sm:$0xf] }
 0x532   : > { %9418 = vst.msk [vmem:[%s13809_s12 + $0xe0] sm:$0xff] %vm841_vm5, %v9386_v62  ;;  %v9007_v62 = vld [vmem:[%s13809_s12 + $0xf8] sm:$0xff]  ;;  %v10713_v4 = vsel %vm12537_vm2, %v11813_v19, %v10712_v38 }
 0x533   : > { %v9696_v49 = vpop.f32.mrf.mxu3 }
 0x534   : > { %v9736_v40 = vadd.f32 %v9696_v49, %v9482_v36  ;;  %v10858_v14 = vpop.f32.mrf.mxu1  ;;  %v16144_v49 = vpop.f32.mrf.mxu0 }
 0x535   : > { %v10928_v8 = vadd.f32 %v10858_v14, %v10546_v11  ;;  %v10760_v11 = vunpack.c.l.b16 %v10716_v35  ;;  %v10536_v35 = vld [vmem:[#allocation3 + $0xcc] sm:$0xe] }
 0x536   : > { %9768 = vst.msk [vmem:[%s13809_s12 + $0xd8] sm:$0xff] %vm841_vm5, %v9736_v40  ;;  %v10441_v40 = vadd.f32 %v15804_v20, %v9835_v34  ;;  %v9838_v34 = vld [vmem:[%s13809_s12 + $0x88] sm:$0xff] }
 0x537   : > { %10960 = vst.msk [vmem:[%s13809_s12 + $0x38] sm:$0xff] %vm841_vm5, %v10928_v8  ;;  %v9350_v13 = vpop.f32.mrf.mxu2  ;;  %v10759_v8 = vunpack.c.l.b16 %v10713_v4  ;;  %v10444_v4 = vadd.f32 %v15887_v28, %v9838_v34  ;;  %v9839_v28 = vld [vmem:[%s13809_s12 + $0x90] sm:$0xff] }
 0x538   : > { %v9387_v59 = vadd.f32 %v9350_v13, %v9005_v54  ;;  %10473 = vst.msk [vmem:[%s13809_s12 + $0x70] sm:$0xff] %vm841_vm5, %v10441_v40  ;;  %v10552_v40 = vld [vmem:[%s13809_s12 + $0x68] sm:$0xff] }
 0x539   : > { %v9483_v50 = vld [vmem:[%s13809_s12 + $0xe0] sm:$0xff]  ;;  %v10778_v20 = vpack.c.b16 %v10760_v11, %v10759_v8  ;;  %10476 = vst.msk [vmem:[%s13809_s12 + $0x88] sm:$0xff] %vm841_vm5, %v10444_v4 }
 0x53a   : > { %9419 = vst.msk [vmem:[%s13809_s12 + $0xe8] sm:$0xff] %vm841_vm5, %v9387_v59 }
 0x53b   : > { %v9699_v29 = vpop.f32.mrf.mxu3 }
 0x53c   : > { %v9737_v21 = vadd.f32 %v9699_v29, %v9483_v50  ;;  %v10861_v57 = vpop.f32.mrf.mxu1  ;;  %v10719_v29 = vrot.slane %v10534_v58, 5 }
 0x53d   : > { %v10929_v46 = vadd.f32 %v10861_v57, %v10547_v3  ;;  %11829 = vmatmul.msk.bf16.gmra.mxu1 %vm841_vm5, %v10777_v56  ;;  %v10550_v3 = vld [vmem:[%s13809_s12 + $0x58] sm:$0xff]  ;;  %v10722_v56 = vrot.slane %v10535_v7, 5  ;;  %v10447_v7 = vadd.f32 %v15951_v25, %v9841_v12 }
 0x53e   : > { %9769 = vst.msk [vmem:[%s13809_s12 + $0xe0] sm:$0xff] %vm841_vm5, %v9737_v21  ;;  %v10721_v21 = vrot.slane %v10719_v29, 4 }
 0x53f   : > { %10961 = vst.msk [vmem:[%s13809_s12 + $0x40] sm:$0xff] %vm841_vm5, %v10929_v46  ;;  %v9353_v53 = vpop.f32.mrf.mxu2 }
 0x540   : > { %v9388_v48 = vadd.f32 %v9353_v53, %v9006_v27  ;;  %v10422_v59 = vpop.f32.mrf.mxu0  ;;  %v11814_v27 = vrot.slane %v10533_v52, 9  ;;  %v10723_v53 = vsel %vm12537_vm2, %v10721_v21, %v10722_v56  ;;  %10479 = vst.msk [vmem:[%s13809_s12 + $0xa0] sm:$0xff] %vm841_vm5, %v10447_v7 }
 0x541   : > { %v9484_v39 = vld [vmem:[%s13809_s12 + $0xe8] sm:$0xff]  ;;  %v10762_v55 = vunpack.c.l.b16 %v10723_v53 }
 0x542   : > { %9420 = vst.msk [vmem:[%s13809_s12 + $0xf0] sm:$0xff] %vm841_vm5, %v9388_v48  ;;  %v10720_v10 = vsel %vm12537_vm2, %v11814_v27, %v10719_v29  ;;  %v9840_v29 = vld [vmem:[%s13809_s12 + $0x98] sm:$0xff] }
 0x543   : > { %v9701_v41 = vpop.f32.mrf.mxu3  ;;  %v10761_v51 = vunpack.c.l.b16 %v10720_v10  ;;  %v10446_v45 = vadd.f32 %v15927_v30, %v9840_v29  ;;  %v9844_v27 = vld [vmem:[%s13809_s12 + $0xb8] sm:$0xff] }
 0x544   : > { %v9738_v18 = vadd.f32 %v9701_v41, %v9484_v39  ;;  %v10863_v17 = vpop.f32.mrf.mxu1  ;;  %v9837_v41 = vld [vmem:[%s13809_s12 + $0x80] sm:$0xff]  ;;  %v10450_v53 = vadd.f32 %v16014_v0, %v9844_v27 }
 0x545   : > { %v10930_v2 = vadd.f32 %v10863_v17, %v10548_v1  ;;  %v10443_v48 = vadd.f32 %v15860_v22, %v9837_v41  ;;  %v10726_v17 = vrot.slane %v10537_v15, 5  ;;  %v10779_v19 = vpack.c.b16 %v10762_v55, %v10761_v51  ;;  %v10538_v22 = vld [vmem:[#allocation3 + $0xd4] sm:$0x1]  ;;  %10478 = vst.msk [vmem:[%s13809_s12 + $0x98] sm:$0xff] %vm841_vm5, %v10446_v45 }
 0x546   : > { %9770 = vst.msk [vmem:[%s13809_s12 + $0xe8] sm:$0xff] %vm841_vm5, %v9738_v18  ;;  %v10551_v18 = vld [vmem:[%s13809_s12 + $0x60] sm:$0xff]  ;;  %v9846_v51 = vld [vmem:[%s13809_s12 + $0xc8] sm:$0xff] }
 0x547   : > { %10962 = vst.msk [vmem:[%s13809_s12 + $0x48] sm:$0xff] %vm841_vm5, %v10930_v2  ;;  %v9355_v44 = vpop.f32.mrf.mxu2  ;;  %v10559_v15 = vld [vmem:[%s13809_s12 + $0xa0] sm:$0xff] }
 0x548   : > { %v9389_v43 = vadd.f32 %v9355_v44, %v9007_v62  ;;  %v10424_v39 = vpop.f32.mrf.mxu0  ;;  %10475 = vst.msk [vmem:[%s13809_s12 + $0x80] sm:$0xff] %vm841_vm5, %v10443_v48  ;;  %v11815_v62 = vrot.slane %v10536_v35, 9  ;;  %v10728_v44 = vrot.slane %v10726_v17, 4  ;;  %v9845_v48 = vld [vmem:[%s13809_s12 + $0xc0] sm:$0xff]  ;;  %v9848_v35 = vld [vmem:[%s13809_s12 + $0xd8] sm:$0xff] }
 0x549   : > { %v9485_v14 = vld [vmem:[%s13809_s12 + $0xf0] sm:$0xff]  ;;  %10482 = vst.msk [vmem:[%s13809_s12 + $0xb8] sm:$0xff] %vm841_vm5, %v10450_v53  ;;  %v10451_v55 = vadd.f32 %v16035_v16, %v9845_v48 }
 0x54a   : > { %9421 = vst.msk [vmem:[%s13809_s12 + $0xf8] sm:$0xff] %vm841_vm5, %v9389_v43  ;;  %v10727_v11 = vsel %vm12537_vm2, %v11815_v62, %v10726_v17  ;;  %v9847_v17 = vld [vmem:[%s13809_s12 + $0xd0] sm:$0xff] }
 0x54b   : > { %v9704_v36 = vpop.f32.mrf.mxu3  ;;  %v10763_v8 = vunpack.c.l.b16 %v10727_v11  ;;  %10483 = vst.msk [vmem:[%s13809_s12 + $0xc0] sm:$0xff] %vm841_vm5, %v10451_v55 }
 0x54c   : > { %v9739_v5 = vadd.f32 %v9704_v36, %v9485_v14  ;;  %v10866_v54 = vpop.f32.mrf.mxu1  ;;  %v10729_v36 = vrot.slane %v10538_v22, 5  ;;  %v10558_v41 = vld [vmem:[%s13809_s12 + $0x98] sm:$0xff]  ;;  %v10454_v22 = vadd.f32 %v16102_v63, %v9848_v35 }
 0x54d   : > { %v10931_v13 = vadd.f32 %v10866_v54, %v10549_v60  ;;  %11830 = vmatmul.msk.bf16.gmra.mxu1 %vm841_vm5, %v10778_v20  ;;  %v10445_v60 = vadd.f32 %v15910_v32, %v9839_v28  ;;  %v10554_v32 = vld [vmem:[%s13809_s12 + $0x78] sm:$0xff] }
 0x54e   : > { %9771 = vst.msk [vmem:[%s13809_s12 + $0xf0] sm:$0xff] %vm841_vm5, %v9739_v5  ;;  %v10730_v14 = vsel %vm12537_vm2, %v10728_v44, %v10729_v36  ;;  %v9849_v44 = vld [vmem:[%s13809_s12 + $0xe0] sm:$0xff] }
 0x54f   : > { %10963 = vst.msk [vmem:[%s13809_s12 + $0x50] sm:$0xff] %vm841_vm5, %v10931_v13  ;;  %v10764_v58 = vunpack.c.l.b16 %v10730_v14  ;;  %v10553_v13 = vld [vmem:[%s13809_s12 + $0x70] sm:$0xff]  ;;  %v10455_v36 = vadd.f32 %v16124_v24, %v9849_v44 }
 0x550   : > { %10477 = vst.msk [vmem:[%s13809_s12 + $0x90] sm:$0xff] %vm841_vm5, %v10445_v60  ;;  %v10562_v34 = vld [vmem:[%s13809_s12 + $0xb8] sm:$0xff] }
 0x551   : > { %v9486_v50 = vld [vmem:[%s13809_s12 + $0xf8] sm:$0xff]  ;;  %v10780_v54 = vpack.c.b16 %v10764_v58, %v10763_v8  ;;  %10486 = vst.msk [vmem:[%s13809_s12 + $0xd8] sm:$0xff] %vm841_vm5, %v10454_v22 }
 0x552   : > { %10487 = vst.msk [vmem:[%s13809_s12 + $0xe0] sm:$0xff] %vm841_vm5, %v10455_v36  ;;  %v10563_v4 = vld [vmem:[%s13809_s12 + $0xc0] sm:$0xff] }
 0x553   : > { %v9706_v42 = vpop.f32.mrf.mxu3 }
 0x554   : > { %v9740_v33 = vadd.f32 %v9706_v42, %v9486_v50  ;;  %v10868_v57 = vpop.f32.mrf.mxu1  ;;  %v10555_v50 = vld [vmem:[%s13809_s12 + $0x80] sm:$0xff] }
 0x555   : > { %v9851_v46 = vld [vmem:[%s13809_s12 + $0xf0] sm:$0xff]  ;;  %v10932_v38 = vadd.f32 %v10868_v57, %v10550_v3  ;;  %v10556_v3 = vld [vmem:[%s13809_s12 + $0x88] sm:$0xff] }
 0x556   : > { %9772 = vst.msk [vmem:[%s13809_s12 + $0xf8] sm:$0xff] %vm841_vm5, %v9740_v33  ;;  %v10457_v23 = vadd.f32 %v10422_v59, %v9851_v46  ;;  %v9842_v33 = vld [vmem:[%s13809_s12 + $0xa8] sm:$0xff]  ;;  %v9843_v46 = vld [vmem:[%s13809_s12 + $0xb0] sm:$0xff] }
 0x557   : > { %10964 = vst.msk [vmem:[%s13809_s12 + $0x58] sm:$0xff] %vm841_vm5, %v10932_v38  ;;  %v10448_v52 = vadd.f32 %v15973_v26, %v9842_v33  ;;  %v10449_v56 = vadd.f32 %v15994_v6, %v9843_v46  ;;  %v10557_v38 = vld [vmem:[%s13809_s12 + $0x90] sm:$0xff] }
 0x558   : > { %10489 = vst.msk [vmem:[%s13809_s12 + $0xf0] sm:$0xff] %vm841_vm5, %v10457_v23  ;;  %v10566_v60 = vld [vmem:[%s13809_s12 + $0xd8] sm:$0xff] }
 0x559   : > { %10480 = vst.msk [vmem:[%s13809_s12 + $0xa8] sm:$0xff] %vm841_vm5, %v10448_v52 }
 0x55a   : > { %10481 = vst.msk [vmem:[%s13809_s12 + $0xb0] sm:$0xff] %vm841_vm5, %v10449_v56 }
 0x55c   : > { %v10871_v9 = vpop.f32.mrf.mxu1 }
 0x55d   : > { %v9852_v1 = vld [vmem:[%s13809_s12 + $0xf8] sm:$0xff]  ;;  %v10933_v37 = vadd.f32 %v10871_v9, %v10551_v18  ;;  %11831 = vmatmul.msk.bf16.gmra.mxu1 %vm841_vm5, %v10779_v19  ;;  %v10452_v18 = vadd.f32 %v16058_v31, %v9846_v51 }
 0x55e   : > { %v10458_v2 = vadd.f32 %v10424_v39, %v9852_v1 }
 0x55f   : > { %10965 = vst.msk [vmem:[%s13809_s12 + $0x60] sm:$0xff] %vm841_vm5, %v10933_v37  ;;  %v10453_v37 = vadd.f32 %v16081_v47, %v9847_v17 }
 0x560   : > { %10490 = vst.msk [vmem:[%s13809_s12 + $0xf8] sm:$0xff] %vm841_vm5, %v10458_v2  ;;  %v10560_v9 = vld [vmem:[%s13809_s12 + $0xa8] sm:$0xff] }
 0x561   : > { %10484 = vst.msk [vmem:[%s13809_s12 + $0xc8] sm:$0xff] %vm841_vm5, %v10452_v18  ;;  %v10561_v2 = vld [vmem:[%s13809_s12 + $0xb0] sm:$0xff] }
 0x562   : > { %10485 = vst.msk [vmem:[%s13809_s12 + $0xd0] sm:$0xff] %vm841_vm5, %v10453_v37 }
 0x564   : > { %v10873_v43 = vpop.f32.mrf.mxu1 }
 0x565   : > { %v10934_v5 = vadd.f32 %v10873_v43, %v10552_v40  ;;  %v9850_v43 = vld [vmem:[%s13809_s12 + $0xe8] sm:$0xff] }
 0x566   : > { %v10456_v11 = vadd.f32 %v16144_v49, %v9850_v43 }
 0x567   : > { %10966 = vst.msk [vmem:[%s13809_s12 + $0x68] sm:$0xff] %vm841_vm5, %v10934_v5  ;;  %v10570_v7 = vld [vmem:[%s13809_s12 + $0xf8] sm:$0xff] }
 0x568   : > { %10488 = vst.msk [vmem:[%s13809_s12 + $0xe8] sm:$0xff] %vm841_vm5, %v10456_v11  ;;  %v10564_v14 = vld [vmem:[%s13809_s12 + $0xc8] sm:$0xff] }
 0x569   : > { %v10565_v8 = vld [vmem:[%s13809_s12 + $0xd0] sm:$0xff] }
 0x56c   : > { %v10876_v61 = vpop.f32.mrf.mxu1 }
 0x56d   : > { %v10935_v20 = vadd.f32 %v10876_v61, %v10553_v13  ;;  %11832 = vmatmul.msk.bf16.gmra.mxu1 %vm841_vm5, %v10780_v54  ;;  %v10567_v13 = vld [vmem:[%s13809_s12 + $0xe0] sm:$0xff] }
 0x56f   : > { %10967 = vst.msk [vmem:[%s13809_s12 + $0x70] sm:$0xff] %vm841_vm5, %v10935_v20  ;;  %v10568_v29 = vld [vmem:[%s13809_s12 + $0xe8] sm:$0xff] }
 0x574   : > { %v10878_v42 = vpop.f32.mrf.mxu1 }
 0x575   : > { %v10936_v59 = vadd.f32 %v10878_v42, %v10554_v32  ;;  %v10569_v42 = vld [vmem:[%s13809_s12 + $0xf0] sm:$0xff] }
 0x577   : > { %10968 = vst.msk [vmem:[%s13809_s12 + $0x78] sm:$0xff] %vm841_vm5, %v10936_v59 }
 0x57c   : > { %v10881_v21 = vpop.f32.mrf.mxu1 }
 0x57d   : > { %v10937_v30 = vadd.f32 %v10881_v21, %v10555_v50 }
 0x57f   : > { %10969 = vst.msk [vmem:[%s13809_s12 + $0x80] sm:$0xff] %vm841_vm5, %v10937_v30 }
 0x584   : > { %v10883_v57 = vpop.f32.mrf.mxu1 }
 0x585   : > { %v10938_v25 = vadd.f32 %v10883_v57, %v10556_v3 }
 0x587   : > { %10970 = vst.msk [vmem:[%s13809_s12 + $0x88] sm:$0xff] %vm841_vm5, %v10938_v25 }
 0x58c   : > { %v10886_v23 = vpop.f32.mrf.mxu1 }
 0x58d   : > { %v10939_v26 = vadd.f32 %v10886_v23, %v10557_v38 }
 0x58f   : > { %10971 = vst.msk [vmem:[%s13809_s12 + $0x90] sm:$0xff] %vm841_vm5, %v10939_v26 }
 0x594   : > { %v10888_v10 = vpop.f32.mrf.mxu1 }
 0x595   : > { %v10940_v6 = vadd.f32 %v10888_v10, %v10558_v41 }
 0x597   : > { %10972 = vst.msk [vmem:[%s13809_s12 + $0x98] sm:$0xff] %vm841_vm5, %v10940_v6 }
 0x59c   : > { %v10891_v39 = vpop.f32.mrf.mxu1 }
 0x59d   : > { %v10941_v0 = vadd.f32 %v10891_v39, %v10559_v15 }
 0x59f   : > { %10973 = vst.msk [vmem:[%s13809_s12 + $0xa0] sm:$0xff] %vm841_vm5, %v10941_v0 }
 0x5a4   : > { %v10893_v1 = vpop.f32.mrf.mxu1 }
 0x5a5   : > { %v10942_v16 = vadd.f32 %v10893_v1, %v10560_v9 }
 0x5a7   : > { %10974 = vst.msk [vmem:[%s13809_s12 + $0xa8] sm:$0xff] %vm841_vm5, %v10942_v16 }
 0x5ac   : > { %v10896_v19 = vpop.f32.mrf.mxu1 }
 0x5ad   : > { %v10943_v31 = vadd.f32 %v10896_v19, %v10561_v2 }
 0x5af   : > { %10975 = vst.msk [vmem:[%s13809_s12 + $0xb0] sm:$0xff] %vm841_vm5, %v10943_v31 }
 0x5b4   : > { %v10898_v62 = vpop.f32.mrf.mxu1 }
 0x5b5   : > { %v10944_v47 = vadd.f32 %v10898_v62, %v10562_v34 }
 0x5b7   : > { %10976 = vst.msk [vmem:[%s13809_s12 + $0xb8] sm:$0xff] %vm841_vm5, %v10944_v47 }
 0x5bc   : > { %v10901_v40 = vpop.f32.mrf.mxu1 }
 0x5bd   : > { %v10945_v63 = vadd.f32 %v10901_v40, %v10563_v4 }
 0x5bf   : > { %10977 = vst.msk [vmem:[%s13809_s12 + $0xc0] sm:$0xff] %vm841_vm5, %v10945_v63 }
 0x5c4   : > { %v10903_v24 = vpop.f32.mrf.mxu1 }
 0x5c5   : > { %v10946_v5 = vadd.f32 %v10903_v24, %v10564_v14 }
 0x5c7   : > { %10978 = vst.msk [vmem:[%s13809_s12 + $0xc8] sm:$0xff] %vm841_vm5, %v10946_v5 }
 0x5cc   : > { %v10906_v58 = vpop.f32.mrf.mxu1 }
 0x5cd   : > { %v10947_v28 = vadd.f32 %v10906_v58, %v10565_v8 }
 0x5cf   : > { %10979 = vst.msk [vmem:[%s13809_s12 + $0xd0] sm:$0xff] %vm841_vm5, %v10947_v28 }
 0x5d4   : > { %v10908_v49 = vpop.f32.mrf.mxu1 }
 0x5d5   : > { %v10948_v54 = vadd.f32 %v10908_v49, %v10566_v60 }
 0x5d7   : > { %10980 = vst.msk [vmem:[%s13809_s12 + $0xd8] sm:$0xff] %vm841_vm5, %v10948_v54 }
 0x5dc   : > { %v10911_v61 = vpop.f32.mrf.mxu1 }
 0x5dd   : > { %v10949_v20 = vadd.f32 %v10911_v61, %v10567_v13 }
 0x5df   : > { %10981 = vst.msk [vmem:[%s13809_s12 + $0xe0] sm:$0xff] %vm841_vm5, %v10949_v20 }
 0x5e4   : > { %v10913_v45 = vpop.f32.mrf.mxu1 }
 0x5e5   : > { %v10950_v32 = vadd.f32 %v10913_v45, %v10568_v29 }
 0x5e7   : > { %10982 = vst.msk [vmem:[%s13809_s12 + $0xe8] sm:$0xff] %vm841_vm5, %v10950_v32 }
 0x5ec   : > { %v10916_v59 = vpop.f32.mrf.mxu1 }
 0x5ed   : > { %v10951_v12 = vadd.f32 %v10916_v59, %v10569_v42 }
 0x5ef   : > { %10983 = vst.msk [vmem:[%s13809_s12 + $0xf0] sm:$0xff] %vm841_vm5, %v10951_v12 }
 0x5f4   : > { %v10918_v50 = vpop.f32.mrf.mxu1 }
 0x5f5   : > { %v10952_v21 = vadd.f32 %v10918_v50, %v10570_v7 }
 0x5f7   : > { %10984 = vst.msk [vmem:[%s13809_s12 + $0xf8] sm:$0xff] %vm841_vm5, %v10952_v21 }
 0x5f8 PF: > { %s15_s18 = sadd.s32 1, %s11954_s18  }
 0x5f9   : > { %p12_p4 = scmp.ge.s32.totalorder %s15_s18, 4  }
 0x5fb   :  { %14 = sbr.rel (!%p12_p4) target bundleno = 1 (0x1), region = 92 }

</bundles_post_ra>
